<compile_context>
chip_gen: v6e
topology: v6e:2x2x1
jax: 0.10.0
libtpu: 0.0.40
codegen_flags: <defaults>
</compile_context>

<pallas_src>
import functools

import jax
import jax.numpy as jnp
from jax.experimental import pallas as pl
from jax.experimental.pallas import tpu as pltpu


def _timm_head_kernel(x_ref, w1t_ref, b1_ref, w2_ref, b2_ref,
                      logits_ref, ft_ref, acc_ref, *, inv_hw, vpu_conv):
    # x_ref:      (TB, Cin, HWc)  batch tile x channels x spatial chunk (lane-dense)
    # w1t_ref:    (F, Cin)        transposed 1x1-conv weight
    # b1_ref:     (F, 1)
    # w2_ref:     (F, NCp)        classifier weight, zero-padded to NCp (mult of 128)
    # b2_ref:     (1, NCp)
    # logits_ref: (TB, NCp)       output
    # ft_ref:     (TB, F)         output (pooled features)
    # acc_ref:    (TB, F) f32     VMEM scratch accumulator over HW chunks
    k = pl.program_id(1)
    nk = pl.num_programs(1)
    TB, Cin, HWc = x_ref.shape
    F_ = w1t_ref.shape[0]

    @pl.when(k == 0)
    def _():
        acc_ref[...] = jnp.zeros_like(acc_ref)

    w1t = w1t_ref[...]                                        # (F, Cin)
    # Hoist (F,1)->(F,HWc) lane-broadcasts out of the batch loop: JAX does not
    # CSE broadcast_in_dim, so leaving them inside re-emits them TB times.
    b1b = jnp.broadcast_to(b1_ref[...], (F_, HWc))
    if vpu_conv:
        wcols = [jnp.broadcast_to(w1t[:, c:c + 1], (F_, HWc)) for c in range(Cin)]

    rows = []
    for b in range(TB):                                       # TB == 8, static
        x_b = x_ref[b]                                        # (Cin, HWc)
        if vpu_conv:
            # tiny contraction dim: Cin broadcast FMAs on the VPU instead of a
            # K-padded (128/256-wide) MXU matmul.
            feat = b1b + wcols[0] * x_b[0:1, :]
            for c in range(1, Cin):
                feat = feat + wcols[c] * x_b[c:c + 1, :]
        else:
            feat = jnp.dot(w1t, x_b, preferred_element_type=jnp.float32) + b1b
        # SiLU with a single EUP transcendental:
        #   x * sigmoid(x) = h * tanh(h) + h,  h = x / 2
        half = 0.5 * feat
        feat = half * jnp.tanh(half) + half                   # (F, HWc) f32
        rows.append(jnp.sum(feat, axis=1))                    # (F,) partial pool

    # one (TB, F) accumulate -- no per-row masked stores
    acc_ref[...] += jnp.stack(rows, axis=0)

    @pl.when(k == nk - 1)
    def _():
        ft = acc_ref[...] * inv_hw                            # (TB, F) f32
        ft_ref[...] = ft.astype(ft_ref.dtype)                 # single unmasked store
        logits = jnp.dot(ft, w2_ref[...],
                         preferred_element_type=jnp.float32) + b2_ref[...]
        logits_ref[...] = logits.astype(logits_ref.dtype)     # lane-dense store


def _pick_hw_chunk(hw, max_chunk=2048):
    """Largest spatial chunk dividing hw; a multiple of 128 unless hw is small."""
    if hw <= max_chunk:
        return hw
    c = (max_chunk // 128) * 128
    while c >= 128:
        if hw % c == 0:
            return c
        c -= 128
    return hw  # no suitable 128-multiple divisor: keep a single chunk


def timm_model_forward(x_nchw, w1, b1, w2, b2):
    """x_nchw: (B, Cin, H, W) f32. Returns (logits (B, NC), ft (B, F))."""
    B, Cin, H, W = x_nchw.shape
    F_ = w1.shape[1]
    NC = w2.shape[1]
    HW = H * W

    # (B, Cin, HW): contiguous reshape of NCHW -- no activation transpose.
    # TODO(synk): for tiny Cin the sublane dim pads 4->8 in VMEM; packing two
    #             batch rows per sublane group would halve the input tile.
    x = x_nchw.reshape(B, Cin, HW)
    w1t = jnp.transpose(w1)                  # (F, Cin): one-time weight transpose
    b1c = b1.reshape(F_, 1)

    # pad the classifier to a lane-dense (multiple-of-128) output slab
    NCp = ((NC + 127) // 128) * 128
    if NCp != NC:
        w2p = jnp.pad(w2, ((0, 0), (0, NCp - NC)))
        b2p = jnp.pad(b2, (0, NCp - NC)).reshape(1, NCp)
    else:
        w2p = w2
        b2p = b2.reshape(1, NCp)

    # Full-sublane batch tiles: TB = 8 always; pad B up to a multiple of 8.
    TB = 8
    Bp = ((B + TB - 1) // TB) * TB
    if Bp != B:
        x = jnp.pad(x, ((0, Bp - B), (0, 0), (0, 0)))

    # HW reduction axis (trailing, "arbitrary"): chunk the spatial dim so the
    # (F, HWc) intermediate and double-buffered input tile stay inside VMEM.
    HWc = _pick_hw_chunk(HW)
    n_hw = HW // HWc

    kernel = functools.partial(_timm_head_kernel,
                               inv_hw=1.0 / HW,
                               vpu_conv=(Cin <= 32))

    grid = (Bp // TB, n_hw)
    logits_p, ft_p = pl.pallas_call(
        kernel,
        out_shape=(
            jax.ShapeDtypeStruct((Bp, NCp), jnp.float32),
            jax.ShapeDtypeStruct((Bp, F_), jnp.float32),
        ),
        grid_spec=pltpu.PrefetchScalarGridSpec(
            num_scalar_prefetch=0,
            grid=grid,
            in_specs=[
                pl.BlockSpec((TB, Cin, HWc), lambda i, k: (i, 0, k)),
                pl.BlockSpec((F_, Cin), lambda i, k: (0, 0)),
                pl.BlockSpec((F_, 1), lambda i, k: (0, 0)),
                # grid-invariant classifier operands: single-buffered for VMEM headroom
                pl.BlockSpec((F_, NCp), lambda i, k: (0, 0),
                             pipeline_mode=pl.Buffered(1)),
                pl.BlockSpec((1, NCp), lambda i, k: (0, 0),
                             pipeline_mode=pl.Buffered(1)),
            ],
            out_specs=[
                pl.BlockSpec((TB, NCp), lambda i, k: (i, 0)),
                pl.BlockSpec((TB, F_), lambda i, k: (i, 0)),
            ],
            scratch_shapes=[pltpu.VMEM((TB, F_), jnp.float32)],
        ),
        compiler_params=pltpu.CompilerParams(
            dimension_semantics=("parallel", "arbitrary"),
            vmem_limit_bytes=48 * 1024 * 1024),
    )(x, w1t, b1c, w2p, b2p)

    return logits_p[:B, :NC], ft_p[:B]


def _reference(x_nchw, w1, b1, w2, b2):
    """Pure-JAX reference of the same computation."""
    B, Cin, H, W = x_nchw.shape
    x = jnp.transpose(x_nchw, (0, 2, 3, 1)).reshape(B, H * W, Cin)
    feat = x @ w1 + b1
    feat = feat * jax.nn.sigmoid(feat)
    ft = feat.mean(axis=1)
    logits = ft @ w2 + b2
    return logits, ft


if __name__ == "__main__":
    # small, deterministic shapes consistent with the module's forward
    B, Cin, H, W = 2, 4, 16, 16          # input image-like tensor (NCHW)
    NUM_FEATURES = 128                   # model.num_features
    NUM_CLASSES = 16                     # args.num_classes

    key = jax.random.PRNGKey(0)
    k0, k1, k2, k3, k4 = jax.random.split(key, 5)
    x = jax.random.normal(k0, (B, Cin, H, W), dtype=jnp.float32)
    w1 = jax.random.normal(k1, (Cin, NUM_FEATURES), dtype=jnp.float32) * 0.1
    b1 = jax.random.normal(k2, (NUM_FEATURES,), dtype=jnp.float32) * 0.1
    w2 = jax.random.normal(k3, (NUM_FEATURES, NUM_CLASSES), dtype=jnp.float32) * 0.1
    b2 = jax.random.normal(k4, (NUM_CLASSES,), dtype=jnp.float32) * 0.1

    logits, ft = jax.block_until_ready(
        jax.jit(timm_model_forward)(x, w1, b1, w2, b2))

    ref_logits, ref_ft = _reference(x, w1, b1, w2, b2)
    assert logits.shape == (B, NUM_CLASSES) and ft.shape == (B, NUM_FEATURES)
    assert jnp.allclose(logits, ref_logits, atol=1e-4, rtol=1e-4)
    assert jnp.allclose(ft, ref_ft, atol=1e-4, rtol=1e-4)

    print("KERNEL_OK")
</pallas_src>

<mosaic_0001>
module attributes {stable_mosaic.version = 11 : i64} {
  func.func @_timm_head_kernel(%arg0: i32, %arg1: i32, %arg2: memref<8x4x256xf32, #tpu.memory_space<vmem>>, %arg3: memref<128x4xf32, #tpu.memory_space<vmem>>, %arg4: memref<128x1xf32, #tpu.memory_space<vmem>>, %arg5: memref<128x128xf32, #tpu.memory_space<vmem>>, %arg6: memref<1x128xf32, #tpu.memory_space<vmem>>, %arg7: memref<8x128xf32, #tpu.memory_space<vmem>>, %arg8: memref<8x128xf32, #tpu.memory_space<vmem>>, %arg9: memref<8x128xf32, #tpu.memory_space<vmem>>) attributes {dimension_semantics = [#tpu.dimension_semantics<parallel>, #tpu.dimension_semantics<arbitrary>], iteration_bounds = array<i64: 1, 1>, scalar_prefetch = 0 : i64, scratch_operands = 1 : i64, tpu.core_type = #tpu.core_type<tc>, window_params = [{transform_indices = @transform_0, window_bounds = array<i64: 8, 4, 256>}, {pipeline_mode = #tpu.pipeline_mode<synchronous>, transform_indices = @transform_1, window_bounds = array<i64: 128, 4>}, {pipeline_mode = #tpu.pipeline_mode<synchronous>, transform_indices = @transform_2, window_bounds = array<i64: 128, 1>}, {pipeline_mode = #tpu.pipeline_mode<synchronous>, transform_indices = @transform_3, window_bounds = array<i64: 128, 128>}, {pipeline_mode = #tpu.pipeline_mode<synchronous>, transform_indices = @transform_4, window_bounds = array<i64: 1, 128>}, {transform_indices = @transform_5, window_bounds = array<i64: 8, 128>}, {transform_indices = @transform_6, window_bounds = array<i64: 8, 128>}]} {
    %c0_i32 = arith.constant 0 : i32
    %0 = arith.cmpi eq, %arg1, %c0_i32 : i32
    %1 = arith.extui %0 : i1 to i32
    %c0_i32_0 = arith.constant 0 : i32
    %2 = arith.cmpi ne, %1, %c0_i32_0 : i32
    scf.if %2 {
      %cst_42 = arith.constant 0.000000e+00 : f32
      %226 = vector.broadcast %cst_42 : f32 to vector<8x128xf32>
      %c0_43 = arith.constant 0 : index
      %c0_44 = arith.constant 0 : index
      %227 = vector.load %arg9[%c0_43, %c0_44] : memref<8x128xf32, #tpu.memory_space<vmem>>, vector<8x128xf32>
      tpu.vector_store %arg9[%c0_43, %c0_44], %226 {strides = array<i32>} : memref<8x128xf32, #tpu.memory_space<vmem>>, vector<8x128xf32>,
    } else {
    }
    %c0 = arith.constant 0 : index
    %c0_1 = arith.constant 0 : index
    %3 = vector.load %arg3[%c0, %c0_1] : memref<128x4xf32, #tpu.memory_space<vmem>>, vector<128x4xf32>
    %c0_2 = arith.constant 0 : index
    %c0_3 = arith.constant 0 : index
    %4 = vector.load %arg4[%c0_2, %c0_3] : memref<128x1xf32, #tpu.memory_space<vmem>>, vector<128x1xf32>
    %5 = vector.shape_cast %4 : vector<128x1xf32> to vector<128x1xf32>
    %6 = vector.broadcast %5 : vector<128x1xf32> to vector<128x256xf32>
    %7 = vector.extract_strided_slice %3 {offsets = [0, 0], sizes = [128, 1], strides = [1, 1]} : vector<128x4xf32> to vector<128x1xf32>
    %8 = vector.shape_cast %7 : vector<128x1xf32> to vector<128x1xf32>
    %9 = vector.broadcast %8 : vector<128x1xf32> to vector<128x256xf32>
    %10 = vector.extract_strided_slice %3 {offsets = [0, 1], sizes = [128, 1], strides = [1, 1]} : vector<128x4xf32> to vector<128x1xf32>
    %11 = vector.shape_cast %10 : vector<128x1xf32> to vector<128x1xf32>
    %12 = vector.broadcast %11 : vector<128x1xf32> to vector<128x256xf32>
    %13 = vector.extract_strided_slice %3 {offsets = [0, 2], sizes = [128, 1], strides = [1, 1]} : vector<128x4xf32> to vector<128x1xf32>
    %14 = vector.shape_cast %13 : vector<128x1xf32> to vector<128x1xf32>
    %15 = vector.broadcast %14 : vector<128x1xf32> to vector<128x256xf32>
    %16 = vector.extract_strided_slice %3 {offsets = [0, 3], sizes = [128, 1], strides = [1, 1]} : vector<128x4xf32> to vector<128x1xf32>
    %17 = vector.shape_cast %16 : vector<128x1xf32> to vector<128x1xf32>
    %18 = vector.broadcast %17 : vector<128x1xf32> to vector<128x256xf32>
    %c0_4 = arith.constant 0 : index
    %c0_5 = arith.constant 0 : index
    %c0_6 = arith.constant 0 : index
    %19 = vector.load %arg2[%c0_4, %c0_5, %c0_6] : memref<8x4x256xf32, #tpu.memory_space<vmem>>, vector<1x4x256xf32>
    %20 = vector.shape_cast %19 : vector<1x4x256xf32> to vector<4x256xf32>
    %21 = vector.extract_strided_slice %20 {offsets = [0, 0], sizes = [1, 256], strides = [1, 1]} : vector<4x256xf32> to vector<1x256xf32>
    %22 = vector.broadcast %21 : vector<1x256xf32> to vector<128x256xf32>
    %23 = arith.mulf %9, %22 : vector<128x256xf32>
    %24 = arith.addf %6, %23 : vector<128x256xf32>
    %25 = vector.extract_strided_slice %20 {offsets = [1, 0], sizes = [1, 256], strides = [1, 1]} : vector<4x256xf32> to vector<1x256xf32>
    %26 = vector.broadcast %25 : vector<1x256xf32> to vector<128x256xf32>
    %27 = arith.mulf %12, %26 : vector<128x256xf32>
    %28 = arith.addf %24, %27 : vector<128x256xf32>
    %29 = vector.extract_strided_slice %20 {offsets = [2, 0], sizes = [1, 256], strides = [1, 1]} : vector<4x256xf32> to vector<1x256xf32>
    %30 = vector.broadcast %29 : vector<1x256xf32> to vector<128x256xf32>
    %31 = arith.mulf %15, %30 : vector<128x256xf32>
    %32 = arith.addf %28, %31 : vector<128x256xf32>
    %33 = vector.extract_strided_slice %20 {offsets = [3, 0], sizes = [1, 256], strides = [1, 1]} : vector<4x256xf32> to vector<1x256xf32>
    %34 = vector.broadcast %33 : vector<1x256xf32> to vector<128x256xf32>
    %35 = arith.mulf %18, %34 : vector<128x256xf32>
    %36 = arith.addf %32, %35 : vector<128x256xf32>
    %cst = arith.constant 5.000000e-01 : f32
    %37 = vector.broadcast %cst : f32 to vector<128x256xf32>
    %38 = arith.mulf %37, %36 : vector<128x256xf32>
    %39 = math.tanh %38 : vector<128x256xf32>
    %40 = arith.mulf %38, %39 : vector<128x256xf32>
    %41 = arith.addf %40, %38 : vector<128x256xf32>
    %cst_7 = arith.constant dense<0.000000e+00> : vector<128xf32>
    %42 = vector.multi_reduction <add>, %41, %cst_7 [1] : vector<128x256xf32> to vector<128xf32>
    %c1 = arith.constant 1 : index
    %c0_8 = arith.constant 0 : index
    %c0_9 = arith.constant 0 : index
    %43 = vector.load %arg2[%c1, %c0_8, %c0_9] : memref<8x4x256xf32, #tpu.memory_space<vmem>>, vector<1x4x256xf32>
    %44 = vector.shape_cast %43 : vector<1x4x256xf32> to vector<4x256xf32>
    %45 = vector.extract_strided_slice %44 {offsets = [0, 0], sizes = [1, 256], strides = [1, 1]} : vector<4x256xf32> to vector<1x256xf32>
    %46 = vector.broadcast %45 : vector<1x256xf32> to vector<128x256xf32>
    %47 = arith.mulf %9, %46 : vector<128x256xf32>
    %48 = arith.addf %6, %47 : vector<128x256xf32>
    %49 = vector.extract_strided_slice %44 {offsets = [1, 0], sizes = [1, 256], strides = [1, 1]} : vector<4x256xf32> to vector<1x256xf32>
    %50 = vector.broadcast %49 : vector<1x256xf32> to vector<128x256xf32>
    %51 = arith.mulf %12, %50 : vector<128x256xf32>
    %52 = arith.addf %48, %51 : vector<128x256xf32>
    %53 = vector.extract_strided_slice %44 {offsets = [2, 0], sizes = [1, 256], strides = [1, 1]} : vector<4x256xf32> to vector<1x256xf32>
    %54 = vector.broadcast %53 : vector<1x256xf32> to vector<128x256xf32>
    %55 = arith.mulf %15, %54 : vector<128x256xf32>
    %56 = arith.addf %52, %55 : vector<128x256xf32>
    %57 = vector.extract_strided_slice %44 {offsets = [3, 0], sizes = [1, 256], strides = [1, 1]} : vector<4x256xf32> to vector<1x256xf32>
    %58 = vector.broadcast %57 : vector<1x256xf32> to vector<128x256xf32>
    %59 = arith.mulf %18, %58 : vector<128x256xf32>
    %60 = arith.addf %56, %59 : vector<128x256xf32>
    %cst_10 = arith.constant 5.000000e-01 : f32
    %61 = vector.broadcast %cst_10 : f32 to vector<128x256xf32>
    %62 = arith.mulf %61, %60 : vector<128x256xf32>
    %63 = math.tanh %62 : vector<128x256xf32>
    %64 = arith.mulf %62, %63 : vector<128x256xf32>
    %65 = arith.addf %64, %62 : vector<128x256xf32>
    %cst_11 = arith.constant dense<0.000000e+00> : vector<128xf32>
    %66 = vector.multi_reduction <add>, %65, %cst_11 [1] : vector<128x256xf32> to vector<128xf32>
    %c2 = arith.constant 2 : index
    %c0_12 = arith.constant 0 : index
    %c0_13 = arith.constant 0 : index
    %67 = vector.load %arg2[%c2, %c0_12, %c0_13] : memref<8x4x256xf32, #tpu.memory_space<vmem>>, vector<1x4x256xf32>
    %68 = vector.shape_cast %67 : vector<1x4x256xf32> to vector<4x256xf32>
    %69 = vector.extract_strided_slice %68 {offsets = [0, 0], sizes = [1, 256], strides = [1, 1]} : vector<4x256xf32> to vector<1x256xf32>
    %70 = vector.broadcast %69 : vector<1x256xf32> to vector<128x256xf32>
    %71 = arith.mulf %9, %70 : vector<128x256xf32>
    %72 = arith.addf %6, %71 : vector<128x256xf32>
    %73 = vector.extract_strided_slice %68 {offsets = [1, 0], sizes = [1, 256], strides = [1, 1]} : vector<4x256xf32> to vector<1x256xf32>
    %74 = vector.broadcast %73 : vector<1x256xf32> to vector<128x256xf32>
    %75 = arith.mulf %12, %74 : vector<128x256xf32>
    %76 = arith.addf %72, %75 : vector<128x256xf32>
    %77 = vector.extract_strided_slice %68 {offsets = [2, 0], sizes = [1, 256], strides = [1, 1]} : vector<4x256xf32> to vector<1x256xf32>
    %78 = vector.broadcast %77 : vector<1x256xf32> to vector<128x256xf32>
    %79 = arith.mulf %15, %78 : vector<128x256xf32>
    %80 = arith.addf %76, %79 : vector<128x256xf32>
    %81 = vector.extract_strided_slice %68 {offsets = [3, 0], sizes = [1, 256], strides = [1, 1]} : vector<4x256xf32> to vector<1x256xf32>
    %82 = vector.broadcast %81 : vector<1x256xf32> to vector<128x256xf32>
    %83 = arith.mulf %18, %82 : vector<128x256xf32>
    %84 = arith.addf %80, %83 : vector<128x256xf32>
    %cst_14 = arith.constant 5.000000e-01 : f32
    %85 = vector.broadcast %cst_14 : f32 to vector<128x256xf32>
    %86 = arith.mulf %85, %84 : vector<128x256xf32>
    %87 = math.tanh %86 : vector<128x256xf32>
    %88 = arith.mulf %86, %87 : vector<128x256xf32>
    %89 = arith.addf %88, %86 : vector<128x256xf32>
    %cst_15 = arith.constant dense<0.000000e+00> : vector<128xf32>
    %90 = vector.multi_reduction <add>, %89, %cst_15 [1] : vector<128x256xf32> to vector<128xf32>
    %c3 = arith.constant 3 : index
    %c0_16 = arith.constant 0 : index
    %c0_17 = arith.constant 0 : index
    %91 = vector.load %arg2[%c3, %c0_16, %c0_17] : memref<8x4x256xf32, #tpu.memory_space<vmem>>, vector<1x4x256xf32>
    %92 = vector.shape_cast %91 : vector<1x4x256xf32> to vector<4x256xf32>
    %93 = vector.extract_strided_slice %92 {offsets = [0, 0], sizes = [1, 256], strides = [1, 1]} : vector<4x256xf32> to vector<1x256xf32>
    %94 = vector.broadcast %93 : vector<1x256xf32> to vector<128x256xf32>
    %95 = arith.mulf %9, %94 : vector<128x256xf32>
    %96 = arith.addf %6, %95 : vector<128x256xf32>
    %97 = vector.extract_strided_slice %92 {offsets = [1, 0], sizes = [1, 256], strides = [1, 1]} : vector<4x256xf32> to vector<1x256xf32>
    %98 = vector.broadcast %97 : vector<1x256xf32> to vector<128x256xf32>
    %99 = arith.mulf %12, %98 : vector<128x256xf32>
    %100 = arith.addf %96, %99 : vector<128x256xf32>
    %101 = vector.extract_strided_slice %92 {offsets = [2, 0], sizes = [1, 256], strides = [1, 1]} : vector<4x256xf32> to vector<1x256xf32>
    %102 = vector.broadcast %101 : vector<1x256xf32> to vector<128x256xf32>
    %103 = arith.mulf %15, %102 : vector<128x256xf32>
    %104 = arith.addf %100, %103 : vector<128x256xf32>
    %105 = vector.extract_strided_slice %92 {offsets = [3, 0], sizes = [1, 256], strides = [1, 1]} : vector<4x256xf32> to vector<1x256xf32>
    %106 = vector.broadcast %105 : vector<1x256xf32> to vector<128x256xf32>
    %107 = arith.mulf %18, %106 : vector<128x256xf32>
    %108 = arith.addf %104, %107 : vector<128x256xf32>
    %cst_18 = arith.constant 5.000000e-01 : f32
    %109 = vector.broadcast %cst_18 : f32 to vector<128x256xf32>
    %110 = arith.mulf %109, %108 : vector<128x256xf32>
    %111 = math.tanh %110 : vector<128x256xf32>
    %112 = arith.mulf %110, %111 : vector<128x256xf32>
    %113 = arith.addf %112, %110 : vector<128x256xf32>
    %cst_19 = arith.constant dense<0.000000e+00> : vector<128xf32>
    %114 = vector.multi_reduction <add>, %113, %cst_19 [1] : vector<128x256xf32> to vector<128xf32>
    %c4 = arith.constant 4 : index
    %c0_20 = arith.constant 0 : index
    %c0_21 = arith.constant 0 : index
    %115 = vector.load %arg2[%c4, %c0_20, %c0_21] : memref<8x4x256xf32, #tpu.memory_space<vmem>>, vector<1x4x256xf32>
    %116 = vector.shape_cast %115 : vector<1x4x256xf32> to vector<4x256xf32>
    %117 = vector.extract_strided_slice %116 {offsets = [0, 0], sizes = [1, 256], strides = [1, 1]} : vector<4x256xf32> to vector<1x256xf32>
    %118 = vector.broadcast %117 : vector<1x256xf32> to vector<128x256xf32>
    %119 = arith.mulf %9, %118 : vector<128x256xf32>
    %120 = arith.addf %6, %119 : vector<128x256xf32>
    %121 = vector.extract_strided_slice %116 {offsets = [1, 0], sizes = [1, 256], strides = [1, 1]} : vector<4x256xf32> to vector<1x256xf32>
    %122 = vector.broadcast %121 : vector<1x256xf32> to vector<128x256xf32>
    %123 = arith.mulf %12, %122 : vector<128x256xf32>
    %124 = arith.addf %120, %123 : vector<128x256xf32>
    %125 = vector.extract_strided_slice %116 {offsets = [2, 0], sizes = [1, 256], strides = [1, 1]} : vector<4x256xf32> to vector<1x256xf32>
    %126 = vector.broadcast %125 : vector<1x256xf32> to vector<128x256xf32>
    %127 = arith.mulf %15, %126 : vector<128x256xf32>
    %128 = arith.addf %124, %127 : vector<128x256xf32>
    %129 = vector.extract_strided_slice %116 {offsets = [3, 0], sizes = [1, 256], strides = [1, 1]} : vector<4x256xf32> to vector<1x256xf32>
    %130 = vector.broadcast %129 : vector<1x256xf32> to vector<128x256xf32>
    %131 = arith.mulf %18, %130 : vector<128x256xf32>
    %132 = arith.addf %128, %131 : vector<128x256xf32>
    %cst_22 = arith.constant 5.000000e-01 : f32
    %133 = vector.broadcast %cst_22 : f32 to vector<128x256xf32>
    %134 = arith.mulf %133, %132 : vector<128x256xf32>
    %135 = math.tanh %134 : vector<128x256xf32>
    %136 = arith.mulf %134, %135 : vector<128x256xf32>
    %137 = arith.addf %136, %134 : vector<128x256xf32>
    %cst_23 = arith.constant dense<0.000000e+00> : vector<128xf32>
    %138 = vector.multi_reduction <add>, %137, %cst_23 [1] : vector<128x256xf32> to vector<128xf32>
    %c5 = arith.constant 5 : index
    %c0_24 = arith.constant 0 : index
    %c0_25 = arith.constant 0 : index
    %139 = vector.load %arg2[%c5, %c0_24, %c0_25] : memref<8x4x256xf32, #tpu.memory_space<vmem>>, vector<1x4x256xf32>
    %140 = vector.shape_cast %139 : vector<1x4x256xf32> to vector<4x256xf32>
    %141 = vector.extract_strided_slice %140 {offsets = [0, 0], sizes = [1, 256], strides = [1, 1]} : vector<4x256xf32> to vector<1x256xf32>
    %142 = vector.broadcast %141 : vector<1x256xf32> to vector<128x256xf32>
    %143 = arith.mulf %9, %142 : vector<128x256xf32>
    %144 = arith.addf %6, %143 : vector<128x256xf32>
    %145 = vector.extract_strided_slice %140 {offsets = [1, 0], sizes = [1, 256], strides = [1, 1]} : vector<4x256xf32> to vector<1x256xf32>
    %146 = vector.broadcast %145 : vector<1x256xf32> to vector<128x256xf32>
    %147 = arith.mulf %12, %146 : vector<128x256xf32>
    %148 = arith.addf %144, %147 : vector<128x256xf32>
    %149 = vector.extract_strided_slice %140 {offsets = [2, 0], sizes = [1, 256], strides = [1, 1]} : vector<4x256xf32> to vector<1x256xf32>
    %150 = vector.broadcast %149 : vector<1x256xf32> to vector<128x256xf32>
    %151 = arith.mulf %15, %150 : vector<128x256xf32>
    %152 = arith.addf %148, %151 : vector<128x256xf32>
    %153 = vector.extract_strided_slice %140 {offsets = [3, 0], sizes = [1, 256], strides = [1, 1]} : vector<4x256xf32> to vector<1x256xf32>
    %154 = vector.broadcast %153 : vector<1x256xf32> to vector<128x256xf32>
    %155 = arith.mulf %18, %154 : vector<128x256xf32>
    %156 = arith.addf %152, %155 : vector<128x256xf32>
    %cst_26 = arith.constant 5.000000e-01 : f32
    %157 = vector.broadcast %cst_26 : f32 to vector<128x256xf32>
    %158 = arith.mulf %157, %156 : vector<128x256xf32>
    %159 = math.tanh %158 : vector<128x256xf32>
    %160 = arith.mulf %158, %159 : vector<128x256xf32>
    %161 = arith.addf %160, %158 : vector<128x256xf32>
    %cst_27 = arith.constant dense<0.000000e+00> : vector<128xf32>
    %162 = vector.multi_reduction <add>, %161, %cst_27 [1] : vector<128x256xf32> to vector<128xf32>
    %c6 = arith.constant 6 : index
    %c0_28 = arith.constant 0 : index
    %c0_29 = arith.constant 0 : index
    %163 = vector.load %arg2[%c6, %c0_28, %c0_29] : memref<8x4x256xf32, #tpu.memory_space<vmem>>, vector<1x4x256xf32>
    %164 = vector.shape_cast %163 : vector<1x4x256xf32> to vector<4x256xf32>
    %165 = vector.extract_strided_slice %164 {offsets = [0, 0], sizes = [1, 256], strides = [1, 1]} : vector<4x256xf32> to vector<1x256xf32>
    %166 = vector.broadcast %165 : vector<1x256xf32> to vector<128x256xf32>
    %167 = arith.mulf %9, %166 : vector<128x256xf32>
    %168 = arith.addf %6, %167 : vector<128x256xf32>
    %169 = vector.extract_strided_slice %164 {offsets = [1, 0], sizes = [1, 256], strides = [1, 1]} : vector<4x256xf32> to vector<1x256xf32>
    %170 = vector.broadcast %169 : vector<1x256xf32> to vector<128x256xf32>
    %171 = arith.mulf %12, %170 : vector<128x256xf32>
    %172 = arith.addf %168, %171 : vector<128x256xf32>
    %173 = vector.extract_strided_slice %164 {offsets = [2, 0], sizes = [1, 256], strides = [1, 1]} : vector<4x256xf32> to vector<1x256xf32>
    %174 = vector.broadcast %173 : vector<1x256xf32> to vector<128x256xf32>
    %175 = arith.mulf %15, %174 : vector<128x256xf32>
    %176 = arith.addf %172, %175 : vector<128x256xf32>
    %177 = vector.extract_strided_slice %164 {offsets = [3, 0], sizes = [1, 256], strides = [1, 1]} : vector<4x256xf32> to vector<1x256xf32>
    %178 = vector.broadcast %177 : vector<1x256xf32> to vector<128x256xf32>
    %179 = arith.mulf %18, %178 : vector<128x256xf32>
    %180 = arith.addf %176, %179 : vector<128x256xf32>
    %cst_30 = arith.constant 5.000000e-01 : f32
    %181 = vector.broadcast %cst_30 : f32 to vector<128x256xf32>
    %182 = arith.mulf %181, %180 : vector<128x256xf32>
    %183 = math.tanh %182 : vector<128x256xf32>
    %184 = arith.mulf %182, %183 : vector<128x256xf32>
    %185 = arith.addf %184, %182 : vector<128x256xf32>
    %cst_31 = arith.constant dense<0.000000e+00> : vector<128xf32>
    %186 = vector.multi_reduction <add>, %185, %cst_31 [1] : vector<128x256xf32> to vector<128xf32>
    %c7 = arith.constant 7 : index
    %c0_32 = arith.constant 0 : index
    %c0_33 = arith.constant 0 : index
    %187 = vector.load %arg2[%c7, %c0_32, %c0_33] : memref<8x4x256xf32, #tpu.memory_space<vmem>>, vector<1x4x256xf32>
    %188 = vector.shape_cast %187 : vector<1x4x256xf32> to vector<4x256xf32>
    %189 = vector.extract_strided_slice %188 {offsets = [0, 0], sizes = [1, 256], strides = [1, 1]} : vector<4x256xf32> to vector<1x256xf32>
    %190 = vector.broadcast %189 : vector<1x256xf32> to vector<128x256xf32>
    %191 = arith.mulf %9, %190 : vector<128x256xf32>
    %192 = arith.addf %6, %191 : vector<128x256xf32>
    %193 = vector.extract_strided_slice %188 {offsets = [1, 0], sizes = [1, 256], strides = [1, 1]} : vector<4x256xf32> to vector<1x256xf32>
    %194 = vector.broadcast %193 : vector<1x256xf32> to vector<128x256xf32>
    %195 = arith.mulf %12, %194 : vector<128x256xf32>
    %196 = arith.addf %192, %195 : vector<128x256xf32>
    %197 = vector.extract_strided_slice %188 {offsets = [2, 0], sizes = [1, 256], strides = [1, 1]} : vector<4x256xf32> to vector<1x256xf32>
    %198 = vector.broadcast %197 : vector<1x256xf32> to vector<128x256xf32>
    %199 = arith.mulf %15, %198 : vector<128x256xf32>
    %200 = arith.addf %196, %199 : vector<128x256xf32>
    %201 = vector.extract_strided_slice %188 {offsets = [3, 0], sizes = [1, 256], strides = [1, 1]} : vector<4x256xf32> to vector<1x256xf32>
    %202 = vector.broadcast %201 : vector<1x256xf32> to vector<128x256xf32>
    %203 = arith.mulf %18, %202 : vector<128x256xf32>
    %204 = arith.addf %200, %203 : vector<128x256xf32>
    %cst_34 = arith.constant 5.000000e-01 : f32
    %205 = vector.broadcast %cst_34 : f32 to vector<128x256xf32>
    %206 = arith.mulf %205, %204 : vector<128x256xf32>
    %207 = math.tanh %206 : vector<128x256xf32>
    %208 = arith.mulf %206, %207 : vector<128x256xf32>
    %209 = arith.addf %208, %206 : vector<128x256xf32>
    %cst_35 = arith.constant dense<0.000000e+00> : vector<128xf32>
    %210 = vector.multi_reduction <add>, %209, %cst_35 [1] : vector<128x256xf32> to vector<128xf32>
    %c0_36 = arith.constant 0 : index
    %c0_37 = arith.constant 0 : index
    %211 = vector.load %arg9[%c0_36, %c0_37] : memref<8x128xf32, #tpu.memory_space<vmem>>, vector<8x128xf32>
    %212 = vector.shape_cast %42 : vector<128xf32> to vector<1x128xf32>
    %213 = vector.shape_cast %66 : vector<128xf32> to vector<1x128xf32>
    %214 = vector.shape_cast %90 : vector<128xf32> to vector<1x128xf32>
    %215 = vector.shape_cast %114 : vector<128xf32> to vector<1x128xf32>
    %216 = vector.shape_cast %138 : vector<128xf32> to vector<1x128xf32>
    %217 = vector.shape_cast %162 : vector<128xf32> to vector<1x128xf32>
    %218 = vector.shape_cast %186 : vector<128xf32> to vector<1x128xf32>
    %219 = vector.shape_cast %210 : vector<128xf32> to vector<1x128xf32>
    %220 = tpu.concatenate %212, %213, %214, %215, %216, %217, %218, %219 in 0 : vector<1x128xf32>, vector<1x128xf32>, vector<1x128xf32>, vector<1x128xf32>, vector<1x128xf32>, vector<1x128xf32>, vector<1x128xf32>, vector<1x128xf32> -> vector<8x128xf32>
    %221 = arith.addf %211, %220 : vector<8x128xf32>
    %c0_38 = arith.constant 0 : index
    %c0_39 = arith.constant 0 : index
    %222 = vector.load %arg9[%c0_38, %c0_39] : memref<8x128xf32, #tpu.memory_space<vmem>>, vector<8x128xf32>
    tpu.vector_store %arg9[%c0_38, %c0_39], %221 {strides = array<i32>} : memref<8x128xf32, #tpu.memory_space<vmem>>, vector<8x128xf32>,
    %c0_i32_40 = arith.constant 0 : i32
    %223 = arith.cmpi eq, %arg1, %c0_i32_40 : i32
    %224 = arith.extui %223 : i1 to i32
    %c0_i32_41 = arith.constant 0 : i32
    %225 = arith.cmpi ne, %224, %c0_i32_41 : i32
    scf.if %225 {
      %c0_42 = arith.constant 0 : index
      %c0_43 = arith.constant 0 : index
      %226 = vector.load %arg9[%c0_42, %c0_43] : memref<8x128xf32, #tpu.memory_space<vmem>>, vector<8x128xf32>
      %cst_44 = arith.constant 3.906250e-03 : f32
      %227 = vector.broadcast %cst_44 : f32 to vector<8x128xf32>
      %228 = arith.mulf %226, %227 : vector<8x128xf32>
      %c0_45 = arith.constant 0 : index
      %c0_46 = arith.constant 0 : index
      %229 = vector.load %arg8[%c0_45, %c0_46] : memref<8x128xf32, #tpu.memory_space<vmem>>, vector<8x128xf32>
      tpu.vector_store %arg8[%c0_45, %c0_46], %228 {strides = array<i32>} : memref<8x128xf32, #tpu.memory_space<vmem>>, vector<8x128xf32>,
      %c0_47 = arith.constant 0 : index
      %c0_48 = arith.constant 0 : index
      %230 = vector.load %arg5[%c0_47, %c0_48] : memref<128x128xf32, #tpu.memory_space<vmem>>, vector<128x128xf32>
      %cst_49 = arith.constant dense<0.000000e+00> : vector<8x128xf32>
      %231 = tpu.matmul %228, %230, %cst_49 {dimension_numbers = #tpu.dot_dimension_numbers<[1], [0], [0], [1], [0, 0, 1, 1], [], []>} : vector<8x128xf32>, vector<128x128xf32>, vector<8x128xf32> -> vector<8x128xf32>
      %c0_50 = arith.constant 0 : index
      %c0_51 = arith.constant 0 : index
      %232 = vector.load %arg6[%c0_50, %c0_51] : memref<1x128xf32, #tpu.memory_space<vmem>>, vector<1x128xf32>
      %233 = vector.broadcast %232 : vector<1x128xf32> to vector<8x128xf32>
      %234 = arith.addf %231, %233 : vector<8x128xf32>
      %c0_52 = arith.constant 0 : index
      %c0_53 = arith.constant 0 : index
      %235 = vector.load %arg7[%c0_52, %c0_53] : memref<8x128xf32, #tpu.memory_space<vmem>>, vector<8x128xf32>
      tpu.vector_store %arg7[%c0_52, %c0_53], %234 {strides = array<i32>} : memref<8x128xf32, #tpu.memory_space<vmem>>, vector<8x128xf32>,
    } else {
    }
    return
  }
  func.func @transform_0(%arg0: i32, %arg1: i32) -> (i32, i32, i32) {
    %c0_i32 = arith.constant 0 : i32
    %c0_i32_0 = arith.constant 0 : i32
    return %arg0, %c0_i32, %arg1 : i32, i32, i32
  }
  func.func @transform_1(%arg0: i32, %arg1: i32) -> (i32, i32) {
    %c0_i32 = arith.constant 0 : i32
    %c0_i32_0 = arith.constant 0 : i32
    %c0_i32_1 = arith.constant 0 : i32
    return %c0_i32, %c0_i32_0 : i32, i32
  }
  func.func @transform_2(%arg0: i32, %arg1: i32) -> (i32, i32) {
    %c0_i32 = arith.constant 0 : i32
    %c0_i32_0 = arith.constant 0 : i32
    %c0_i32_1 = arith.constant 0 : i32
    return %c0_i32, %c0_i32_0 : i32, i32
  }
  func.func @transform_3(%arg0: i32, %arg1: i32) -> (i32, i32) {
    %c0_i32 = arith.constant 0 : i32
    %c0_i32_0 = arith.constant 0 : i32
    %c0_i32_1 = arith.constant 0 : i32
    return %c0_i32, %c0_i32_0 : i32, i32
  }
  func.func @transform_4(%arg0: i32, %arg1: i32) -> (i32, i32) {
    %c0_i32 = arith.constant 0 : i32
    %c0_i32_0 = arith.constant 0 : i32
    %c0_i32_1 = arith.constant 0 : i32
    return %c0_i32, %c0_i32_0 : i32, i32
  }
  func.func @transform_5(%arg0: i32, %arg1: i32) -> (i32, i32) {
    %c0_i32 = arith.constant 0 : i32
    %c0_i32_0 = arith.constant 0 : i32
    return %arg0, %c0_i32 : i32, i32
  }
  func.func @transform_6(%arg0: i32, %arg1: i32) -> (i32, i32) {
    %c0_i32 = arith.constant 0 : i32
    %c0_i32_0 = arith.constant 0 : i32
    return %arg0, %c0_i32 : i32, i32
  }
}

</mosaic_0001>

<bundles_post_ra>
// kernel: timm_model_forward.1
= control target key start
LH: loop header
LB: loop body
LE: loop exit
PB: predicated region body
PF: predicated region fallthrough
CT: control target
= control target key end

     0   :  { %v5980_v0 = vmov 0   ;;  %v5981_v33 = vmov 1   ;;  %v5982_v34 = vmov 2   ;;  %v11406_v35 = vmov 3   ;;  %s11398_s2 = inlined_call_operand.vmem [shape: f32[128,1], index: 2, kind: input, shape index: {}]   ;;  %s11399_s1 = inlined_call_operand.vmem [shape: f32[128,4], index: 1, kind: input, shape index: {}]   ;;  %s11400_s0 = inlined_call_operand.vmem [shape: f32[8,4,256], index: 0, kind: input, shape index: {}]   ;;  %s11401_s3 = inlined_call_operand.vmem [shape: f32[128,128], index: 3, kind: input, shape index: {}]   ;;  %s11402_s6 = inlined_call_operand.vmem [shape: f32[8,128], index: 6, kind: output, shape index: {1}]   ;;  %s11403_s4 = inlined_call_operand.vmem [shape: f32[1,128], index: 4, kind: input, shape index: {}]   ;;  %s11404_s5 = inlined_call_operand.vmem [shape: f32[8,128], index: 5, kind: output, shape index: {0}]  }
   0x1   :  { %5458 = vset.pattern.permute.xlu1 %v5980_v0  ;;  %5457 = vset.pattern.permute.xlu0 %v5980_v0  ;;  %v45_v1 = vld [vmem:[%s11398_s2 + $0x10] sm:$0xff]  ;;  %v43_v2 = vld [vmem:[%s11398_s2] sm:$0xff]  ;;  %v46_v3 = vld [vmem:[%s11398_s2 + $0x18] sm:$0xff]  ;;  %v11405_v36 = vlaneseq  ;;  %vm5985_vm0 = vmmov 0   ;;  %vm4494_vm1 = vcmask 130112   ;;  %vm4501_vm2 = vcmask 195712  }
   0x2   :  { %71 = vperm.xlu1 %5458, %v45_v1   ;;  %61 = vperm.xlu0 %5457, %v43_v2   ;;  %v44_v4 = vld [vmem:[%s11398_s2 + $0x8] sm:$0xff]  ;;  %v47_v6 = vld [vmem:[%s11398_s2 + $0x20] sm:$0xff]  ;;  %v50_v7 = vld [vmem:[%s11398_s2 + $0x38] sm:$0xff]  ;;  %vm4508_vm3 = vcmask 261312   ;;  %vm4515_vm4 = vcmask 326912   ;;  %vm4522_vm5 = vcmask 392512  }
   0x3   :  { %v48_v5 = vld [vmem:[%s11398_s2 + $0x28] sm:$0xff]  ;;  %v49_v8 = vld [vmem:[%s11398_s2 + $0x30] sm:$0xff]  ;;  %v51_v10 = vld [vmem:[%s11398_s2 + $0x40] sm:$0xff]  ;;  %v6160_v39 = vshrl.u32 %v11405_v36, 7  ;;  %vm4529_vm6 = vcmask 458112   ;;  %vm4536_vm7 = vcmask 523712  }
   0x4   :  { %v52_v9 = vld [vmem:[%s11398_s2 + $0x48] sm:$0xff]  ;;  %v54_v11 = vld [vmem:[%s11398_s2 + $0x58] sm:$0xff]  ;;  %v53_v12 = vld [vmem:[%s11398_s2 + $0x50] sm:$0xff]  ;;  %vm11905_vm8 = vcmask 589312   ;;  %vm11904_vm9 = vcmask 654912   ;;  %vm11903_vm10 = vcmask 720512  }
   0x5   :  { %v56_v13 = vld [vmem:[%s11398_s2 + $0x68] sm:$0xff]  ;;  %v55_v14 = vld [vmem:[%s11398_s2 + $0x60] sm:$0xff]  ;;  %v58_v15 = vld [vmem:[%s11398_s2 + $0x78] sm:$0xff]  ;;  %11908 = vst [vmem:[#allocation5_spill] sm:$0xff] %v6160_v39  ;;  %v6169_v42 = vsub.s32 0, %v6160_v39  ;;  %v6172_v43 = vsub.s32 4, %v6160_v39 }
   0x6   :  { %76 = vperm.xlu1 %5458, %v46_v3   ;;  %66 = vperm.xlu0 %5457, %v44_v4   ;;  %v57_v16 = vld [vmem:[%s11398_s2 + $0x70] sm:$0xff]  ;;  %v28_v17 = vld [vmem:[%s11399_s1 + $0x8] sm:$0xff]  ;;  %v27_v18 = vld [vmem:[%s11399_s1] sm:$0xff]  ;;  %v6205_v52 = vsub.s32 1, %v6160_v39  ;;  %v6208_v53 = vsub.s32 5, %v6160_v39  ;;  %v6245_v4 = vsub.s32 2, %v6160_v39 }
   0x7   :  { %v30_v19 = vld [vmem:[%s11399_s1 + $0x18] sm:$0xff]  ;;  %v29_v20 = vld [vmem:[%s11399_s1 + $0x10] sm:$0xff]  ;;  %v32_v21 = vld [vmem:[%s11399_s1 + $0x28] sm:$0xff]  ;;  %11911 = vst [vmem:[#allocation8_spill] sm:$0xff] %v6169_v42  ;;  %vm4564_vm11 = vcmask 786112   ;;  %vm4571_vm12 = vcmask 851712  }
   0x8   :  { %v31_v22 = vld [vmem:[%s11399_s1 + $0x20] sm:$0xff]  ;;  %v6090_v23 = vld [vmem:[%s11399_s1 + $0x38] sm:$0xff]  ;;  %v33_v24 = vld [vmem:[%s11399_s1 + $0x30] sm:$0xff]  ;;  %11912 = vst [vmem:[#allocation9_spill] sm:$0xff] %v6172_v43  ;;  %vm4578_vm13 = vcmask 917312   ;;  %vm4585_vm14 = vcmask 982912  }
   0x9   :  { %v6099_v25 = vld [vmem:[%s11399_s1 + $0x48] sm:$0xff]  ;;  %v6104_v26 = vld [vmem:[%s11399_s1 + $0x40] sm:$0xff]  ;;  %v6111_v27 = vld [vmem:[%s11399_s1 + $0x58] sm:$0xff]  ;;  %11915 = vst [vmem:[#allocation12_spill] sm:$0xff] %v6205_v52  ;;  %vm4592_vm15 = vcmask 1048512  }
   0xa   :  { %86 = vperm.xlu1 %5458, %v48_v5   ;;  %81 = vperm.xlu0 %5457, %v47_v6   ;;  %v6116_v28 = vld [vmem:[%s11399_s1 + $0x50] sm:$0xff]  ;;  %v6123_v29 = vld [vmem:[%s11399_s1 + $0x68] sm:$0xff]  ;;  %v6128_v30 = vld [vmem:[%s11399_s1 + $0x60] sm:$0xff]  ;;  %11916 = vst [vmem:[#allocation13_spill] sm:$0xff] %v6208_v53  ;;  %v6248_v5 = vsub.s32 6, %v6160_v39 }
   0xb   :  { %v6135_v31 = vld [vmem:[%s11399_s1 + $0x78] sm:$0xff]  ;;  %v6140_v32 = vld [vmem:[%s11399_s1 + $0x70] sm:$0xff]  ;;  %v6177_v44 = vld [vmem:[%s11400_s0] sm:$0xff]  ;;  %11923 = vst [vmem:[#allocation20_spill] sm:$0xff] %v6245_v4 }
   0xc   :  { %v6182_v45 = vld [vmem:[%s11400_s0 + $0x8] sm:$0xff]  ;;  %v6192_v48 = vld [vmem:[%s11400_s0 + $0x10] sm:$0xff]  ;;  %v416_v49 = vrot.slane %v6177_v44, %v6169_v42  ;;  %v420_v50 = vrot.slane %v6177_v44, %v6172_v43  ;;  %v6202_v51 = vld [vmem:[%s11400_s0 + $0x18] sm:$0xff]  ;;  %v498_v0 = vrot.slane %v6177_v44, %v6205_v52  ;;  %v502_v1 = vrot.slane %v6177_v44, %v6208_v53  ;;  %11924 = vst [vmem:[#allocation21_spill] sm:$0xff] %v6248_v5 }
   0xd   :  { %v923_v54 = vrot.slane %v6182_v45, %v6169_v42  ;;  %v927_v55 = vrot.slane %v6182_v45, %v6172_v43  ;;  %v1430_v56 = vrot.slane %v6192_v48, %v6169_v42  ;;  %v1434_v57 = vrot.slane %v6192_v48, %v6172_v43 }
   0xe   :  { %96 = vperm.xlu1 %5458, %v50_v7   ;;  %91 = vperm.xlu0 %5457, %v49_v8   ;;  %v1937_v60 = vrot.slane %v6202_v51, %v6169_v42  ;;  %v1941_v61 = vrot.slane %v6202_v51, %v6172_v43  ;;  %v6229_v62 = vrot.slane %v416_v49, %v6169_v42 }
   0xf   :  { %v6232_v63 = vrot.slane %v420_v50, %v6169_v42  ;;  %v6239_v2 = vrot.slane %v923_v54, %v6169_v42  ;;  %v6242_v3 = vrot.slane %v927_v55, %v6169_v42  ;;  %v6251_v6 = vrot.slane %v1430_v56, %v6169_v42 }
  0x10   :  { %11919 = vst [vmem:[#allocation16_spill] sm:$0xff] %v6229_v62  ;;  %v6254_v7 = vrot.slane %v1434_v57, %v6169_v42  ;;  %v1087_v50 = vrot.slane %v6182_v45, %v6245_v4  ;;  %v1091_v54 = vrot.slane %v6182_v45, %v6248_v5 }
  0x11   :  { %11920 = vst [vmem:[#allocation17_spill] sm:$0xff] %v6232_v63  ;;  %11921 = vst [vmem:[#allocation18_spill] sm:$0xff] %v6239_v2 }
  0x12   :  { %106 = vperm.xlu1 %5458, %v52_v9   ;;  %101 = vperm.xlu0 %5457, %v51_v10   ;;  %11922 = vst [vmem:[#allocation19_spill] sm:$0xff] %v6242_v3  ;;  %11925 = vst [vmem:[#allocation22_spill] sm:$0xff] %v6251_v6  ;;  %v1005_v10 = vrot.slane %v6182_v45, %v6205_v52 }
  0x13   :  { %11926 = vst [vmem:[#allocation23_spill] sm:$0xff] %v6254_v7 }
  0x16   :  { %116 = vperm.xlu1 %5458, %v54_v11   ;;  %111 = vperm.xlu0 %5457, %v53_v12   ;;  %v1009_v11 = vrot.slane %v6182_v45, %v6208_v53  ;;  %v6266_v12 = vrot.slane %v1937_v60, %v6169_v42 }
  0x18   :  { %11929 = vst [vmem:[#allocation26_spill] sm:$0xff] %v6266_v12  ;;  %v6314_v49 = vrot.slane %v1009_v11, %v6205_v52 }
  0x1a   :  { %126 = vperm.xlu1 %5458, %v56_v13   ;;  %121 = vperm.xlu0 %5457, %v55_v14   ;;  %v6269_v13 = vrot.slane %v1941_v61, %v6169_v42  ;;  %v6274_v14 = vld [vmem:[%s11400_s0 + $0x20] sm:$0xff]  ;;  %11938 = vst [vmem:[#allocation35_spill] sm:$0xff] %v6314_v49 }
  0x1c   :  { %11930 = vst [vmem:[#allocation27_spill] sm:$0xff] %v6269_v13 }
  0x1e   :  { %136 = vperm.xlu1 %5458, %v58_v15   ;;  %131 = vperm.xlu0 %5457, %v57_v16   ;;  %v6278_v15 = vsub.s32 3, %v6160_v39  ;;  %v6281_v16 = vsub.s32 7, %v6160_v39 }
  0x20   :  { %11931 = vst [vmem:[#allocation28_spill] sm:$0xff] %v6278_v15  ;;  %11932 = vst [vmem:[#allocation29_spill] sm:$0xff] %v6281_v16  ;;  %v662_v55 = vrot.slane %v6177_v44, %v6278_v15  ;;  %v666_v56 = vrot.slane %v6177_v44, %v6281_v16  ;;  %v1169_v61 = vrot.slane %v6182_v45, %v6278_v15 }
  0x22   :  { %146 = vperm.xlu1 %5458, %v28_v17   ;;  %141 = vperm.xlu0 %5457, %v27_v18   ;;  %v6378_v36 = vrot.slane %v666_v56, %v6278_v15  ;;  %v1676_v56 = vrot.slane %v6192_v48, %v6278_v15 }
  0x24   :  { %11953 = vst [vmem:[#allocation50_spill] sm:$0xff] %v6378_v36 }
  0x26   :  { %156 = vperm.xlu1 %5458, %v30_v19   ;;  %151 = vperm.xlu0 %5457, %v29_v20  }
  0x2a   :  { %166 = vperm.xlu1 %5458, %v32_v21   ;;  %161 = vperm.xlu0 %5457, %v31_v22  }
  0x2e   :  { %176 = vperm.xlu1 %5458, %v6090_v23   ;;  %171 = vperm.xlu0 %5457, %v33_v24  }
  0x32   :  { %186 = vperm.xlu1 %5458, %v6099_v25   ;;  %181 = vperm.xlu0 %5457, %v6104_v26  }
  0x36   :  { %196 = vperm.xlu1 %5458, %v6111_v27   ;;  %191 = vperm.xlu0 %5457, %v6116_v28  }
  0x3a   :  { %206 = vperm.xlu1 %5458, %v6123_v29   ;;  %201 = vperm.xlu0 %5457, %v6128_v30  }
  0x3e   :  { %216 = vperm.xlu1 %5458, %v6135_v31   ;;  %211 = vperm.xlu0 %5457, %v6140_v32  }
  0x42   :  { %5460 = vset.pattern.permute.xlu1 %v5981_v33  ;;  %5459 = vset.pattern.permute.xlu0 %v5981_v33 }
  0x43   :  { %224 = vperm.xlu1 %5460, %v28_v17   ;;  %220 = vperm.xlu0 %5459, %v27_v18  }
  0x47   :  { %228 = vperm.xlu1 %5460, %v29_v20   ;;  %232 = vperm.xlu0 %5459, %v30_v19  }
  0x4b   :  { %236 = vperm.xlu1 %5460, %v31_v22   ;;  %240 = vperm.xlu0 %5459, %v32_v21  }
  0x4f   :  { %244 = vperm.xlu1 %5460, %v33_v24   ;;  %248 = vperm.xlu0 %5459, %v6090_v23  }
  0x53   :  { %252 = vperm.xlu1 %5460, %v6104_v26   ;;  %256 = vperm.xlu0 %5459, %v6099_v25  }
  0x57   :  { %260 = vperm.xlu1 %5460, %v6116_v28   ;;  %264 = vperm.xlu0 %5459, %v6111_v27  }
  0x5b   :  { %268 = vperm.xlu1 %5460, %v6128_v30   ;;  %272 = vperm.xlu0 %5459, %v6123_v29  }
  0x5f   :  { %276 = vperm.xlu1 %5460, %v6140_v32   ;;  %280 = vperm.xlu0 %5459, %v6135_v31  }
  0x63   :  { %5461 = vset.pattern.permute.xlu1 %v5982_v34  ;;  %5462 = vset.pattern.permute.xlu0 %v5982_v34 }
  0x64   :  { %284 = vperm.xlu1 %5461, %v27_v18   ;;  %288 = vperm.xlu0 %5462, %v28_v17  }
  0x68   :  { %292 = vperm.xlu1 %5461, %v29_v20   ;;  %300 = vperm.xlu0 %5462, %v31_v22  }
  0x6c   :  { %296 = vperm.xlu1 %5461, %v30_v19   ;;  %5464 = vset.pattern.permute.xlu0 %v11406_v35 }
  0x6d   :  { %352 = vperm.xlu0 %5464, %v28_v17   ;;  %v1512_v17 = vrot.slane %v6192_v48, %v6205_v52 }
  0x6f   :  { %v6326_v57 = vrot.slane %v1512_v17, %v6205_v52 }
  0x70   :  { %5463 = vset.pattern.permute.xlu1 %v11406_v35  ;;  %v6385_v35 = vrot.slane %v1169_v61, %v6278_v15  ;;  %v2530_v61 = vrot.slane %v6274_v14, %v6208_v53 }
  0x71   :  { %348 = vperm.xlu1 %5463, %v27_v18   ;;  %360 = vperm.xlu0 %5464, %v30_v19   ;;  %v1516_v18 = vrot.slane %v6192_v48, %v6208_v53  ;;  %v6288_v19 = vrot.slane %v498_v0, %v6205_v52  ;;  %11939 = vst [vmem:[#allocation36_spill] sm:$0xff] %v6326_v57 }
  0x72   :  { %v1173_v0 = vrot.slane %v6182_v45, %v6281_v16  ;;  %11954 = vst [vmem:[#allocation51_spill] sm:$0xff] %v6385_v35 }
  0x73   :  { %11933 = vst [vmem:[#allocation30_spill] sm:$0xff] %v6288_v19  ;;  %v6329_v60 = vrot.slane %v1516_v18, %v6205_v52 }
  0x74   :  { %v6388_v39 = vrot.slane %v1173_v0, %v6278_v15 }
  0x75   :  { %356 = vperm.xlu1 %5463, %v29_v20   ;;  %364 = vperm.xlu0 %5464, %v31_v22   ;;  %v6291_v20 = vrot.slane %v502_v1, %v6205_v52  ;;  %v2023_v22 = vrot.slane %v6202_v51, %v6208_v53  ;;  %11940 = vst [vmem:[#allocation37_spill] sm:$0xff] %v6329_v60 }
  0x76   :  { %11955 = vst [vmem:[#allocation52_spill] sm:$0xff] %v6388_v39 }
  0x77   :  { %11934 = vst [vmem:[#allocation31_spill] sm:$0xff] %v6291_v20  ;;  %v6339_v1 = vrot.slane %v2023_v22, %v6205_v52  ;;  %v6364_v22 = vrot.slane %v1087_v50, %v6245_v4 }
  0x79   :  { %5465 = vset.pattern.permute.xlu1 %v5982_v34  ;;  %368 = vperm.xlu0 %5464, %v32_v21   ;;  %v6311_v34 = vrot.slane %v1005_v10, %v6205_v52  ;;  %11942 = vst [vmem:[#allocation39_spill] sm:$0xff] %v6339_v1  ;;  %11950 = vst [vmem:[#allocation47_spill] sm:$0xff] %v6364_v22 }
  0x7a   :  { %304 = vperm.xlu1 %5465, %v32_v21   ;;  %v2019_v21 = vrot.slane %v6202_v51, %v6205_v52 }
  0x7b   :  { %11937 = vst [vmem:[#allocation34_spill] sm:$0xff] %v6311_v34 }
  0x7d   :  { %v6155_v37 = vpop.permute.xlu1 %71  ;;  %v6157_v38 = vpop.permute.xlu0 %61  ;;  %372 = vperm.xlu0 %5464, %v33_v24  }
  0x7e   :  { %11906 = vst [vmem:[#allocation3_spill] sm:$0xff] %v6155_v37  ;;  %11907 = vst [vmem:[#allocation4_spill] sm:$0xff] %v6157_v38  ;;  %308 = vperm.xlu1 %5465, %v33_v24   ;;  %v584_v24 = vrot.slane %v6177_v44, %v6248_v5 }
  0x80   :  { %v6350_v11 = vrot.slane %v584_v24, %v6245_v4  ;;  %v1594_v24 = vrot.slane %v6192_v48, %v6245_v4 }
  0x81   :  { %v6162_v40 = vpop.permute.xlu1 %76  ;;  %v6164_v41 = vpop.permute.xlu0 %66  ;;  %376 = vperm.xlu0 %5464, %v6090_v23  }
  0x82   :  { %11909 = vst [vmem:[#allocation6_spill] sm:$0xff] %v6162_v40  ;;  %11910 = vst [vmem:[#allocation7_spill] sm:$0xff] %v6164_v41  ;;  %312 = vperm.xlu1 %5465, %v6090_v23   ;;  %v580_v23 = vrot.slane %v6177_v44, %v6245_v4  ;;  %v6344_v44 = vld [vmem:[%s11400_s0 + $0x28] sm:$0xff] }
  0x83   :  { %11943 = vst [vmem:[#allocation40_spill] sm:$0xff] %v6344_v44  ;;  %11945 = vst [vmem:[#allocation42_spill] sm:$0xff] %v6350_v11  ;;  %v2951_v50 = vrot.slane %v6344_v44, %v6169_v42 }
  0x84   :  { %v6347_v10 = vrot.slane %v580_v23, %v6245_v4  ;;  %v6367_v23 = vrot.slane %v1091_v54, %v6245_v4  ;;  %v2955_v54 = vrot.slane %v6344_v44, %v6172_v43 }
  0x85   :  { %v6184_v46 = vpop.permute.xlu1 %86  ;;  %v6186_v47 = vpop.permute.xlu0 %81  ;;  %380 = vperm.xlu0 %5464, %v6104_v26  }
  0x86   :  { %11913 = vst [vmem:[#allocation10_spill] sm:$0xff] %v6184_v46  ;;  %11914 = vst [vmem:[#allocation11_spill] sm:$0xff] %v6186_v47  ;;  %316 = vperm.xlu1 %5465, %v6104_v26   ;;  %v2448_v26 = vrot.slane %v6274_v14, %v6172_v43  ;;  %v6426_v39 = vrot.slane %v2955_v54, %v6169_v42 }
  0x87   :  { %11944 = vst [vmem:[#allocation41_spill] sm:$0xff] %v6347_v10  ;;  %11951 = vst [vmem:[#allocation48_spill] sm:$0xff] %v6367_v23 }
  0x88   :  { %v6356_v45 = vrot.slane %v2448_v26, %v6169_v42  ;;  %v6375_v26 = vrot.slane %v662_v55, %v6278_v15  ;;  %v2105_v55 = vrot.slane %v6202_v51, %v6248_v5  ;;  %11961 = vst [vmem:[#allocation58_spill] sm:$0xff] %v6426_v39 }
  0x89   :  { %v6218_v58 = vpop.permute.xlu1 %96  ;;  %v6220_v59 = vpop.permute.xlu0 %91  ;;  %384 = vperm.xlu0 %5464, %v6099_v25  }
  0x8a   :  { %11917 = vst [vmem:[#allocation14_spill] sm:$0xff] %v6218_v58  ;;  %11918 = vst [vmem:[#allocation15_spill] sm:$0xff] %v6220_v59  ;;  %320 = vperm.xlu1 %5465, %v6099_v25   ;;  %v2444_v25 = vrot.slane %v6274_v14, %v6169_v42  ;;  %v6423_v58 = vrot.slane %v2951_v50, %v6169_v42  ;;  %v6432_v35 = vrot.slane %v2105_v55, %v6245_v4 }
  0x8b   :  { %11947 = vst [vmem:[#allocation44_spill] sm:$0xff] %v6356_v45  ;;  %11952 = vst [vmem:[#allocation49_spill] sm:$0xff] %v6375_v26 }
  0x8c   :  { %v6353_v17 = vrot.slane %v2444_v25, %v6169_v42  ;;  %v1598_v25 = vrot.slane %v6192_v48, %v6248_v5  ;;  %11960 = vst [vmem:[#allocation57_spill] sm:$0xff] %v6423_v58  ;;  %11963 = vst [vmem:[#allocation60_spill] sm:$0xff] %v6432_v35 }
  0x8d   :  { %v6256_v8 = vpop.permute.xlu1 %106  ;;  %v6258_v9 = vpop.permute.xlu0 %101  ;;  %388 = vperm.xlu0 %5464, %v6116_v28  }
  0x8e   :  { %11927 = vst [vmem:[#allocation24_spill] sm:$0xff] %v6256_v8  ;;  %11928 = vst [vmem:[#allocation25_spill] sm:$0xff] %v6258_v9  ;;  %324 = vperm.xlu1 %5465, %v6116_v28   ;;  %v2187_v8 = vrot.slane %v6202_v51, %v6281_v16  ;;  %v3037_v9 = vrot.slane %v6344_v44, %v6208_v53 }
  0x8f   :  { %11946 = vst [vmem:[#allocation43_spill] sm:$0xff] %v6353_v17 }
  0x91   :  { %v6305_v28 = vpop.permute.xlu1 %116  ;;  %v6307_v33 = vpop.permute.xlu0 %111  ;;  %392 = vperm.xlu0 %5464, %v6111_v27  }
  0x92   :  { %11935 = vst [vmem:[#allocation32_spill] sm:$0xff] %v6305_v28  ;;  %11936 = vst [vmem:[#allocation33_spill] sm:$0xff] %v6307_v33  ;;  %328 = vperm.xlu1 %5465, %v6111_v27   ;;  %v6336_v27 = vrot.slane %v2019_v21, %v6205_v52  ;;  %v2183_v33 = vrot.slane %v6202_v51, %v6278_v15 }
  0x94   :  { %11941 = vst [vmem:[#allocation38_spill] sm:$0xff] %v6336_v27  ;;  %v6456_v35 = vrot.slane %v2183_v33, %v6278_v15 }
  0x95   :  { %v6358_v18 = vpop.permute.xlu1 %126  ;;  %v6360_v21 = vpop.permute.xlu0 %121  ;;  %396 = vperm.xlu0 %5464, %v6128_v30  }
  0x96   :  { %11948 = vst [vmem:[#allocation45_spill] sm:$0xff] %v6358_v18  ;;  %11949 = vst [vmem:[#allocation46_spill] sm:$0xff] %v6360_v21  ;;  %332 = vperm.xlu1 %5465, %v6128_v30   ;;  %v2101_v30 = vrot.slane %v6202_v51, %v6245_v4  ;;  %v1680_v18 = vrot.slane %v6192_v48, %v6281_v16  ;;  %v2526_v21 = vrot.slane %v6274_v14, %v6205_v52 }
  0x97   :  { %v3033_v48 = vrot.slane %v6344_v44, %v6205_v52  ;;  %11970 = vst [vmem:[#allocation67_spill] sm:$0xff] %v6456_v35 }
  0x98   :  { %v6429_v51 = vrot.slane %v2101_v30, %v6245_v4  ;;  %v6442_v50 = vrot.slane %v1680_v18, %v6278_v15  ;;  %v6445_v54 = vrot.slane %v2526_v21, %v6205_v52  ;;  %v6448_v30 = vrot.slane %v2530_v61, %v6205_v52 }
  0x99   :  { %v6402_v0 = vpop.permute.xlu1 %136  ;;  %v6404_v28 = vpop.permute.xlu0 %131  ;;  %400 = vperm.xlu0 %5464, %v6123_v29   ;;  %v6462_v18 = vrot.slane %v3033_v48, %v6205_v52  ;;  %v6465_v21 = vrot.slane %v3037_v9, %v6205_v52 }
  0x9a   :  { %11956 = vst [vmem:[#allocation53_spill] sm:$0xff] %v6402_v0  ;;  %11957 = vst [vmem:[#allocation54_spill] sm:$0xff] %v6404_v28  ;;  %336 = vperm.xlu1 %5465, %v6123_v29   ;;  %v6417_v0 = vrot.slane %v1594_v24, %v6245_v4  ;;  %v6420_v28 = vrot.slane %v1598_v25, %v6245_v4  ;;  %v2608_v29 = vrot.slane %v6274_v14, %v6245_v4 }
  0x9b   :  { %11962 = vst [vmem:[#allocation59_spill] sm:$0xff] %v6429_v51  ;;  %v2612_v24 = vrot.slane %v6274_v14, %v6248_v5  ;;  %v6439_v25 = vrot.slane %v1676_v56, %v6278_v15  ;;  %11965 = vst [vmem:[#allocation62_spill] sm:$0xff] %v6442_v50  ;;  %v6459_v56 = vrot.slane %v2187_v8, %v6278_v15 }
  0x9c   :  { %11958 = vst [vmem:[#allocation55_spill] sm:$0xff] %v6417_v0  ;;  %11959 = vst [vmem:[#allocation56_spill] sm:$0xff] %v6420_v28  ;;  %v6481_v52 = vrot.slane %v2608_v29, %v6245_v4 }
  0x9d   :  { %11964 = vst [vmem:[#allocation61_spill] sm:$0xff] %v6439_v25  ;;  %11966 = vst [vmem:[#allocation63_spill] sm:$0xff] %v6445_v54  ;;  %v6450_v55 = vpop.permute.xlu1 %146  ;;  %408 = vperm.xlu0 %5464, %v6135_v31   ;;  %v6453_v53 = vpop.permute.xlu0 %141 }
  0x9e   :  { %11967 = vst [vmem:[#allocation64_spill] sm:$0xff] %v6448_v30  ;;  %11968 = vst [vmem:[#allocation65_spill] sm:$0xff] %v6450_v55  ;;  %340 = vperm.xlu1 %5465, %v6140_v32   ;;  %v433_v61 = vmul.f32 %v6229_v62, %v6450_v55  ;;  %v434_v51 = vmul.f32 %v6232_v63, %v6450_v55  ;;  %v938_v33 = vmul.f32 %v6239_v2, %v6453_v53 }
  0x9f   :  { %11969 = vst [vmem:[#allocation66_spill] sm:$0xff] %v6453_v53  ;;  %11971 = vst [vmem:[#allocation68_spill] sm:$0xff] %v6459_v56  ;;  %v939_v8 = vmul.f32 %v6242_v3, %v6453_v53  ;;  %v431_v48 = vmul.f32 %v6229_v62, %v6453_v53  ;;  %v432_v9 = vmul.f32 %v6232_v63, %v6453_v53 }
  0xa0   :  { %11972 = vst [vmem:[#allocation69_spill] sm:$0xff] %v6462_v18  ;;  %11973 = vst [vmem:[#allocation70_spill] sm:$0xff] %v6465_v21  ;;  %v6484_v56 = vrot.slane %v2612_v24, %v6245_v4  ;;  %v6487_v35 = vadd.f32 %v433_v61, %v6164_v41  ;;  %v6490_v50 = vadd.f32 %v434_v51, %v6164_v41 }
  0xa1   :  { %11974 = vst [vmem:[#allocation71_spill] sm:$0xff] %v6481_v52  ;;  %v940_v25 = vmul.f32 %v6239_v2, %v6450_v55  ;;  %v941_v36 = vmul.f32 %v6242_v3, %v6450_v55  ;;  %v6496_v26 = vpop.permute.xlu1 %156  ;;  %v6498_v28 = vpop.permute.xlu0 %151  ;;  %v6501_v29 = vadd.f32 %v938_v33, %v6157_v38  ;;  %v6504_v24 = vadd.f32 %v939_v8, %v6157_v38 }
  0xa2   :  { %11975 = vst [vmem:[#allocation72_spill] sm:$0xff] %v6484_v56  ;;  %11976 = vst [vmem:[#allocation73_spill] sm:$0xff] %v6496_v26  ;;  %v6507_v61 = vadd.f32 %v431_v48, %v6157_v38  ;;  %v6510_v51 = vadd.f32 %v432_v9, %v6157_v38  ;;  %344 = vperm.xlu1 %5465, %v6135_v31   ;;  %v435_v56 = vmul.f32 %v6229_v62, %v6498_v28 }
  0xa3   :  { %11977 = vst [vmem:[#allocation74_spill] sm:$0xff] %v6498_v28  ;;  %v436_v52 = vmul.f32 %v6232_v63, %v6498_v28  ;;  %v1445_v33 = vmul.f32 %v6251_v6, %v6453_v53  ;;  %v1446_v8 = vmul.f32 %v6254_v7, %v6453_v53  ;;  %v942_v48 = vmul.f32 %v6239_v2, %v6498_v28 }
  0xa4   :  { %v943_v9 = vmul.f32 %v6242_v3, %v6498_v28  ;;  %v437_v31 = vmul.f32 %v6229_v62, %v6496_v26  ;;  %v438_v0 = vmul.f32 %v6232_v63, %v6496_v26  ;;  %v6530_v23 = vadd.f32 %v435_v56, %v6155_v37 }
  0xa5   :  { %v6533_v22 = vadd.f32 %v436_v52, %v6155_v37  ;;  %v6536_v11 = vadd.f32 %v940_v25, %v6164_v41  ;;  %v6539_v10 = vadd.f32 %v941_v36, %v6164_v41  ;;  %v6541_v21 = vpop.permute.xlu1 %166  ;;  %v6543_v18 = vpop.permute.xlu0 %161  ;;  %v6546_v30 = vadd.f32 %v1445_v33, %v6157_v38 }
  0xa6   :  { %11978 = vst [vmem:[#allocation75_spill] sm:$0xff] %v6530_v23  ;;  %11982 = vst [vmem:[#allocation79_spill] sm:$0xff] %v6541_v21  ;;  %v6549_v54 = vadd.f32 %v1446_v8, %v6157_v38  ;;  %v6552_v56 = vadd.f32 %v942_v48, %v6155_v37  ;;  %v6555_v52 = vadd.f32 %v943_v9, %v6155_v37  ;;  %v11988_v25 = vmov 3  }
  0xa7   :  { %11979 = vst [vmem:[#allocation76_spill] sm:$0xff] %v6533_v22  ;;  %11980 = vst [vmem:[#allocation77_spill] sm:$0xff] %v6536_v11  ;;  %5466 = vset.pattern.permute.xlu1 %v11988_v25  ;;  %v1447_v36 = vmul.f32 %v6251_v6, %v6450_v55  ;;  %v1448_v1 = vmul.f32 %v6254_v7, %v6450_v55  ;;  %v1449_v33 = vmul.f32 %v6251_v6, %v6498_v28 }
  0xa8   :  { %11981 = vst [vmem:[#allocation78_spill] sm:$0xff] %v6539_v10  ;;  %11983 = vst [vmem:[#allocation80_spill] sm:$0xff] %v6543_v18  ;;  %v1450_v8 = vmul.f32 %v6254_v7, %v6498_v28  ;;  %404 = vperm.xlu1 %5466, %v6140_v32   ;;  %v6568_v48 = vadd.f32 %v437_v31, %v6162_v40  ;;  %v6571_v9 = vadd.f32 %v438_v0, %v6162_v40 }
  0xa9   :  { %11984 = vst [vmem:[#allocation81_spill] sm:$0xff] %v6546_v30  ;;  %11985 = vst [vmem:[#allocation82_spill] sm:$0xff] %v6549_v54  ;;  %v944_v25 = vmul.f32 %v6239_v2, %v6496_v26  ;;  %v945_v27 = vmul.f32 %v6242_v3, %v6496_v26  ;;  %v1954_v32 = vmul.f32 %v6266_v12, %v6450_v55  ;;  %v6587_v0 = vpop.permute.xlu1 %176 }
  0xaa   :  { %11986 = vst [vmem:[#allocation83_spill] sm:$0xff] %v6552_v56  ;;  %11987 = vst [vmem:[#allocation84_spill] sm:$0xff] %v6555_v52  ;;  %v6578_v52 = vadd.f32 %v1447_v36, %v6164_v41  ;;  %v6581_v56 = vadd.f32 %v1448_v1, %v6164_v41  ;;  %v1955_v31 = vmul.f32 %v6269_v13, %v6450_v55 }
  0xab   :  { %11989 = vst [vmem:[#allocation85_spill] sm:$0xff] %v6568_v48  ;;  %11990 = vst [vmem:[#allocation86_spill] sm:$0xff] %v6571_v9  ;;  %v6589_v9 = vpop.permute.xlu0 %171  ;;  %v6592_v48 = vadd.f32 %v1449_v33, %v6155_v37  ;;  %v6595_v54 = vadd.f32 %v1450_v8, %v6155_v37  ;;  %v6598_v36 = vadd.f32 %v944_v25, %v6162_v40 }
  0xac   :  { %11991 = vst [vmem:[#allocation87_spill] sm:$0xff] %v6578_v52  ;;  %11992 = vst [vmem:[#allocation88_spill] sm:$0xff] %v6581_v56  ;;  %v6601_v1 = vadd.f32 %v945_v27, %v6162_v40  ;;  %v1952_v56 = vmul.f32 %v6266_v12, %v6453_v53  ;;  %v946_v52 = vmul.f32 %v6239_v2, %v6543_v18 }
  0xad   :  { %11993 = vst [vmem:[#allocation89_spill] sm:$0xff] %v6587_v0  ;;  %11994 = vst [vmem:[#allocation90_spill] sm:$0xff] %v6589_v9  ;;  %v1953_v0 = vmul.f32 %v6269_v13, %v6453_v53  ;;  %v947_v33 = vmul.f32 %v6242_v3, %v6543_v18  ;;  %v439_v8 = vmul.f32 %v6229_v62, %v6543_v18  ;;  %v6631_v22 = vpop.permute.xlu1 %186 }
  0xae   :  { %11995 = vst [vmem:[#allocation91_spill] sm:$0xff] %v6592_v48  ;;  %11996 = vst [vmem:[#allocation92_spill] sm:$0xff] %v6595_v54  ;;  %v440_v25 = vmul.f32 %v6232_v63, %v6543_v18  ;;  %v1956_v27 = vmul.f32 %v6266_v12, %v6498_v28  ;;  %v6623_v54 = vadd.f32 %v1955_v31, %v6164_v41 }
  0xaf   :  { %11997 = vst [vmem:[#allocation93_spill] sm:$0xff] %v6598_v36  ;;  %11998 = vst [vmem:[#allocation94_spill] sm:$0xff] %v6601_v1  ;;  %v1957_v1 = vmul.f32 %v6269_v13, %v6498_v28  ;;  %v6620_v36 = vadd.f32 %v1954_v32, %v6164_v41  ;;  %v6626_v48 = vadd.f32 %v1952_v56, %v6157_v38  ;;  %v6633_v23 = vpop.permute.xlu0 %181 }
  0xb0   :  { %v6629_v30 = vadd.f32 %v1953_v0, %v6157_v38  ;;  %12000 = vst [vmem:[#allocation96_spill] sm:$0xff] %v6631_v22  ;;  %12001 = vst [vmem:[#allocation97_spill] sm:$0xff] %v6633_v23  ;;  %v6636_v10 = vadd.f32 %v946_v52, %v6186_v47  ;;  %v6639_v11 = vadd.f32 %v947_v33, %v6186_v47 }
  0xb1   :  { %v6642_v32 = vadd.f32 %v439_v8, %v6186_v47  ;;  %v6645_v31 = vadd.f32 %v440_v25, %v6186_v47  ;;  %v1451_v56 = vmul.f32 %v6251_v6, %v6496_v26  ;;  %v1452_v0 = vmul.f32 %v6254_v7, %v6496_v26 }
  0xb2   :  { %11999 = vst [vmem:[#allocation95_spill] sm:$0xff] %v6629_v30  ;;  %12002 = vst [vmem:[#allocation98_spill] sm:$0xff] %v6636_v10  ;;  %v2461_v22 = vmul.f32 %v6353_v17, %v6450_v55  ;;  %v2462_v52 = vmul.f32 %v6356_v45, %v6450_v55  ;;  %v6656_v33 = vadd.f32 %v1956_v27, %v6155_v37 }
  0xb3   :  { %12003 = vst [vmem:[#allocation99_spill] sm:$0xff] %v6639_v11  ;;  %12004 = vst [vmem:[#allocation100_spill] sm:$0xff] %v6642_v32  ;;  %v6659_v8 = vadd.f32 %v1957_v1, %v6155_v37  ;;  %v2690_v25 = vrot.slane %v6274_v14, %v6278_v15  ;;  %v2694_v23 = vrot.slane %v6274_v14, %v6281_v16  ;;  %v6675_v1 = vpop.permute.xlu1 %196 }
  0xb4   :  { %12005 = vst [vmem:[#allocation101_spill] sm:$0xff] %v6645_v31  ;;  %12006 = vst [vmem:[#allocation102_spill] sm:$0xff] %v6656_v33  ;;  %v6666_v31 = vadd.f32 %v1451_v56, %v6162_v40  ;;  %v6669_v32 = vadd.f32 %v1452_v0, %v6162_v40  ;;  %v2459_v11 = vmul.f32 %v6353_v17, %v6453_v53 }
  0xb5   :  { %12007 = vst [vmem:[#allocation103_spill] sm:$0xff] %v6659_v8  ;;  %v2460_v27 = vmul.f32 %v6356_v45, %v6453_v53  ;;  %12010 = vst [vmem:[#allocation106_spill] sm:$0xff] %v6675_v1  ;;  %v6677_v8 = vpop.permute.xlu0 %191  ;;  %v6680_v33 = vadd.f32 %v2461_v22, %v6164_v41  ;;  %v6683_v14 = vadd.f32 %v2462_v52, %v6164_v41 }
  0xb6   :  { %12008 = vst [vmem:[#allocation104_spill] sm:$0xff] %v6666_v31  ;;  %12009 = vst [vmem:[#allocation105_spill] sm:$0xff] %v6669_v32  ;;  %v6686_v56 = vrot.slane %v2690_v25, %v6278_v15  ;;  %v6689_v0 = vrot.slane %v2694_v23, %v6278_v15  ;;  %v948_v16 = vmul.f32 %v6239_v2, %v6541_v21 }
  0xb7   :  { %12011 = vst [vmem:[#allocation107_spill] sm:$0xff] %v6677_v8  ;;  %12012 = vst [vmem:[#allocation108_spill] sm:$0xff] %v6680_v33  ;;  %v949_v1 = vmul.f32 %v6242_v3, %v6541_v21  ;;  %v441_v8 = vmul.f32 %v6229_v62, %v6541_v21  ;;  %v442_v22 = vmul.f32 %v6232_v63, %v6541_v21  ;;  %v6719_v32 = vpop.permute.xlu1 %206 }
  0xb8   :  { %12013 = vst [vmem:[#allocation109_spill] sm:$0xff] %v6683_v14  ;;  %12014 = vst [vmem:[#allocation110_spill] sm:$0xff] %v6686_v56  ;;  %v1958_v52 = vmul.f32 %v6266_v12, %v6496_v26  ;;  %v1959_v25 = vmul.f32 %v6269_v13, %v6496_v26  ;;  %v1453_v23 = vmul.f32 %v6251_v6, %v6543_v18 }
  0xb9   :  { %12015 = vst [vmem:[#allocation111_spill] sm:$0xff] %v6689_v0  ;;  %v1454_v0 = vmul.f32 %v6254_v7, %v6543_v18  ;;  %v6708_v56 = vadd.f32 %v2459_v11, %v6157_v38  ;;  %v6711_v15 = vadd.f32 %v2460_v27, %v6157_v38  ;;  %v6714_v14 = vadd.f32 %v948_v16, %v6184_v46  ;;  %v6721_v31 = vpop.permute.xlu0 %201 }
  0xba   :  { %v6717_v33 = vadd.f32 %v949_v1, %v6184_v46  ;;  %12016 = vst [vmem:[#allocation112_spill] sm:$0xff] %v6719_v32  ;;  %12017 = vst [vmem:[#allocation113_spill] sm:$0xff] %v6721_v31  ;;  %v6724_v10 = vadd.f32 %v441_v8, %v6184_v46  ;;  %v6727_v30 = vadd.f32 %v442_v22, %v6184_v46 }
  0xbb   :  { %v6730_v11 = vadd.f32 %v1958_v52, %v6162_v40  ;;  %v6733_v27 = vadd.f32 %v1959_v25, %v6162_v40  ;;  %v2966_v16 = vmul.f32 %v6423_v58, %v6453_v53  ;;  %v2967_v1 = vmul.f32 %v6426_v39, %v6453_v53 }
  0xbc   :  { %v3115_v32 = vrot.slane %v6344_v44, %v6245_v4  ;;  %v3119_v8 = vrot.slane %v6344_v44, %v6248_v5  ;;  %v6744_v22 = vadd.f32 %v1453_v23, %v6186_v47  ;;  %v6747_v52 = vadd.f32 %v1454_v0, %v6186_v47  ;;  %v6763_v0 = vpop.permute.xlu1 %216 }
  0xbd   :  { %12018 = vst [vmem:[#allocation114_spill] sm:$0xff] %v6733_v27  ;;  %v2463_v25 = vmul.f32 %v6353_v17, %v6498_v28  ;;  %v2464_v31 = vmul.f32 %v6356_v45, %v6498_v28  ;;  %v6754_v53 = vadd.f32 %v2966_v16, %v6157_v38  ;;  %v6757_v27 = vadd.f32 %v2967_v1, %v6157_v38  ;;  %v6765_v47 = vpop.permute.xlu0 %211  ;;  %v12042_v38 = vld [vmem:[#allocation76_spill] sm:$0xff] }
  0xbe   :  { %v443_v5 = vmul.f32 %v6229_v62, %v6589_v9  ;;  %v444_v23 = vmul.f32 %v6232_v63, %v6589_v9  ;;  %12019 = vst [vmem:[#allocation115_spill] sm:$0xff] %v6763_v0  ;;  %12020 = vst [vmem:[#allocation116_spill] sm:$0xff] %v6765_v47  ;;  %v6768_v44 = vrot.slane %v3115_v32, %v6245_v4 }
  0xbf   :  { %v6771_v28 = vrot.slane %v3119_v8, %v6245_v4  ;;  %v6774_v16 = vadd.f32 %v2463_v25, %v6155_v37  ;;  %v6777_v1 = vadd.f32 %v2464_v31, %v6155_v37  ;;  %v2968_v62 = vmul.f32 %v6423_v58, %v6450_v55 }
  0xc0   :  { %12021 = vst [vmem:[#allocation117_spill] sm:$0xff] %v6768_v44  ;;  %v2969_v0 = vmul.f32 %v6426_v39, %v6450_v55  ;;  %v1455_v47 = vmul.f32 %v6251_v6, %v6541_v21  ;;  %v1456_v32 = vmul.f32 %v6254_v7, %v6541_v21  ;;  %v950_v8 = vmul.f32 %v6239_v2, %v6589_v9 }
  0xc1   :  { %12022 = vst [vmem:[#allocation118_spill] sm:$0xff] %v6771_v28  ;;  %v951_v25 = vmul.f32 %v6242_v3, %v6589_v9  ;;  %v2465_v31 = vmul.f32 %v6353_v17, %v6496_v26  ;;  %v2466_v63 = vmul.f32 %v6356_v45, %v6496_v26  ;;  %v6796_v55 = vadd.f32 %v443_v5, %v6220_v59  ;;  %v6821_v45 = vpop.permute.xlu0 %220 }
  0xc2   :  { %v6799_v6 = vadd.f32 %v444_v23, %v6220_v59  ;;  %v6802_v21 = vadd.f32 %v2968_v62, %v6164_v41  ;;  %v6805_v2 = vadd.f32 %v2969_v0, %v6164_v41  ;;  %v6808_v3 = vadd.f32 %v1455_v47, %v6184_v46  ;;  %v6819_v23 = vpop.permute.xlu1 %224  ;;  %12024 = vst [vmem:[#allocation120_spill] sm:$0xff] %v6821_v45 }
  0xc3   :  { %v6811_v17 = vadd.f32 %v1456_v32, %v6184_v46  ;;  %v6814_v26 = vadd.f32 %v950_v8, %v6220_v59  ;;  %v6817_v5 = vadd.f32 %v951_v25, %v6220_v59  ;;  %12023 = vst [vmem:[#allocation119_spill] sm:$0xff] %v6819_v23  ;;  %v6824_v62 = vadd.f32 %v2465_v31, %v6162_v40  ;;  %v6840_v8 = vld [vmem:[%s11400_s0 + $0x30] sm:$0xff] }
  0xc4   :  { %v6827_v0 = vadd.f32 %v2466_v63, %v6162_v40  ;;  %v6831_v47 = vmul.f32 %v6266_v12, %v6543_v18  ;;  %v6835_v32 = vmul.f32 %v6269_v13, %v6543_v18  ;;  %12027 = vst [vmem:[#allocation123_spill] sm:$0xff] %v6840_v8  ;;  %v515_v25 = vmul.f32 %v6288_v19, %v6819_v23  ;;  %v12066_v8 = vld [vmem:[#allocation91_spill] sm:$0xff] }
  0xc5   :  { %12025 = vst [vmem:[#allocation121_spill] sm:$0xff] %v6824_v62  ;;  %v516_v63 = vmul.f32 %v6291_v20, %v6819_v23  ;;  %v1020_v31 = vmul.f32 %v6311_v34, %v6821_v45  ;;  %v1021_v40 = vmul.f32 %v6314_v49, %v6821_v45  ;;  %v513_v46 = vmul.f32 %v6288_v19, %v6821_v45  ;;  %v6870_v39 = vpop.permute.xlu0 %232 }
  0xc6   :  { %12026 = vst [vmem:[#allocation122_spill] sm:$0xff] %v6827_v0  ;;  %v514_v13 = vmul.f32 %v6291_v20, %v6821_v45  ;;  %v1022_v12 = vmul.f32 %v6311_v34, %v6819_v23  ;;  %v1023_v18 = vmul.f32 %v6314_v49, %v6819_v23  ;;  %v6859_v59 = vadd.f32 %v515_v25, %v6487_v35  ;;  %v6868_v37 = vpop.permute.xlu1 %228  ;;  %v12068_v0 = vld [vmem:[#allocation92_spill] sm:$0xff] }
  0xc7   :  { %v6862_v7 = vadd.f32 %v516_v63, %v6490_v50  ;;  %12030 = vst [vmem:[#allocation126_spill] sm:$0xff] %v6868_v37  ;;  %12031 = vst [vmem:[#allocation127_spill] sm:$0xff] %v6870_v39  ;;  %v6873_v58 = vadd.f32 %v1020_v31, %v6501_v29  ;;  %v6876_v4 = vadd.f32 %v1021_v40, %v6504_v24  ;;  %v12036_v40 = vld [vmem:[#allocation77_spill] sm:$0xff]  ;;  %v12040_v31 = vld [vmem:[#allocation75_spill] sm:$0xff] }
  0xc8   :  { %12028 = vst [vmem:[#allocation124_spill] sm:$0xff] %v6859_v59  ;;  %v6879_v35 = vadd.f32 %v513_v46, %v6507_v61  ;;  %v6882_v50 = vadd.f32 %v514_v13, %v6510_v51  ;;  %v517_v25 = vmul.f32 %v6288_v19, %v6868_v37  ;;  %v518_v63 = vmul.f32 %v6291_v20, %v6868_v37  ;;  %v12038_v46 = vld [vmem:[#allocation78_spill] sm:$0xff] }
  0xc9   :  { %12029 = vst [vmem:[#allocation125_spill] sm:$0xff] %v6862_v7  ;;  %12032 = vst [vmem:[#allocation128_spill] sm:$0xff] %v6873_v58  ;;  %v1527_v41 = vmul.f32 %v6326_v57, %v6821_v45  ;;  %v1528_v29 = vmul.f32 %v6329_v60, %v6821_v45  ;;  %v6893_v24 = vadd.f32 %v1022_v12, %v12036_v40  ;;  %v6914_v40 = vpop.permute.xlu0 %240  ;;  %v12062_v58 = vld [vmem:[#allocation88_spill] sm:$0xff] }
  0xca   :  { %12033 = vst [vmem:[#allocation129_spill] sm:$0xff] %v6876_v4  ;;  %12034 = vst [vmem:[#allocation130_spill] sm:$0xff] %v6879_v35  ;;  %v6896_v61 = vadd.f32 %v1023_v18, %v12038_v46  ;;  %v1024_v13 = vmul.f32 %v6311_v34, %v6868_v37  ;;  %v1025_v51 = vmul.f32 %v6314_v49, %v6868_v37  ;;  %v6912_v18 = vpop.permute.xlu1 %236  ;;  %v12046_v46 = vld [vmem:[#allocation81_spill] sm:$0xff] }
  0xcb   :  { %12035 = vst [vmem:[#allocation131_spill] sm:$0xff] %v6882_v50  ;;  %12037 = vst [vmem:[#allocation77_spill] sm:$0xff] %v6893_v24  ;;  %v6903_v9 = vadd.f32 %v517_v25, %v12040_v31  ;;  %v6906_v28 = vadd.f32 %v518_v63, %v12042_v38  ;;  %v519_v44 = vmul.f32 %v6288_v19, %v6870_v39  ;;  %v12048_v24 = vld [vmem:[#allocation82_spill] sm:$0xff]  ;;  %v12050_v25 = vld [vmem:[#allocation83_spill] sm:$0xff] }
  0xcc   :  { %12039 = vst [vmem:[#allocation78_spill] sm:$0xff] %v6896_v61  ;;  %v520_v12 = vmul.f32 %v6291_v20, %v6870_v39  ;;  %12044 = vst [vmem:[#allocation132_spill] sm:$0xff] %v6912_v18  ;;  %v6917_v61 = vadd.f32 %v1527_v41, %v12046_v46  ;;  %v6920_v50 = vadd.f32 %v1528_v29, %v12048_v24  ;;  %v12052_v38 = vld [vmem:[#allocation84_spill] sm:$0xff]  ;;  %v12055_v46 = vld [vmem:[#allocation39_spill] sm:$0xff] }
  0xcd   :  { %12041 = vst [vmem:[#allocation75_spill] sm:$0xff] %v6903_v9  ;;  %12043 = vst [vmem:[#allocation76_spill] sm:$0xff] %v6906_v28  ;;  %v6923_v31 = vadd.f32 %v1024_v13, %v12050_v25  ;;  %v6926_v63 = vadd.f32 %v1025_v51, %v12052_v38  ;;  %v1529_v28 = vmul.f32 %v6326_v57, %v6819_v23  ;;  %v12054_v13 = vld [vmem:[#allocation38_spill] sm:$0xff]  ;;  %v12056_v38 = vld [vmem:[#allocation85_spill] sm:$0xff]  ;;  %v6958_v43 = vpop.permute.xlu0 %248 }
  0xce   :  { %12045 = vst [vmem:[#allocation133_spill] sm:$0xff] %v6914_v40  ;;  %12047 = vst [vmem:[#allocation81_spill] sm:$0xff] %v6917_v61  ;;  %v1530_v9 = vmul.f32 %v6329_v60, %v6819_v23  ;;  %v1531_v35 = vmul.f32 %v6326_v57, %v6868_v37  ;;  %v1532_v41 = vmul.f32 %v6329_v60, %v6868_v37  ;;  %v12060_v61 = vld [vmem:[#allocation87_spill] sm:$0xff]  ;;  %v6956_v59 = vpop.permute.xlu1 %244 }
  0xcf   :  { %12049 = vst [vmem:[#allocation82_spill] sm:$0xff] %v6920_v50  ;;  %12051 = vst [vmem:[#allocation83_spill] sm:$0xff] %v6923_v31  ;;  %v1026_v29 = vmul.f32 %v6311_v34, %v6870_v39  ;;  %v1027_v24 = vmul.f32 %v6314_v49, %v6870_v39  ;;  %v2036_v51 = vmul.f32 %v12054_v13, %v6819_v23  ;;  %v12058_v31 = vld [vmem:[#allocation86_spill] sm:$0xff] }
  0xd0   :  { %12053 = vst [vmem:[#allocation84_spill] sm:$0xff] %v6926_v63  ;;  %v2037_v25 = vmul.f32 %v12055_v46, %v6819_v23  ;;  %v6945_v63 = vadd.f32 %v519_v44, %v12056_v38  ;;  %v6948_v50 = vadd.f32 %v520_v12, %v12058_v31  ;;  %v6951_v4 = vadd.f32 %v1529_v28, %v12060_v61  ;;  %v12070_v44 = vld [vmem:[#allocation93_spill] sm:$0xff]  ;;  %v12072_v12 = vld [vmem:[#allocation94_spill] sm:$0xff] }
  0xd1   :  { %v6954_v7 = vadd.f32 %v1530_v9, %v12062_v58  ;;  %12064 = vst [vmem:[#allocation134_spill] sm:$0xff] %v6956_v59  ;;  %12065 = vst [vmem:[#allocation135_spill] sm:$0xff] %v6958_v43  ;;  %v6961_v42 = vadd.f32 %v1531_v35, %v12066_v8  ;;  %v6964_v62 = vadd.f32 %v1532_v41, %v12068_v0 }
  0xd2   :  { %12057 = vst [vmem:[#allocation85_spill] sm:$0xff] %v6945_v63  ;;  %12059 = vst [vmem:[#allocation86_spill] sm:$0xff] %v6948_v50  ;;  %v6967_v38 = vadd.f32 %v1026_v29, %v12070_v44  ;;  %v6970_v31 = vadd.f32 %v1027_v24, %v12072_v12  ;;  %v2034_v58 = vmul.f32 %v12054_v13, %v6821_v45  ;;  %v12077_v24 = vld [vmem:[#allocation95_spill] sm:$0xff]  ;;  %v12099_v50 = vld [vmem:[#allocation108_spill] sm:$0xff] }
  0xd3   :  { %12061 = vst [vmem:[#allocation87_spill] sm:$0xff] %v6951_v4  ;;  %12063 = vst [vmem:[#allocation88_spill] sm:$0xff] %v6954_v7  ;;  %v2035_v28 = vmul.f32 %v12055_v46, %v6821_v45  ;;  %v1028_v9 = vmul.f32 %v6311_v34, %v6912_v18  ;;  %v1029_v8 = vmul.f32 %v6314_v49, %v6912_v18  ;;  %v12101_v7 = vld [vmem:[#allocation109_spill] sm:$0xff] }
  0xd4   :  { %12067 = vst [vmem:[#allocation91_spill] sm:$0xff] %v6961_v42  ;;  %12069 = vst [vmem:[#allocation92_spill] sm:$0xff] %v6964_v62  ;;  %v6981_v0 = vadd.f32 %v2036_v51, %v6620_v36  ;;  %v6984_v35 = vadd.f32 %v2037_v25, %v6623_v54  ;;  %v521_v61 = vmul.f32 %v6288_v19, %v6912_v18  ;;  %v7000_v54 = vpop.permute.xlu1 %252  ;;  %v7002_v51 = vpop.permute.xlu0 %256  ;;  %v12081_v25 = vld [vmem:[#allocation98_spill] sm:$0xff] }
  0xd5   :  { %12071 = vst [vmem:[#allocation93_spill] sm:$0xff] %v6967_v38  ;;  %12073 = vst [vmem:[#allocation94_spill] sm:$0xff] %v6970_v31  ;;  %v522_v41 = vmul.f32 %v6291_v20, %v6912_v18  ;;  %v6991_v29 = vadd.f32 %v2034_v58, %v6626_v48  ;;  %v6994_v44 = vadd.f32 %v2035_v28, %v12077_v24  ;;  %v12085_v48 = vld [vmem:[#allocation100_spill] sm:$0xff]  ;;  %v12087_v28 = vld [vmem:[#allocation101_spill] sm:$0xff] }
  0xd6   :  { %12074 = vst [vmem:[#allocation136_spill] sm:$0xff] %v6981_v0  ;;  %12075 = vst [vmem:[#allocation137_spill] sm:$0xff] %v6984_v35  ;;  %v2038_v12 = vmul.f32 %v12054_v13, %v6868_v37  ;;  %v2039_v36 = vmul.f32 %v12055_v46, %v6868_v37  ;;  %v7005_v43 = vadd.f32 %v1028_v9, %v12081_v25  ;;  %v12083_v35 = vld [vmem:[#allocation99_spill] sm:$0xff]  ;;  %v12090_v9 = vld [vmem:[#allocation64_spill] sm:$0xff] }
  0xd7   :  { %12076 = vst [vmem:[#allocation138_spill] sm:$0xff] %v6991_v29  ;;  %12078 = vst [vmem:[#allocation95_spill] sm:$0xff] %v6994_v44  ;;  %v7008_v0 = vadd.f32 %v1029_v8, %v12083_v35  ;;  %v7011_v58 = vadd.f32 %v521_v61, %v12085_v48  ;;  %v7014_v24 = vadd.f32 %v522_v41, %v12087_v28  ;;  %v12091_v48 = vld [vmem:[#allocation102_spill] sm:$0xff]  ;;  %v12095_v31 = vld [vmem:[#allocation105_spill] sm:$0xff] }
  0xd8   :  { %12079 = vst [vmem:[#allocation139_spill] sm:$0xff] %v7000_v54  ;;  %12080 = vst [vmem:[#allocation140_spill] sm:$0xff] %v7002_v51  ;;  %v1533_v44 = vmul.f32 %v6326_v57, %v6870_v39  ;;  %v1534_v54 = vmul.f32 %v6329_v60, %v6870_v39  ;;  %v12089_v51 = vld [vmem:[#allocation63_spill] sm:$0xff]  ;;  %v2544_v25 = vmul.f32 %v12090_v9, %v6819_v23  ;;  %v7044_v62 = vpop.permute.xlu1 %260  ;;  %v7046_v42 = vpop.permute.xlu0 %264 }
  0xd9   :  { %12082 = vst [vmem:[#allocation98_spill] sm:$0xff] %v7005_v43  ;;  %12084 = vst [vmem:[#allocation99_spill] sm:$0xff] %v7008_v0  ;;  %v2543_v29 = vmul.f32 %v12089_v51, %v6819_v23  ;;  %v2541_v8 = vmul.f32 %v12089_v51, %v6821_v45  ;;  %v2542_v35 = vmul.f32 %v12090_v9, %v6821_v45  ;;  %v12093_v0 = vld [vmem:[#allocation104_spill] sm:$0xff] }
  0xda   :  { %12086 = vst [vmem:[#allocation100_spill] sm:$0xff] %v7011_v58  ;;  %12088 = vst [vmem:[#allocation101_spill] sm:$0xff] %v7014_v24  ;;  %v1030_v61 = vmul.f32 %v6311_v34, %v6914_v40  ;;  %v1031_v41 = vmul.f32 %v6314_v49, %v6914_v40  ;;  %v7033_v28 = vadd.f32 %v2038_v12, %v12091_v48  ;;  %v12092_v24 = vld [vmem:[#allocation103_spill] sm:$0xff]  ;;  %v12114_v48 = vld [vmem:[#allocation114_spill] sm:$0xff] }
  0xdb   :  { %v7036_v58 = vadd.f32 %v2039_v36, %v12092_v24  ;;  %v7039_v43 = vadd.f32 %v1533_v44, %v12093_v0  ;;  %v7042_v38 = vadd.f32 %v1534_v54, %v12095_v31  ;;  %12097 = vst [vmem:[#allocation104_spill] sm:$0xff] %v7044_v62  ;;  %12098 = vst [vmem:[#allocation105_spill] sm:$0xff] %v7046_v42 }
  0xdc   :  { %v7049_v63 = vadd.f32 %v2543_v29, %v12099_v50  ;;  %v7052_v4 = vadd.f32 %v2544_v25, %v12101_v7  ;;  %v7055_v12 = vadd.f32 %v2541_v8, %v6708_v56  ;;  %v7058_v36 = vadd.f32 %v2542_v35, %v6711_v15  ;;  %v12109_v25 = vld [vmem:[#allocation69_spill] sm:$0xff] }
  0xdd   :  { %12094 = vst [vmem:[#allocation102_spill] sm:$0xff] %v7039_v43  ;;  %12096 = vst [vmem:[#allocation103_spill] sm:$0xff] %v7042_v38  ;;  %v523_v31 = vmul.f32 %v6288_v19, %v6914_v40  ;;  %v524_v0 = vmul.f32 %v6291_v20, %v6914_v40  ;;  %v2040_v44 = vmul.f32 %v12054_v13, %v6870_v39 }
  0xde   :  { %12100 = vst [vmem:[#allocation108_spill] sm:$0xff] %v7049_v63  ;;  %12102 = vst [vmem:[#allocation109_spill] sm:$0xff] %v7052_v4  ;;  %v2041_v50 = vmul.f32 %v12055_v46, %v6870_v39  ;;  %v7069_v7 = vadd.f32 %v1030_v61, %v6714_v14  ;;  %v7072_v56 = vadd.f32 %v1031_v41, %v6717_v33  ;;  %v12110_v14 = vld [vmem:[#allocation70_spill] sm:$0xff]  ;;  %v7088_v33 = vpop.permute.xlu1 %268  ;;  %v7090_v61 = vpop.permute.xlu0 %272 }
  0xdf   :  { %12103 = vst [vmem:[#allocation141_spill] sm:$0xff] %v7055_v12  ;;  %12104 = vst [vmem:[#allocation142_spill] sm:$0xff] %v7058_v36  ;;  %v1535_v15 = vmul.f32 %v6326_v57, %v6912_v18  ;;  %v1536_v29 = vmul.f32 %v6329_v60, %v6912_v18  ;;  %v7079_v54 = vadd.f32 %v523_v31, %v6724_v10  ;;  %v12118_v31 = vld [vmem:[#allocation28_spill] sm:$0xff] }
  0xe0   :  { %12105 = vst [vmem:[#allocation143_spill] sm:$0xff] %v7069_v7  ;;  %12106 = vst [vmem:[#allocation144_spill] sm:$0xff] %v7072_v56  ;;  %v7082_v24 = vadd.f32 %v524_v0, %v6727_v30  ;;  %v3048_v8 = vmul.f32 %v12109_v25, %v6821_v45  ;;  %v3049_v35 = vmul.f32 %v12110_v14, %v6821_v45  ;;  %v12119_v0 = vld [vmem:[#allocation40_spill] sm:$0xff]  ;;  %v12120_v45 = vld [vmem:[#allocation29_spill] sm:$0xff] }
  0xe1   :  { %12107 = vst [vmem:[#allocation145_spill] sm:$0xff] %v7079_v54  ;;  %12111 = vst [vmem:[#allocation147_spill] sm:$0xff] %v7088_v33  ;;  %v7093_v41 = vadd.f32 %v2040_v44, %v6730_v11  ;;  %v7096_v42 = vadd.f32 %v2041_v50, %v12114_v48  ;;  %v7099_v10 = vadd.f32 %v1535_v15, %v6744_v22  ;;  %v12190_v7 = vld [vmem:[#allocation91_spill] sm:$0xff] }
  0xe2   :  { %12108 = vst [vmem:[#allocation146_spill] sm:$0xff] %v7082_v24  ;;  %12112 = vst [vmem:[#allocation148_spill] sm:$0xff] %v7090_v61  ;;  %v7102_v30 = vadd.f32 %v1536_v29, %v6747_v52  ;;  %v3197_v62 = vrot.slane %v12119_v0, %v12118_v31  ;;  %v3201_v33 = vrot.slane %v12119_v0, %v12120_v45  ;;  %v12165_v45 = vld [vmem:[#allocation130_spill] sm:$0xff] }
  0xe3   :  { %12113 = vst [vmem:[#allocation149_spill] sm:$0xff] %v7093_v41  ;;  %12115 = vst [vmem:[#allocation114_spill] sm:$0xff] %v7096_v42  ;;  %v2545_v61 = vmul.f32 %v12089_v51, %v6868_v37  ;;  %v2546_v11 = vmul.f32 %v12090_v9, %v6868_v37  ;;  %v525_v44 = vmul.f32 %v6288_v19, %v6956_v59  ;;  %v7132_v19 = vpop.permute.xlu1 %276 }
  0xe4   :  { %12116 = vst [vmem:[#allocation150_spill] sm:$0xff] %v7099_v10  ;;  %12117 = vst [vmem:[#allocation151_spill] sm:$0xff] %v7102_v30  ;;  %v526_v22 = vmul.f32 %v6291_v20, %v6956_v59  ;;  %v3050_v52 = vmul.f32 %v12109_v25, %v6819_v23  ;;  %v3051_v50 = vmul.f32 %v12110_v14, %v6819_v23  ;;  %v7134_v20 = vpop.permute.xlu0 %280 }
  0xe5   :  { %v7121_v15 = vadd.f32 %v3048_v8, %v6754_v53  ;;  %v7124_v29 = vadd.f32 %v3049_v35, %v6757_v27  ;;  %v7127_v48 = vrot.slane %v3197_v62, %v12118_v31  ;;  %v7130_v0 = vrot.slane %v3201_v33, %v12118_v31  ;;  %12125 = vst [vmem:[#allocation155_spill] sm:$0xff] %v7132_v19 }
  0xe6   :  { %12126 = vst [vmem:[#allocation156_spill] sm:$0xff] %v7134_v20  ;;  %v7137_v25 = vadd.f32 %v2545_v61, %v6774_v16  ;;  %v7140_v23 = vadd.f32 %v2546_v11, %v6777_v1  ;;  %v7143_v53 = vadd.f32 %v525_v44, %v6796_v55  ;;  %v7146_v27 = vadd.f32 %v526_v22, %v6799_v6  ;;  %v12135_v44 = vld [vmem:[#allocation11_spill] sm:$0xff]  ;;  %v12155_v20 = vld [vmem:[#allocation41_spill] sm:$0xff] }
  0xe7   :  { %12121 = vst [vmem:[#allocation40_spill] sm:$0xff] %v7121_v15  ;;  %12122 = vst [vmem:[#allocation152_spill] sm:$0xff] %v7124_v29  ;;  %v1537_v62 = vmul.f32 %v6326_v57, %v6914_v40  ;;  %v1538_v8 = vmul.f32 %v6329_v60, %v6914_v40  ;;  %v1032_v35 = vmul.f32 %v6311_v34, %v6956_v59  ;;  %v12161_v34 = vld [vmem:[#allocation128_spill] sm:$0xff]  ;;  %v12162_v57 = vld [vmem:[#allocation129_spill] sm:$0xff] }
  0xe8   :  { %12123 = vst [vmem:[#allocation153_spill] sm:$0xff] %v7127_v48  ;;  %12124 = vst [vmem:[#allocation154_spill] sm:$0xff] %v7130_v0  ;;  %v1033_v16 = vmul.f32 %v6314_v49, %v6956_v59  ;;  %v7157_v1 = vadd.f32 %v3050_v52, %v6802_v21  ;;  %v7160_v55 = vadd.f32 %v3051_v50, %v6805_v2  ;;  %v12140_v50 = vld [vmem:[#allocation121_spill] sm:$0xff]  ;;  %v12188_v15 = vld [vmem:[#allocation62_spill] sm:$0xff] }
  0xe9   :  { %12127 = vst [vmem:[#allocation157_spill] sm:$0xff] %v7137_v25  ;;  %12128 = vst [vmem:[#allocation158_spill] sm:$0xff] %v7140_v23  ;;  %v2547_v6 = vmul.f32 %v12089_v51, %v6870_v39  ;;  %v2548_v33 = vmul.f32 %v12090_v9, %v6870_v39  ;;  %v7167_v61 = vadd.f32 %v1537_v62, %v6808_v3  ;;  %v12142_v62 = vld [vmem:[#allocation122_spill] sm:$0xff]  ;;  %v12158_v9 = vld [vmem:[#allocation48_spill] sm:$0xff] }
  0xea   :  { %12129 = vst [vmem:[#allocation159_spill] sm:$0xff] %v7143_v53  ;;  %12130 = vst [vmem:[#allocation160_spill] sm:$0xff] %v7146_v27  ;;  %v7170_v11 = vadd.f32 %v1538_v8, %v6811_v17  ;;  %v7174_v22 = vadd.f32 %v6831_v47, %v12135_v44  ;;  %v7178_v2 = vadd.f32 %v6835_v32, %v12135_v44  ;;  %v7192_v8 = vpop.permute.xlu1 %284  ;;  %v7194_v47 = vpop.permute.xlu0 %288  ;;  %v12156_v39 = vld [vmem:[#allocation42_spill] sm:$0xff]  ;;  %v12179_v53 = vld [vmem:[#allocation88_spill] sm:$0xff] }
  0xeb   :  { %12131 = vst [vmem:[#allocation161_spill] sm:$0xff] %v7157_v1  ;;  %12132 = vst [vmem:[#allocation162_spill] sm:$0xff] %v7160_v55  ;;  %v7181_v21 = vadd.f32 %v1032_v35, %v6814_v26  ;;  %v7184_v52 = vadd.f32 %v1033_v16, %v6817_v5  ;;  %v7187_v3 = vadd.f32 %v2547_v6, %v12140_v50  ;;  %v12148_v5 = vld [vmem:[#allocation8_spill] sm:$0xff]  ;;  %v12149_v35 = vld [vmem:[#allocation123_spill] sm:$0xff] }
  0xec   :  { %12133 = vst [vmem:[#allocation163_spill] sm:$0xff] %v7167_v61  ;;  %12134 = vst [vmem:[#allocation164_spill] sm:$0xff] %v7170_v11  ;;  %v7190_v17 = vadd.f32 %v2548_v33, %v12142_v62  ;;  %v7198_v32 = vmul.f32 %v12054_v13, %v6912_v18  ;;  %v7202_v26 = vmul.f32 %v12055_v46, %v6912_v18  ;;  %v12152_v33 = vld [vmem:[#allocation9_spill] sm:$0xff]  ;;  %v12157_v46 = vld [vmem:[#allocation47_spill] sm:$0xff] }
  0xed   :  { %12136 = vst [vmem:[#allocation165_spill] sm:$0xff] %v7174_v22  ;;  %12137 = vst [vmem:[#allocation166_spill] sm:$0xff] %v7178_v2  ;;  %v12150_v16 = vrot.slane %v12149_v35, %v12148_v5  ;;  %v12153_v50 = vrot.slane %v12149_v35, %v12152_v33  ;;  %v597_v19 = vmul.f32 %v12155_v20, %v7194_v47  ;;  %v12160_v18 = vld [vmem:[#allocation125_spill] sm:$0xff]  ;;  %v12177_v61 = vld [vmem:[#allocation84_spill] sm:$0xff] }
  0xee   :  { %12138 = vst [vmem:[#allocation167_spill] sm:$0xff] %v7181_v21  ;;  %12139 = vst [vmem:[#allocation168_spill] sm:$0xff] %v7184_v52  ;;  %v598_v13 = vmul.f32 %v12156_v39, %v7194_v47  ;;  %v1102_v40 = vmul.f32 %v12157_v46, %v7192_v8  ;;  %v1103_v44 = vmul.f32 %v12158_v9, %v7192_v8  ;;  %v7236_v14 = vpop.permute.xlu1 %292  ;;  %v7238_v37 = vpop.permute.xlu0 %300  ;;  %v12176_v21 = vld [vmem:[#allocation83_spill] sm:$0xff]  ;;  %v12187_v0 = vld [vmem:[#allocation61_spill] sm:$0xff] }
  0xef   :  { %12141 = vst [vmem:[#allocation121_spill] sm:$0xff] %v7187_v3  ;;  %12143 = vst [vmem:[#allocation122_spill] sm:$0xff] %v7190_v17  ;;  %v7208_v6 = vrot.slane %v12150_v16, %v12148_v5  ;;  %v7214_v62 = vrot.slane %v12153_v50, %v12148_v5  ;;  %v595_v16 = vmul.f32 %v12155_v20, %v7192_v8  ;;  %v12159_v5 = vld [vmem:[#allocation124_spill] sm:$0xff]  ;;  %v12174_v17 = vld [vmem:[#allocation82_spill] sm:$0xff] }
  0xf0   :  { %12144 = vst [vmem:[#allocation169_spill] sm:$0xff] %v7192_v8  ;;  %12145 = vst [vmem:[#allocation170_spill] sm:$0xff] %v7194_v47  ;;  %v596_v35 = vmul.f32 %v12156_v39, %v7192_v8  ;;  %v1104_v50 = vmul.f32 %v12157_v46, %v7194_v47  ;;  %v1105_v33 = vmul.f32 %v12158_v9, %v7194_v47  ;;  %v12178_v1 = vld [vmem:[#allocation87_spill] sm:$0xff] }
  0xf1   :  { %12146 = vst [vmem:[#allocation171_spill] sm:$0xff] %v7198_v32  ;;  %12147 = vst [vmem:[#allocation172_spill] sm:$0xff] %v7202_v26  ;;  %v629_v51 = vadd.f32 %v597_v19, %v12159_v5  ;;  %v630_v49 = vadd.f32 %v598_v13, %v12160_v18  ;;  %v1134_v60 = vadd.f32 %v1102_v40, %v12161_v34  ;;  %v12167_v26 = vld [vmem:[#allocation77_spill] sm:$0xff]  ;;  %v12168_v32 = vld [vmem:[#allocation78_spill] sm:$0xff] }
  0xf2   :  { %12151 = vst [vmem:[#allocation123_spill] sm:$0xff] %v7208_v6  ;;  %12154 = vst [vmem:[#allocation173_spill] sm:$0xff] %v7214_v62  ;;  %v1135_v59 = vadd.f32 %v1103_v44, %v12162_v57  ;;  %v627_v31 = vadd.f32 %v595_v16, %v12165_v45  ;;  %v12166_v62 = vld [vmem:[#allocation131_spill] sm:$0xff]  ;;  %v1136_v2 = vadd.f32 %v1104_v50, %v12167_v26  ;;  %v12170_v40 = vld [vmem:[#allocation56_spill] sm:$0xff]  ;;  %v7264_v52 = vpop.permute.xlu1 %296  ;;  %v7274_v25 = vpop.permute.xlu0 %352 }
  0xf3   :  { %12163 = vst [vmem:[#allocation124_spill] sm:$0xff] %v7236_v14  ;;  %12164 = vst [vmem:[#allocation125_spill] sm:$0xff] %v7238_v37  ;;  %v628_v6 = vadd.f32 %v596_v35, %v12166_v62  ;;  %v1137_v22 = vadd.f32 %v1105_v33, %v12168_v32  ;;  %v599_v19 = vmul.f32 %v12155_v20, %v7236_v14  ;;  %v12169_v57 = vld [vmem:[#allocation55_spill] sm:$0xff]  ;;  %v12172_v62 = vld [vmem:[#allocation76_spill] sm:$0xff] }
  0xf4   :  { %v600_v34 = vmul.f32 %v12156_v39, %v7236_v14  ;;  %v1609_v18 = vmul.f32 %v12169_v57, %v7192_v8  ;;  %v1610_v13 = vmul.f32 %v12170_v40, %v7192_v8  ;;  %v1106_v45 = vmul.f32 %v12157_v46, %v7236_v14  ;;  %v12171_v5 = vld [vmem:[#allocation75_spill] sm:$0xff]  ;;  %v12173_v35 = vld [vmem:[#allocation81_spill] sm:$0xff]  ;;  %12175 = vst [vmem:[#allocation128_spill] sm:$0xff] %v7264_v52 }
  0xf5   :  { %v1107_v44 = vmul.f32 %v12158_v9, %v7236_v14  ;;  %v1611_v32 = vmul.f32 %v12169_v57, %v7194_v47  ;;  %v1612_v26 = vmul.f32 %v12170_v40, %v7194_v47  ;;  %v631_v33 = vadd.f32 %v599_v19, %v12171_v5  ;;  %12180 = vst [vmem:[#allocation129_spill] sm:$0xff] %v7274_v25 }
  0xf6   :  { %v632_v16 = vadd.f32 %v600_v34, %v12172_v62  ;;  %v1641_v50 = vadd.f32 %v1609_v18, %v12173_v35  ;;  %v1642_v3 = vadd.f32 %v1610_v13, %v12174_v17  ;;  %v7267_v11 = vadd.f32 %v1106_v45, %v12176_v21  ;;  %v12183_v13 = vld [vmem:[#allocation51_spill] sm:$0xff]  ;;  %v12186_v62 = vld [vmem:[#allocation86_spill] sm:$0xff]  ;;  %v7300_v24 = vpop.permute.xlu1 %348 }
  0xf7   :  { %v7270_v55 = vadd.f32 %v1107_v44, %v12177_v61  ;;  %v1643_v27 = vadd.f32 %v1611_v32, %v12178_v1  ;;  %v1644_v23 = vadd.f32 %v1612_v26, %v12179_v53  ;;  %v601_v19 = vmul.f32 %v12155_v20, %v7264_v52  ;;  %v12181_v61 = vld [vmem:[#allocation49_spill] sm:$0xff]  ;;  %v12182_v1 = vld [vmem:[#allocation50_spill] sm:$0xff]  ;;  %v12184_v44 = vld [vmem:[#allocation52_spill] sm:$0xff]  ;;  %12189 = vst [vmem:[#allocation130_spill] sm:$0xff] %v7300_v24 }
  0xf8   :  { %v602_v17 = vmul.f32 %v12156_v39, %v7264_v52  ;;  %v1613_v34 = vmul.f32 %v12169_v57, %v7236_v14  ;;  %v1614_v21 = vmul.f32 %v12170_v40, %v7236_v14  ;;  %v679_v18 = vmul.f32 %v12181_v61, %v7274_v25  ;;  %v12185_v26 = vld [vmem:[#allocation85_spill] sm:$0xff] }
  0xf9   :  { %v680_v53 = vmul.f32 %v12182_v1, %v7274_v25  ;;  %v1186_v45 = vmul.f32 %v12183_v13, %v7274_v25  ;;  %v1187_v32 = vmul.f32 %v12184_v44, %v7274_v25  ;;  %v633_v5 = vadd.f32 %v601_v19, %v12185_v26  ;;  %v12191_v19 = vld [vmem:[#allocation92_spill] sm:$0xff] }
  0xfa   :  { %v7294_v35 = vadd.f32 %v602_v17, %v12186_v62  ;;  %v1693_v29 = vmul.f32 %v12187_v0, %v7274_v25  ;;  %v1694_v48 = vmul.f32 %v12188_v15, %v7274_v25  ;;  %v711_v30 = vadd.f32 %v679_v18, %v629_v51 }
  0xfb   :  { %v712_v10 = vadd.f32 %v680_v53, %v630_v49  ;;  %v1218_v42 = vadd.f32 %v1186_v45, %v1136_v2  ;;  %v1219_v41 = vadd.f32 %v1187_v32, %v1137_v22  ;;  %v1645_v36 = vadd.f32 %v1613_v34, %v12190_v7 }
  0xfc   :  { %v1725_v54 = vadd.f32 %v1693_v29, %v1643_v27  ;;  %v1726_v56 = vadd.f32 %v1694_v48, %v1644_v23  ;;  %v1646_v26 = vadd.f32 %v1614_v21, %v12191_v19  ;;  %v7304_v17 = vmul.f32 0.5, %v711_v30  ;;  %v7323_v27 = vpop.permute.xlu1 %356 }
  0xfd   :  { %v7306_v62 = vmul.f32 0.5, %v712_v10  ;;  %v1184_v12 = vmul.f32 %v12183_v13, %v7300_v24  ;;  %v1185_v49 = vmul.f32 %v12184_v44, %v7300_v24  ;;  %v677_v51 = vmul.f32 %v12181_v61, %v7300_v24  ;;  %12192 = vst [vmem:[#allocation131_spill] sm:$0xff] %v7323_v27 }
  0xfe   :  { %v678_v23 = vmul.f32 %v12182_v1, %v7300_v24  ;;  %v7316_v29 = vmul.f32 0.5, %v1218_v42  ;;  %v7318_v7 = vmul.f32 0.5, %v1219_v41  ;;  %5467 = vtanh.f32 %v7304_v17 }
  0xff   :  { %v1216_v10 = vadd.f32 %v1184_v12, %v1134_v60  ;;  %v1217_v30 = vadd.f32 %v1185_v49, %v1135_v59  ;;  %v1691_v48 = vmul.f32 %v12187_v0, %v7300_v24  ;;  %5469 = vtanh.f32 %v7306_v62 }
 0x100   :  { %v709_v22 = vadd.f32 %v677_v51, %v627_v31  ;;  %v710_v2 = vadd.f32 %v678_v23, %v628_v6  ;;  %v1692_v34 = vmul.f32 %v12188_v15, %v7300_v24  ;;  %v681_v60 = vmul.f32 %v12181_v61, %v7323_v27  ;;  %v7341_v6 = vpop.permute.xlu0 %360 }
 0x101   :  { %v7328_v42 = vmul.f32 0.5, %v1216_v10  ;;  %v7330_v41 = vmul.f32 0.5, %v1217_v30  ;;  %v682_v59 = vmul.f32 %v12182_v1, %v7323_v27  ;;  %5471 = vtanh.f32 %v7316_v29  ;;  %12193 = vst [vmem:[#allocation77_spill] sm:$0xff] %v7341_v6 }
 0x102   :  { %v7336_v12 = vmul.f32 0.5, %v709_v22  ;;  %v7338_v21 = vmul.f32 0.5, %v710_v2  ;;  %v1723_v31 = vadd.f32 %v1691_v48, %v1641_v50  ;;  %v713_v18 = vadd.f32 %v681_v60, %v631_v33 }
 0x103   :  { %5473 = vtanh.f32 %v7328_v42  ;;  %v714_v53 = vadd.f32 %v682_v59, %v632_v16  ;;  %v1724_v45 = vadd.f32 %v1692_v34, %v1642_v3  ;;  %v1188_v19 = vmul.f32 %v12183_v13, %v7323_v27 }
 0x104   :  { %5475 = vtanh.f32 %v7330_v41  ;;  %v7345_v32 = vmul.f32 0.5, %v1723_v31  ;;  %v1189_v49 = vmul.f32 %v12184_v44, %v7323_v27  ;;  %v7352_v50 = vmul.f32 0.5, %v713_v18 }
 0x105   :  { %5477 = vtanh.f32 %v7336_v12  ;;  %v7354_v51 = vmul.f32 0.5, %v714_v53  ;;  %v7356_v23 = vmul.f32 0.5, %v1724_v45  ;;  %v1220_v3 = vadd.f32 %v1188_v19, %v7267_v11  ;;  %v12194_v53 = vld [vmem:[#allocation93_spill] sm:$0xff]  ;;  %v12195_v19 = vld [vmem:[#allocation94_spill] sm:$0xff] }
 0x106   :  { %5479 = vtanh.f32 %v7338_v21  ;;  %v1221_v33 = vadd.f32 %v1189_v49, %v7270_v55  ;;  %v683_v16 = vmul.f32 %v12181_v61, %v7341_v6  ;;  %v684_v10 = vmul.f32 %v12182_v1, %v7341_v6 }
 0x107   :  { %5481 = vtanh.f32 %v7352_v50  ;;  %v7366_v30 = vmul.f32 0.5, %v1725_v54  ;;  %v7368_v48 = vmul.f32 0.5, %v1726_v56  ;;  %v7371_v22 = vmul.f32 0.5, %v1220_v3 }
 0x108   :  { %5483 = vtanh.f32 %v7354_v51  ;;  %v7373_v2 = vmul.f32 0.5, %v1221_v33  ;;  %v715_v11 = vadd.f32 %v683_v16, %v633_v5  ;;  %v716_v55 = vadd.f32 %v684_v10, %v7294_v35 }
 0x109   :  { %5485 = vtanh.f32 %v7318_v7  ;;  %v1695_v34 = vmul.f32 %v12187_v0, %v7323_v27  ;;  %v1696_v54 = vmul.f32 %v12188_v15, %v7323_v27  ;;  %v1108_v60 = vmul.f32 %v12157_v46, %v7264_v52 }
 0x10a   :  { %5487 = vtanh.f32 %v7345_v32  ;;  %v7382_v56 = vmul.f32 0.5, %v715_v11  ;;  %v1109_v5 = vmul.f32 %v12158_v9, %v7264_v52  ;;  %v7389_v59 = vmul.f32 0.5, %v716_v55 }
 0x10b   :  { %5489 = vtanh.f32 %v7356_v23  ;;  %v1727_v35 = vadd.f32 %v1695_v34, %v1645_v36  ;;  %v1728_v31 = vadd.f32 %v1696_v54, %v1646_v26  ;;  %v5468_v18 = vpop.eup %5467  ;;  %v1140_v45 = vadd.f32 %v1108_v60, %v12194_v53  ;;  %v12196_v60 = vld [vmem:[#allocation59_spill] sm:$0xff] }
 0x10c   :  { %5491 = vtanh.f32 %v7371_v22  ;;  %v1141_v49 = vadd.f32 %v1109_v5, %v12195_v19  ;;  %v1190_v3 = vmul.f32 %v12183_v13, %v7341_v6  ;;  %v5470_v33 = vpop.eup %5469  ;;  %v807_v16 = vmul.f32 %v5468_v18, %v7304_v17 }
 0x10d   :  { %5493 = vtanh.f32 %v7373_v2  ;;  %v7398_v10 = vmul.f32 0.5, %v1727_v35  ;;  %v7400_v11 = vmul.f32 0.5, %v1728_v31  ;;  %v808_v36 = vmul.f32 %v5470_v33, %v7306_v62  ;;  %v12197_v35 = vld [vmem:[#allocation60_spill] sm:$0xff] }
 0x10e   :  { %5495 = vtanh.f32 %v7382_v56  ;;  %v1191_v26 = vmul.f32 %v12184_v44, %v7341_v6  ;;  %v1222_v55 = vadd.f32 %v1190_v3, %v1140_v45  ;;  %v5472_v34 = vpop.eup %5471  ;;  %v839_v54 = vadd.f32 %v807_v16, %v7304_v17  ;;  %v12198_v16 = vld [vmem:[#allocation136_spill] sm:$0xff] }
 0x10f   :  { %5497 = vtanh.f32 %v7389_v59  ;;  %v2118_v5 = vmul.f32 %v12196_v60, %v7194_v47  ;;  %v2119_v31 = vmul.f32 %v12197_v35, %v7194_v47  ;;  %v840_v53 = vadd.f32 %v808_v36, %v7306_v62 }
 0x110   :  { %v5474_v18 = vpop.eup %5473  ;;  %v1314_v19 = vmul.f32 %v5472_v34, %v7316_v29  ;;  %5499 = vtanh.f32 %v7366_v30  ;;  %v1223_v33 = vadd.f32 %v1191_v26, %v1141_v49  ;;  %v7417_v17 = vmul.f32 0.5, %v1222_v55 }
 0x111   :  { %v5476_v45 = vpop.eup %5475  ;;  %v1312_v3 = vmul.f32 %v5474_v18, %v7328_v42  ;;  %5501 = vtanh.f32 %v7368_v48  ;;  %v2150_v4 = vadd.f32 %v2118_v5, %v12198_v16  ;;  %v872_v38 = vadd.f32 %v840_v53, %v839_v54 }
 0x112   :  { %v5478_v63 = vpop.eup %5477  ;;  %v1313_v47 = vmul.f32 %v5476_v45, %v7330_v41  ;;  %v1346_v62 = vadd.f32 %v1314_v19, %v7316_v29  ;;  %5503 = vtanh.f32 %v7398_v10  ;;  %v7426_v34 = vmul.f32 0.5, %v1223_v33  ;;  %v12199_v29 = vld [vmem:[#allocation137_spill] sm:$0xff] }
 0x113   :  { %v5480_v36 = vpop.eup %5479  ;;  %v1344_v49 = vadd.f32 %v1312_v3, %v7328_v42  ;;  %v805_v26 = vmul.f32 %v5478_v63, %v7336_v12  ;;  %5505 = vtanh.f32 %v7400_v11  ;;  %873 = vadd.xlane.f32.xlu0 %v872_v38  ;;  %v2151_v18 = vadd.f32 %v2119_v31, %v12199_v29  ;;  %v12200_v63 = vld [vmem:[#allocation67_spill] sm:$0xff]  ;;  %v12201_v3 = vld [vmem:[#allocation68_spill] sm:$0xff] }
 0x114   :  { %v5482_v55 = vpop.eup %5481  ;;  %v1345_v5 = vadd.f32 %v1313_v47, %v7330_v41  ;;  %v806_v54 = vmul.f32 %v5480_v36, %v7338_v21  ;;  %5507 = vtanh.f32 %v7417_v17  ;;  %v2200_v33 = vmul.f32 %v12200_v63, %v7274_v25 }
 0x115   :  { %v5484_v53 = vpop.eup %5483  ;;  %v837_v19 = vadd.f32 %v805_v26, %v7336_v12  ;;  %v809_v42 = vmul.f32 %v5482_v55, %v7352_v50  ;;  %5509 = vtanh.f32 %v7426_v34  ;;  %v2201_v16 = vmul.f32 %v12201_v3, %v7274_v25 }
 0x116   :  { %v5486_v45 = vpop.eup %5485  ;;  %v1376_v38 = vadd.f32 %v1345_v5, %v1344_v49  ;;  %v838_v47 = vadd.f32 %v806_v54, %v7338_v21  ;;  %v810_v41 = vmul.f32 %v5484_v53, %v7354_v51  ;;  %v2232_v26 = vadd.f32 %v2200_v33, %v2150_v4 }
 0x117   :  { %v5488_v31 = vpop.eup %5487  ;;  %v841_v36 = vadd.f32 %v809_v42, %v7352_v50  ;;  %v1315_v12 = vmul.f32 %v5486_v45, %v7318_v7  ;;  %v2116_v55 = vmul.f32 %v12196_v60, %v7192_v8  ;;  %v2233_v5 = vadd.f32 %v2201_v16, %v2151_v18 }
 0x118   :  { %v5490_v29 = vpop.eup %5489  ;;  %1377 = vadd.xlane.f32.xlu0 %v1376_v38  ;;  %v869_v43 = vadd.f32 %v838_v47, %v837_v19  ;;  %v842_v49 = vadd.f32 %v810_v41, %v7354_v51  ;;  %v1819_v21 = vmul.f32 %v5488_v31, %v7345_v32  ;;  %v7449_v50 = vmul.f32 0.5, %v2232_v26 }
 0x119   :  { %v5492_v54 = vpop.eup %5491  ;;  %v1347_v53 = vadd.f32 %v1315_v12, %v7318_v7  ;;  %v1820_v25 = vmul.f32 %v5490_v29, %v7356_v23  ;;  %v2117_v4 = vmul.f32 %v12197_v35, %v7192_v8  ;;  %v7455_v45 = vmul.f32 0.5, %v2233_v5 }
 0x11a   :  { %v5494_v42 = vpop.eup %5493  ;;  %870 = vadd.xlane.f32.xlu1 %v869_v43  ;;  %v875_v33 = vadd.f32 %v842_v49, %v841_v36  ;;  %v1851_v19 = vadd.f32 %v1819_v21, %v7345_v32  ;;  %v1316_v51 = vmul.f32 %v5492_v54, %v7371_v22  ;;  %5511 = vtanh.f32 %v7449_v50  ;;  %v12202_v32 = vld [vmem:[#allocation138_spill] sm:$0xff] }
 0x11b   :  { %v5496_v18 = vpop.eup %5495  ;;  %v1379_v38 = vadd.f32 %v1347_v53, %v1346_v62  ;;  %v1852_v7 = vadd.f32 %v1820_v25, %v7356_v23  ;;  %v1317_v47 = vmul.f32 %v5494_v42, %v7373_v2  ;;  %5513 = vtanh.f32 %v7455_v45  ;;  %v12203_v23 = vld [vmem:[#allocation95_spill] sm:$0xff] }
 0x11c   :  { %v5498_v41 = vpop.eup %5497  ;;  %876 = vadd.xlane.f32.xlu0 %v875_v33  ;;  %v1348_v16 = vadd.f32 %v1316_v51, %v7371_v22  ;;  %v811_v43 = vmul.f32 %v5496_v18, %v7382_v56  ;;  %v2148_v31 = vadd.f32 %v2116_v55, %v12202_v32  ;;  %v2149_v26 = vadd.f32 %v2117_v4, %v12203_v23 }
 0x11d   :  { %v5500_v36 = vpop.eup %5499  ;;  %v1883_v12 = vadd.f32 %v1852_v7, %v1851_v19  ;;  %v1349_v62 = vadd.f32 %v1317_v47, %v7373_v2  ;;  %v812_v25 = vmul.f32 %v5498_v41, %v7389_v59  ;;  %v2198_v21 = vmul.f32 %v12200_v63, %v7300_v24 }
 0x11e   :  { %v5502_v29 = vpop.eup %5501  ;;  %1380 = vadd.xlane.f32.xlu1 %v1379_v38  ;;  %v843_v49 = vadd.f32 %v811_v43, %v7382_v56  ;;  %v1821_v22 = vmul.f32 %v5500_v36, %v7366_v30  ;;  %v2199_v55 = vmul.f32 %v12201_v3, %v7300_v24  ;;  %v1110_v4 = vmul.f32 %v12157_v46, %v7238_v37  ;;  %v7479_v38 = vpop.permute.xlu0 %364 }
 0x11f   :  { %v5504_v5 = vpop.eup %5503  ;;  %v1382_v54 = vadd.f32 %v1349_v62, %v1348_v16  ;;  %v844_v2 = vadd.f32 %v812_v25, %v7389_v59  ;;  %v1822_v53 = vmul.f32 %v5502_v29, %v7368_v48  ;;  %v2230_v19 = vadd.f32 %v2198_v21, %v2148_v31  ;;  %12204 = vst [vmem:[#allocation78_spill] sm:$0xff] %v7479_v38  ;;  %v12205_v62 = vld [vmem:[#allocation98_spill] sm:$0xff] }
 0x120   :  { %v5506_v42 = vpop.eup %5505  ;;  %1884 = vadd.xlane.f32.xlu0 %v1883_v12  ;;  %v1853_v56 = vadd.f32 %v1821_v22, %v7366_v30  ;;  %v1823_v33 = vmul.f32 %v5504_v5, %v7398_v10  ;;  %v2231_v51 = vadd.f32 %v2199_v55, %v2149_v26  ;;  %v1111_v41 = vmul.f32 %v12158_v9, %v7238_v37  ;;  %v12206_v26 = vld [vmem:[#allocation99_spill] sm:$0xff] }
 0x121   :  { %v5508_v18 = vpop.eup %5507  ;;  %v878_v7 = vadd.f32 %v844_v2, %v843_v49  ;;  %v1854_v47 = vadd.f32 %v1822_v53, %v7368_v48  ;;  %v1824_v59 = vmul.f32 %v5506_v42, %v7400_v11  ;;  %v7487_v32 = vmul.f32 0.5, %v2230_v19  ;;  %v12208_v19 = vld [vmem:[#allocation101_spill] sm:$0xff] }
 0x122   :  { %v5510_v16 = vpop.eup %5509  ;;  %1383 = vadd.xlane.f32.xlu1 %v1382_v54  ;;  %v1855_v43 = vadd.f32 %v1823_v33, %v7398_v10  ;;  %v1318_v30 = vmul.f32 %v5508_v18, %v7417_v17  ;;  %v7489_v31 = vmul.f32 0.5, %v2231_v51  ;;  %v1142_v25 = vadd.f32 %v1110_v4, %v12205_v62 }
 0x123   :  { %v1886_v36 = vadd.f32 %v1854_v47, %v1853_v56  ;;  %v1856_v12 = vadd.f32 %v1824_v59, %v7400_v11  ;;  %v1319_v48 = vmul.f32 %v5510_v16, %v7426_v34  ;;  %5515 = vtanh.f32 %v7487_v32  ;;  %v12207_v56 = vld [vmem:[#allocation100_spill] sm:$0xff] }
 0x124   :  { %879 = vadd.xlane.f32.xlu0 %v878_v7  ;;  %v1350_v23 = vadd.f32 %v1318_v30, %v7417_v17  ;;  %v1143_v10 = vadd.f32 %v1111_v41, %v12206_v26  ;;  %v1192_v29 = vmul.f32 %v12183_v13, %v7479_v38  ;;  %5517 = vtanh.f32 %v7489_v31 }
 0x125   :  { %v1889_v49 = vadd.f32 %v1856_v12, %v1855_v43  ;;  %v1351_v22 = vadd.f32 %v1319_v48, %v7426_v34  ;;  %v1193_v11 = vmul.f32 %v12184_v44, %v7479_v38  ;;  %v603_v17 = vmul.f32 %v12155_v20, %v7238_v37 }
 0x126   :  { %1887 = vadd.xlane.f32.xlu1 %v1886_v36  ;;  %v1224_v21 = vadd.f32 %v1192_v29, %v1142_v25  ;;  %v604_v55 = vmul.f32 %v12156_v39, %v7238_v37  ;;  %v685_v5 = vmul.f32 %v12181_v61, %v7479_v38  ;;  %v686_v34 = vmul.f32 %v12182_v1, %v7479_v38 }
 0x127   :  { %v1385_v54 = vadd.f32 %v1351_v22, %v1350_v23  ;;  %v1225_v2 = vadd.f32 %v1193_v11, %v1143_v10  ;;  %v2120_v53 = vmul.f32 %v12196_v60, %v7236_v14  ;;  %v5512_v4 = vpop.eup %5511  ;;  %v635_v33 = vadd.f32 %v603_v17, %v12207_v56  ;;  %v12214_v56 = vld [vmem:[#allocation129_spill] sm:$0xff] }
 0x128   :  { %1890 = vadd.xlane.f32.xlu0 %v1889_v49  ;;  %v7513_v42 = vmul.f32 0.5, %v1224_v21  ;;  %v636_v51 = vadd.f32 %v604_v55, %v12208_v19  ;;  %v2121_v18 = vmul.f32 %v12197_v35, %v7236_v14  ;;  %v5514_v7 = vpop.eup %5513  ;;  %v2328_v47 = vmul.f32 %v5512_v4, %v7449_v50  ;;  %v12209_v21 = vld [vmem:[#allocation102_spill] sm:$0xff]  ;;  %v12210_v55 = vld [vmem:[#allocation103_spill] sm:$0xff] }
 0x129   :  { %v7520_v59 = vmul.f32 0.5, %v1225_v2  ;;  %v2152_v41 = vadd.f32 %v2120_v53, %v7033_v28  ;;  %v2202_v16 = vmul.f32 %v12200_v63, %v7323_v27  ;;  %v2329_v43 = vmul.f32 %v5514_v7, %v7455_v45  ;;  %v12212_v2 = vld [vmem:[#allocation71_spill] sm:$0xff]  ;;  %v12213_v53 = vld [vmem:[#allocation72_spill] sm:$0xff] }
 0x12a   :  { %1386 = vadd.xlane.f32.xlu1 %v1385_v54  ;;  %5519 = vtanh.f32 %v7513_v42  ;;  %v717_v30 = vadd.f32 %v685_v5, %v635_v33  ;;  %v718_v36 = vadd.f32 %v686_v34, %v636_v51  ;;  %v2360_v12 = vadd.f32 %v2328_v47, %v7449_v50  ;;  %v12211_v54 = vld [vmem:[#allocation170_spill] sm:$0xff]  ;;  %v12216_v47 = vld [vmem:[#allocation111_spill] sm:$0xff] }
 0x12b   :  { %5521 = vtanh.f32 %v7520_v59  ;;  %v2153_v48 = vadd.f32 %v2121_v18, %v7036_v58  ;;  %v2203_v62 = vmul.f32 %v12201_v3, %v7323_v27  ;;  %v2361_v28 = vadd.f32 %v2329_v43, %v7455_v45  ;;  %v12215_v33 = vld [vmem:[#allocation110_spill] sm:$0xff] }
 0x12c   :  { %v7533_v25 = vmul.f32 0.5, %v717_v30  ;;  %v7535_v23 = vmul.f32 0.5, %v718_v36  ;;  %v2234_v26 = vadd.f32 %v2202_v16, %v2152_v41  ;;  %v1615_v29 = vmul.f32 %v12169_v57, %v7264_v52  ;;  %v12217_v30 = vld [vmem:[#allocation108_spill] sm:$0xff] }
 0x12d   :  { %v2235_v10 = vadd.f32 %v2203_v62, %v2153_v48  ;;  %v1616_v50 = vmul.f32 %v12170_v40, %v7264_v52  ;;  %v1697_v58 = vmul.f32 %v12187_v0, %v7341_v6  ;;  %v2393_v49 = vadd.f32 %v2361_v28, %v2360_v12  ;;  %v12218_v12 = vld [vmem:[#allocation109_spill] sm:$0xff] }
 0x12e   :  { %5523 = vtanh.f32 %v7533_v25  ;;  %v7544_v22 = vmul.f32 0.5, %v2234_v26  ;;  %v1698_v45 = vmul.f32 %v12188_v15, %v7341_v6  ;;  %v1647_v17 = vadd.f32 %v1615_v29, %v12209_v21  ;;  %v12220_v21 = vld [vmem:[#allocation141_spill] sm:$0xff] }
 0x12f   :  { %5525 = vtanh.f32 %v7535_v23  ;;  %v7549_v11 = vmul.f32 0.5, %v2235_v10  ;;  %v1648_v5 = vadd.f32 %v1616_v50, %v12210_v55  ;;  %2394 = vadd.xlane.f32.xlu0 %v2393_v49  ;;  %v2625_v34 = vmul.f32 %v12212_v2, %v12211_v54  ;;  %v7575_v50 = vpop.permute.xlu1 %304  ;;  %v7579_v55 = vpop.permute.xlu0 %368 }
 0x130   :  { %5527 = vtanh.f32 %v7544_v22  ;;  %v2626_v4 = vmul.f32 %v12213_v53, %v12211_v54  ;;  %v2707_v19 = vmul.f32 %v12215_v33, %v12214_v56  ;;  %v5516_v51 = vpop.eup %5515  ;;  %v1729_v18 = vadd.f32 %v1697_v58, %v1647_v17  ;;  %12219 = vst [vmem:[#allocation75_spill] sm:$0xff] %v7575_v50  ;;  %12221 = vst [vmem:[#allocation76_spill] sm:$0xff] %v7579_v55 }
 0x131   :  { %5529 = vtanh.f32 %v7549_v11  ;;  %v1730_v7 = vadd.f32 %v1698_v45, %v1648_v5  ;;  %v2708_v41 = vmul.f32 %v12216_v47, %v12214_v56  ;;  %v5518_v16 = vpop.eup %5517  ;;  %v2326_v43 = vmul.f32 %v5516_v51, %v7487_v32 }
 0x132   :  { %v2657_v36 = vadd.f32 %v2625_v34, %v12217_v30  ;;  %v2658_v48 = vadd.f32 %v2626_v4, %v12218_v12  ;;  %v2623_v62 = vmul.f32 %v12212_v2, %v7192_v8  ;;  %v2327_v28 = vmul.f32 %v5518_v16, %v7489_v31  ;;  %v12222_v34 = vld [vmem:[#allocation142_spill] sm:$0xff] }
 0x133   :  { %v7569_v26 = vmul.f32 0.5, %v1729_v18  ;;  %v7571_v10 = vmul.f32 0.5, %v1730_v7  ;;  %v2624_v29 = vmul.f32 %v12213_v53, %v7192_v8  ;;  %v2358_v58 = vadd.f32 %v2326_v43, %v7487_v32 }
 0x134   :  { %v2739_v49 = vadd.f32 %v2707_v19, %v2657_v36  ;;  %v2740_v45 = vadd.f32 %v2708_v41, %v2658_v48  ;;  %v2655_v17 = vadd.f32 %v2623_v62, %v12220_v21  ;;  %v2359_v5 = vadd.f32 %v2327_v28, %v7489_v31  ;;  %v12224_v21 = vld [vmem:[#allocation144_spill] sm:$0xff] }
 0x135   :  { %5531 = vtanh.f32 %v7569_v26  ;;  %v2656_v4 = vadd.f32 %v2624_v29, %v12222_v34  ;;  %v2705_v51 = vmul.f32 %v12215_v33, %v7300_v24  ;;  %v2706_v19 = vmul.f32 %v12216_v47, %v7300_v24  ;;  %v12223_v29 = vld [vmem:[#allocation143_spill] sm:$0xff] }
 0x136   :  { %5533 = vtanh.f32 %v7571_v10  ;;  %v7587_v18 = vmul.f32 0.5, %v2739_v49  ;;  %v7589_v32 = vmul.f32 0.5, %v2740_v45  ;;  %v2390_v41 = vadd.f32 %v2359_v5, %v2358_v58 }
 0x137   :  { %v5520_v7 = vpop.eup %5519  ;;  %v2737_v16 = vadd.f32 %v2705_v51, %v2655_v17  ;;  %v1112_v31 = vmul.f32 %v12157_v46, %v7575_v50  ;;  %v1113_v43 = vmul.f32 %v12158_v9, %v7575_v50  ;;  %v2738_v12 = vadd.f32 %v2706_v19, %v2656_v4 }
 0x138   :  { %v5522_v30 = vpop.eup %5521  ;;  %v1320_v36 = vmul.f32 %v5520_v7, %v7513_v42  ;;  %5535 = vtanh.f32 %v7587_v18  ;;  %v1194_v48 = vmul.f32 %v12183_v13, %v7579_v55  ;;  %2391 = vadd.xlane.f32.xlu1 %v2390_v41  ;;  %v1195_v5 = vmul.f32 %v12184_v44, %v7579_v55 }
 0x139   :  { %v1321_v62 = vmul.f32 %v5522_v30, %v7520_v59  ;;  %5537 = vtanh.f32 %v7589_v32  ;;  %v7603_v28 = vmul.f32 0.5, %v2737_v16  ;;  %v1144_v58 = vadd.f32 %v1112_v31, %v12223_v29 }
 0x13a   :  { %v1352_v49 = vadd.f32 %v1320_v36, %v7513_v42  ;;  %v7607_v45 = vmul.f32 0.5, %v2738_v12  ;;  %v1145_v17 = vadd.f32 %v1113_v43, %v12224_v21  ;;  %v605_v19 = vmul.f32 %v12155_v20, %v7575_v50  ;;  %v12225_v36 = vld [vmem:[#allocation145_spill] sm:$0xff]  ;;  %v12226_v21 = vld [vmem:[#allocation146_spill] sm:$0xff] }
 0x13b   :  { %v5524_v34 = vpop.eup %5523  ;;  %v1353_v4 = vadd.f32 %v1321_v62, %v7520_v59  ;;  %5539 = vtanh.f32 %v7603_v28  ;;  %v1226_v51 = vadd.f32 %v1194_v48, %v1144_v58  ;;  %v606_v16 = vmul.f32 %v12156_v39, %v7575_v50 }
 0x13c   :  { %v5526_v7 = vpop.eup %5525  ;;  %v813_v41 = vmul.f32 %v5524_v34, %v7533_v25  ;;  %5541 = vtanh.f32 %v7607_v45  ;;  %v1227_v42 = vadd.f32 %v1195_v5, %v1145_v17  ;;  %v637_v12 = vadd.f32 %v605_v19, %v12225_v36 }
 0x13d   :  { %v5528_v31 = vpop.eup %5527  ;;  %v1388_v43 = vadd.f32 %v1353_v4, %v1352_v49  ;;  %v814_v30 = vmul.f32 %v5526_v7, %v7535_v23  ;;  %v7621_v59 = vmul.f32 0.5, %v1226_v51  ;;  %v638_v17 = vadd.f32 %v606_v16, %v12226_v21 }
 0x13e   :  { %v5530_v48 = vpop.eup %5529  ;;  %v845_v62 = vadd.f32 %v813_v41, %v7533_v25  ;;  %v2330_v29 = vmul.f32 %v5528_v31, %v7544_v22  ;;  %v7626_v58 = vmul.f32 0.5, %v1227_v42  ;;  %v687_v34 = vmul.f32 %v12181_v61, %v7579_v55  ;;  %v12227_v31 = vld [vmem:[#allocation149_spill] sm:$0xff] }
 0x13f   :  { %1389 = vadd.xlane.f32.xlu0 %v1388_v43  ;;  %v846_v5 = vadd.f32 %v814_v30, %v7535_v23  ;;  %v2331_v49 = vmul.f32 %v5530_v48, %v7549_v11  ;;  %5543 = vtanh.f32 %v7621_v59  ;;  %v688_v25 = vmul.f32 %v12182_v1, %v7579_v55 }
 0x140   :  { %v2362_v4 = vadd.f32 %v2330_v29, %v7544_v22  ;;  %5545 = vtanh.f32 %v7626_v58  ;;  %v2122_v51 = vmul.f32 %v12196_v60, %v7264_v52  ;;  %v719_v7 = vadd.f32 %v687_v34, %v637_v12  ;;  %v12228_v12 = vld [vmem:[#allocation114_spill] sm:$0xff] }
 0x141   :  { %v881_v19 = vadd.f32 %v846_v5, %v845_v62  ;;  %v2363_v23 = vadd.f32 %v2331_v49, %v7549_v11  ;;  %v2123_v41 = vmul.f32 %v12197_v35, %v7264_v52  ;;  %v720_v16 = vadd.f32 %v688_v25, %v638_v17 }
 0x142   :  { %v5532_v42 = vpop.eup %5531  ;;  %v2154_v43 = vadd.f32 %v2122_v51, %v12227_v31  ;;  %v2204_v22 = vmul.f32 %v12200_v63, %v7341_v6  ;;  %v2205_v30 = vmul.f32 %v12201_v3, %v7341_v6  ;;  %v7649_v11 = vmul.f32 0.5, %v719_v7 }
 0x143   :  { %v5534_v36 = vpop.eup %5533  ;;  %882 = vadd.xlane.f32.xlu1 %v881_v19  ;;  %v2396_v48 = vadd.f32 %v2363_v23, %v2362_v4  ;;  %v1825_v62 = vmul.f32 %v5532_v42, %v7569_v26  ;;  %v2155_v29 = vadd.f32 %v2123_v41, %v12228_v12  ;;  %v7653_v17 = vmul.f32 0.5, %v720_v16 }
 0x144   :  { %v1826_v21 = vmul.f32 %v5534_v36, %v7571_v10  ;;  %v2236_v5 = vadd.f32 %v2204_v22, %v2154_v43  ;;  %v1617_v49 = vmul.f32 %v12169_v57, %v7238_v37  ;;  %5547 = vtanh.f32 %v7649_v11  ;;  %v12230_v43 = vld [vmem:[#allocation151_spill] sm:$0xff] }
 0x145   :  { %v5536_v34 = vpop.eup %5535  ;;  %2397 = vadd.xlane.f32.xlu0 %v2396_v48  ;;  %v1857_v25 = vadd.f32 %v1825_v62, %v7569_v26  ;;  %v2237_v4 = vadd.f32 %v2205_v30, %v2155_v29  ;;  %v1618_v51 = vmul.f32 %v12170_v40, %v7238_v37  ;;  %5549 = vtanh.f32 %v7653_v17  ;;  %v12229_v26 = vld [vmem:[#allocation150_spill] sm:$0xff] }
 0x146   :  { %v5538_v19 = vpop.eup %5537  ;;  %v1858_v23 = vadd.f32 %v1826_v21, %v7571_v10  ;;  %v2835_v7 = vmul.f32 %v5536_v34, %v7587_v18  ;;  %v7664_v41 = vmul.f32 0.5, %v2236_v5  ;;  %v1649_v31 = vadd.f32 %v1617_v49, %v12229_v26 }
 0x147   :  { %v2836_v42 = vmul.f32 %v5538_v19, %v7589_v32  ;;  %v7667_v16 = vmul.f32 0.5, %v2237_v4  ;;  %v1650_v22 = vadd.f32 %v1618_v51, %v12230_v43  ;;  %v1699_v10 = vmul.f32 %v12187_v0, %v7479_v38 }
 0x148   :  { %v5540_v30 = vpop.eup %5539  ;;  %v1892_v36 = vadd.f32 %v1858_v23, %v1857_v25  ;;  %v2867_v48 = vadd.f32 %v2835_v7, %v7587_v18  ;;  %5551 = vtanh.f32 %v7664_v41  ;;  %v1700_v21 = vmul.f32 %v12188_v15, %v7479_v38  ;;  %v12231_v18 = vld [vmem:[#allocation117_spill] sm:$0xff]  ;;  %v12232_v25 = vld [vmem:[#allocation118_spill] sm:$0xff] }
 0x149   :  { %v5542_v62 = vpop.eup %5541  ;;  %v2868_v12 = vadd.f32 %v2836_v42, %v7589_v32  ;;  %v2833_v29 = vmul.f32 %v5540_v30, %v7603_v28  ;;  %5553 = vtanh.f32 %v7667_v16  ;;  %v1731_v49 = vadd.f32 %v1699_v10, %v1649_v31  ;;  %v12233_v23 = vld [vmem:[#allocation153_spill] sm:$0xff]  ;;  %v12234_v30 = vld [vmem:[#allocation40_spill] sm:$0xff] }
 0x14a   :  { %1893 = vadd.xlane.f32.xlu1 %v1892_v36  ;;  %v2834_v5 = vmul.f32 %v5542_v62, %v7607_v45  ;;  %v3130_v34 = vmul.f32 %v12231_v18, %v7192_v8  ;;  %v3131_v4 = vmul.f32 %v12232_v25, %v7192_v8  ;;  %v1732_v19 = vadd.f32 %v1700_v21, %v1650_v22  ;;  %v12235_v36 = vld [vmem:[#allocation152_spill] sm:$0xff] }
 0x14b   :  { %v2900_v51 = vadd.f32 %v2868_v12, %v2867_v48  ;;  %v2865_v32 = vadd.f32 %v2833_v29, %v7603_v28  ;;  %v3212_v7 = vmul.f32 %v12233_v23, %v7300_v24  ;;  %v7689_v43 = vmul.f32 0.5, %v1731_v49  ;;  %v12236_v28 = vld [vmem:[#allocation154_spill] sm:$0xff]  ;;  %v7700_v29 = vpop.permute.xlu1 %308 }
 0x14c   :  { %v5544_v42 = vpop.eup %5543  ;;  %v2866_v26 = vadd.f32 %v2834_v5, %v7607_v45  ;;  %v3162_v31 = vadd.f32 %v3130_v34, %v12234_v30  ;;  %v3163_v10 = vadd.f32 %v3131_v4, %v12235_v36  ;;  %v7694_v48 = vmul.f32 0.5, %v1732_v19  ;;  %12237 = vst [vmem:[#allocation81_spill] sm:$0xff] %v7700_v29  ;;  %v7714_v30 = vpop.permute.xlu0 %372 }
 0x14d   :  { %v5546_v62 = vpop.eup %5545  ;;  %2901 = vadd.xlane.f32.xlu0 %v2900_v51  ;;  %v1322_v8 = vmul.f32 %v5544_v42, %v7621_v59  ;;  %v3213_v22 = vmul.f32 %v12236_v28, %v7300_v24  ;;  %v2627_v12 = vmul.f32 %v12212_v2, %v7236_v14  ;;  %5555 = vtanh.f32 %v7689_v43  ;;  %v12238_v42 = vld [vmem:[#allocation157_spill] sm:$0xff]  ;;  %12239 = vst [vmem:[#allocation82_spill] sm:$0xff] %v7714_v30 }
 0x14e   :  { %v2897_v45 = vadd.f32 %v2866_v26, %v2865_v32  ;;  %v1323_v21 = vmul.f32 %v5546_v62, %v7626_v58  ;;  %v3244_v5 = vadd.f32 %v3212_v7, %v3162_v31  ;;  %5557 = vtanh.f32 %v7694_v48 }
 0x14f   :  { %v1354_v49 = vadd.f32 %v1322_v8, %v7621_v59  ;;  %v3245_v34 = vadd.f32 %v3213_v22, %v3163_v10  ;;  %v2628_v4 = vmul.f32 %v12213_v53, %v7236_v14  ;;  %v2659_v32 = vadd.f32 %v2627_v12, %v12238_v42  ;;  %v12240_v8 = vld [vmem:[#allocation158_spill] sm:$0xff] }
 0x150   :  { %2898 = vadd.xlane.f32.xlu1 %v2897_v45  ;;  %v1355_v51 = vadd.f32 %v1323_v21, %v7626_v58  ;;  %v7709_v19 = vmul.f32 0.5, %v3244_v5  ;;  %v2709_v26 = vmul.f32 %v12215_v33, %v7323_v27  ;;  %v2710_v31 = vmul.f32 %v12216_v47, %v7323_v27  ;;  %v12241_v5 = vld [vmem:[#allocation159_spill] sm:$0xff] }
 0x151   :  { %v7716_v7 = vmul.f32 0.5, %v3245_v34  ;;  %v2660_v59 = vadd.f32 %v2628_v4, %v12240_v8  ;;  %v607_v36 = vmul.f32 %v12155_v20, %v7700_v29  ;;  %v5548_v58 = vpop.eup %5547  ;;  %v608_v22 = vmul.f32 %v12156_v39, %v7700_v29 }
 0x152   :  { %v1391_v10 = vadd.f32 %v1355_v51, %v1354_v49  ;;  %5559 = vtanh.f32 %v7709_v19  ;;  %v2741_v62 = vadd.f32 %v2709_v26, %v2659_v32  ;;  %v5550_v12 = vpop.eup %5549  ;;  %v815_v45 = vmul.f32 %v5548_v58, %v7649_v11  ;;  %v12242_v49 = vld [vmem:[#allocation160_spill] sm:$0xff] }
 0x153   :  { %5561 = vtanh.f32 %v7716_v7  ;;  %v2742_v21 = vadd.f32 %v2710_v31, %v2660_v59  ;;  %v639_v34 = vadd.f32 %v607_v36, %v12241_v5  ;;  %v816_v4 = vmul.f32 %v5550_v12, %v7653_v17 }
 0x154   :  { %1392 = vadd.xlane.f32.xlu0 %v1391_v10  ;;  %v7730_v42 = vmul.f32 0.5, %v2741_v62  ;;  %v640_v51 = vadd.f32 %v608_v22, %v12242_v49  ;;  %v689_v32 = vmul.f32 %v12181_v61, %v7714_v30  ;;  %v847_v8 = vadd.f32 %v815_v45, %v7649_v11  ;;  %v12243_v49 = vld [vmem:[#allocation161_spill] sm:$0xff] }
 0x155   :  { %v5552_v26 = vpop.eup %5551  ;;  %v7736_v39 = vmul.f32 0.5, %v2742_v21  ;;  %v690_v59 = vmul.f32 %v12182_v1, %v7714_v30  ;;  %v3132_v31 = vmul.f32 %v12231_v18, %v12211_v54  ;;  %v848_v58 = vadd.f32 %v816_v4, %v7653_v17 }
 0x156   :  { %v5554_v36 = vpop.eup %5553  ;;  %v2332_v10 = vmul.f32 %v5552_v26, %v7664_v41  ;;  %5563 = vtanh.f32 %v7730_v42  ;;  %v721_v62 = vadd.f32 %v689_v32, %v639_v34  ;;  %v3133_v12 = vmul.f32 %v12232_v25, %v12211_v54  ;;  %v12244_v34 = vld [vmem:[#allocation162_spill] sm:$0xff] }
 0x157   :  { %v2333_v22 = vmul.f32 %v5554_v36, %v7667_v16  ;;  %5565 = vtanh.f32 %v7736_v39  ;;  %v722_v11 = vadd.f32 %v690_v59, %v640_v51  ;;  %v884_v45 = vadd.f32 %v848_v58, %v847_v8 }
 0x158   :  { %v2364_v21 = vadd.f32 %v2332_v10, %v7664_v41  ;;  %v7750_v5 = vmul.f32 0.5, %v721_v62  ;;  %v3164_v17 = vadd.f32 %v3132_v31, %v12243_v49  ;;  %v3165_v32 = vadd.f32 %v3133_v12, %v12244_v34 }
 0x159   :  { %v2365_v4 = vadd.f32 %v2333_v22, %v7667_v16  ;;  %v7754_v26 = vmul.f32 0.5, %v722_v11  ;;  %v3214_v36 = vmul.f32 %v12233_v23, %v12214_v56  ;;  %885 = vadd.xlane.f32.xlu1 %v884_v45  ;;  %v3215_v51 = vmul.f32 %v12236_v28, %v12214_v56  ;;  %v12245_v11 = vld [vmem:[#allocation163_spill] sm:$0xff]  ;;  %v12246_v45 = vld [vmem:[#allocation164_spill] sm:$0xff] }
 0x15a   :  { %5567 = vtanh.f32 %v7750_v5  ;;  %v1619_v41 = vmul.f32 %v12169_v57, %v7575_v50  ;;  %v1620_v8 = vmul.f32 %v12170_v40, %v7575_v50  ;;  %v5556_v16 = vpop.eup %5555  ;;  %v1701_v58 = vmul.f32 %v12187_v0, %v7579_v55 }
 0x15b   :  { %v2399_v59 = vadd.f32 %v2365_v4, %v2364_v21  ;;  %5569 = vtanh.f32 %v7754_v26  ;;  %v3246_v31 = vadd.f32 %v3214_v36, %v3164_v17  ;;  %v5558_v10 = vpop.eup %5557  ;;  %v1827_v62 = vmul.f32 %v5556_v16, %v7689_v43 }
 0x15c   :  { %v3247_v22 = vadd.f32 %v3215_v51, %v3165_v32  ;;  %v1651_v12 = vadd.f32 %v1619_v41, %v12245_v11  ;;  %v1652_v49 = vadd.f32 %v1620_v8, %v12246_v45  ;;  %v1828_v34 = vmul.f32 %v5558_v10, %v7694_v48 }
 0x15d   :  { %2400 = vadd.xlane.f32.xlu0 %v2399_v59  ;;  %v7773_v50 = vmul.f32 0.5, %v3246_v31  ;;  %v1702_v21 = vmul.f32 %v12188_v15, %v7579_v55  ;;  %v1114_v17 = vmul.f32 %v12157_v46, %v7700_v29  ;;  %v1859_v4 = vadd.f32 %v1827_v62, %v7689_v43  ;;  %v12247_v59 = vld [vmem:[#allocation167_spill] sm:$0xff]  ;;  %v12248_v62 = vld [vmem:[#allocation168_spill] sm:$0xff] }
 0x15e   :  { %v7780_v36 = vmul.f32 0.5, %v3247_v22  ;;  %v1733_v32 = vadd.f32 %v1701_v58, %v1651_v12  ;;  %v1115_v51 = vmul.f32 %v12158_v9, %v7700_v29  ;;  %v1860_v8 = vadd.f32 %v1828_v34, %v7694_v48 }
 0x15f   :  { %v5560_v41 = vpop.eup %5559  ;;  %5571 = vtanh.f32 %v7773_v50  ;;  %v1734_v16 = vadd.f32 %v1702_v21, %v1652_v49  ;;  %v1146_v31 = vadd.f32 %v1114_v17, %v12247_v59  ;;  %v1196_v48 = vmul.f32 %v12183_v13, %v7714_v30 }
 0x160   :  { %v5562_v10 = vpop.eup %5561  ;;  %v3340_v11 = vmul.f32 %v5560_v41, %v7709_v19  ;;  %5573 = vtanh.f32 %v7780_v36  ;;  %v7789_v43 = vmul.f32 0.5, %v1733_v32  ;;  %v1147_v58 = vadd.f32 %v1115_v51, %v12248_v62 }
 0x161   :  { %v1895_v22 = vadd.f32 %v1860_v8, %v1859_v4  ;;  %v3341_v12 = vmul.f32 %v5562_v10, %v7716_v7  ;;  %v7793_v45 = vmul.f32 0.5, %v1734_v16  ;;  %v1197_v34 = vmul.f32 %v12184_v44, %v7714_v30  ;;  %v12249_v16 = vld [vmem:[#allocation121_spill] sm:$0xff] }
 0x162   :  { %v3372_v49 = vadd.f32 %v3340_v11, %v7709_v19  ;;  %5575 = vtanh.f32 %v7789_v43  ;;  %v2629_v21 = vmul.f32 %v12212_v2, %v7264_v52  ;;  %v1228_v32 = vadd.f32 %v1196_v48, %v1146_v31 }
 0x163   :  { %v5564_v17 = vpop.eup %5563  ;;  %1896 = vadd.xlane.f32.xlu1 %v1895_v22  ;;  %v3373_v4 = vadd.f32 %v3341_v12, %v7716_v7  ;;  %5577 = vtanh.f32 %v7793_v45  ;;  %v2630_v51 = vmul.f32 %v12213_v53, %v7264_v52  ;;  %v1229_v8 = vadd.f32 %v1197_v34, %v1147_v58  ;;  %v12250_v7 = vld [vmem:[#allocation122_spill] sm:$0xff] }
 0x164   :  { %v5566_v41 = vpop.eup %5565  ;;  %v2837_v19 = vmul.f32 %v5564_v17, %v7730_v42  ;;  %v2661_v59 = vadd.f32 %v2629_v21, %v12249_v16  ;;  %v2711_v10 = vmul.f32 %v12215_v33, %v7341_v6  ;;  %v7812_v22 = vmul.f32 0.5, %v1228_v32  ;;  %v12254_v16 = vld [vmem:[#allocation172_spill] sm:$0xff] }
 0x165   :  { %v3404_v11 = vadd.f32 %v3373_v4, %v3372_v49  ;;  %v2838_v62 = vmul.f32 %v5566_v41, %v7736_v39  ;;  %v2662_v12 = vadd.f32 %v2630_v51, %v12250_v7  ;;  %v7816_v48 = vmul.f32 0.5, %v1229_v8  ;;  %v12251_v49 = vld [vmem:[#allocation165_spill] sm:$0xff]  ;;  %v12252_v4 = vld [vmem:[#allocation171_spill] sm:$0xff]  ;;  %v12253_v41 = vld [vmem:[#allocation166_spill] sm:$0xff] }
 0x166   :  { %v2869_v31 = vadd.f32 %v2837_v19, %v7730_v42  ;;  %v2712_v17 = vmul.f32 %v12216_v47, %v7341_v6  ;;  %v2743_v58 = vadd.f32 %v2711_v10, %v2661_v59  ;;  %5579 = vtanh.f32 %v7812_v22  ;;  %v12259_v6 = vld [vmem:[#allocation4_spill] sm:$0xff] }
 0x167   :  { %v5568_v34 = vpop.eup %5567  ;;  %3405 = vadd.xlane.f32.xlu0 %v3404_v11  ;;  %v2870_v21 = vadd.f32 %v2838_v62, %v7736_v39  ;;  %v2074_v32 = vadd.f32 %v12252_v4, %v12251_v49  ;;  %v2075_v51 = vadd.f32 %v12254_v16, %v12253_v41  ;;  %5581 = vtanh.f32 %v7816_v48  ;;  %v12255_v4 = vld [vmem:[#allocation66_spill] sm:$0xff]  ;;  %v12257_v16 = vld [vmem:[#allocation173_spill] sm:$0xff] }
 0x168   :  { %v5570_v7 = vpop.eup %5569  ;;  %v817_v42 = vmul.f32 %v5568_v34, %v7750_v5  ;;  %v2744_v19 = vadd.f32 %v2712_v17, %v2662_v12  ;;  %v7828_v8 = vmul.f32 0.5, %v2743_v58  ;;  %v2124_v39 = vmul.f32 %v12196_v60, %v7238_v37 }
 0x169   :  { %v2903_v59 = vadd.f32 %v2870_v21, %v2869_v31  ;;  %v818_v10 = vmul.f32 %v5570_v7, %v7754_v26  ;;  %v2125_v11 = vmul.f32 %v12197_v35, %v7238_v37  ;;  %v2206_v12 = vmul.f32 %v12200_v63, %v7479_v38  ;;  %v12260_v63 = vld [vmem:[#allocation13_spill] sm:$0xff] }
 0x16a   :  { %v849_v62 = vadd.f32 %v817_v42, %v7750_v5  ;;  %v7836_v49 = vmul.f32 0.5, %v2744_v19  ;;  %5583 = vtanh.f32 %v7828_v8  ;;  %v2156_v17 = vadd.f32 %v2124_v39, %v2074_v32  ;;  %v12256_v5 = vld [vmem:[#allocation123_spill] sm:$0xff]  ;;  %v5979_v42 = vld [vmem:[%s11400_s0 + $0x30] sm:$0xff]  ;;  %v12258_v19 = vld [vmem:[#allocation12_spill] sm:$0xff] }
 0x16b   :  { %2904 = vadd.xlane.f32.xlu1 %v2903_v59  ;;  %v850_v31 = vadd.f32 %v818_v10, %v7754_v26  ;;  %v2157_v58 = vadd.f32 %v2125_v11, %v2075_v51  ;;  %v2207_v34 = vmul.f32 %v12201_v3, %v7479_v38  ;;  %v3473_v41 = vmul.f32 %v12256_v5, %v12255_v4 }
 0x16c   :  { %v5572_v21 = vpop.eup %5571  ;;  %5585 = vtanh.f32 %v7836_v49  ;;  %v3474_v7 = vmul.f32 %v12257_v16, %v12255_v4  ;;  %v3540_v26 = vrot.slane %v5979_v42, %v12258_v19  ;;  %v2238_v10 = vadd.f32 %v2206_v12, %v2156_v17 }
 0x16d   :  { %v5574_v32 = vpop.eup %5573  ;;  %v887_v51 = vadd.f32 %v850_v31, %v849_v62  ;;  %v3342_v59 = vmul.f32 %v5572_v21, %v7773_v50  ;;  %v2239_v39 = vadd.f32 %v2207_v34, %v2157_v58  ;;  %v3505_v52 = vadd.f32 %v3473_v41, %v12259_v6  ;;  %v12263_v34 = vld [vmem:[#allocation20_spill] sm:$0xff] }
 0x16e   :  { %v3343_v11 = vmul.f32 %v5574_v32, %v7780_v36  ;;  %v3506_v3 = vadd.f32 %v3474_v7, %v12259_v6  ;;  %v3544_v4 = vrot.slane %v5979_v42, %v12260_v63  ;;  %v7859_v60 = vmul.f32 0.5, %v2238_v10  ;;  %v12265_v32 = vld [vmem:[#allocation21_spill] sm:$0xff]  ;;  %v12270_v6 = vld [vmem:[#allocation74_spill] sm:$0xff] }
 0x16f   :  { %v5576_v55 = vpop.eup %5575  ;;  %888 = vadd.xlane.f32.xlu0 %v887_v51  ;;  %v3374_v35 = vadd.f32 %v3342_v59, %v7773_v50  ;;  %v7861_v47 = vmul.f32 0.5, %v2239_v39  ;;  %v7864_v62 = vrot.slane %v3540_v26, %v12258_v19  ;;  %v3622_v21 = vrot.slane %v5979_v42, %v12263_v34  ;;  %v12264_v50 = vld [vmem:[#allocation120_spill] sm:$0xff] }
 0x170   :  { %v5578_v12 = vpop.eup %5577  ;;  %v3375_v31 = vadd.f32 %v3343_v11, %v7780_v36  ;;  %v1829_v17 = vmul.f32 %v5576_v55, %v7789_v43  ;;  %v7869_v58 = vrot.slane %v3544_v4, %v12258_v19  ;;  %5587 = vtanh.f32 %v7859_v60 }
 0x171   :  { %12261 = vst [vmem:[#allocation83_spill] sm:$0xff] %v7864_v62  ;;  %v1830_v41 = vmul.f32 %v5578_v12, %v7793_v45  ;;  %v3555_v7 = vmul.f32 %v7864_v62, %v12264_v50  ;;  %v3626_v26 = vrot.slane %v5979_v42, %v12265_v32  ;;  %5589 = vtanh.f32 %v7861_v47  ;;  %v12271_v32 = vld [vmem:[#allocation57_spill] sm:$0xff] }
 0x172   :  { %12262 = vst [vmem:[#allocation84_spill] sm:$0xff] %v7869_v58  ;;  %v3407_v51 = vadd.f32 %v3375_v31, %v3374_v35  ;;  %v1861_v59 = vadd.f32 %v1829_v17, %v7789_v43  ;;  %v3556_v55 = vmul.f32 %v7869_v58, %v12264_v50  ;;  %v7883_v10 = vrot.slane %v3622_v21, %v12263_v34  ;;  %v12268_v35 = vld [vmem:[#allocation28_spill] sm:$0xff]  ;;  %v12269_v43 = vld [vmem:[#allocation29_spill] sm:$0xff] }
 0x173   :  { %v1862_v36 = vadd.f32 %v1830_v41, %v7793_v45  ;;  %v3587_v4 = vadd.f32 %v3555_v7, %v3505_v52  ;;  %v7886_v39 = vrot.slane %v3626_v26, %v12263_v34  ;;  %v5580_v11 = vpop.eup %5579  ;;  %v3704_v31 = vrot.slane %v5979_v42, %v12268_v35  ;;  %v12272_v45 = vld [vmem:[#allocation169_spill] sm:$0xff]  ;;  %v12275_v26 = vld [vmem:[#allocation58_spill] sm:$0xff] }
 0x174   :  { %12266 = vst [vmem:[#allocation87_spill] sm:$0xff] %v7883_v10  ;;  %3408 = vadd.xlane.f32.xlu1 %v3407_v51  ;;  %v3588_v12 = vadd.f32 %v3556_v55, %v3506_v3  ;;  %v3708_v17 = vrot.slane %v5979_v42, %v12269_v43  ;;  %v2970_v63 = vmul.f32 %v12271_v32, %v12270_v6  ;;  %v5582_v50 = vpop.eup %5581  ;;  %v12276_v43 = vld [vmem:[#allocation3_spill] sm:$0xff]  ;;  %v12278_v32 = vld [vmem:[#allocation69_spill] sm:$0xff] }
 0x175   :  { %12267 = vst [vmem:[#allocation88_spill] sm:$0xff] %v7886_v39  ;;  %v1898_v19 = vadd.f32 %v1862_v36, %v1861_v59  ;;  %v1324_v52 = vmul.f32 %v5580_v11, %v7812_v22  ;;  %v3637_v21 = vmul.f32 %v7883_v10, %v12272_v45  ;;  %v3638_v41 = vmul.f32 %v7886_v39, %v12272_v45 }
 0x176   :  { %v1325_v7 = vmul.f32 %v5582_v50, %v7816_v48  ;;  %v7899_v3 = vrot.slane %v3704_v31, %v12268_v35  ;;  %v7902_v42 = vrot.slane %v3708_v17, %v12268_v35  ;;  %v2971_v51 = vmul.f32 %v12275_v26, %v12270_v6 }
 0x177   :  { %v5584_v59 = vpop.eup %5583  ;;  %1899 = vadd.xlane.f32.xlu0 %v1898_v19  ;;  %v1356_v55 = vadd.f32 %v1324_v52, %v7812_v22  ;;  %v3669_v36 = vadd.f32 %v3637_v21, %v3587_v4  ;;  %v3670_v11 = vadd.f32 %v3638_v41, %v3588_v12  ;;  %v3002_v34 = vadd.f32 %v2970_v63, %v12276_v43  ;;  %v12277_v19 = vld [vmem:[#allocation126_spill] sm:$0xff] }
 0x178   :  { %12273 = vst [vmem:[#allocation85_spill] sm:$0xff] %v7899_v3  ;;  %12274 = vst [vmem:[#allocation86_spill] sm:$0xff] %v7902_v42  ;;  %v1357_v45 = vadd.f32 %v1325_v7, %v7816_v48  ;;  %v2839_v50 = vmul.f32 %v5584_v59, %v7828_v8  ;;  %v3719_v31 = vmul.f32 %v7899_v3, %v7300_v24  ;;  %v12279_v4 = vld [vmem:[#allocation70_spill] sm:$0xff] }
 0x179   :  { %v3720_v17 = vmul.f32 %v7902_v42, %v7300_v24  ;;  %v5586_v35 = vpop.eup %5585  ;;  %v3003_v26 = vadd.f32 %v2971_v51, %v12276_v43  ;;  %v3052_v22 = vmul.f32 %v12278_v32, %v12277_v19  ;;  %v3053_v12 = vmul.f32 %v12279_v4, %v12277_v19 }
 0x17a   :  { %v3134_v63 = vmul.f32 %v12231_v18, %v7236_v14  ;;  %v1394_v48 = vadd.f32 %v1357_v45, %v1356_v55  ;;  %v2840_v52 = vmul.f32 %v5586_v35, %v7836_v49  ;;  %v2871_v21 = vadd.f32 %v2839_v50, %v7828_v8  ;;  %v7936_v50 = vpop.permute.xlu1 %312 }
 0x17b   :  { %v3751_v41 = vadd.f32 %v3719_v31, %v3669_v36  ;;  %v3752_v7 = vadd.f32 %v3720_v17, %v3670_v11  ;;  %v3084_v59 = vadd.f32 %v3052_v22, %v3002_v34  ;;  %v3085_v24 = vadd.f32 %v3053_v12, %v3003_v26  ;;  %v12280_v34 = vld [vmem:[#allocation89_spill] sm:$0xff]  ;;  %v12281_v26 = vld [vmem:[#allocation16_spill] sm:$0xff]  ;;  %12282 = vst [vmem:[#allocation91_spill] sm:$0xff] %v7936_v50  ;;  %v12284_v22 = vld [vmem:[#allocation135_spill] sm:$0xff] }
 0x17c   :  { %v3135_v51 = vmul.f32 %v12232_v25, %v7236_v14  ;;  %1395 = vadd.xlane.f32.xlu1 %v1394_v48  ;;  %v2872_v32 = vadd.f32 %v2840_v52, %v7836_v49  ;;  %v3216_v18 = vmul.f32 %v12233_v23, %v7323_v27  ;;  %v3217_v35 = vmul.f32 %v12236_v28, %v7323_v27  ;;  %v12283_v49 = vld [vmem:[#allocation17_spill] sm:$0xff]  ;;  %v12285_v12 = vld [vmem:[#allocation30_spill] sm:$0xff] }
 0x17d   :  { %v7926_v43 = vmul.f32 0.5, %v3751_v41  ;;  %v7932_v45 = vmul.f32 0.5, %v3752_v7  ;;  %v3166_v8 = vadd.f32 %v3134_v63, %v3084_v59  ;;  %v445_v36 = vmul.f32 %v12281_v26, %v12280_v34  ;;  %v5588_v11 = vpop.eup %5587  ;;  %v7945_v7 = vpop.permute.xlu0 %376 }
 0x17e   :  { %v3167_v55 = vadd.f32 %v3135_v51, %v3085_v24  ;;  %v2906_v31 = vadd.f32 %v2872_v32, %v2871_v21  ;;  %v446_v17 = vmul.f32 %v12283_v49, %v12280_v34  ;;  %v527_v48 = vmul.f32 %v12285_v12, %v12284_v22  ;;  %v5590_v52 = vpop.eup %5589  ;;  %12286 = vst [vmem:[#allocation92_spill] sm:$0xff] %v7945_v7  ;;  %v12287_v21 = vld [vmem:[#allocation14_spill] sm:$0xff]  ;;  %v12288_v49 = vld [vmem:[#allocation31_spill] sm:$0xff] }
 0x17f   :  { %5591 = vtanh.f32 %v7926_v43  ;;  %v2334_v41 = vmul.f32 %v5588_v11, %v7859_v60  ;;  %v3248_v24 = vadd.f32 %v3216_v18, %v3166_v8  ;;  %v2335_v32 = vmul.f32 %v5590_v52, %v7861_v47  ;;  %v12290_v52 = vld [vmem:[#allocation65_spill] sm:$0xff] }
 0x180   :  { %5593 = vtanh.f32 %v7932_v45  ;;  %v3249_v63 = vadd.f32 %v3217_v35, %v3167_v55  ;;  %2907 = vadd.xlane.f32.xlu0 %v2906_v31  ;;  %v477_v59 = vadd.f32 %v445_v36, %v12287_v21  ;;  %v478_v51 = vadd.f32 %v446_v17, %v12287_v21  ;;  %v12289_v36 = vld [vmem:[#allocation42_spill] sm:$0xff] }
 0x181   :  { %v528_v26 = vmul.f32 %v12288_v49, %v12284_v22  ;;  %v2366_v12 = vadd.f32 %v2334_v41, %v7859_v60  ;;  %v7953_v28 = vmul.f32 0.5, %v3248_v24  ;;  %v609_v18 = vmul.f32 %v12155_v20, %v7936_v50 }
 0x182   :  { %v7955_v11 = vmul.f32 0.5, %v3249_v63  ;;  %v2367_v35 = vadd.f32 %v2335_v32, %v7861_v47  ;;  %v559_v8 = vadd.f32 %v527_v48, %v477_v59  ;;  %v610_v31 = vmul.f32 %v12289_v36, %v7936_v50  ;;  %v12291_v63 = vld [vmem:[#allocation7_spill] sm:$0xff] }
 0x183   :  { %v560_v55 = vadd.f32 %v528_v26, %v478_v51  ;;  %5595 = vtanh.f32 %v7953_v28  ;;  %v691_v17 = vmul.f32 %v12181_v61, %v7945_v7  ;;  %v692_v60 = vmul.f32 %v12182_v1, %v7945_v7  ;;  %v12292_v59 = vld [vmem:[#allocation119_spill] sm:$0xff] }
 0x184   :  { %v3475_v41 = vmul.f32 %v12256_v5, %v12290_v52  ;;  %v2402_v24 = vadd.f32 %v2367_v35, %v2366_v12  ;;  %5597 = vtanh.f32 %v7955_v11  ;;  %v641_v47 = vadd.f32 %v609_v18, %v559_v8 }
 0x185   :  { %v642_v48 = vadd.f32 %v610_v31, %v560_v55  ;;  %v3476_v26 = vmul.f32 %v12257_v16, %v12290_v52  ;;  %v3557_v51 = vmul.f32 %v7864_v62, %v12292_v59  ;;  %v3558_v61 = vmul.f32 %v7869_v58, %v12292_v59  ;;  %v12298_v59 = vld [vmem:[#allocation37_spill] sm:$0xff] }
 0x186   :  { %v3507_v32 = vadd.f32 %v3475_v41, %v12291_v63  ;;  %2403 = vadd.xlane.f32.xlu1 %v2402_v24  ;;  %v723_v1 = vadd.f32 %v691_v17, %v641_v47  ;;  %v3639_v12 = vmul.f32 %v7883_v10, %v12211_v54  ;;  %v3640_v18 = vmul.f32 %v7886_v39, %v12211_v54  ;;  %v12293_v17 = vld [vmem:[#allocation90_spill] sm:$0xff] }
 0x187   :  { %v724_v36 = vadd.f32 %v692_v60, %v642_v48  ;;  %v3508_v35 = vadd.f32 %v3476_v26, %v12291_v63  ;;  %v3721_v55 = vmul.f32 %v7899_v3, %v12214_v56  ;;  %v3722_v31 = vmul.f32 %v7902_v42, %v12214_v56  ;;  %v12294_v60 = vld [vmem:[#allocation22_spill] sm:$0xff]  ;;  %v12295_v48 = vld [vmem:[#allocation23_spill] sm:$0xff] }
 0x188   :  { %v3589_v8 = vadd.f32 %v3557_v51, %v3507_v32  ;;  %v7986_v41 = vmul.f32 0.5, %v723_v1  ;;  %v1457_v47 = vmul.f32 %v12294_v60, %v12293_v17  ;;  %v1458_v20 = vmul.f32 %v12295_v48, %v12293_v17  ;;  %v12296_v26 = vld [vmem:[#allocation134_spill] sm:$0xff]  ;;  %v12297_v32 = vld [vmem:[#allocation36_spill] sm:$0xff]  ;;  %v12299_v1 = vld [vmem:[#allocation15_spill] sm:$0xff] }
 0x189   :  { %v7988_v24 = vmul.f32 0.5, %v724_v36  ;;  %v3590_v49 = vadd.f32 %v3558_v61, %v3508_v35  ;;  %v1539_v51 = vmul.f32 %v12297_v32, %v12296_v26  ;;  %v1540_v63 = vmul.f32 %v12298_v59, %v12296_v26 }
 0x18a   :  { %v3671_v54 = vadd.f32 %v3639_v12, %v3589_v8  ;;  %5599 = vtanh.f32 %v7986_v41  ;;  %v1489_v56 = vadd.f32 %v1457_v47, %v12299_v1  ;;  %v1490_v36 = vadd.f32 %v1458_v20, %v12299_v1 }
 0x18b   :  { %v1621_v60 = vmul.f32 %v12169_v57, %v7700_v29  ;;  %5601 = vtanh.f32 %v7988_v24  ;;  %v3672_v61 = vadd.f32 %v3640_v18, %v3590_v49  ;;  %v1622_v35 = vmul.f32 %v12170_v40, %v7700_v29  ;;  %v12300_v40 = vld [vmem:[#allocation18_spill] sm:$0xff] }
 0x18c   :  { %v5592_v52 = vpop.eup %5591  ;;  %v3753_v12 = vadd.f32 %v3721_v55, %v3671_v54  ;;  %v1571_v32 = vadd.f32 %v1539_v51, %v1489_v56  ;;  %v1572_v48 = vadd.f32 %v1540_v63, %v1490_v36  ;;  %v1703_v47 = vmul.f32 %v12187_v0, %v7714_v30 }
 0x18d   :  { %v5594_v8 = vpop.eup %5593  ;;  %v3847_v59 = vmul.f32 %v5592_v52, %v7926_v43  ;;  %v3754_v1 = vadd.f32 %v3722_v31, %v3672_v61  ;;  %v1704_v49 = vmul.f32 %v12188_v15, %v7714_v30  ;;  %v952_v52 = vmul.f32 %v12300_v40, %v12280_v34  ;;  %v12301_v31 = vld [vmem:[#allocation19_spill] sm:$0xff] }
 0x18e   :  { %v3848_v20 = vmul.f32 %v5594_v8, %v7932_v45  ;;  %v8010_v57 = vmul.f32 0.5, %v3753_v12  ;;  %v1653_v18 = vadd.f32 %v1621_v60, %v1571_v32  ;;  %v1654_v55 = vadd.f32 %v1622_v35, %v1572_v48  ;;  %v12308_v15 = vld [vmem:[#allocation63_spill] sm:$0xff] }
 0x18f   :  { %v3879_v54 = vadd.f32 %v3847_v59, %v7926_v43  ;;  %v8018_v63 = vmul.f32 0.5, %v3754_v1  ;;  %v953_v51 = vmul.f32 %v12301_v31, %v12280_v34  ;;  %v984_v8 = vadd.f32 %v952_v52, %v12287_v21  ;;  %v12302_v43 = vld [vmem:[#allocation34_spill] sm:$0xff] }
 0x190   :  { %v3880_v56 = vadd.f32 %v3848_v20, %v7932_v45  ;;  %5603 = vtanh.f32 %v8010_v57  ;;  %v5596_v36 = vpop.eup %5595  ;;  %v1735_v61 = vadd.f32 %v1703_v47, %v1653_v18  ;;  %v1736_v12 = vadd.f32 %v1704_v49, %v1654_v55  ;;  %v12303_v47 = vld [vmem:[#allocation35_spill] sm:$0xff] }
 0x191   :  { %v1034_v59 = vmul.f32 %v12302_v43, %v12284_v22  ;;  %v5598_v60 = vpop.eup %5597  ;;  %v3344_v32 = vmul.f32 %v5596_v36, %v7953_v28  ;;  %5605 = vtanh.f32 %v8018_v63  ;;  %v985_v45 = vadd.f32 %v953_v51, %v12287_v21 }
 0x192   :  { %v3911_v48 = vadd.f32 %v3880_v56, %v3879_v54  ;;  %v3345_v1 = vmul.f32 %v5598_v60, %v7955_v11  ;;  %v8030_v35 = vmul.f32 0.5, %v1735_v61  ;;  %v8032_v20 = vmul.f32 0.5, %v1736_v12  ;;  %v12304_v12 = vld [vmem:[#allocation80_spill] sm:$0xff] }
 0x193   :  { %v1035_v49 = vmul.f32 %v12303_v47, %v12284_v22  ;;  %v3376_v18 = vadd.f32 %v3344_v32, %v7953_v28  ;;  %v1066_v55 = vadd.f32 %v1034_v59, %v984_v8  ;;  %v1116_v54 = vmul.f32 %v12157_v46, %v7936_v50  ;;  %v12305_v8 = vld [vmem:[#allocation43_spill] sm:$0xff]  ;;  %v12306_v32 = vld [vmem:[#allocation44_spill] sm:$0xff] }
 0x194   :  { %3912 = vadd.xlane.f32.xlu0 %v3911_v48  ;;  %v1117_v52 = vmul.f32 %v12158_v9, %v7936_v50  ;;  %v3377_v56 = vadd.f32 %v3345_v1, %v7955_v11  ;;  %5607 = vtanh.f32 %v8030_v35  ;;  %v1198_v36 = vmul.f32 %v12183_v13, %v7945_v7  ;;  %v12307_v1 = vld [vmem:[#allocation132_spill] sm:$0xff]  ;;  %v12309_v50 = vld [vmem:[#allocation11_spill] sm:$0xff] }
 0x195   :  { %v1067_v51 = vadd.f32 %v1035_v49, %v985_v45  ;;  %5609 = vtanh.f32 %v8032_v20  ;;  %v1148_v61 = vadd.f32 %v1116_v54, %v1066_v55  ;;  %v1199_v28 = vmul.f32 %v12184_v44, %v7945_v7  ;;  %v12310_v55 = vld [vmem:[#allocation64_spill] sm:$0xff] }
 0x196   :  { %v2467_v59 = vmul.f32 %v12305_v8, %v12304_v12  ;;  %v3410_v60 = vadd.f32 %v3377_v56, %v3376_v18  ;;  %v2468_v11 = vmul.f32 %v12306_v32, %v12304_v12  ;;  %v2549_v45 = vmul.f32 %v12308_v15, %v12307_v1 }
 0x197   :  { %v1149_v48 = vadd.f32 %v1117_v52, %v1067_v51  ;;  %v5600_v49 = vpop.eup %5599  ;;  %v1230_v0 = vadd.f32 %v1198_v36, %v1148_v61  ;;  %v2550_v54 = vmul.f32 %v12310_v55, %v12307_v1  ;;  %v2631_v7 = vmul.f32 %v12212_v2, %v7238_v37 }
 0x198   :  { %v2499_v22 = vadd.f32 %v2467_v59, %v12309_v50  ;;  %v5602_v21 = vpop.eup %5601  ;;  %3411 = vadd.xlane.f32.xlu1 %v3410_v60  ;;  %v819_v18 = vmul.f32 %v5600_v49, %v7986_v41  ;;  %v2500_v56 = vadd.f32 %v2468_v11, %v12309_v50  ;;  %v2632_v51 = vmul.f32 %v12213_v53, %v7238_v37 }
 0x199   :  { %v1231_v52 = vadd.f32 %v1199_v28, %v1149_v48  ;;  %v820_v36 = vmul.f32 %v5602_v21, %v7988_v24  ;;  %v8064_v61 = vmul.f32 0.5, %v1230_v0  ;;  %v2713_v55 = vmul.f32 %v12215_v33, %v7479_v38  ;;  %v12311_v28 = vld [vmem:[#allocation111_spill] sm:$0xff]  ;;  %v12313_v0 = vld [vmem:[#allocation26_spill] sm:$0xff] }
 0x19a   :  { %v2581_v59 = vadd.f32 %v2549_v45, %v2499_v22  ;;  %v851_v2 = vadd.f32 %v819_v18, %v7986_v41  ;;  %v2582_v60 = vadd.f32 %v2550_v54, %v2500_v56  ;;  %v2714_v48 = vmul.f32 %v12311_v28, %v7479_v38  ;;  %v12312_v21 = vld [vmem:[#allocation79_spill] sm:$0xff]  ;;  %v12316_v54 = vld [vmem:[#allocation38_spill] sm:$0xff] }
 0x19b   :  { %v8069_v15 = vmul.f32 0.5, %v1231_v52  ;;  %v852_v11 = vadd.f32 %v820_v36, %v7988_v24  ;;  %5611 = vtanh.f32 %v8064_v61  ;;  %v1962_v53 = vmul.f32 %v12313_v0, %v12312_v21  ;;  %v12314_v41 = vld [vmem:[#allocation27_spill] sm:$0xff]  ;;  %v12315_v52 = vld [vmem:[#allocation133_spill] sm:$0xff]  ;;  %v12317_v36 = vld [vmem:[#allocation10_spill] sm:$0xff] }
 0x19c   :  { %v2663_v49 = vadd.f32 %v2631_v7, %v2581_v59  ;;  %v2664_v45 = vadd.f32 %v2632_v51, %v2582_v60  ;;  %v1963_v18 = vmul.f32 %v12314_v41, %v12312_v21  ;;  %v2044_v56 = vmul.f32 %v12316_v54, %v12315_v52  ;;  %v12318_v38 = vld [vmem:[#allocation39_spill] sm:$0xff] }
 0x19d   :  { %v5604_v22 = vpop.eup %5603  ;;  %5613 = vtanh.f32 %v8069_v15  ;;  %v890_v33 = vadd.f32 %v852_v11, %v851_v2  ;;  %v1994_v32 = vadd.f32 %v1962_v53, %v12317_v36  ;;  %v2045_v50 = vmul.f32 %v12318_v38, %v12315_v52  ;;  %v12319_v51 = vld [vmem:[#allocation75_spill] sm:$0xff] }
 0x19e   :  { %v3849_v28 = vmul.f32 %v5604_v22, %v8010_v57  ;;  %v2745_v24 = vadd.f32 %v2713_v55, %v2663_v49  ;;  %v5606_v7 = vpop.eup %5605  ;;  %v2746_v59 = vadd.f32 %v2714_v48, %v2664_v45  ;;  %v1995_v8 = vadd.f32 %v1963_v18, %v12317_v36  ;;  %v12320_v60 = vld [vmem:[#allocation59_spill] sm:$0xff]  ;;  %v12321_v48 = vld [vmem:[#allocation60_spill] sm:$0xff] }
 0x19f   :  { %v2126_v37 = vmul.f32 %v12320_v60, %v12319_v51  ;;  %891 = vadd.xlane.f32.xlu0 %v890_v33  ;;  %v3850_v21 = vmul.f32 %v5606_v7, %v8018_v63  ;;  %v2076_v55 = vadd.f32 %v2044_v56, %v1994_v32  ;;  %v2127_v22 = vmul.f32 %v12321_v48, %v12319_v51  ;;  %v12322_v45 = vld [vmem:[#allocation76_spill] sm:$0xff]  ;;  %v12323_v18 = vld [vmem:[#allocation67_spill] sm:$0xff] }
 0x1a0   :  { %v3881_v2 = vadd.f32 %v3849_v28, %v8010_v57  ;;  %v8091_v11 = vmul.f32 0.5, %v2745_v24  ;;  %v8093_v49 = vmul.f32 0.5, %v2746_v59  ;;  %v2077_v53 = vadd.f32 %v2045_v50, %v1995_v8  ;;  %v12324_v57 = vld [vmem:[#allocation68_spill] sm:$0xff] }
 0x1a1   :  { %v2208_v36 = vmul.f32 %v12323_v18, %v12322_v45  ;;  %v5608_v52 = vpop.eup %5607  ;;  %v3882_v1 = vadd.f32 %v3850_v21, %v8018_v63  ;;  %v2158_v33 = vadd.f32 %v2126_v37, %v2076_v55  ;;  %v2209_v28 = vmul.f32 %v12324_v57, %v12322_v45  ;;  %v12325_v55 = vld [vmem:[#allocation3_spill] sm:$0xff] }
 0x1a2   :  { %5615 = vtanh.f32 %v8091_v11  ;;  %v5610_v24 = vpop.eup %5609  ;;  %v1831_v32 = vmul.f32 %v5608_v52, %v8030_v35  ;;  %v2159_v50 = vadd.f32 %v2127_v22, %v2077_v53  ;;  %v3477_v8 = vmul.f32 %v12256_v5, %v12270_v6 }
 0x1a3   :  { %5617 = vtanh.f32 %v8093_v49  ;;  %v3914_v56 = vadd.f32 %v3882_v1, %v3881_v2  ;;  %v1832_v7 = vmul.f32 %v5610_v24, %v8032_v20  ;;  %v2240_v59 = vadd.f32 %v2208_v36, %v2158_v33 }
 0x1a4   :  { %v3478_v63 = vmul.f32 %v12257_v16, %v12270_v6  ;;  %v1863_v37 = vadd.f32 %v1831_v32, %v8030_v35  ;;  %v2241_v21 = vadd.f32 %v2209_v28, %v2159_v50  ;;  %v3509_v45 = vadd.f32 %v3477_v8, %v12325_v55  ;;  %v5397_v16 = vld [vmem:[%s11400_s0 + $0x38] sm:$0xff]  ;;  %v12351_v6 = vld [vmem:[#allocation29_spill] sm:$0xff] }
 0x1a5   :  { %v3559_v52 = vmul.f32 %v7864_v62, %v12277_v19  ;;  %3915 = vadd.xlane.f32.xlu1 %v3914_v56  ;;  %v1864_v53 = vadd.f32 %v1832_v7, %v8032_v20  ;;  %v8115_v22 = vmul.f32 0.5, %v2240_v59  ;;  %v3560_v36 = vmul.f32 %v7869_v58, %v12277_v19  ;;  %v12326_v56 = vld [vmem:[#allocation73_spill] sm:$0xff] }
 0x1a6   :  { %v3510_v1 = vadd.f32 %v3478_v63, %v12325_v55  ;;  %v8120_v2 = vmul.f32 0.5, %v2241_v21  ;;  %v3641_v35 = vmul.f32 %v7883_v10, %v7236_v14  ;;  %v3642_v28 = vmul.f32 %v7886_v39, %v7236_v14  ;;  %v12327_v7 = vld [vmem:[#allocation57_spill] sm:$0xff] }
 0x1a7   :  { %v3591_v33 = vadd.f32 %v3559_v52, %v3509_v45  ;;  %v1901_v24 = vadd.f32 %v1864_v53, %v1863_v37  ;;  %5619 = vtanh.f32 %v8115_v22  ;;  %v3723_v32 = vmul.f32 %v7899_v3, %v7323_v27  ;;  %v12328_v52 = vld [vmem:[#allocation58_spill] sm:$0xff] }
 0x1a8   :  { %v3592_v20 = vadd.f32 %v3560_v36, %v3510_v1  ;;  %v5612_v50 = vpop.eup %5611  ;;  %5621 = vtanh.f32 %v8120_v2  ;;  %v3724_v45 = vmul.f32 %v7902_v42, %v7323_v27  ;;  %v2972_v59 = vmul.f32 %v12327_v7, %v12326_v56  ;;  %v12329_v1 = vld [vmem:[#allocation127_spill] sm:$0xff]  ;;  %v12330_v36 = vld [vmem:[#allocation69_spill] sm:$0xff] }
 0x1a9   :  { %v3673_v8 = vadd.f32 %v3641_v35, %v3591_v33  ;;  %1902 = vadd.xlane.f32.xlu0 %v1901_v24  ;;  %v1326_v37 = vmul.f32 %v5612_v50, %v8064_v61  ;;  %v2973_v53 = vmul.f32 %v12328_v52, %v12326_v56  ;;  %v3054_v3 = vmul.f32 %v12330_v36, %v12329_v1  ;;  %v12331_v35 = vld [vmem:[#allocation6_spill] sm:$0xff] }
 0x1aa   :  { %v5614_v63 = vpop.eup %5613  ;;  %v3674_v21 = vadd.f32 %v3642_v28, %v3592_v20  ;;  %v3004_v10 = vadd.f32 %v2972_v59, %v12331_v35  ;;  %v3055_v42 = vmul.f32 %v12279_v4, %v12329_v1  ;;  %v12332_v28 = vld [vmem:[#allocation128_spill] sm:$0xff]  ;;  %v12333_v20 = vld [vmem:[#allocation117_spill] sm:$0xff]  ;;  %v4215_v51 = vrot.slane %v5397_v16, %v12351_v6 }
 0x1ab   :  { %v1327_v39 = vmul.f32 %v5614_v63, %v8069_v15  ;;  %v3755_v33 = vadd.f32 %v3723_v32, %v3673_v8  ;;  %v1358_v58 = vadd.f32 %v1326_v37, %v8064_v61  ;;  %v3005_v50 = vadd.f32 %v2973_v53, %v12331_v35 }
 0x1ac   :  { %v3756_v24 = vadd.f32 %v3724_v45, %v3674_v21  ;;  %v3136_v62 = vmul.f32 %v12333_v20, %v12332_v28  ;;  %v3086_v8 = vadd.f32 %v3054_v3, %v3004_v10  ;;  %v3137_v59 = vmul.f32 %v12232_v25, %v12332_v28  ;;  %v12334_v45 = vld [vmem:[#allocation77_spill] sm:$0xff]  ;;  %v12335_v21 = vld [vmem:[#allocation154_spill] sm:$0xff] }
 0x1ad   :  { %v1359_v63 = vadd.f32 %v1327_v39, %v8069_v15  ;;  %v8151_v32 = vmul.f32 0.5, %v3755_v33  ;;  %v3087_v61 = vadd.f32 %v3055_v42, %v3005_v50  ;;  %v3218_v37 = vmul.f32 %v12233_v23, %v12334_v45  ;;  %v12336_v39 = vld [vmem:[#allocation8_spill] sm:$0xff]  ;;  %v12337_v42 = vld [vmem:[#allocation9_spill] sm:$0xff] }
 0x1ae   :  { %v8155_v1 = vmul.f32 0.5, %v3756_v24  ;;  %v3219_v53 = vmul.f32 %v12335_v21, %v12334_v45  ;;  %v3168_v15 = vadd.f32 %v3136_v62, %v3086_v8  ;;  %v3965_v33 = vrot.slane %v5397_v16, %v12336_v39 }
 0x1af   :  { %v5616_v35 = vpop.eup %5615  ;;  %v1397_v5 = vadd.f32 %v1359_v63, %v1358_v58  ;;  %5623 = vtanh.f32 %v8151_v32  ;;  %v3169_v24 = vadd.f32 %v3137_v59, %v3087_v61  ;;  %v3969_v50 = vrot.slane %v5397_v16, %v12337_v42  ;;  %v12339_v58 = vld [vmem:[#allocation12_spill] sm:$0xff] }
 0x1b0   :  { %v5618_v10 = vpop.eup %5617  ;;  %v2841_v3 = vmul.f32 %v5616_v35, %v8091_v11  ;;  %5625 = vtanh.f32 %v8155_v1  ;;  %v3250_v56 = vadd.f32 %v3218_v37, %v3168_v15  ;;  %v8168_v45 = vrot.slane %v3965_v33, %v12336_v39  ;;  %v12341_v35 = vld [vmem:[#allocation13_spill] sm:$0xff] }
 0x1b1   :  { %1398 = vadd.xlane.f32.xlu1 %v1397_v5  ;;  %v2842_v28 = vmul.f32 %v5618_v10, %v8093_v49  ;;  %v4047_v63 = vrot.slane %v5397_v16, %v12339_v58  ;;  %v3251_v8 = vadd.f32 %v3219_v53, %v3169_v24  ;;  %v8173_v27 = vrot.slane %v3969_v50, %v12336_v39  ;;  %v12342_v5 = vld [vmem:[#allocation65_spill] sm:$0xff]  ;;  %v12345_v39 = vld [vmem:[#allocation20_spill] sm:$0xff]  ;;  %v12347_v24 = vld [vmem:[#allocation119_spill] sm:$0xff] }
 0x1b2   :  { %12338 = vst [vmem:[#allocation93_spill] sm:$0xff] %v8168_v45  ;;  %v2873_v62 = vadd.f32 %v2841_v3, %v8091_v11  ;;  %v4051_v14 = vrot.slane %v5397_v16, %v12341_v35  ;;  %v8177_v61 = vmul.f32 0.5, %v3250_v56  ;;  %v3982_v37 = vmul.f32 %v8168_v45, %v12342_v5  ;;  %v12346_v56 = vld [vmem:[#allocation7_spill] sm:$0xff]  ;;  %v12348_v35 = vld [vmem:[#allocation21_spill] sm:$0xff] }
 0x1b3   :  { %12340 = vst [vmem:[#allocation94_spill] sm:$0xff] %v8173_v27  ;;  %v2874_v59 = vadd.f32 %v2842_v28, %v8093_v49  ;;  %v8182_v15 = vrot.slane %v4047_v63, %v12339_v58  ;;  %v8184_v33 = vmul.f32 0.5, %v3251_v8  ;;  %v3983_v11 = vmul.f32 %v8173_v27, %v12342_v5 }
 0x1b4   :  { %v8189_v53 = vrot.slane %v4051_v14, %v12339_v58  ;;  %v4129_v10 = vrot.slane %v5397_v16, %v12345_v39  ;;  %v5620_v3 = vpop.eup %5619  ;;  %5627 = vtanh.f32 %v8177_v61  ;;  %v4014_v28 = vadd.f32 %v3982_v37, %v12346_v56 }
 0x1b5   :  { %12343 = vst [vmem:[#allocation136_spill] sm:$0xff] %v8182_v15  ;;  %v2909_v49 = vadd.f32 %v2874_v59, %v2873_v62  ;;  %v4064_v42 = vmul.f32 %v8182_v15, %v12347_v24  ;;  %v5622_v50 = vpop.eup %5621  ;;  %v2336_v63 = vmul.f32 %v5620_v3, %v8115_v22  ;;  %5629 = vtanh.f32 %v8184_v33  ;;  %v12350_v3 = vld [vmem:[#allocation28_spill] sm:$0xff] }
 0x1b6   :  { %12344 = vst [vmem:[#allocation137_spill] sm:$0xff] %v8189_v53  ;;  %v4015_v8 = vadd.f32 %v3983_v11, %v12346_v56  ;;  %v4065_v14 = vmul.f32 %v8189_v53, %v12347_v24  ;;  %v2337_v58 = vmul.f32 %v5622_v50, %v8120_v2  ;;  %v4133_v59 = vrot.slane %v5397_v16, %v12348_v35  ;;  %v12354_v24 = vld [vmem:[#allocation66_spill] sm:$0xff]  ;;  %v12359_v35 = vld [vmem:[#allocation129_spill] sm:$0xff] }
 0x1b7   :  { %2910 = vadd.xlane.f32.xlu0 %v2909_v49  ;;  %v4096_v62 = vadd.f32 %v4064_v42, %v4014_v28  ;;  %v8204_v5 = vrot.slane %v4129_v10, %v12345_v39  ;;  %v2368_v37 = vadd.f32 %v2336_v63, %v8115_v22  ;;  %v4211_v55 = vrot.slane %v5397_v16, %v12350_v3  ;;  %v12353_v49 = vld [vmem:[#allocation170_spill] sm:$0xff]  ;;  %v12357_v16 = vld [vmem:[#allocation120_spill] sm:$0xff] }
 0x1b8   :  { %v4097_v19 = vadd.f32 %v4065_v14, %v4015_v8  ;;  %v2369_v11 = vadd.f32 %v2337_v58, %v8120_v2  ;;  %v8211_v56 = vrot.slane %v4133_v59, %v12345_v39  ;;  %v3980_v42 = vmul.f32 %v8168_v45, %v12354_v24  ;;  %v12358_v8 = vld [vmem:[#allocation4_spill] sm:$0xff] }
 0x1b9   :  { %12349 = vst [vmem:[#allocation138_spill] sm:$0xff] %v8204_v5  ;;  %v4146_v28 = vmul.f32 %v8204_v5, %v12353_v49  ;;  %v8218_v10 = vrot.slane %v4211_v55, %v12350_v3  ;;  %v8221_v22 = vrot.slane %v4215_v51, %v12350_v3  ;;  %v3981_v6 = vmul.f32 %v8173_v27, %v12354_v24 }
 0x1ba   :  { %12352 = vst [vmem:[#allocation95_spill] sm:$0xff] %v8211_v56  ;;  %v4062_v2 = vmul.f32 %v8182_v15, %v12357_v16  ;;  %v2405_v39 = vadd.f32 %v2369_v11, %v2368_v37  ;;  %v4147_v50 = vmul.f32 %v8211_v56, %v12353_v49  ;;  %v4012_v14 = vadd.f32 %v3980_v42, %v12358_v8  ;;  %v12360_v49 = vld [vmem:[#allocation169_spill] sm:$0xff] }
 0x1bb   :  { %12355 = vst [vmem:[#allocation98_spill] sm:$0xff] %v8218_v10  ;;  %12356 = vst [vmem:[#allocation99_spill] sm:$0xff] %v8221_v22  ;;  %v4178_v63 = vadd.f32 %v4146_v28, %v4096_v62  ;;  %v4228_v55 = vmul.f32 %v8218_v10, %v12359_v35  ;;  %v4229_v51 = vmul.f32 %v8221_v22, %v12359_v35 }
 0x1bc   :  { %v5624_v58 = vpop.eup %5623  ;;  %v4013_v59 = vadd.f32 %v3981_v6, %v12358_v8  ;;  %v4063_v3 = vmul.f32 %v8189_v53, %v12357_v16  ;;  %2406 = vadd.xlane.f32.xlu1 %v2405_v39  ;;  %v4179_v11 = vadd.f32 %v4147_v50, %v4097_v19  ;;  %v4094_v62 = vadd.f32 %v4062_v2, %v4012_v14  ;;  %v12361_v53 = vld [vmem:[#allocation130_spill] sm:$0xff] }
 0x1bd   :  { %v5626_v24 = vpop.eup %5625  ;;  %v3851_v37 = vmul.f32 %v5624_v58, %v8151_v32  ;;  %v4144_v28 = vmul.f32 %v8204_v5, %v12360_v49  ;;  %v4260_v15 = vadd.f32 %v4228_v55, %v4178_v63  ;;  %v4145_v35 = vmul.f32 %v8211_v56, %v12360_v49  ;;  %v12362_v55 = vld [vmem:[#allocation97_spill] sm:$0xff] }
 0x1be   :  { %v3852_v42 = vmul.f32 %v5626_v24, %v8155_v1  ;;  %v4095_v27 = vadd.f32 %v4063_v3, %v4013_v59  ;;  %v4261_v8 = vadd.f32 %v4229_v51, %v4179_v11  ;;  %v4226_v39 = vmul.f32 %v8218_v10, %v12361_v53  ;;  %v8257_v3 = vpop.permute.xlu1 %316 }
 0x1bf   :  { %v3883_v6 = vadd.f32 %v3851_v37, %v8151_v32  ;;  %v4176_v16 = vadd.f32 %v4144_v28, %v4094_v62  ;;  %v8247_v2 = vmul.f32 0.5, %v4260_v15  ;;  %v4227_v14 = vmul.f32 %v8221_v22, %v12361_v53  ;;  %12363 = vst [vmem:[#allocation100_spill] sm:$0xff] %v8257_v3  ;;  %v12365_v62 = vld [vmem:[#allocation25_spill] sm:$0xff]  ;;  %v8267_v28 = vpop.permute.xlu0 %380 }
 0x1c0   :  { %v3884_v19 = vadd.f32 %v3852_v42, %v8155_v1  ;;  %v4177_v50 = vadd.f32 %v4145_v35, %v4095_v27  ;;  %v8251_v63 = vmul.f32 0.5, %v4261_v8  ;;  %v954_v59 = vmul.f32 %v12300_v40, %v12362_v55  ;;  %v12364_v27 = vld [vmem:[#allocation139_spill] sm:$0xff]  ;;  %12366 = vst [vmem:[#allocation101_spill] sm:$0xff] %v8267_v28 }
 0x1c1   :  { %v4258_v58 = vadd.f32 %v4226_v39, %v4176_v16  ;;  %v955_v32 = vmul.f32 %v12301_v31, %v12362_v55  ;;  %v5628_v51 = vpop.eup %5627  ;;  %5631 = vtanh.f32 %v8247_v2  ;;  %v1036_v15 = vmul.f32 %v12302_v43, %v12364_v27 }
 0x1c2   :  { %v3917_v24 = vadd.f32 %v3884_v19, %v3883_v6  ;;  %v4259_v1 = vadd.f32 %v4227_v14, %v4177_v50  ;;  %v5630_v53 = vpop.eup %5629  ;;  %v3346_v37 = vmul.f32 %v5628_v51, %v8177_v61  ;;  %5633 = vtanh.f32 %v8251_v63  ;;  %v12367_v51 = vld [vmem:[#allocation16_spill] sm:$0xff] }
 0x1c3   :  { %v8264_v11 = vmul.f32 0.5, %v4258_v58  ;;  %v986_v49 = vadd.f32 %v954_v59, %v12365_v62  ;;  %v3347_v42 = vmul.f32 %v5630_v53, %v8184_v33  ;;  %v987_v6 = vadd.f32 %v955_v32, %v12365_v62 }
 0x1c4   :  { %3918 = vadd.xlane.f32.xlu0 %v3917_v24  ;;  %v8270_v35 = vmul.f32 0.5, %v4259_v1  ;;  %v1037_v8 = vmul.f32 %v12303_v47, %v12364_v27  ;;  %v3378_v16 = vadd.f32 %v3346_v37, %v8177_v61  ;;  %v1118_v19 = vmul.f32 %v12157_v46, %v8257_v3  ;;  %v12369_v37 = vld [vmem:[#allocation30_spill] sm:$0xff] }
 0x1c5   :  { %5635 = vtanh.f32 %v8264_v11  ;;  %v1068_v39 = vadd.f32 %v1036_v15, %v986_v49  ;;  %v3379_v50 = vadd.f32 %v3347_v42, %v8184_v33  ;;  %v1119_v58 = vmul.f32 %v12158_v9, %v8257_v3  ;;  %v12368_v33 = vld [vmem:[#allocation17_spill] sm:$0xff] }
 0x1c6   :  { %5637 = vtanh.f32 %v8270_v35  ;;  %v1069_v14 = vadd.f32 %v1037_v8, %v987_v6  ;;  %v1200_v32 = vmul.f32 %v12183_v13, %v8267_v28  ;;  %v1201_v61 = vmul.f32 %v12184_v44, %v8267_v28  ;;  %v12370_v8 = vld [vmem:[#allocation31_spill] sm:$0xff] }
 0x1c7   :  { %v1150_v59 = vadd.f32 %v1118_v19, %v1068_v39  ;;  %v447_v24 = vmul.f32 %v12367_v51, %v12362_v55  ;;  %v3413_v1 = vadd.f32 %v3379_v50, %v3378_v16  ;;  %v448_v53 = vmul.f32 %v12368_v33, %v12362_v55  ;;  %v12371_v19 = vld [vmem:[#allocation41_spill] sm:$0xff]  ;;  %v12372_v50 = vld [vmem:[#allocation42_spill] sm:$0xff] }
 0x1c8   :  { %v1151_v15 = vadd.f32 %v1119_v58, %v1069_v14  ;;  %v529_v49 = vmul.f32 %v12369_v37, %v12364_v27  ;;  %v530_v39 = vmul.f32 %v12370_v8, %v12364_v27  ;;  %v611_v44 = vmul.f32 %v12371_v19, %v8257_v3  ;;  %v12373_v58 = vld [vmem:[#allocation49_spill] sm:$0xff] }
 0x1c9   :  { %v1232_v42 = vadd.f32 %v1200_v32, %v1150_v59  ;;  %v479_v6 = vadd.f32 %v447_v24, %v12365_v62  ;;  %3414 = vadd.xlane.f32.xlu1 %v3413_v1  ;;  %v480_v16 = vadd.f32 %v448_v53, %v12365_v62  ;;  %v612_v14 = vmul.f32 %v12372_v50, %v8257_v3  ;;  %v12374_v32 = vld [vmem:[#allocation50_spill] sm:$0xff] }
 0x1ca   :  { %v1233_v13 = vadd.f32 %v1201_v61, %v1151_v15  ;;  %v693_v55 = vmul.f32 %v12373_v58, %v8267_v28  ;;  %v694_v24 = vmul.f32 %v12374_v32, %v8267_v28  ;;  %v1964_v27 = vmul.f32 %v12313_v0, %v12293_v17 }
 0x1cb   :  { %v8303_v37 = vmul.f32 0.5, %v1232_v42  ;;  %v561_v59 = vadd.f32 %v529_v49, %v479_v6  ;;  %v562_v61 = vadd.f32 %v530_v39, %v480_v16  ;;  %v1965_v1 = vmul.f32 %v12314_v41, %v12293_v17  ;;  %v12375_v42 = vld [vmem:[#allocation15_spill] sm:$0xff] }
 0x1cc   :  { %v8309_v19 = vmul.f32 0.5, %v1233_v13  ;;  %v2046_v15 = vmul.f32 %v12316_v54, %v12296_v26  ;;  %v1996_v49 = vadd.f32 %v1964_v27, %v12375_v42  ;;  %v2047_v6 = vmul.f32 %v12318_v38, %v12296_v26 }
 0x1cd   :  { %5639 = vtanh.f32 %v8303_v37  ;;  %v643_v53 = vadd.f32 %v611_v44, %v561_v59  ;;  %v644_v28 = vadd.f32 %v612_v14, %v562_v61  ;;  %v1997_v13 = vadd.f32 %v1965_v1, %v12375_v42 }
 0x1ce   :  { %5641 = vtanh.f32 %v8309_v19  ;;  %v2128_v39 = vmul.f32 %v12320_v60, %v7700_v29  ;;  %v5632_v16 = vpop.eup %5631  ;;  %v2078_v3 = vadd.f32 %v2046_v15, %v1996_v49  ;;  %v2129_v62 = vmul.f32 %v12321_v48, %v7700_v29  ;;  %v12376_v15 = vld [vmem:[#allocation22_spill] sm:$0xff] }
 0x1cf   :  { %v725_v17 = vadd.f32 %v693_v55, %v643_v53  ;;  %v2210_v44 = vmul.f32 %v12323_v18, %v7714_v30  ;;  %v5634_v27 = vpop.eup %5633  ;;  %v4356_v59 = vmul.f32 %v5632_v16, %v8247_v2  ;;  %v726_v26 = vadd.f32 %v694_v24, %v644_v28  ;;  %v12377_v28 = vld [vmem:[#allocation23_spill] sm:$0xff] }
 0x1d0   :  { %v2079_v38 = vadd.f32 %v2047_v6, %v1997_v13  ;;  %v2211_v14 = vmul.f32 %v12324_v57, %v7714_v30  ;;  %v4357_v61 = vmul.f32 %v5634_v27, %v8251_v63  ;;  %v2160_v55 = vadd.f32 %v2128_v39, %v2078_v3 }
 0x1d1   :  { %v8331_v1 = vmul.f32 0.5, %v725_v17  ;;  %v1459_v53 = vmul.f32 %v12376_v15, %v12280_v34  ;;  %v4388_v29 = vadd.f32 %v4356_v59, %v8247_v2  ;;  %v8336_v42 = vmul.f32 0.5, %v726_v26  ;;  %v12378_v2 = vld [vmem:[#allocation14_spill] sm:$0xff] }
 0x1d2   :  { %v5636_v49 = vpop.eup %5635  ;;  %v2161_v18 = vadd.f32 %v2129_v62, %v2079_v38  ;;  %v1460_v24 = vmul.f32 %v12377_v28, %v12280_v34  ;;  %v4389_v13 = vadd.f32 %v4357_v61, %v8251_v63  ;;  %v2242_v17 = vadd.f32 %v2210_v44, %v2160_v55  ;;  %v12380_v44 = vld [vmem:[#allocation36_spill] sm:$0xff] }
 0x1d3   :  { %v5638_v6 = vpop.eup %5637  ;;  %v4354_v16 = vmul.f32 %v5636_v49, %v8264_v11  ;;  %5643 = vtanh.f32 %v8331_v1  ;;  %v1491_v26 = vadd.f32 %v1459_v53, %v12378_v2  ;;  %v12379_v49 = vld [vmem:[#allocation135_spill] sm:$0xff] }
 0x1d4   :  { %v4355_v3 = vmul.f32 %v5638_v6, %v8270_v35  ;;  %5645 = vtanh.f32 %v8336_v42  ;;  %v2243_v39 = vadd.f32 %v2211_v14, %v2161_v18  ;;  %v4421_v27 = vadd.f32 %v4389_v13, %v4388_v29  ;;  %v12381_v6 = vld [vmem:[#allocation37_spill] sm:$0xff]  ;;  %v12382_v29 = vld [vmem:[#allocation91_spill] sm:$0xff]  ;;  %v12384_v14 = vld [vmem:[#allocation56_spill] sm:$0xff] }
 0x1d5   :  { %v4386_v38 = vadd.f32 %v4354_v16, %v8264_v11  ;;  %v8347_v62 = vmul.f32 0.5, %v2242_v17  ;;  %v1492_v59 = vadd.f32 %v1460_v24, %v12378_v2  ;;  %v1541_v55 = vmul.f32 %v12380_v44, %v12379_v49  ;;  %v12383_v18 = vld [vmem:[#allocation55_spill] sm:$0xff]  ;;  %v12385_v24 = vld [vmem:[#allocation92_spill] sm:$0xff]  ;;  %v12386_v13 = vld [vmem:[#allocation61_spill] sm:$0xff] }
 0x1d6   :  { %v4387_v63 = vadd.f32 %v4355_v3, %v8270_v35  ;;  %v8351_v61 = vmul.f32 0.5, %v2243_v39  ;;  %v1542_v30 = vmul.f32 %v12381_v6, %v12379_v49  ;;  %4422 = vadd.xlane.f32.xlu0 %v4421_v27  ;;  %v1623_v11 = vmul.f32 %v12383_v18, %v12382_v29  ;;  %v12387_v39 = vld [vmem:[#allocation62_spill] sm:$0xff]  ;;  %v12388_v44 = vld [vmem:[#allocation132_spill] sm:$0xff] }
 0x1d7   :  { %5647 = vtanh.f32 %v8347_v62  ;;  %v1624_v53 = vmul.f32 %v12384_v14, %v12382_v29  ;;  %v1705_v35 = vmul.f32 %v12386_v13, %v12385_v24  ;;  %v1573_v17 = vadd.f32 %v1541_v55, %v1491_v26 }
 0x1d8   :  { %v4418_v16 = vadd.f32 %v4387_v63, %v4386_v38  ;;  %5649 = vtanh.f32 %v8351_v61  ;;  %v1574_v3 = vadd.f32 %v1542_v30, %v1492_v59  ;;  %v1706_v6 = vmul.f32 %v12387_v39, %v12385_v24  ;;  %v12389_v30 = vld [vmem:[#allocation125_spill] sm:$0xff] }
 0x1d9   :  { %v2974_v27 = vmul.f32 %v12327_v7, %v12304_v12  ;;  %v2975_v18 = vmul.f32 %v12328_v52, %v12304_v12  ;;  %v3056_v14 = vmul.f32 %v12330_v36, %v12388_v44  ;;  %v1655_v13 = vadd.f32 %v1623_v11, %v1573_v17  ;;  %v12390_v7 = vld [vmem:[#allocation11_spill] sm:$0xff]  ;;  %v12391_v17 = vld [vmem:[#allocation78_spill] sm:$0xff] }
 0x1da   :  { %v5640_v28 = vpop.eup %5639  ;;  %4419 = vadd.xlane.f32.xlu1 %v4418_v16  ;;  %v1656_v38 = vadd.f32 %v1624_v53, %v1574_v3  ;;  %v3057_v26 = vmul.f32 %v12279_v4, %v12388_v44  ;;  %v3138_v59 = vmul.f32 %v12333_v20, %v12389_v30  ;;  %v3139_v36 = vmul.f32 %v12232_v25, %v12389_v30  ;;  %v12392_v30 = vld [vmem:[#allocation79_spill] sm:$0xff] }
 0x1db   :  { %v5642_v63 = vpop.eup %5641  ;;  %v1328_v55 = vmul.f32 %v5640_v28, %v8303_v37  ;;  %v3006_v39 = vadd.f32 %v2974_v27, %v12390_v7  ;;  %v3007_v12 = vadd.f32 %v2975_v18, %v12390_v7  ;;  %v1737_v11 = vadd.f32 %v1705_v35, %v1655_v13 }
 0x1dc   :  { %v1329_v16 = vmul.f32 %v5642_v63, %v8309_v19  ;;  %v1738_v53 = vadd.f32 %v1706_v6, %v1656_v38  ;;  %v3220_v3 = vmul.f32 %v12233_v23, %v12391_v17  ;;  %v3221_v28 = vmul.f32 %v12335_v21, %v12391_v17  ;;  %v12393_v63 = vld [vmem:[#allocation43_spill] sm:$0xff]  ;;  %v12394_v38 = vld [vmem:[#allocation44_spill] sm:$0xff] }
 0x1dd   :  { %v1360_v44 = vadd.f32 %v1328_v55, %v8303_v37  ;;  %v3088_v20 = vadd.f32 %v3056_v14, %v3006_v39  ;;  %v3089_v4 = vadd.f32 %v3057_v26, %v3007_v12  ;;  %v8389_v18 = vmul.f32 0.5, %v1737_v11  ;;  %v12395_v37 = vld [vmem:[#allocation133_spill] sm:$0xff]  ;;  %v12396_v14 = vld [vmem:[#allocation63_spill] sm:$0xff] }
 0x1de   :  { %v1361_v27 = vadd.f32 %v1329_v16, %v8309_v19  ;;  %v8391_v7 = vmul.f32 0.5, %v1738_v53  ;;  %v2469_v13 = vmul.f32 %v12393_v63, %v12392_v30  ;;  %v2470_v23 = vmul.f32 %v12394_v38, %v12392_v30  ;;  %v12397_v19 = vld [vmem:[#allocation10_spill] sm:$0xff]  ;;  %v12398_v16 = vld [vmem:[#allocation64_spill] sm:$0xff] }
 0x1df   :  { %v3170_v6 = vadd.f32 %v3138_v59, %v3088_v20  ;;  %v3171_v35 = vadd.f32 %v3139_v36, %v3089_v4  ;;  %v2551_v12 = vmul.f32 %v12396_v14, %v12395_v37  ;;  %5651 = vtanh.f32 %v8389_v18  ;;  %v12400_v14 = vld [vmem:[#allocation71_spill] sm:$0xff] }
 0x1e0   :  { %v5644_v39 = vpop.eup %5643  ;;  %v1400_v26 = vadd.f32 %v1361_v27, %v1360_v44  ;;  %v2501_v55 = vadd.f32 %v2469_v13, %v12397_v19  ;;  %v2552_v11 = vmul.f32 %v12398_v16, %v12395_v37  ;;  %5653 = vtanh.f32 %v8391_v7  ;;  %v12399_v27 = vld [vmem:[#allocation75_spill] sm:$0xff] }
 0x1e1   :  { %v5646_v53 = vpop.eup %5645  ;;  %v821_v17 = vmul.f32 %v5644_v39, %v8331_v1  ;;  %v3252_v4 = vadd.f32 %v3220_v3, %v3170_v6  ;;  %v3253_v36 = vadd.f32 %v3221_v28, %v3171_v35  ;;  %v2502_v59 = vadd.f32 %v2470_v23, %v12397_v19  ;;  %v12401_v39 = vld [vmem:[#allocation72_spill] sm:$0xff]  ;;  %v12403_v23 = vld [vmem:[#allocation110_spill] sm:$0xff] }
 0x1e2   :  { %1401 = vadd.xlane.f32.xlu0 %v1400_v26  ;;  %v822_v20 = vmul.f32 %v5646_v53, %v8336_v42  ;;  %v2583_v44 = vadd.f32 %v2551_v12, %v2501_v55  ;;  %v2633_v38 = vmul.f32 %v12400_v14, %v12399_v27  ;;  %v2634_v21 = vmul.f32 %v12401_v39, %v12399_v27  ;;  %v12402_v26 = vld [vmem:[#allocation76_spill] sm:$0xff] }
 0x1e3   :  { %v853_v13 = vadd.f32 %v821_v17, %v8331_v1  ;;  %v8410_v63 = vmul.f32 0.5, %v3252_v4  ;;  %v8412_v16 = vmul.f32 0.5, %v3253_v36  ;;  %v2584_v6 = vadd.f32 %v2552_v11, %v2502_v59  ;;  %v12404_v1 = vld [vmem:[#allocation111_spill] sm:$0xff]  ;;  %v12405_v4 = vld [vmem:[#allocation74_spill] sm:$0xff] }
 0x1e4   :  { %v5648_v3 = vpop.eup %5647  ;;  %v854_v28 = vadd.f32 %v822_v20, %v8336_v42  ;;  %v2665_v35 = vadd.f32 %v2633_v38, %v2583_v44  ;;  %v2715_v12 = vmul.f32 %v12403_v23, %v12402_v26  ;;  %v2716_v17 = vmul.f32 %v12404_v1, %v12402_v26  ;;  %v12406_v20 = vld [vmem:[#allocation94_spill] sm:$0xff]  ;;  %v12407_v44 = vld [vmem:[#allocation3_spill] sm:$0xff] }
 0x1e5   :  { %v5650_v55 = vpop.eup %5649  ;;  %v2338_v53 = vmul.f32 %v5648_v3, %v8347_v62  ;;  %5655 = vtanh.f32 %v8410_v63  ;;  %v3984_v36 = vmul.f32 %v8168_v45, %v12405_v4  ;;  %v2666_v42 = vadd.f32 %v2634_v21, %v2584_v6  ;;  %v12408_v26 = vld [vmem:[#allocation126_spill] sm:$0xff]  ;;  %v12409_v45 = vld [vmem:[#allocation136_spill] sm:$0xff] }
 0x1e6   :  { %v893_v39 = vadd.f32 %v854_v28, %v853_v13  ;;  %v2339_v14 = vmul.f32 %v5650_v55, %v8351_v61  ;;  %5657 = vtanh.f32 %v8412_v16  ;;  %v2747_v11 = vadd.f32 %v2715_v12, %v2665_v35  ;;  %v12410_v28 = vld [vmem:[#allocation137_spill] sm:$0xff] }
 0x1e7   :  { %v2370_v38 = vadd.f32 %v2338_v53, %v8347_v62  ;;  %v3985_v59 = vmul.f32 %v12406_v20, %v12405_v4  ;;  %v4016_v3 = vadd.f32 %v3984_v36, %v12407_v44  ;;  %v2748_v23 = vadd.f32 %v2716_v17, %v2666_v42  ;;  %v12411_v62 = vld [vmem:[#allocation124_spill] sm:$0xff]  ;;  %v12413_v4 = vld [vmem:[#allocation73_spill] sm:$0xff]  ;;  %v12414_v36 = vld [vmem:[#allocation123_spill] sm:$0xff] }
 0x1e8   :  { %894 = vadd.xlane.f32.xlu1 %v893_v39  ;;  %v2371_v1 = vadd.f32 %v2339_v14, %v8351_v61  ;;  %v4066_v13 = vmul.f32 %v12409_v45, %v12408_v26  ;;  %v4067_v55 = vmul.f32 %v12410_v28, %v12408_v26  ;;  %v8436_v25 = vmul.f32 0.5, %v2747_v11  ;;  %v12412_v14 = vld [vmem:[#allocation131_spill] sm:$0xff]  ;;  %v12424_v28 = vld [vmem:[#allocation85_spill] sm:$0xff] }
 0x1e9   :  { %v4017_v21 = vadd.f32 %v3985_v59, %v12407_v44  ;;  %v4148_v6 = vmul.f32 %v8204_v5, %v12411_v62  ;;  %v4149_v35 = vmul.f32 %v8211_v56, %v12411_v62  ;;  %v8443_v12 = vmul.f32 0.5, %v2748_v23  ;;  %v12415_v23 = vld [vmem:[#allocation173_spill] sm:$0xff]  ;;  %v12417_v59 = vld [vmem:[#allocation83_spill] sm:$0xff]  ;;  %v12418_v62 = vld [vmem:[#allocation6_spill] sm:$0xff] }
 0x1ea   :  { %v2408_v39 = vadd.f32 %v2371_v1, %v2370_v38  ;;  %v4098_v61 = vadd.f32 %v4066_v13, %v4016_v3  ;;  %v4230_v53 = vmul.f32 %v8218_v10, %v12412_v14  ;;  %5659 = vtanh.f32 %v8436_v25  ;;  %v12416_v38 = vld [vmem:[#allocation127_spill] sm:$0xff] }
 0x1eb   :  { %v4099_v26 = vadd.f32 %v4067_v55, %v4017_v21  ;;  %v4231_v17 = vmul.f32 %v8221_v22, %v12412_v14  ;;  %v3479_v42 = vmul.f32 %v12414_v36, %v12413_v4  ;;  %5661 = vtanh.f32 %v8443_v12  ;;  %v12419_v21 = vld [vmem:[#allocation84_spill] sm:$0xff]  ;;  %v12421_v10 = vld [vmem:[#allocation87_spill] sm:$0xff] }
 0x1ec   :  { %2409 = vadd.xlane.f32.xlu0 %v2408_v39  ;;  %v4180_v11 = vadd.f32 %v4148_v6, %v4098_v61  ;;  %v3480_v1 = vmul.f32 %v12415_v23, %v12413_v4  ;;  %v3561_v44 = vmul.f32 %v12417_v59, %v12416_v38  ;;  %v5652_v3 = vpop.eup %5651  ;;  %v3562_v14 = vmul.f32 %v12419_v21, %v12416_v38  ;;  %v12420_v22 = vld [vmem:[#allocation128_spill] sm:$0xff] }
 0x1ed   :  { %v4181_v13 = vadd.f32 %v4149_v35, %v4099_v26  ;;  %v3511_v55 = vadd.f32 %v3479_v42, %v12418_v62  ;;  %v3643_v36 = vmul.f32 %v12421_v10, %v12420_v22  ;;  %v5654_v39 = vpop.eup %5653  ;;  %v1833_v56 = vmul.f32 %v5652_v3, %v8389_v18  ;;  %v12422_v23 = vld [vmem:[#allocation88_spill] sm:$0xff]  ;;  %v12423_v42 = vld [vmem:[#allocation77_spill] sm:$0xff]  ;;  %v12425_v3 = vld [vmem:[#allocation86_spill] sm:$0xff] }
 0x1ee   :  { %v4262_v6 = vadd.f32 %v4230_v53, %v4180_v11  ;;  %v3512_v61 = vadd.f32 %v3480_v1, %v12418_v62  ;;  %v3644_v5 = vmul.f32 %v12422_v23, %v12420_v22  ;;  %v1834_v59 = vmul.f32 %v5654_v39, %v8391_v7  ;;  %v12426_v22 = vld [vmem:[#allocation96_spill] sm:$0xff] }
 0x1ef   :  { %v4263_v35 = vadd.f32 %v4231_v17, %v4181_v13  ;;  %v3593_v26 = vadd.f32 %v3561_v44, %v3511_v55  ;;  %v3725_v45 = vmul.f32 %v12424_v28, %v12423_v42  ;;  %v1865_v21 = vadd.f32 %v1833_v56, %v8389_v18  ;;  %v8479_v13 = vpop.permute.xlu1 %320  ;;  %v12428_v55 = vld [vmem:[#allocation140_spill] sm:$0xff] }
 0x1f0   :  { %v8470_v38 = vmul.f32 0.5, %v4262_v6  ;;  %v3594_v10 = vadd.f32 %v3562_v14, %v3512_v61  ;;  %v3726_v53 = vmul.f32 %v12425_v3, %v12423_v42  ;;  %v1866_v11 = vadd.f32 %v1834_v59, %v8391_v7  ;;  %12427 = vst [vmem:[#allocation102_spill] sm:$0xff] %v8479_v13  ;;  %v8488_v6 = vpop.permute.xlu0 %384 }
 0x1f1   :  { %v8475_v1 = vmul.f32 0.5, %v4263_v35  ;;  %v3675_v23 = vadd.f32 %v3643_v36, %v3593_v26  ;;  %v956_v17 = vmul.f32 %v12300_v40, %v12426_v22  ;;  %v957_v18 = vmul.f32 %v12301_v31, %v12426_v22  ;;  %12429 = vst [vmem:[#allocation103_spill] sm:$0xff] %v8488_v6  ;;  %v12430_v26 = vld [vmem:[#allocation24_spill] sm:$0xff] }
 0x1f2   :  { %v5656_v44 = vpop.eup %5655  ;;  %5663 = vtanh.f32 %v8470_v38  ;;  %v3676_v56 = vadd.f32 %v3644_v5, %v3594_v10  ;;  %v1038_v14 = vmul.f32 %v12302_v43, %v12428_v55  ;;  %v1904_v7 = vadd.f32 %v1866_v11, %v1865_v21 }
 0x1f3   :  { %v5658_v39 = vpop.eup %5657  ;;  %v3348_v59 = vmul.f32 %v5656_v44, %v8410_v63  ;;  %5665 = vtanh.f32 %v8475_v1  ;;  %v3757_v36 = vadd.f32 %v3725_v45, %v3675_v23  ;;  %v988_v5 = vadd.f32 %v956_v17, %v12430_v26 }
 0x1f4   :  { %v3349_v61 = vmul.f32 %v5658_v39, %v8412_v16  ;;  %v3758_v35 = vadd.f32 %v3726_v53, %v3676_v56  ;;  %v989_v10 = vadd.f32 %v957_v18, %v12430_v26  ;;  %1905 = vadd.xlane.f32.xlu1 %v1904_v7  ;;  %v1039_v21 = vmul.f32 %v12303_v47, %v12428_v55  ;;  %v12432_v18 = vld [vmem:[#allocation52_spill] sm:$0xff] }
 0x1f5   :  { %v3380_v31 = vadd.f32 %v3348_v59, %v8410_v63  ;;  %v8494_v43 = vmul.f32 0.5, %v3757_v36  ;;  %v1120_v45 = vmul.f32 %v12157_v46, %v8479_v13  ;;  %v1070_v53 = vadd.f32 %v1038_v14, %v988_v5  ;;  %v12431_v63 = vld [vmem:[#allocation51_spill] sm:$0xff] }
 0x1f6   :  { %v3381_v23 = vadd.f32 %v3349_v61, %v8412_v16  ;;  %v8501_v11 = vmul.f32 0.5, %v3758_v35  ;;  %v1121_v17 = vmul.f32 %v12158_v9, %v8479_v13  ;;  %v1071_v44 = vadd.f32 %v1039_v21, %v989_v10  ;;  %v12433_v10 = vld [vmem:[#allocation30_spill] sm:$0xff] }
 0x1f7   :  { %5667 = vtanh.f32 %v8494_v43  ;;  %v1202_v56 = vmul.f32 %v12431_v63, %v8488_v6  ;;  %v1203_v39 = vmul.f32 %v12432_v18, %v8488_v6  ;;  %v5660_v7 = vpop.eup %5659  ;;  %v1152_v16 = vadd.f32 %v1120_v45, %v1070_v53 }
 0x1f8   :  { %v3416_v59 = vadd.f32 %v3381_v23, %v3380_v31  ;;  %5669 = vtanh.f32 %v8501_v11  ;;  %v449_v14 = vmul.f32 %v12367_v51, %v12426_v22  ;;  %v5662_v36 = vpop.eup %5661  ;;  %v2843_v61 = vmul.f32 %v5660_v7, %v8436_v25 }
 0x1f9   :  { %v1153_v35 = vadd.f32 %v1121_v17, %v1071_v44  ;;  %v450_v5 = vmul.f32 %v12368_v33, %v12426_v22  ;;  %v531_v21 = vmul.f32 %v12433_v10, %v12428_v55  ;;  %v2844_v18 = vmul.f32 %v5662_v36, %v8443_v12  ;;  %v12434_v44 = vld [vmem:[#allocation41_spill] sm:$0xff] }
 0x1fa   :  { %3417 = vadd.xlane.f32.xlu0 %v3416_v59  ;;  %v1234_v31 = vadd.f32 %v1202_v56, %v1152_v16  ;;  %v481_v23 = vadd.f32 %v449_v14, %v12430_v26  ;;  %v532_v45 = vmul.f32 %v12370_v8, %v12428_v55  ;;  %v2875_v53 = vadd.f32 %v2843_v61, %v8436_v25 }
 0x1fb   :  { %v1235_v51 = vadd.f32 %v1203_v39, %v1153_v35  ;;  %v482_v17 = vadd.f32 %v450_v5, %v12430_v26  ;;  %v613_v7 = vmul.f32 %v12434_v44, %v8479_v13  ;;  %v2876_v22 = vadd.f32 %v2844_v18, %v8443_v12 }
 0x1fc   :  { %v8527_v10 = vmul.f32 0.5, %v1234_v31  ;;  %v563_v59 = vadd.f32 %v531_v21, %v481_v23  ;;  %v614_v56 = vmul.f32 %v12372_v50, %v8479_v13  ;;  %v695_v25 = vmul.f32 %v12373_v58, %v8488_v6 }
 0x1fd   :  { %v8531_v16 = vmul.f32 0.5, %v1235_v51  ;;  %v564_v14 = vadd.f32 %v532_v45, %v482_v17  ;;  %v696_v39 = vmul.f32 %v12374_v32, %v8488_v6  ;;  %v2912_v36 = vadd.f32 %v2876_v22, %v2875_v53  ;;  %v12435_v45 = vld [vmem:[#allocation39_spill] sm:$0xff]  ;;  %v12441_v6 = vld [vmem:[#allocation36_spill] sm:$0xff] }
 0x1fe   :  { %5671 = vtanh.f32 %v8527_v10  ;;  %v645_v61 = vadd.f32 %v613_v7, %v563_v59  ;;  %v1966_v12 = vmul.f32 %v12313_v0, %v12280_v34  ;;  %v1967_v51 = vmul.f32 %v12314_v41, %v12280_v34 }
 0x1ff   :  { %v5664_v18 = vpop.eup %5663  ;;  %5673 = vtanh.f32 %v8531_v16  ;;  %v646_v35 = vadd.f32 %v614_v56, %v564_v14  ;;  %v2048_v5 = vmul.f32 %v12316_v54, %v12379_v49  ;;  %2913 = vadd.xlane.f32.xlu1 %v2912_v36  ;;  %v2049_v53 = vmul.f32 %v12435_v45, %v12379_v49 }
 0x200   :  { %v5666_v21 = vpop.eup %5665  ;;  %v4358_v22 = vmul.f32 %v5664_v18, %v8470_v38  ;;  %v727_v31 = vadd.f32 %v695_v25, %v645_v61  ;;  %v1998_v23 = vadd.f32 %v1966_v12, %v12378_v2  ;;  %v1999_v59 = vadd.f32 %v1967_v51, %v12378_v2  ;;  %v12440_v2 = vld [vmem:[#allocation139_spill] sm:$0xff] }
 0x201   :  { %v4359_v17 = vmul.f32 %v5666_v21, %v8475_v1  ;;  %v728_v7 = vadd.f32 %v696_v39, %v646_v35  ;;  %v2130_v56 = vmul.f32 %v12320_v60, %v12382_v29  ;;  %v2131_v25 = vmul.f32 %v12321_v48, %v12382_v29  ;;  %v12436_v39 = vld [vmem:[#allocation67_spill] sm:$0xff] }
 0x202   :  { %v4390_v14 = vadd.f32 %v4358_v22, %v8470_v38  ;;  %v8554_v34 = vmul.f32 0.5, %v727_v31  ;;  %v2080_v36 = vadd.f32 %v2048_v5, %v1998_v23  ;;  %v2081_v18 = vadd.f32 %v2049_v53, %v1999_v59  ;;  %v12437_v22 = vld [vmem:[#allocation97_spill] sm:$0xff]  ;;  %v12438_v59 = vld [vmem:[#allocation23_spill] sm:$0xff] }
 0x203   :  { %v4391_v61 = vadd.f32 %v4359_v17, %v8475_v1  ;;  %v8559_v12 = vmul.f32 0.5, %v728_v7  ;;  %v2212_v35 = vmul.f32 %v12436_v39, %v12385_v24  ;;  %v2213_v38 = vmul.f32 %v12324_v57, %v12385_v24 }
 0x204   :  { %v5668_v51 = vpop.eup %5667  ;;  %5675 = vtanh.f32 %v8554_v34  ;;  %v2162_v21 = vadd.f32 %v2130_v56, %v2080_v36  ;;  %v1461_v5 = vmul.f32 %v12376_v15, %v12437_v22  ;;  %v2163_v53 = vadd.f32 %v2131_v25, %v2081_v18  ;;  %v12439_v56 = vld [vmem:[#allocation25_spill] sm:$0xff] }
 0x205   :  { %v5670_v31 = vpop.eup %5669  ;;  %v4424_v23 = vadd.f32 %v4391_v61, %v4390_v14  ;;  %v3853_v1 = vmul.f32 %v5668_v51, %v8494_v43  ;;  %5677 = vtanh.f32 %v8559_v12  ;;  %v1462_v29 = vmul.f32 %v12438_v59, %v12437_v22  ;;  %v12442_v61 = vld [vmem:[#allocation37_spill] sm:$0xff] }
 0x206   :  { %v3854_v17 = vmul.f32 %v5670_v31, %v8501_v11  ;;  %v2244_v7 = vadd.f32 %v2212_v35, %v2162_v21  ;;  %v1493_v36 = vadd.f32 %v1461_v5, %v12439_v56  ;;  %v2245_v49 = vadd.f32 %v2213_v38, %v2163_v53  ;;  %v12443_v21 = vld [vmem:[#allocation100_spill] sm:$0xff]  ;;  %v12444_v31 = vld [vmem:[#allocation55_spill] sm:$0xff]  ;;  %v12447_v53 = vld [vmem:[#allocation61_spill] sm:$0xff] }
 0x207   :  { %4425 = vadd.xlane.f32.xlu0 %v4424_v23  ;;  %v3885_v24 = vadd.f32 %v3853_v1, %v8494_v43  ;;  %v1543_v14 = vmul.f32 %v12441_v6, %v12440_v2  ;;  %v1544_v51 = vmul.f32 %v12442_v61, %v12440_v2  ;;  %v1494_v35 = vadd.f32 %v1462_v29, %v12439_v56  ;;  %v12445_v43 = vld [vmem:[#allocation56_spill] sm:$0xff]  ;;  %v12446_v1 = vld [vmem:[#allocation101_spill] sm:$0xff] }
 0x208   :  { %v3886_v25 = vadd.f32 %v3854_v17, %v8501_v11  ;;  %v8580_v18 = vmul.f32 0.5, %v2244_v7  ;;  %v1625_v13 = vmul.f32 %v12444_v31, %v12443_v21  ;;  %v8585_v5 = vmul.f32 0.5, %v2245_v49  ;;  %v12448_v17 = vld [vmem:[#allocation62_spill] sm:$0xff]  ;;  %v12449_v49 = vld [vmem:[#allocation57_spill] sm:$0xff] }
 0x209   :  { %v1575_v23 = vadd.f32 %v1543_v14, %v1493_v36  ;;  %v1626_v38 = vmul.f32 %v12445_v43, %v12443_v21  ;;  %v1707_v26 = vmul.f32 %v12447_v53, %v12446_v1  ;;  %v1576_v11 = vadd.f32 %v1544_v51, %v1494_v35  ;;  %v12450_v51 = vld [vmem:[#allocation69_spill] sm:$0xff] }
 0x20a   :  { %v3920_v6 = vadd.f32 %v3886_v25, %v3885_v24  ;;  %5679 = vtanh.f32 %v8580_v18  ;;  %v1708_v7 = vmul.f32 %v12448_v17, %v12446_v1  ;;  %v2976_v36 = vmul.f32 %v12449_v49, %v12392_v30  ;;  %v12451_v17 = vld [vmem:[#allocation70_spill] sm:$0xff] }
 0x20b   :  { %v5672_v29 = vpop.eup %5671  ;;  %5681 = vtanh.f32 %v8585_v5  ;;  %v1657_v31 = vadd.f32 %v1625_v13, %v1575_v23  ;;  %v2977_v14 = vmul.f32 %v12328_v52, %v12392_v30  ;;  %v1658_v25 = vadd.f32 %v1626_v38, %v1576_v11  ;;  %v12453_v38 = vld [vmem:[#allocation118_spill] sm:$0xff] }
 0x20c   :  { %v5674_v43 = vpop.eup %5673  ;;  %3921 = vadd.xlane.f32.xlu1 %v3920_v6  ;;  %v1330_v24 = vmul.f32 %v5672_v29, %v8527_v10  ;;  %v3058_v35 = vmul.f32 %v12450_v51, %v12395_v37  ;;  %v3059_v53 = vmul.f32 %v12451_v17, %v12395_v37  ;;  %v3008_v23 = vadd.f32 %v2976_v36, %v12397_v19  ;;  %v12452_v6 = vld [vmem:[#allocation117_spill] sm:$0xff] }
 0x20d   :  { %v1331_v61 = vmul.f32 %v5674_v43, %v8531_v16  ;;  %v1739_v13 = vadd.f32 %v1707_v26, %v1657_v31  ;;  %v3009_v49 = vadd.f32 %v2977_v14, %v12397_v19  ;;  %v1740_v52 = vadd.f32 %v1708_v7, %v1658_v25  ;;  %v12454_v31 = vld [vmem:[#allocation76_spill] sm:$0xff]  ;;  %v12455_v36 = vld [vmem:[#allocation153_spill] sm:$0xff]  ;;  %v12458_v25 = vld [vmem:[#allocation43_spill] sm:$0xff] }
 0x20e   :  { %v1362_v30 = vadd.f32 %v1330_v24, %v8527_v10  ;;  %v3140_v29 = vmul.f32 %v12452_v6, %v12399_v27  ;;  %v3141_v11 = vmul.f32 %v12453_v38, %v12399_v27  ;;  %v3090_v37 = vadd.f32 %v3058_v35, %v3008_v23  ;;  %v12456_v10 = vld [vmem:[#allocation154_spill] sm:$0xff]  ;;  %v12460_v35 = vld [vmem:[#allocation15_spill] sm:$0xff] }
 0x20f   :  { %v1363_v51 = vadd.f32 %v1331_v61, %v8531_v16  ;;  %v8613_v55 = vmul.f32 0.5, %v1739_v13  ;;  %v3091_v43 = vadd.f32 %v3059_v53, %v3009_v49  ;;  %v8615_v26 = vmul.f32 0.5, %v1740_v52  ;;  %v12457_v24 = vld [vmem:[#allocation90_spill] sm:$0xff]  ;;  %v12459_v52 = vld [vmem:[#allocation44_spill] sm:$0xff] }
 0x210   :  { %v3222_v14 = vmul.f32 %v12455_v36, %v12454_v31  ;;  %v3223_v7 = vmul.f32 %v12456_v10, %v12454_v31  ;;  %v2471_v19 = vmul.f32 %v12458_v25, %v12457_v24  ;;  %v3172_v16 = vadd.f32 %v3140_v29, %v3090_v37  ;;  %v12465_v36 = vld [vmem:[#allocation71_spill] sm:$0xff] }
 0x211   :  { %v5676_v6 = vpop.eup %5675  ;;  %v1403_v17 = vadd.f32 %v1363_v51, %v1362_v30  ;;  %5683 = vtanh.f32 %v8613_v55  ;;  %v3173_v61 = vadd.f32 %v3141_v11, %v3091_v43  ;;  %v2472_v49 = vmul.f32 %v12459_v52, %v12457_v24  ;;  %v12461_v30 = vld [vmem:[#allocation134_spill] sm:$0xff]  ;;  %v12462_v51 = vld [vmem:[#allocation63_spill] sm:$0xff]  ;;  %v12464_v43 = vld [vmem:[#allocation81_spill] sm:$0xff] }
 0x212   :  { %v5678_v13 = vpop.eup %5677  ;;  %v823_v53 = vmul.f32 %v5676_v6, %v8554_v34  ;;  %5685 = vtanh.f32 %v8615_v26  ;;  %v2503_v23 = vadd.f32 %v2471_v19, %v12460_v35  ;;  %v3254_v27 = vadd.f32 %v3222_v14, %v3172_v16  ;;  %v12463_v6 = vld [vmem:[#allocation64_spill] sm:$0xff] }
 0x213   :  { %1404 = vadd.xlane.f32.xlu0 %v1403_v17  ;;  %v824_v31 = vmul.f32 %v5678_v13, %v8559_v12  ;;  %v3255_v25 = vadd.f32 %v3223_v7, %v3173_v61  ;;  %v2553_v10 = vmul.f32 %v12462_v51, %v12461_v30  ;;  %v2504_v29 = vadd.f32 %v2472_v49, %v12460_v35  ;;  %v12466_v16 = vld [vmem:[#allocation72_spill] sm:$0xff]  ;;  %v12469_v51 = vld [vmem:[#allocation111_spill] sm:$0xff] }
 0x214   :  { %v855_v37 = vadd.f32 %v823_v53, %v8554_v34  ;;  %v2554_v11 = vmul.f32 %v12463_v6, %v12461_v30  ;;  %v2635_v52 = vmul.f32 %v12465_v36, %v12464_v43  ;;  %v8639_v17 = vmul.f32 0.5, %v3254_v27  ;;  %v12467_v34 = vld [vmem:[#allocation82_spill] sm:$0xff]  ;;  %v12470_v27 = vld [vmem:[#allocation93_spill] sm:$0xff] }
 0x215   :  { %v856_v19 = vadd.f32 %v824_v31, %v8559_v12  ;;  %v8641_v13 = vmul.f32 0.5, %v3255_v25  ;;  %v2585_v14 = vadd.f32 %v2553_v10, %v2503_v23  ;;  %v2636_v61 = vmul.f32 %v12466_v16, %v12464_v43  ;;  %v12468_v53 = vld [vmem:[#allocation110_spill] sm:$0xff]  ;;  %v12473_v16 = vld [vmem:[#allocation137_spill] sm:$0xff] }
 0x216   :  { %v2586_v7 = vadd.f32 %v2554_v11, %v2504_v29  ;;  %v2717_v49 = vmul.f32 %v12468_v53, %v12467_v34  ;;  %v2718_v6 = vmul.f32 %v12469_v51, %v12467_v34  ;;  %5687 = vtanh.f32 %v8639_v17 }
 0x217   :  { %v5680_v38 = vpop.eup %5679  ;;  %v896_v30 = vadd.f32 %v856_v19, %v855_v37  ;;  %v2667_v12 = vadd.f32 %v2635_v52, %v2585_v14  ;;  %v3986_v31 = vmul.f32 %v12470_v27, %v12413_v4  ;;  %5689 = vtanh.f32 %v8641_v13  ;;  %v12471_v19 = vld [vmem:[#allocation127_spill] sm:$0xff]  ;;  %v12472_v52 = vld [vmem:[#allocation136_spill] sm:$0xff] }
 0x218   :  { %v5682_v25 = vpop.eup %5681  ;;  %v2340_v10 = vmul.f32 %v5680_v38, %v8580_v18  ;;  %v2668_v23 = vadd.f32 %v2636_v61, %v2586_v7  ;;  %v3987_v29 = vmul.f32 %v12406_v20, %v12413_v4  ;;  %v4068_v14 = vmul.f32 %v12472_v52, %v12471_v19  ;;  %v12476_v52 = vld [vmem:[#allocation95_spill] sm:$0xff] }
 0x219   :  { %897 = vadd.xlane.f32.xlu1 %v896_v30  ;;  %v2341_v11 = vmul.f32 %v5682_v25, %v8585_v5  ;;  %v2749_v51 = vadd.f32 %v2717_v49, %v2667_v12  ;;  %v4018_v37 = vadd.f32 %v3986_v31, %v12418_v62  ;;  %v4069_v7 = vmul.f32 %v12473_v16, %v12471_v19  ;;  %v12474_v25 = vld [vmem:[#allocation128_spill] sm:$0xff]  ;;  %v12475_v49 = vld [vmem:[#allocation138_spill] sm:$0xff] }
 0x21a   :  { %v2372_v27 = vadd.f32 %v2340_v10, %v8580_v18  ;;  %v2750_v53 = vadd.f32 %v2718_v6, %v2668_v23  ;;  %v4019_v38 = vadd.f32 %v3987_v29, %v12418_v62  ;;  %v4150_v12 = vmul.f32 %v12475_v49, %v12474_v25  ;;  %v12477_v6 = vld [vmem:[#allocation98_spill] sm:$0xff] }
 0x21b   :  { %v2373_v61 = vadd.f32 %v2341_v11, %v8585_v5  ;;  %v8665_v4 = vmul.f32 0.5, %v2749_v51  ;;  %v4100_v30 = vadd.f32 %v4068_v14, %v4018_v37  ;;  %v4151_v18 = vmul.f32 %v12476_v52, %v12474_v25  ;;  %v12478_v5 = vld [vmem:[#allocation99_spill] sm:$0xff]  ;;  %v12481_v14 = vld [vmem:[#allocation173_spill] sm:$0xff]  ;;  %v12482_v25 = vld [vmem:[#allocation132_spill] sm:$0xff] }
 0x21c   :  { %v8669_v31 = vmul.f32 0.5, %v2750_v53  ;;  %v4101_v20 = vadd.f32 %v4069_v7, %v4019_v38  ;;  %v4232_v62 = vmul.f32 %v12477_v6, %v12423_v42  ;;  %v4233_v51 = vmul.f32 %v12478_v5, %v12423_v42  ;;  %v12479_v53 = vld [vmem:[#allocation80_spill] sm:$0xff]  ;;  %v12480_v37 = vld [vmem:[#allocation123_spill] sm:$0xff] }
 0x21d   :  { %v2411_v10 = vadd.f32 %v2373_v61, %v2372_v27  ;;  %5691 = vtanh.f32 %v8665_v4  ;;  %v4182_v23 = vadd.f32 %v4150_v12, %v4100_v30  ;;  %v3481_v19 = vmul.f32 %v12480_v37, %v12479_v53  ;;  %v12483_v30 = vld [vmem:[#allocation83_spill] sm:$0xff]  ;;  %v12484_v42 = vld [vmem:[#allocation84_spill] sm:$0xff] }
 0x21e   :  { %v5684_v29 = vpop.eup %5683  ;;  %5693 = vtanh.f32 %v8669_v31  ;;  %v4183_v11 = vadd.f32 %v4151_v18, %v4101_v20  ;;  %v3482_v38 = vmul.f32 %v12481_v14, %v12479_v53  ;;  %v3563_v12 = vmul.f32 %v12483_v30, %v12482_v25  ;;  %v12485_v18 = vld [vmem:[#allocation11_spill] sm:$0xff] }
 0x21f   :  { %v5686_v7 = vpop.eup %5685  ;;  %2412 = vadd.xlane.f32.xlu0 %v2411_v10  ;;  %v1835_v27 = vmul.f32 %v5684_v29, %v8613_v55  ;;  %v4264_v61 = vadd.f32 %v4232_v62, %v4182_v23  ;;  %v3564_v5 = vmul.f32 %v12484_v42, %v12482_v25  ;;  %v3513_v52 = vadd.f32 %v3481_v19, %v12485_v18  ;;  %v12486_v10 = vld [vmem:[#allocation125_spill] sm:$0xff]  ;;  %v12487_v29 = vld [vmem:[#allocation87_spill] sm:$0xff]  ;;  %v12488_v23 = vld [vmem:[#allocation88_spill] sm:$0xff] }
 0x220   :  { %v1836_v6 = vmul.f32 %v5686_v7, %v8615_v26  ;;  %v4265_v20 = vadd.f32 %v4233_v51, %v4183_v11  ;;  %v3514_v37 = vadd.f32 %v3482_v38, %v12485_v18  ;;  %v3645_v62 = vmul.f32 %v12487_v29, %v12486_v10  ;;  %v12489_v11 = vld [vmem:[#allocation78_spill] sm:$0xff]  ;;  %v12490_v38 = vld [vmem:[#allocation107_spill] sm:$0xff]  ;;  %v8708_v29 = vpop.permute.xlu1 %324 }
 0x221   :  { %v1867_v14 = vadd.f32 %v1835_v27, %v8613_v55  ;;  %v8692_v49 = vmul.f32 0.5, %v4264_v61  ;;  %v3646_v30 = vmul.f32 %v12488_v23, %v12486_v10  ;;  %v3595_v7 = vadd.f32 %v3563_v12, %v3513_v52  ;;  %12491 = vst [vmem:[#allocation108_spill] sm:$0xff] %v8708_v29 }
 0x222   :  { %v1868_v16 = vadd.f32 %v1836_v6, %v8615_v26  ;;  %v8699_v42 = vmul.f32 0.5, %v4265_v20  ;;  %v3596_v51 = vadd.f32 %v3564_v5, %v3514_v37  ;;  %v3727_v19 = vmul.f32 %v12424_v28, %v12489_v11  ;;  %v12492_v37 = vld [vmem:[#allocation19_spill] sm:$0xff]  ;;  %v12493_v20 = vld [vmem:[#allocation33_spill] sm:$0xff] }
 0x223   :  { %5695 = vtanh.f32 %v8692_v49  ;;  %v3728_v55 = vmul.f32 %v12425_v3, %v12489_v11  ;;  %v958_v27 = vmul.f32 %v12300_v40, %v12490_v38  ;;  %v5688_v61 = vpop.eup %5687  ;;  %v3677_v26 = vadd.f32 %v3645_v62, %v3595_v7  ;;  %v12494_v3 = vld [vmem:[#allocation104_spill] sm:$0xff]  ;;  %v12495_v11 = vld [vmem:[#allocation34_spill] sm:$0xff]  ;;  %v8717_v40 = vpop.permute.xlu0 %388 }
 0x224   :  { %v1907_v23 = vadd.f32 %v1868_v16, %v1867_v14  ;;  %5697 = vtanh.f32 %v8699_v42  ;;  %v3678_v52 = vadd.f32 %v3646_v30, %v3596_v51  ;;  %v5690_v6 = vpop.eup %5689  ;;  %v3350_v5 = vmul.f32 %v5688_v61, %v8639_v17  ;;  %12496 = vst [vmem:[#allocation109_spill] sm:$0xff] %v8717_v40 }
 0x225   :  { %v959_v12 = vmul.f32 %v12492_v37, %v12490_v38  ;;  %v990_v28 = vadd.f32 %v958_v27, %v12493_v20  ;;  %v1040_v10 = vmul.f32 %v12495_v11, %v12494_v3  ;;  %v3351_v16 = vmul.f32 %v5690_v6, %v8641_v13 }
 0x226   :  { %1908 = vadd.xlane.f32.xlu1 %v1907_v23  ;;  %v3759_v14 = vadd.f32 %v3727_v19, %v3677_v26  ;;  %v3760_v25 = vadd.f32 %v3728_v55, %v3678_v52  ;;  %v1041_v30 = vmul.f32 %v12303_v47, %v12494_v3  ;;  %v3382_v62 = vadd.f32 %v3350_v5, %v8639_v17  ;;  %v12497_v52 = vld [vmem:[#allocation52_spill] sm:$0xff] }
 0x227   :  { %v991_v7 = vadd.f32 %v959_v12, %v12493_v20  ;;  %v1072_v51 = vadd.f32 %v1040_v10, %v990_v28  ;;  %v1122_v27 = vmul.f32 %v12157_v46, %v8708_v29  ;;  %v3383_v61 = vadd.f32 %v3351_v16, %v8641_v13  ;;  %v12498_v13 = vld [vmem:[#allocation16_spill] sm:$0xff] }
 0x228   :  { %v8727_v11 = vmul.f32 0.5, %v3759_v14  ;;  %v8729_v23 = vmul.f32 0.5, %v3760_v25  ;;  %v1123_v19 = vmul.f32 %v12158_v9, %v8708_v29  ;;  %v1204_v17 = vmul.f32 %v12431_v63, %v8717_v40 }
 0x229   :  { %v1073_v55 = vadd.f32 %v1041_v30, %v991_v7  ;;  %v1154_v26 = vadd.f32 %v1122_v27, %v1072_v51  ;;  %v1205_v28 = vmul.f32 %v12497_v52, %v8717_v40  ;;  %v3419_v6 = vadd.f32 %v3383_v61, %v3382_v62  ;;  %v12499_v27 = vld [vmem:[#allocation30_spill] sm:$0xff] }
 0x22a   :  { %v5692_v10 = vpop.eup %5691  ;;  %5699 = vtanh.f32 %v8727_v11  ;;  %v451_v5 = vmul.f32 %v12498_v13, %v12490_v38  ;;  %v452_v25 = vmul.f32 %v12368_v33, %v12490_v38  ;;  %v533_v61 = vmul.f32 %v12499_v27, %v12494_v3 }
 0x22b   :  { %v5694_v12 = vpop.eup %5693  ;;  %v2845_v16 = vmul.f32 %v5692_v10, %v8665_v4  ;;  %5701 = vtanh.f32 %v8729_v23  ;;  %v1155_v14 = vadd.f32 %v1123_v19, %v1073_v55  ;;  %v1236_v30 = vadd.f32 %v1204_v17, %v1154_v26  ;;  %3420 = vadd.xlane.f32.xlu0 %v3419_v6 }
 0x22c   :  { %v2846_v7 = vmul.f32 %v5694_v12, %v8669_v31  ;;  %v483_v62 = vadd.f32 %v451_v5, %v12493_v20  ;;  %v484_v51 = vadd.f32 %v452_v25, %v12493_v20  ;;  %v534_v10 = vmul.f32 %v12370_v8, %v12494_v3 }
 0x22d   :  { %v2877_v13 = vadd.f32 %v2845_v16, %v8665_v4  ;;  %v1237_v38 = vadd.f32 %v1205_v28, %v1155_v14  ;;  %v8750_v33 = vmul.f32 0.5, %v1236_v30  ;;  %v615_v26 = vmul.f32 %v12434_v44, %v8708_v29 }
 0x22e   :  { %v2878_v19 = vadd.f32 %v2846_v7, %v8669_v31  ;;  %v565_v55 = vadd.f32 %v533_v61, %v483_v62  ;;  %v616_v17 = vmul.f32 %v12372_v50, %v8708_v29  ;;  %v566_v4 = vadd.f32 %v534_v10, %v484_v51 }
 0x22f   :  { %v8759_v6 = vmul.f32 0.5, %v1237_v38  ;;  %5703 = vtanh.f32 %v8750_v33  ;;  %v697_v28 = vmul.f32 %v12373_v58, %v8717_v40  ;;  %v698_v31 = vmul.f32 %v12374_v32, %v8717_v40 }
 0x230   :  { %v5696_v5 = vpop.eup %5695  ;;  %v2915_v25 = vadd.f32 %v2878_v19, %v2877_v13  ;;  %v647_v12 = vadd.f32 %v615_v26, %v565_v55  ;;  %v1968_v16 = vmul.f32 %v12313_v0, %v12437_v22  ;;  %v648_v38 = vadd.f32 %v616_v17, %v566_v4 }
 0x231   :  { %v5698_v14 = vpop.eup %5697  ;;  %v4360_v30 = vmul.f32 %v5696_v5, %v8692_v49  ;;  %5705 = vtanh.f32 %v8759_v6  ;;  %v1969_v7 = vmul.f32 %v12314_v41, %v12437_v22  ;;  %v2050_v61 = vmul.f32 %v12316_v54, %v12440_v2 }
 0x232   :  { %2916 = vadd.xlane.f32.xlu1 %v2915_v25  ;;  %v4361_v62 = vmul.f32 %v5698_v14, %v8699_v42  ;;  %v729_v13 = vadd.f32 %v697_v28, %v647_v12  ;;  %v2000_v51 = vadd.f32 %v1968_v16, %v12439_v56  ;;  %v730_v19 = vadd.f32 %v698_v31, %v648_v38 }
 0x233   :  { %v4392_v10 = vadd.f32 %v4360_v30, %v8692_v49  ;;  %v2001_v55 = vadd.f32 %v1969_v7, %v12439_v56  ;;  %v2051_v26 = vmul.f32 %v12435_v45, %v12440_v2  ;;  %v2132_v28 = vmul.f32 %v12320_v60, %v12443_v21  ;;  %v12500_v7 = vld [vmem:[#allocation96_spill] sm:$0xff] }
 0x234   :  { %v4393_v17 = vadd.f32 %v4361_v62, %v8699_v42  ;;  %v8781_v4 = vmul.f32 0.5, %v729_v13  ;;  %v2082_v5 = vadd.f32 %v2050_v61, %v2000_v51  ;;  %v8785_v25 = vmul.f32 0.5, %v730_v19  ;;  %v12501_v19 = vld [vmem:[#allocation140_spill] sm:$0xff] }
 0x235   :  { %v2083_v12 = vadd.f32 %v2051_v26, %v2001_v55  ;;  %v2133_v49 = vmul.f32 %v12321_v48, %v12443_v21  ;;  %v2214_v31 = vmul.f32 %v12436_v39, %v12446_v1  ;;  %v2215_v42 = vmul.f32 %v12324_v57, %v12446_v1  ;;  %v12502_v55 = vld [vmem:[#allocation36_spill] sm:$0xff] }
 0x236   :  { %v4427_v16 = vadd.f32 %v4393_v17, %v4392_v10  ;;  %5707 = vtanh.f32 %v8781_v4  ;;  %v2164_v14 = vadd.f32 %v2132_v28, %v2082_v5  ;;  %v1463_v62 = vmul.f32 %v12376_v15, %v12500_v7  ;;  %v12503_v17 = vld [vmem:[#allocation37_spill] sm:$0xff] }
 0x237   :  { %v5700_v30 = vpop.eup %5699  ;;  %5709 = vtanh.f32 %v8785_v25  ;;  %v2165_v38 = vadd.f32 %v2133_v49, %v2083_v12  ;;  %v1464_v13 = vmul.f32 %v12438_v59, %v12500_v7  ;;  %v1545_v26 = vmul.f32 %v12502_v55, %v12501_v19  ;;  %v12504_v49 = vld [vmem:[#allocation24_spill] sm:$0xff] }
 0x238   :  { %v5702_v51 = vpop.eup %5701  ;;  %4428 = vadd.xlane.f32.xlu0 %v4427_v16  ;;  %v3855_v61 = vmul.f32 %v5700_v30, %v8727_v11  ;;  %v2246_v10 = vadd.f32 %v2214_v31, %v2164_v14  ;;  %v1546_v5 = vmul.f32 %v12503_v17, %v12501_v19  ;;  %v1495_v1 = vadd.f32 %v1463_v62, %v12504_v49  ;;  %v12505_v16 = vld [vmem:[#allocation102_spill] sm:$0xff]  ;;  %v12506_v30 = vld [vmem:[#allocation55_spill] sm:$0xff]  ;;  %v12507_v14 = vld [vmem:[#allocation56_spill] sm:$0xff] }
 0x239   :  { %v3856_v28 = vmul.f32 %v5702_v51, %v8729_v23  ;;  %v2247_v12 = vadd.f32 %v2215_v42, %v2165_v38  ;;  %v1496_v21 = vadd.f32 %v1464_v13, %v12504_v49  ;;  %v1627_v31 = vmul.f32 %v12506_v30, %v12505_v16  ;;  %v12508_v62 = vld [vmem:[#allocation103_spill] sm:$0xff]  ;;  %v12509_v13 = vld [vmem:[#allocation61_spill] sm:$0xff] }
 0x23a   :  { %v3887_v56 = vadd.f32 %v3855_v61, %v8727_v11  ;;  %v8808_v2 = vmul.f32 0.5, %v2246_v10  ;;  %v1628_v22 = vmul.f32 %v12507_v14, %v12505_v16  ;;  %v1577_v51 = vadd.f32 %v1545_v26, %v1495_v1  ;;  %v12510_v61 = vld [vmem:[#allocation62_spill] sm:$0xff]  ;;  %v12511_v30 = vld [vmem:[#allocation57_spill] sm:$0xff] }
 0x23b   :  { %v3888_v40 = vadd.f32 %v3856_v28, %v8729_v23  ;;  %v8815_v29 = vmul.f32 0.5, %v2247_v12  ;;  %v1578_v42 = vadd.f32 %v1546_v5, %v1496_v21  ;;  %v1709_v11 = vmul.f32 %v12509_v13, %v12508_v62  ;;  %v12512_v26 = vld [vmem:[#allocation58_spill] sm:$0xff]  ;;  %v12514_v13 = vld [vmem:[#allocation69_spill] sm:$0xff] }
 0x23c   :  { %v5704_v38 = vpop.eup %5703  ;;  %5711 = vtanh.f32 %v8808_v2  ;;  %v1710_v10 = vmul.f32 %v12510_v61, %v12508_v62  ;;  %v2978_v17 = vmul.f32 %v12511_v30, %v12457_v24  ;;  %v1659_v23 = vadd.f32 %v1627_v31, %v1577_v51  ;;  %v12513_v12 = vld [vmem:[#allocation134_spill] sm:$0xff] }
 0x23d   :  { %v3923_v20 = vadd.f32 %v3888_v40, %v3887_v56  ;;  %v1332_v14 = vmul.f32 %v5704_v38, %v8750_v33  ;;  %5713 = vtanh.f32 %v8815_v29  ;;  %v1660_v21 = vadd.f32 %v1628_v22, %v1578_v42  ;;  %v12515_v38 = vld [vmem:[#allocation70_spill] sm:$0xff]  ;;  %v12516_v42 = vld [vmem:[#allocation117_spill] sm:$0xff] }
 0x23e   :  { %v5706_v1 = vpop.eup %5705  ;;  %v2979_v5 = vmul.f32 %v12512_v26, %v12457_v24  ;;  %v3010_v28 = vadd.f32 %v2978_v17, %v12460_v35  ;;  %v3060_v55 = vmul.f32 %v12514_v13, %v12513_v12  ;;  %v1741_v56 = vadd.f32 %v1709_v11, %v1659_v23 }
 0x23f   :  { %3924 = vadd.xlane.f32.xlu1 %v3923_v20  ;;  %v1333_v61 = vmul.f32 %v5706_v1, %v8759_v6  ;;  %v1364_v40 = vadd.f32 %v1332_v14, %v8750_v33  ;;  %v3061_v30 = vmul.f32 %v12515_v38, %v12513_v12  ;;  %v1742_v31 = vadd.f32 %v1710_v10, %v1660_v21  ;;  %v12517_v20 = vld [vmem:[#allocation118_spill] sm:$0xff]  ;;  %v12518_v33 = vld [vmem:[#allocation153_spill] sm:$0xff]  ;;  %v12522_v12 = vld [vmem:[#allocation44_spill] sm:$0xff] }
 0x240   :  { %v3011_v22 = vadd.f32 %v2979_v5, %v12460_v35  ;;  %v3092_v51 = vadd.f32 %v3060_v55, %v3010_v28  ;;  %v3142_v24 = vmul.f32 %v12516_v42, %v12464_v43  ;;  %v8839_v26 = vmul.f32 0.5, %v1741_v56  ;;  %v12519_v21 = vld [vmem:[#allocation154_spill] sm:$0xff] }
 0x241   :  { %v1365_v17 = vadd.f32 %v1333_v61, %v8759_v6  ;;  %v3143_v1 = vmul.f32 %v12517_v20, %v12464_v43  ;;  %v3224_v14 = vmul.f32 %v12518_v33, %v12467_v34  ;;  %v8845_v11 = vmul.f32 0.5, %v1742_v31  ;;  %v12520_v6 = vld [vmem:[#allocation89_spill] sm:$0xff]  ;;  %v12521_v61 = vld [vmem:[#allocation43_spill] sm:$0xff] }
 0x242   :  { %v3093_v23 = vadd.f32 %v3061_v30, %v3011_v22  ;;  %v3174_v10 = vadd.f32 %v3142_v24, %v3092_v51  ;;  %v3225_v55 = vmul.f32 %v12519_v21, %v12467_v34  ;;  %5715 = vtanh.f32 %v8839_v26  ;;  %v12523_v22 = vld [vmem:[#allocation14_spill] sm:$0xff]  ;;  %v12525_v34 = vld [vmem:[#allocation63_spill] sm:$0xff] }
 0x243   :  { %v5708_v5 = vpop.eup %5707  ;;  %v1406_v28 = vadd.f32 %v1365_v17, %v1364_v40  ;;  %v2473_v56 = vmul.f32 %v12521_v61, %v12520_v6  ;;  %v2474_v43 = vmul.f32 %v12522_v12, %v12520_v6  ;;  %5717 = vtanh.f32 %v8845_v11  ;;  %v12524_v17 = vld [vmem:[#allocation135_spill] sm:$0xff] }
 0x244   :  { %v5710_v35 = vpop.eup %5709  ;;  %v825_v33 = vmul.f32 %v5708_v5, %v8781_v4  ;;  %v3175_v30 = vadd.f32 %v3143_v1, %v3093_v23  ;;  %v3256_v24 = vadd.f32 %v3224_v14, %v3174_v10  ;;  %v2555_v61 = vmul.f32 %v12525_v34, %v12524_v17  ;;  %v12526_v5 = vld [vmem:[#allocation64_spill] sm:$0xff]  ;;  %v12527_v23 = vld [vmem:[#allocation91_spill] sm:$0xff] }
 0x245   :  { %1407 = vadd.xlane.f32.xlu0 %v1406_v28  ;;  %v826_v31 = vmul.f32 %v5710_v35, %v8785_v25  ;;  %v2505_v40 = vadd.f32 %v2473_v56, %v12523_v22  ;;  %v2506_v51 = vadd.f32 %v2474_v43, %v12523_v22  ;;  %v2556_v42 = vmul.f32 %v12526_v5, %v12524_v17  ;;  %v12528_v10 = vld [vmem:[#allocation72_spill] sm:$0xff] }
 0x246   :  { %v857_v21 = vadd.f32 %v825_v33, %v8781_v4  ;;  %v3257_v12 = vadd.f32 %v3225_v55, %v3175_v30  ;;  %v8862_v20 = vmul.f32 0.5, %v3256_v24  ;;  %v2637_v35 = vmul.f32 %v12465_v36, %v12527_v23  ;;  %v12529_v33 = vld [vmem:[#allocation92_spill] sm:$0xff]  ;;  %v12530_v55 = vld [vmem:[#allocation110_spill] sm:$0xff] }
 0x247   :  { %v858_v1 = vadd.f32 %v826_v31, %v8785_v25  ;;  %v2587_v14 = vadd.f32 %v2555_v61, %v2505_v40  ;;  %v2638_v43 = vmul.f32 %v12528_v10, %v12527_v23  ;;  %v2588_v4 = vadd.f32 %v2556_v42, %v2506_v51  ;;  %v12531_v25 = vld [vmem:[#allocation111_spill] sm:$0xff]  ;;  %v12532_v31 = vld [vmem:[#allocation93_spill] sm:$0xff]  ;;  %v12533_v42 = vld [vmem:[#allocation94_spill] sm:$0xff]  ;;  %v8936_v23 = vpop.permute.xlu1 %328 }
 0x248   :  { %v8871_v28 = vmul.f32 0.5, %v3257_v12  ;;  %5719 = vtanh.f32 %v8862_v20  ;;  %v2719_v56 = vmul.f32 %v12530_v55, %v12529_v33  ;;  %v2720_v61 = vmul.f32 %v12531_v25, %v12529_v33  ;;  %v12536_v33 = vld [vmem:[#allocation137_spill] sm:$0xff]  ;;  %12558 = vst [vmem:[#allocation141_spill] sm:$0xff] %v8936_v23 }
 0x249   :  { %v5712_v30 = vpop.eup %5711  ;;  %v899_v24 = vadd.f32 %v858_v1, %v857_v21  ;;  %v2669_v5 = vadd.f32 %v2637_v35, %v2587_v14  ;;  %v3988_v40 = vmul.f32 %v12532_v31, %v12479_v53  ;;  %v2670_v12 = vadd.f32 %v2638_v43, %v2588_v4  ;;  %v12534_v14 = vld [vmem:[#allocation132_spill] sm:$0xff] }
 0x24a   :  { %v5714_v36 = vpop.eup %5713  ;;  %v2342_v10 = vmul.f32 %v5712_v30, %v8808_v2  ;;  %5721 = vtanh.f32 %v8871_v28  ;;  %v3989_v51 = vmul.f32 %v12533_v42, %v12479_v53  ;;  %v12535_v35 = vld [vmem:[#allocation136_spill] sm:$0xff]  ;;  %v4071_v43 = vmul.f32 %v12536_v33, %v12534_v14 }
 0x24b   :  { %900 = vadd.xlane.f32.xlu1 %v899_v24  ;;  %v2343_v55 = vmul.f32 %v5714_v36, %v8815_v29  ;;  %v2751_v21 = vadd.f32 %v2719_v56, %v2669_v5  ;;  %v4020_v1 = vadd.f32 %v3988_v40, %v12485_v18  ;;  %v4070_v25 = vmul.f32 %v12535_v35, %v12534_v14  ;;  %v12537_v36 = vld [vmem:[#allocation125_spill] sm:$0xff]  ;;  %v12538_v5 = vld [vmem:[#allocation138_spill] sm:$0xff]  ;;  %v12539_v35 = vld [vmem:[#allocation95_spill] sm:$0xff] }
 0x24c   :  { %v2374_v31 = vadd.f32 %v2342_v10, %v8808_v2  ;;  %v2752_v34 = vadd.f32 %v2720_v61, %v2670_v12  ;;  %v4021_v30 = vadd.f32 %v3989_v51, %v12485_v18  ;;  %v4152_v56 = vmul.f32 %v12538_v5, %v12537_v36  ;;  %v12540_v10 = vld [vmem:[#allocation78_spill] sm:$0xff] }
 0x24d   :  { %v2375_v4 = vadd.f32 %v2343_v55, %v8815_v29  ;;  %v8893_v53 = vmul.f32 0.5, %v2751_v21  ;;  %v4102_v24 = vadd.f32 %v4070_v25, %v4020_v1  ;;  %v4153_v2 = vmul.f32 %v12539_v35, %v12537_v36  ;;  %v12541_v61 = vld [vmem:[#allocation98_spill] sm:$0xff]  ;;  %v12542_v29 = vld [vmem:[#allocation99_spill] sm:$0xff] }
 0x24e   :  { %v8897_v40 = vmul.f32 0.5, %v2752_v34  ;;  %v4103_v42 = vadd.f32 %v4071_v43, %v4021_v30  ;;  %v4234_v18 = vmul.f32 %v12541_v61, %v12540_v10  ;;  %v4235_v55 = vmul.f32 %v12542_v29, %v12540_v10  ;;  %v12543_v34 = vld [vmem:[#allocation79_spill] sm:$0xff]  ;;  %v12545_v30 = vld [vmem:[#allocation173_spill] sm:$0xff]  ;;  %v12548_v10 = vld [vmem:[#allocation84_spill] sm:$0xff] }
 0x24f   :  { %v2414_v12 = vadd.f32 %v2375_v4, %v2374_v31  ;;  %5723 = vtanh.f32 %v8893_v53  ;;  %v4184_v51 = vadd.f32 %v4152_v56, %v4102_v24  ;;  %v5716_v25 = vpop.eup %5715  ;;  %v12544_v1 = vld [vmem:[#allocation123_spill] sm:$0xff]  ;;  %v3484_v43 = vmul.f32 %v12545_v30, %v12543_v34  ;;  %v12546_v61 = vld [vmem:[#allocation133_spill] sm:$0xff] }
 0x250   :  { %5725 = vtanh.f32 %v8897_v40  ;;  %v4185_v21 = vadd.f32 %v4153_v2, %v4103_v42  ;;  %v3483_v14 = vmul.f32 %v12544_v1, %v12543_v34  ;;  %v5718_v36 = vpop.eup %5717  ;;  %v1837_v31 = vmul.f32 %v5716_v25, %v8839_v26  ;;  %v12547_v24 = vld [vmem:[#allocation83_spill] sm:$0xff]  ;;  %v12549_v2 = vld [vmem:[#allocation10_spill] sm:$0xff] }
 0x251   :  { %2415 = vadd.xlane.f32.xlu0 %v2414_v12  ;;  %v4266_v4 = vadd.f32 %v4234_v18, %v4184_v51  ;;  %v3565_v56 = vmul.f32 %v12547_v24, %v12546_v61  ;;  %v3566_v29 = vmul.f32 %v12548_v10, %v12546_v61  ;;  %v1838_v35 = vmul.f32 %v5718_v36, %v8845_v11  ;;  %v12550_v12 = vld [vmem:[#allocation75_spill] sm:$0xff]  ;;  %v12552_v51 = vld [vmem:[#allocation88_spill] sm:$0xff] }
 0x252   :  { %v4267_v42 = vadd.f32 %v4235_v55, %v4185_v21  ;;  %v3515_v5 = vadd.f32 %v3483_v14, %v12549_v2  ;;  %v3516_v1 = vadd.f32 %v3484_v43, %v12549_v2  ;;  %v1869_v30 = vadd.f32 %v1837_v31, %v8839_v26  ;;  %v12551_v25 = vld [vmem:[#allocation87_spill] sm:$0xff]  ;;  %v12553_v14 = vld [vmem:[#allocation76_spill] sm:$0xff]  ;;  %v12554_v43 = vld [vmem:[#allocation85_spill] sm:$0xff] }
 0x253   :  { %v8920_v33 = vmul.f32 0.5, %v4266_v4  ;;  %v3647_v18 = vmul.f32 %v12551_v25, %v12550_v12  ;;  %v3648_v24 = vmul.f32 %v12552_v51, %v12550_v12  ;;  %v1870_v34 = vadd.f32 %v1838_v35, %v8845_v11  ;;  %v12555_v31 = vld [vmem:[#allocation86_spill] sm:$0xff] }
 0x254   :  { %v8927_v10 = vmul.f32 0.5, %v4267_v42  ;;  %v3597_v36 = vadd.f32 %v3565_v56, %v3515_v5  ;;  %v3598_v55 = vadd.f32 %v3566_v29, %v3516_v1  ;;  %v3729_v26 = vmul.f32 %v12554_v43, %v12553_v14  ;;  %v12556_v2 = vld [vmem:[#allocation106_spill] sm:$0xff]  ;;  %v8940_v29 = vpop.permute.xlu0 %392  ;;  %v12560_v42 = vld [vmem:[#allocation32_spill] sm:$0xff]  ;;  %v12561_v43 = vld [vmem:[#allocation105_spill] sm:$0xff] }
 0x255   :  { %v5720_v21 = vpop.eup %5719  ;;  %5727 = vtanh.f32 %v8920_v33  ;;  %v3730_v4 = vmul.f32 %v12555_v31, %v12553_v14  ;;  %v12557_v25 = vld [vmem:[#allocation18_spill] sm:$0xff]  ;;  %v1910_v51 = vadd.f32 %v1870_v34, %v1869_v30  ;;  %12559 = vst [vmem:[#allocation142_spill] sm:$0xff] %v8940_v29  ;;  %v961_v56 = vmul.f32 %v12492_v37, %v12556_v2 }
 0x256   :  { %v960_v61 = vmul.f32 %v12557_v25, %v12556_v2  ;;  %v3352_v11 = vmul.f32 %v5720_v21, %v8862_v20  ;;  %5729 = vtanh.f32 %v8927_v10  ;;  %v3679_v35 = vadd.f32 %v3647_v18, %v3597_v36  ;;  %v12562_v14 = vld [vmem:[#allocation34_spill] sm:$0xff] }
 0x257   :  { %v5722_v5 = vpop.eup %5721  ;;  %v3680_v1 = vadd.f32 %v3648_v24, %v3598_v55  ;;  %v1042_v25 = vmul.f32 %v12562_v14, %v12561_v43  ;;  %1911 = vadd.xlane.f32.xlu1 %v1910_v51  ;;  %v1043_v18 = vmul.f32 %v12303_v47, %v12561_v43  ;;  %v993_v24 = vadd.f32 %v961_v56, %v12560_v42 }
 0x258   :  { %v992_v31 = vadd.f32 %v960_v61, %v12560_v42  ;;  %v3353_v34 = vmul.f32 %v5722_v5, %v8871_v28  ;;  %v3384_v30 = vadd.f32 %v3352_v11, %v8862_v20  ;;  %v3761_v21 = vadd.f32 %v3729_v26, %v3679_v35 }
 0x259   :  { %v3762_v36 = vadd.f32 %v3730_v4, %v3680_v1  ;;  %v1124_v37 = vmul.f32 %v12157_v46, %v8936_v23  ;;  %v1125_v51 = vmul.f32 %v12158_v9, %v8936_v23  ;;  %v1206_v20 = vmul.f32 %v12431_v63, %v8940_v29  ;;  %v12564_v1 = vld [vmem:[#allocation17_spill] sm:$0xff] }
 0x25a   :  { %v1074_v55 = vadd.f32 %v1042_v25, %v992_v31  ;;  %v3385_v61 = vadd.f32 %v3353_v34, %v8871_v28  ;;  %v8955_v12 = vmul.f32 0.5, %v3761_v21  ;;  %v1075_v11 = vadd.f32 %v1043_v18, %v993_v24  ;;  %v12563_v28 = vld [vmem:[#allocation16_spill] sm:$0xff] }
 0x25b   :  { %v8961_v26 = vmul.f32 0.5, %v3762_v36  ;;  %v1207_v25 = vmul.f32 %v12497_v52, %v8940_v29  ;;  %v453_v5 = vmul.f32 %v12563_v28, %v12556_v2  ;;  %v454_v56 = vmul.f32 %v12564_v1, %v12556_v2 }
 0x25c   :  { %v1156_v4 = vadd.f32 %v1124_v37, %v1074_v55  ;;  %v5724_v31 = vpop.eup %5723  ;;  %v3422_v35 = vadd.f32 %v3385_v61, %v3384_v30  ;;  %5731 = vtanh.f32 %v8955_v12  ;;  %v1157_v18 = vadd.f32 %v1125_v51, %v1075_v11 }
 0x25d   :  { %v5726_v34 = vpop.eup %5725  ;;  %v2847_v21 = vmul.f32 %v5724_v31, %v8893_v53  ;;  %5733 = vtanh.f32 %v8961_v26  ;;  %v485_v30 = vadd.f32 %v453_v5, %v12560_v42  ;;  %v486_v24 = vadd.f32 %v454_v56, %v12560_v42 }
 0x25e   :  { %v1238_v37 = vadd.f32 %v1206_v20, %v1156_v4  ;;  %3423 = vadd.xlane.f32.xlu0 %v3422_v35  ;;  %v2848_v36 = vmul.f32 %v5726_v34, %v8897_v40  ;;  %v535_v55 = vmul.f32 %v12499_v27, %v12561_v43  ;;  %v1239_v2 = vadd.f32 %v1207_v25, %v1157_v18 }
 0x25f   :  { %v2879_v61 = vadd.f32 %v2847_v21, %v8893_v53  ;;  %v536_v31 = vmul.f32 %v12370_v8, %v12561_v43  ;;  %v617_v11 = vmul.f32 %v12434_v44, %v8936_v23  ;;  %v618_v4 = vmul.f32 %v12372_v50, %v8936_v23 }
 0x260   :  { %v8978_v1 = vmul.f32 0.5, %v1238_v37  ;;  %v2880_v51 = vadd.f32 %v2848_v36, %v8897_v40  ;;  %v567_v20 = vadd.f32 %v535_v55, %v485_v30  ;;  %v8987_v35 = vmul.f32 0.5, %v1239_v2 }
 0x261   :  { %v568_v53 = vadd.f32 %v536_v31, %v486_v24  ;;  %v699_v34 = vmul.f32 %v12373_v58, %v8940_v29  ;;  %v700_v40 = vmul.f32 %v12374_v32, %v8940_v29  ;;  %v1970_v2 = vmul.f32 %v12313_v0, %v12500_v7 }
 0x262   :  { %5735 = vtanh.f32 %v8978_v1  ;;  %v5728_v25 = vpop.eup %5727  ;;  %v2918_v5 = vadd.f32 %v2880_v51, %v2879_v61  ;;  %v649_v56 = vadd.f32 %v617_v11, %v567_v20  ;;  %v1971_v24 = vmul.f32 %v12314_v41, %v12500_v7 }
 0x263   :  { %v5730_v21 = vpop.eup %5729  ;;  %v4362_v18 = vmul.f32 %v5728_v25, %v8920_v33  ;;  %5737 = vtanh.f32 %v8987_v35  ;;  %v650_v37 = vadd.f32 %v618_v4, %v568_v53  ;;  %v2002_v31 = vadd.f32 %v1970_v2, %v12504_v49 }
 0x264   :  { %2919 = vadd.xlane.f32.xlu1 %v2918_v5  ;;  %v4363_v36 = vmul.f32 %v5730_v21, %v8927_v10  ;;  %v731_v30 = vadd.f32 %v699_v34, %v649_v56  ;;  %v2052_v51 = vmul.f32 %v12316_v54, %v12501_v19  ;;  %v2003_v4 = vadd.f32 %v1971_v24, %v12504_v49 }
 0x265   :  { %v4394_v55 = vadd.f32 %v4362_v18, %v8920_v33  ;;  %v732_v61 = vadd.f32 %v700_v40, %v650_v37  ;;  %v2053_v25 = vmul.f32 %v12435_v45, %v12501_v19  ;;  %v2134_v33 = vmul.f32 %v12320_v60, %v12505_v16 }
 0x266   :  { %v4395_v20 = vadd.f32 %v4363_v36, %v8927_v10  ;;  %v9006_v11 = vmul.f32 0.5, %v731_v30  ;;  %v2084_v5 = vadd.f32 %v2052_v51, %v2002_v31  ;;  %v2135_v34 = vmul.f32 %v12321_v48, %v12505_v16  ;;  %v12565_v30 = vld [vmem:[#allocation107_spill] sm:$0xff] }
 0x267   :  { %v9009_v53 = vmul.f32 0.5, %v732_v61  ;;  %v2085_v40 = vadd.f32 %v2053_v25, %v2003_v4  ;;  %v2216_v18 = vmul.f32 %v12436_v39, %v12508_v62  ;;  %v2217_v36 = vmul.f32 %v12324_v57, %v12508_v62 }
 0x268   :  { %v4430_v56 = vadd.f32 %v4395_v20, %v4394_v55  ;;  %5739 = vtanh.f32 %v9006_v11  ;;  %v2166_v21 = vadd.f32 %v2134_v33, %v2084_v5  ;;  %v1465_v24 = vmul.f32 %v12376_v15, %v12565_v30  ;;  %v12566_v20 = vld [vmem:[#allocation36_spill] sm:$0xff]  ;;  %v12567_v5 = vld [vmem:[#allocation33_spill] sm:$0xff] }
 0x269   :  { %v5732_v10 = vpop.eup %5731  ;;  %5741 = vtanh.f32 %v9009_v53  ;;  %v1466_v55 = vmul.f32 %v12438_v59, %v12565_v30  ;;  %v2167_v31 = vadd.f32 %v2135_v34, %v2085_v40  ;;  %v1547_v4 = vmul.f32 %v12566_v20, %v12494_v3  ;;  %v12570_v34 = vld [vmem:[#allocation55_spill] sm:$0xff] }
 0x26a   :  { %v5734_v37 = vpop.eup %5733  ;;  %4431 = vadd.xlane.f32.xlu0 %v4430_v56  ;;  %v3857_v2 = vmul.f32 %v5732_v10, %v8955_v12  ;;  %v2248_v51 = vadd.f32 %v2216_v18, %v2166_v21  ;;  %v1497_v33 = vadd.f32 %v1465_v24, %v12567_v5  ;;  %v12568_v10 = vld [vmem:[#allocation37_spill] sm:$0xff] }
 0x26b   :  { %v3858_v61 = vmul.f32 %v5734_v37, %v8961_v26  ;;  %v1498_v56 = vadd.f32 %v1466_v55, %v12567_v5  ;;  %v1548_v62 = vmul.f32 %v12568_v10, %v12494_v3  ;;  %v2249_v49 = vadd.f32 %v2217_v36, %v2167_v31  ;;  %v12569_v37 = vld [vmem:[#allocation108_spill] sm:$0xff]  ;;  %v12572_v31 = vld [vmem:[#allocation109_spill] sm:$0xff] }
 0x26c   :  { %v3889_v25 = vadd.f32 %v3857_v2, %v8955_v12  ;;  %v9037_v19 = vmul.f32 0.5, %v2248_v51  ;;  %v1629_v40 = vmul.f32 %v12570_v34, %v12569_v37  ;;  %v1579_v18 = vadd.f32 %v1547_v4, %v1497_v33  ;;  %v12571_v12 = vld [vmem:[#allocation56_spill] sm:$0xff]  ;;  %v12573_v51 = vld [vmem:[#allocation61_spill] sm:$0xff]  ;;  %v12574_v34 = vld [vmem:[#allocation62_spill] sm:$0xff] }
 0x26d   :  { %v3890_v16 = vadd.f32 %v3858_v61, %v8961_v26  ;;  %v1580_v7 = vadd.f32 %v1548_v62, %v1498_v56  ;;  %v1630_v2 = vmul.f32 %v12571_v12, %v12569_v37  ;;  %v9044_v29 = vmul.f32 0.5, %v2249_v49  ;;  %v12575_v56 = vld [vmem:[#allocation57_spill] sm:$0xff] }
 0x26e   :  { %5743 = vtanh.f32 %v9037_v19  ;;  %v1661_v36 = vadd.f32 %v1629_v40, %v1579_v18  ;;  %v1711_v23 = vmul.f32 %v12573_v51, %v12572_v31  ;;  %v1712_v4 = vmul.f32 %v12574_v34, %v12572_v31  ;;  %v12576_v40 = vld [vmem:[#allocation58_spill] sm:$0xff]  ;;  %v12587_v51 = vld [vmem:[#allocation63_spill] sm:$0xff] }
 0x26f   :  { %v5736_v21 = vpop.eup %5735  ;;  %v3926_v24 = vadd.f32 %v3890_v16, %v3889_v25  ;;  %v1662_v61 = vadd.f32 %v1630_v2, %v1580_v7  ;;  %5745 = vtanh.f32 %v9044_v29  ;;  %v2980_v7 = vmul.f32 %v12575_v56, %v12520_v6 }
 0x270   :  { %v1334_v55 = vmul.f32 %v5736_v21, %v8978_v1  ;;  %v5738_v26 = vpop.eup %5737  ;;  %v1743_v49 = vadd.f32 %v1711_v23, %v1661_v36  ;;  %v2981_v21 = vmul.f32 %v12576_v40, %v12520_v6  ;;  %v3062_v18 = vmul.f32 %v12514_v13, %v12524_v17  ;;  %v12577_v36 = vld [vmem:[#allocation91_spill] sm:$0xff]  ;;  %v12580_v13 = vld [vmem:[#allocation92_spill] sm:$0xff]  ;;  %v12581_v40 = vld [vmem:[#allocation153_spill] sm:$0xff] }
 0x271   :  { %3927 = vadd.xlane.f32.xlu1 %v3926_v24  ;;  %v1335_v62 = vmul.f32 %v5738_v26, %v8987_v35  ;;  %v1744_v25 = vadd.f32 %v1712_v4, %v1662_v61  ;;  %v12578_v61 = vld [vmem:[#allocation117_spill] sm:$0xff] }
 0x272   :  { %v1366_v16 = vadd.f32 %v1334_v55, %v8978_v1  ;;  %v9061_v2 = vmul.f32 0.5, %v1743_v49  ;;  %v3063_v1 = vmul.f32 %v12515_v38, %v12524_v17  ;;  %v3013_v26 = vadd.f32 %v2981_v21, %v12523_v22  ;;  %v12579_v49 = vld [vmem:[#allocation118_spill] sm:$0xff]  ;;  %v12584_v38 = vld [vmem:[#allocation43_spill] sm:$0xff] }
 0x273   :  { %v1367_v33 = vadd.f32 %v1335_v62, %v8987_v35  ;;  %v9063_v24 = vmul.f32 0.5, %v1744_v25  ;;  %v3012_v35 = vadd.f32 %v2980_v7, %v12523_v22  ;;  %v3144_v4 = vmul.f32 %v12578_v61, %v12577_v36  ;;  %v12582_v22 = vld [vmem:[#allocation154_spill] sm:$0xff]  ;;  %v12583_v61 = vld [vmem:[#allocation97_spill] sm:$0xff] }
 0x274   :  { %5747 = vtanh.f32 %v9061_v2  ;;  %v3145_v25 = vmul.f32 %v12579_v49, %v12577_v36  ;;  %v3226_v17 = vmul.f32 %v12581_v40, %v12580_v13  ;;  %v3095_v7 = vadd.f32 %v3063_v1, %v3013_v26  ;;  %v12585_v36 = vld [vmem:[#allocation44_spill] sm:$0xff] }
 0x275   :  { %v5740_v23 = vpop.eup %5739  ;;  %v1409_v55 = vadd.f32 %v1367_v33, %v1366_v16  ;;  %5749 = vtanh.f32 %v9063_v24  ;;  %v3094_v33 = vadd.f32 %v3062_v18, %v3012_v35  ;;  %v2475_v56 = vmul.f32 %v12584_v38, %v12583_v61  ;;  %v12588_v18 = vld [vmem:[#allocation25_spill] sm:$0xff]  ;;  %v12590_v26 = vld [vmem:[#allocation100_spill] sm:$0xff] }
 0x276   :  { %v5742_v62 = vpop.eup %5741  ;;  %v827_v6 = vmul.f32 %v5740_v23, %v9006_v11  ;;  %v3227_v23 = vmul.f32 %v12582_v22, %v12580_v13  ;;  %v2476_v49 = vmul.f32 %v12585_v36, %v12583_v61  ;;  %v3177_v34 = vadd.f32 %v3145_v25, %v3095_v7  ;;  %v12591_v13 = vld [vmem:[#allocation71_spill] sm:$0xff] }
 0x277   :  { %1410 = vadd.xlane.f32.xlu0 %v1409_v55  ;;  %v828_v16 = vmul.f32 %v5742_v62, %v9009_v53  ;;  %v3176_v55 = vadd.f32 %v3144_v4, %v3094_v33  ;;  %v12586_v62 = vld [vmem:[#allocation139_spill] sm:$0xff]  ;;  %v2507_v1 = vadd.f32 %v2475_v56, %v12588_v18  ;;  %v2639_v38 = vmul.f32 %v12591_v13, %v12590_v26  ;;  %v12593_v13 = vld [vmem:[#allocation101_spill] sm:$0xff] }
 0x278   :  { %v859_v21 = vadd.f32 %v827_v6, %v9006_v11  ;;  %v2557_v12 = vmul.f32 %v12587_v51, %v12586_v62  ;;  %v2508_v6 = vadd.f32 %v2476_v49, %v12588_v18  ;;  %v12589_v11 = vld [vmem:[#allocation64_spill] sm:$0xff]  ;;  %v3259_v36 = vadd.f32 %v3227_v23, %v3177_v34  ;;  %v12595_v34 = vld [vmem:[#allocation111_spill] sm:$0xff] }
 0x279   :  { %v860_v40 = vadd.f32 %v828_v16, %v9009_v53  ;;  %v2558_v35 = vmul.f32 %v12589_v11, %v12586_v62  ;;  %v3258_v10 = vadd.f32 %v3226_v17, %v3176_v55  ;;  %v12592_v53 = vld [vmem:[#allocation72_spill] sm:$0xff]  ;;  %v12597_v55 = vld [vmem:[#allocation93_spill] sm:$0xff] }
 0x27a   :  { %v2640_v4 = vmul.f32 %v12592_v53, %v12590_v26  ;;  %v2589_v16 = vadd.f32 %v2557_v12, %v2507_v1  ;;  %v9100_v49 = vmul.f32 0.5, %v3259_v36  ;;  %v12616_v26 = vld [vmem:[#allocation81_spill] sm:$0xff] }
 0x27b   :  { %v902_v22 = vadd.f32 %v860_v40, %v859_v21  ;;  %v5744_v25 = vpop.eup %5743  ;;  %v2590_v33 = vadd.f32 %v2558_v35, %v2508_v6  ;;  %v9098_v7 = vmul.f32 0.5, %v3258_v10  ;;  %v12594_v40 = vld [vmem:[#allocation110_spill] sm:$0xff]  ;;  %v2722_v21 = vmul.f32 %v12595_v34, %v12593_v13 }
 0x27c   :  { %v2344_v56 = vmul.f32 %v5744_v25, %v9037_v19  ;;  %v5746_v11 = vpop.eup %5745  ;;  %v2671_v51 = vadd.f32 %v2639_v38, %v2589_v16  ;;  %v2721_v17 = vmul.f32 %v12594_v40, %v12593_v13  ;;  %v12596_v38 = vld [vmem:[#allocation79_spill] sm:$0xff]  ;;  %v12598_v6 = vld [vmem:[#allocation94_spill] sm:$0xff] }
 0x27d   :  { %903 = vadd.xlane.f32.xlu1 %v902_v22  ;;  %v2672_v62 = vadd.f32 %v2640_v4, %v2590_v33  ;;  %v2345_v23 = vmul.f32 %v5746_v11, %v9044_v29  ;;  %5751 = vtanh.f32 %v9098_v7  ;;  %v3990_v1 = vmul.f32 %v12597_v55, %v12596_v38  ;;  %v12599_v11 = vld [vmem:[#allocation133_spill] sm:$0xff]  ;;  %v12609_v40 = vld [vmem:[#allocation90_spill] sm:$0xff] }
 0x27e   :  { %v2376_v12 = vadd.f32 %v2344_v56, %v9037_v19  ;;  %5753 = vtanh.f32 %v9100_v49  ;;  %v2753_v22 = vadd.f32 %v2721_v17, %v2671_v51  ;;  %v3991_v35 = vmul.f32 %v12598_v6, %v12596_v38  ;;  %v12600_v19 = vld [vmem:[#allocation136_spill] sm:$0xff]  ;;  %v12601_v33 = vld [vmem:[#allocation137_spill] sm:$0xff]  ;;  %v12602_v17 = vld [vmem:[#allocation10_spill] sm:$0xff] }
 0x27f   :  { %v2754_v10 = vadd.f32 %v2722_v21, %v2672_v62  ;;  %v2377_v36 = vadd.f32 %v2345_v23, %v9044_v29  ;;  %v4072_v16 = vmul.f32 %v12600_v19, %v12599_v11  ;;  %v4073_v56 = vmul.f32 %v12601_v33, %v12599_v11  ;;  %v12605_v6 = vld [vmem:[#allocation95_spill] sm:$0xff] }
 0x280   :  { %v9115_v4 = vmul.f32 0.5, %v2753_v22  ;;  %v4022_v29 = vadd.f32 %v3990_v1, %v12602_v17  ;;  %v4023_v21 = vadd.f32 %v3991_v35, %v12602_v17  ;;  %v12603_v22 = vld [vmem:[#allocation75_spill] sm:$0xff]  ;;  %v12606_v35 = vld [vmem:[#allocation76_spill] sm:$0xff]  ;;  %v12607_v17 = vld [vmem:[#allocation98_spill] sm:$0xff] }
 0x281   :  { %v9117_v25 = vmul.f32 0.5, %v2754_v10  ;;  %v5748_v51 = vpop.eup %5747  ;;  %v2417_v62 = vadd.f32 %v2377_v36, %v2376_v12  ;;  %v12604_v10 = vld [vmem:[#allocation138_spill] sm:$0xff]  ;;  %v4155_v19 = vmul.f32 %v12605_v6, %v12603_v22  ;;  %v12608_v33 = vld [vmem:[#allocation99_spill] sm:$0xff] }
 0x282   :  { %v5750_v23 = vpop.eup %5749  ;;  %v1839_v55 = vmul.f32 %v5748_v51, %v9061_v2  ;;  %5755 = vtanh.f32 %v9115_v4  ;;  %v4154_v38 = vmul.f32 %v12604_v10, %v12603_v22  ;;  %v4104_v12 = vadd.f32 %v4072_v16, %v4022_v29  ;;  %v12610_v10 = vld [vmem:[#allocation123_spill] sm:$0xff]  ;;  %v12613_v29 = vld [vmem:[#allocation134_spill] sm:$0xff] }
 0x283   :  { %2418 = vadd.xlane.f32.xlu0 %v2417_v62  ;;  %v1840_v11 = vmul.f32 %v5750_v23, %v9063_v24  ;;  %5757 = vtanh.f32 %v9117_v25  ;;  %v4105_v36 = vadd.f32 %v4073_v56, %v4023_v21  ;;  %v4236_v51 = vmul.f32 %v12607_v17, %v12606_v35  ;;  %v12611_v23 = vld [vmem:[#allocation173_spill] sm:$0xff]  ;;  %v12612_v16 = vld [vmem:[#allocation15_spill] sm:$0xff]  ;;  %v12615_v21 = vld [vmem:[#allocation84_spill] sm:$0xff] }
 0x284   :  { %v1871_v1 = vadd.f32 %v1839_v55, %v9061_v2  ;;  %v4237_v34 = vmul.f32 %v12608_v33, %v12606_v35  ;;  %v3485_v53 = vmul.f32 %v12610_v10, %v12609_v40  ;;  %v4186_v62 = vadd.f32 %v4154_v38, %v4104_v12  ;;  %v12614_v2 = vld [vmem:[#allocation83_spill] sm:$0xff]  ;;  %v12618_v38 = vld [vmem:[#allocation88_spill] sm:$0xff] }
 0x285   :  { %v1872_v22 = vadd.f32 %v1840_v11, %v9063_v24  ;;  %v4187_v6 = vadd.f32 %v4155_v19, %v4105_v36  ;;  %v3486_v13 = vmul.f32 %v12611_v23, %v12609_v40  ;;  %v3567_v55 = vmul.f32 %v12614_v2, %v12613_v29  ;;  %v12617_v35 = vld [vmem:[#allocation87_spill] sm:$0xff]  ;;  %v12619_v2 = vld [vmem:[#allocation82_spill] sm:$0xff] }
 0x286   :  { %v3517_v56 = vadd.f32 %v3485_v53, %v12612_v16  ;;  %v3568_v17 = vmul.f32 %v12615_v21, %v12613_v29  ;;  %v3649_v33 = vmul.f32 %v12617_v35, %v12616_v26  ;;  %v4268_v10 = vadd.f32 %v4236_v51, %v4186_v62  ;;  %v12620_v21 = vld [vmem:[#allocation85_spill] sm:$0xff] }
 0x287   :  { %v1913_v18 = vadd.f32 %v1872_v22, %v1871_v1  ;;  %v4269_v61 = vadd.f32 %v4237_v34, %v4187_v6  ;;  %v3518_v24 = vadd.f32 %v3486_v13, %v12612_v16  ;;  %v3650_v11 = vmul.f32 %v12618_v38, %v12616_v26  ;;  %v12621_v1 = vld [vmem:[#allocation86_spill] sm:$0xff]  ;;  %v12622_v6 = vld [vmem:[#allocation113_spill] sm:$0xff]  ;;  %v12624_v22 = vld [vmem:[#allocation19_spill] sm:$0xff] }
 0x288   :  { %v3599_v19 = vadd.f32 %v3567_v55, %v3517_v56  ;;  %v9153_v53 = vmul.f32 0.5, %v4268_v10  ;;  %v3731_v23 = vmul.f32 %v12620_v21, %v12619_v2  ;;  %v3732_v34 = vmul.f32 %v12621_v1, %v12619_v2  ;;  %v12623_v13 = vld [vmem:[#allocation18_spill] sm:$0xff]  ;;  %v9165_v10 = vpop.permute.xlu1 %332  ;;  %v12626_v56 = vld [vmem:[#allocation147_spill] sm:$0xff]  ;;  %v9171_v55 = vpop.permute.xlu0 %396 }
 0x289   :  { %1914 = vadd.xlane.f32.xlu1 %v1913_v18  ;;  %v9155_v12 = vmul.f32 0.5, %v4269_v61  ;;  %v3600_v36 = vadd.f32 %v3568_v17, %v3518_v24  ;;  %v962_v51 = vmul.f32 %v12623_v13, %v12622_v6  ;;  %v963_v62 = vmul.f32 %v12624_v22, %v12622_v6  ;;  %12625 = vst [vmem:[#allocation143_spill] sm:$0xff] %v9165_v10  ;;  %v12628_v1 = vld [vmem:[#allocation46_spill] sm:$0xff] }
 0x28a   :  { %v5752_v29 = vpop.eup %5751  ;;  %v3681_v35 = vadd.f32 %v3649_v33, %v3599_v19  ;;  %5759 = vtanh.f32 %v9153_v53  ;;  %v1044_v33 = vmul.f32 %v12562_v14, %v12626_v56  ;;  %12627 = vst [vmem:[#allocation144_spill] sm:$0xff] %v9171_v55 }
 0x28b   :  { %v5754_v18 = vpop.eup %5753  ;;  %v3354_v61 = vmul.f32 %v5752_v29, %v9098_v7  ;;  %v3682_v17 = vadd.f32 %v3650_v11, %v3600_v36  ;;  %5761 = vtanh.f32 %v9155_v12  ;;  %v994_v21 = vadd.f32 %v962_v51, %v12628_v1 }
 0x28c   :  { %v3355_v24 = vmul.f32 %v5754_v18, %v9100_v49  ;;  %v3763_v19 = vadd.f32 %v3731_v23, %v3681_v35  ;;  %v995_v29 = vadd.f32 %v963_v62, %v12628_v1  ;;  %v1045_v36 = vmul.f32 %v12303_v47, %v12626_v56 }
 0x28d   :  { %v3386_v22 = vadd.f32 %v3354_v61, %v9098_v7  ;;  %v3764_v13 = vadd.f32 %v3732_v34, %v3682_v17  ;;  %v1126_v18 = vmul.f32 %v12157_v46, %v9165_v10  ;;  %v1076_v23 = vadd.f32 %v1044_v33, %v994_v21 }
 0x28e   :  { %v3387_v38 = vadd.f32 %v3355_v24, %v9100_v49  ;;  %v9179_v11 = vmul.f32 0.5, %v3763_v19  ;;  %v1127_v7 = vmul.f32 %v12158_v9, %v9165_v10  ;;  %v1208_v35 = vmul.f32 %v12431_v63, %v9171_v55 }
 0x28f   :  { %v5756_v14 = vpop.eup %5755  ;;  %v9185_v2 = vmul.f32 0.5, %v3764_v13  ;;  %v1077_v62 = vadd.f32 %v1045_v36, %v995_v29  ;;  %v1158_v13 = vadd.f32 %v1126_v18, %v1076_v23  ;;  %v1209_v21 = vmul.f32 %v12497_v52, %v9171_v55 }
 0x290   :  { %v5758_v34 = vpop.eup %5757  ;;  %v3425_v49 = vadd.f32 %v3387_v38, %v3386_v22  ;;  %v2849_v51 = vmul.f32 %v5756_v14, %v9115_v4  ;;  %5763 = vtanh.f32 %v9179_v11  ;;  %v455_v38 = vmul.f32 %v12563_v28, %v12622_v6  ;;  %v12629_v14 = vld [vmem:[#allocation17_spill] sm:$0xff] }
 0x291   :  { %v2850_v61 = vmul.f32 %v5758_v34, %v9117_v25  ;;  %5765 = vtanh.f32 %v9185_v2  ;;  %v1159_v33 = vadd.f32 %v1127_v7, %v1077_v62  ;;  %v456_v22 = vmul.f32 %v12629_v14, %v12622_v6 }
 0x292   :  { %3426 = vadd.xlane.f32.xlu0 %v3425_v49  ;;  %v2881_v17 = vadd.f32 %v2849_v51, %v9115_v4  ;;  %v1240_v19 = vadd.f32 %v1208_v35, %v1158_v13  ;;  %v537_v29 = vmul.f32 %v12499_v27, %v12626_v56  ;;  %v538_v36 = vmul.f32 %v12370_v8, %v12626_v56 }
 0x293   :  { %v2882_v24 = vadd.f32 %v2850_v61, %v9117_v25  ;;  %v1241_v18 = vadd.f32 %v1209_v21, %v1159_v33  ;;  %v487_v23 = vadd.f32 %v455_v38, %v12628_v1  ;;  %v488_v4 = vadd.f32 %v456_v22, %v12628_v1 }
 0x294   :  { %v619_v7 = vmul.f32 %v12434_v44, %v9165_v10  ;;  %v9211_v49 = vmul.f32 0.5, %v1240_v19  ;;  %v620_v25 = vmul.f32 %v12372_v50, %v9165_v10  ;;  %v701_v61 = vmul.f32 %v12373_v58, %v9171_v55  ;;  %v12642_v10 = vld [vmem:[#allocation139_spill] sm:$0xff] }
 0x295   :  { %v2921_v34 = vadd.f32 %v2882_v24, %v2881_v17  ;;  %v9215_v35 = vmul.f32 0.5, %v1241_v18  ;;  %v569_v51 = vadd.f32 %v537_v29, %v487_v23  ;;  %v570_v62 = vadd.f32 %v538_v36, %v488_v4 }
 0x296   :  { %5767 = vtanh.f32 %v9211_v49  ;;  %v702_v13 = vmul.f32 %v12374_v32, %v9171_v55  ;;  %v1972_v38 = vmul.f32 %v12313_v0, %v12565_v30  ;;  %v1973_v19 = vmul.f32 %v12314_v41, %v12565_v30  ;;  %v12639_v55 = vld [vmem:[#allocation57_spill] sm:$0xff] }
 0x297   :  { %2922 = vadd.xlane.f32.xlu1 %v2921_v34  ;;  %v5760_v21 = vpop.eup %5759  ;;  %5769 = vtanh.f32 %v9215_v35  ;;  %v651_v17 = vadd.f32 %v619_v7, %v569_v51  ;;  %v652_v33 = vadd.f32 %v620_v25, %v570_v62  ;;  %v2054_v34 = vmul.f32 %v12316_v54, %v12494_v3 }
 0x298   :  { %v5762_v22 = vpop.eup %5761  ;;  %v4364_v24 = vmul.f32 %v5760_v21, %v9153_v53  ;;  %v2004_v4 = vadd.f32 %v1972_v38, %v12567_v5  ;;  %v2005_v7 = vadd.f32 %v1973_v19, %v12567_v5  ;;  %v2055_v21 = vmul.f32 %v12435_v45, %v12494_v3 }
 0x299   :  { %v4365_v29 = vmul.f32 %v5762_v22, %v9155_v12  ;;  %v733_v36 = vadd.f32 %v701_v61, %v651_v17  ;;  %v734_v18 = vadd.f32 %v702_v13, %v652_v33  ;;  %v2137_v17 = vmul.f32 %v12321_v48, %v12569_v37 }
 0x29a   :  { %v4396_v23 = vadd.f32 %v4364_v24, %v9153_v53  ;;  %v2086_v13 = vadd.f32 %v2054_v34, %v2004_v4  ;;  %v2136_v53 = vmul.f32 %v12320_v60, %v12569_v37  ;;  %v12630_v4 = vld [vmem:[#allocation106_spill] sm:$0xff] }
 0x29b   :  { %v4397_v25 = vadd.f32 %v4365_v29, %v9155_v12  ;;  %v9235_v51 = vmul.f32 0.5, %v733_v36  ;;  %v9237_v62 = vmul.f32 0.5, %v734_v18  ;;  %v2087_v12 = vadd.f32 %v2055_v21, %v2005_v7 }
 0x29c   :  { %v2168_v19 = vadd.f32 %v2136_v53, %v2086_v13  ;;  %v2218_v29 = vmul.f32 %v12436_v39, %v12572_v31  ;;  %v1467_v34 = vmul.f32 %v12376_v15, %v12630_v4  ;;  %v1468_v21 = vmul.f32 %v12438_v59, %v12630_v4 }
 0x29d   :  { %v5764_v61 = vpop.eup %5763  ;;  %v4433_v38 = vadd.f32 %v4397_v25, %v4396_v23  ;;  %5771 = vtanh.f32 %v9235_v51  ;;  %v2169_v18 = vadd.f32 %v2137_v17, %v2087_v12  ;;  %v2219_v23 = vmul.f32 %v12324_v57, %v12572_v31 }
 0x29e   :  { %v5766_v33 = vpop.eup %5765  ;;  %v3859_v22 = vmul.f32 %v5764_v61, %v9179_v11  ;;  %5773 = vtanh.f32 %v9237_v62  ;;  %v2250_v25 = vadd.f32 %v2218_v29, %v2168_v19  ;;  %v1549_v61 = vmul.f32 %v12566_v20, %v12561_v43  ;;  %v12658_v20 = vld [vmem:[#allocation102_spill] sm:$0xff] }
 0x29f   :  { %v3860_v24 = vmul.f32 %v5766_v33, %v9185_v2  ;;  %4434 = vadd.xlane.f32.xlu0 %v4433_v38  ;;  %v2251_v13 = vadd.f32 %v2219_v23, %v2169_v18  ;;  %v1499_v53 = vadd.f32 %v1467_v34, %v12560_v42  ;;  %v12632_v33 = vld [vmem:[#allocation141_spill] sm:$0xff]  ;;  %v12633_v38 = vld [vmem:[#allocation55_spill] sm:$0xff] }
 0x2a0   :  { %v3891_v36 = vadd.f32 %v3859_v22, %v9179_v11  ;;  %v12631_v11 = vld [vmem:[#allocation37_spill] sm:$0xff]  ;;  %v1631_v22 = vmul.f32 %v12633_v38, %v12632_v33  ;;  %v9266_v31 = vmul.f32 0.5, %v2250_v25  ;;  %v12635_v25 = vld [vmem:[#allocation142_spill] sm:$0xff] }
 0x2a1   :  { %v3892_v7 = vadd.f32 %v3860_v24, %v9185_v2  ;;  %v1550_v17 = vmul.f32 %v12631_v11, %v12561_v43  ;;  %v1500_v2 = vadd.f32 %v1468_v21, %v12560_v42  ;;  %v12634_v24 = vld [vmem:[#allocation56_spill] sm:$0xff]  ;;  %v9271_v37 = vmul.f32 0.5, %v2251_v13  ;;  %v12636_v21 = vld [vmem:[#allocation61_spill] sm:$0xff] }
 0x2a2   :  { %v1632_v19 = vmul.f32 %v12634_v24, %v12632_v33  ;;  %v1581_v18 = vadd.f32 %v1549_v61, %v1499_v53  ;;  %5775 = vtanh.f32 %v9266_v31  ;;  %v1713_v3 = vmul.f32 %v12636_v21, %v12635_v25  ;;  %v12637_v61 = vld [vmem:[#allocation62_spill] sm:$0xff]  ;;  %v12643_v21 = vld [vmem:[#allocation69_spill] sm:$0xff] }
 0x2a3   :  { %v3929_v12 = vadd.f32 %v3892_v7, %v3891_v36  ;;  %v5768_v29 = vpop.eup %5767  ;;  %v1582_v5 = vadd.f32 %v1550_v17, %v1500_v2  ;;  %5777 = vtanh.f32 %v9271_v37  ;;  %v1714_v53 = vmul.f32 %v12637_v61, %v12635_v25  ;;  %v12640_v2 = vld [vmem:[#allocation58_spill] sm:$0xff] }
 0x2a4   :  { %v5770_v23 = vpop.eup %5769  ;;  %v1336_v34 = vmul.f32 %v5768_v29, %v9211_v49  ;;  %v1663_v7 = vadd.f32 %v1631_v22, %v1581_v18  ;;  %v12641_v22 = vld [vmem:[#allocation25_spill] sm:$0xff]  ;;  %v3064_v11 = vmul.f32 %v12643_v21, %v12642_v10 }
 0x2a5   :  { %3930 = vadd.xlane.f32.xlu1 %v3929_v12  ;;  %v1337_v36 = vmul.f32 %v5770_v23, %v9215_v35  ;;  %v1664_v13 = vadd.f32 %v1632_v19, %v1582_v5  ;;  %v12638_v12 = vld [vmem:[#allocation97_spill] sm:$0xff]  ;;  %v12644_v5 = vld [vmem:[#allocation70_spill] sm:$0xff] }
 0x2a6   :  { %v1368_v30 = vadd.f32 %v1336_v34, %v9211_v49  ;;  %v2982_v29 = vmul.f32 %v12639_v55, %v12638_v12  ;;  %v1745_v17 = vadd.f32 %v1713_v3, %v1663_v7  ;;  %v2983_v23 = vmul.f32 %v12640_v2, %v12638_v12  ;;  %v12645_v55 = vld [vmem:[#allocation100_spill] sm:$0xff]  ;;  %v12648_v12 = vld [vmem:[#allocation101_spill] sm:$0xff] }
 0x2a7   :  { %v1369_v24 = vadd.f32 %v1337_v36, %v9215_v35  ;;  %v1746_v38 = vadd.f32 %v1714_v53, %v1664_v13  ;;  %v3065_v49 = vmul.f32 %v12644_v5, %v12642_v10  ;;  %v12646_v35 = vld [vmem:[#allocation117_spill] sm:$0xff]  ;;  %v12647_v53 = vld [vmem:[#allocation118_spill] sm:$0xff]  ;;  %v12657_v5 = vld [vmem:[#allocation64_spill] sm:$0xff] }
 0x2a8   :  { %v3014_v18 = vadd.f32 %v2982_v29, %v12641_v22  ;;  %v9292_v34 = vmul.f32 0.5, %v1745_v17  ;;  %v3015_v61 = vadd.f32 %v2983_v23, %v12641_v22  ;;  %v3146_v3 = vmul.f32 %v12646_v35, %v12645_v55  ;;  %v12649_v21 = vld [vmem:[#allocation153_spill] sm:$0xff]  ;;  %v12650_v17 = vld [vmem:[#allocation154_spill] sm:$0xff]  ;;  %v12655_v35 = vld [vmem:[#allocation63_spill] sm:$0xff] }
 0x2a9   :  { %v1412_v19 = vadd.f32 %v1369_v24, %v1368_v30  ;;  %v9297_v7 = vmul.f32 0.5, %v1746_v38  ;;  %v3147_v29 = vmul.f32 %v12647_v53, %v12645_v55  ;;  %v3228_v2 = vmul.f32 %v12649_v21, %v12648_v12  ;;  %v12652_v55 = vld [vmem:[#allocation43_spill] sm:$0xff]  ;;  %v12654_v53 = vld [vmem:[#allocation140_spill] sm:$0xff] }
 0x2aa   :  { %v5772_v36 = vpop.eup %5771  ;;  %v3096_v13 = vadd.f32 %v3064_v11, %v3014_v18  ;;  %5779 = vtanh.f32 %v9292_v34  ;;  %v3097_v24 = vadd.f32 %v3065_v49, %v3015_v61  ;;  %v3229_v23 = vmul.f32 %v12650_v17, %v12648_v12  ;;  %v12651_v18 = vld [vmem:[#allocation96_spill] sm:$0xff] }
 0x2ab   :  { %v5774_v1 = vpop.eup %5773  ;;  %1413 = vadd.xlane.f32.xlu0 %v1412_v19  ;;  %v829_v30 = vmul.f32 %v5772_v36, %v9235_v51  ;;  %5781 = vtanh.f32 %v9297_v7  ;;  %v2477_v22 = vmul.f32 %v12652_v55, %v12651_v18  ;;  %v12653_v19 = vld [vmem:[#allocation44_spill] sm:$0xff]  ;;  %v2559_v61 = vmul.f32 %v12655_v35, %v12654_v53 }
 0x2ac   :  { %v830_v38 = vmul.f32 %v5774_v1, %v9237_v62  ;;  %v3178_v11 = vadd.f32 %v3146_v3, %v3096_v13  ;;  %v3179_v21 = vadd.f32 %v3147_v29, %v3097_v24  ;;  %v2478_v36 = vmul.f32 %v12653_v19, %v12651_v18  ;;  %v12656_v17 = vld [vmem:[#allocation24_spill] sm:$0xff] }
 0x2ad   :  { %v861_v10 = vadd.f32 %v829_v30, %v9235_v51  ;;  %v2509_v1 = vadd.f32 %v2477_v22, %v12656_v17  ;;  %v2560_v3 = vmul.f32 %v12657_v5, %v12654_v53  ;;  %v12659_v51 = vld [vmem:[#allocation71_spill] sm:$0xff]  ;;  %v12660_v30 = vld [vmem:[#allocation72_spill] sm:$0xff] }
 0x2ae   :  { %v862_v49 = vadd.f32 %v830_v38, %v9237_v62  ;;  %v3260_v12 = vadd.f32 %v3228_v2, %v3178_v11  ;;  %v3261_v13 = vadd.f32 %v3229_v23, %v3179_v21  ;;  %v2510_v55 = vadd.f32 %v2478_v36, %v12656_v17  ;;  %v12661_v38 = vld [vmem:[#allocation103_spill] sm:$0xff]  ;;  %v12662_v11 = vld [vmem:[#allocation110_spill] sm:$0xff] }
 0x2af   :  { %v2641_v29 = vmul.f32 %v12659_v51, %v12658_v20  ;;  %v2642_v24 = vmul.f32 %v12660_v30, %v12658_v20  ;;  %v2591_v35 = vadd.f32 %v2559_v61, %v2509_v1  ;;  %v5776_v62 = vpop.eup %5775  ;;  %v2723_v5 = vmul.f32 %v12662_v11, %v12661_v38  ;;  %v12663_v30 = vld [vmem:[#allocation111_spill] sm:$0xff]  ;;  %v12667_v11 = vld [vmem:[#allocation136_spill] sm:$0xff] }
 0x2b0   :  { %v905_v19 = vadd.f32 %v862_v49, %v861_v10  ;;  %v9325_v18 = vmul.f32 0.5, %v3260_v12  ;;  %v9327_v2 = vmul.f32 0.5, %v3261_v13  ;;  %v2592_v22 = vadd.f32 %v2560_v3, %v2510_v55  ;;  %v5778_v21 = vpop.eup %5777  ;;  %v12664_v55 = vld [vmem:[#allocation93_spill] sm:$0xff] }
 0x2b1   :  { %v2346_v23 = vmul.f32 %v5776_v62, %v9266_v31  ;;  %v2673_v36 = vadd.f32 %v2641_v29, %v2591_v35  ;;  %v2724_v10 = vmul.f32 %v12663_v30, %v12661_v38  ;;  %v2347_v12 = vmul.f32 %v5778_v21, %v9271_v37  ;;  %v12666_v30 = vld [vmem:[#allocation134_spill] sm:$0xff] }
 0x2b2   :  { %906 = vadd.xlane.f32.xlu1 %v905_v19  ;;  %5783 = vtanh.f32 %v9325_v18  ;;  %v2674_v61 = vadd.f32 %v2642_v24, %v2592_v22  ;;  %v3992_v49 = vmul.f32 %v12664_v55, %v12609_v40  ;;  %v12665_v19 = vld [vmem:[#allocation94_spill] sm:$0xff]  ;;  %v4074_v21 = vmul.f32 %v12667_v11, %v12666_v30  ;;  %v12668_v22 = vld [vmem:[#allocation137_spill] sm:$0xff] }
 0x2b3   :  { %5785 = vtanh.f32 %v9327_v2  ;;  %v2378_v1 = vadd.f32 %v2346_v23, %v9266_v31  ;;  %v2755_v3 = vadd.f32 %v2723_v5, %v2673_v36  ;;  %v3993_v13 = vmul.f32 %v12665_v19, %v12609_v40  ;;  %v12669_v31 = vld [vmem:[#allocation138_spill] sm:$0xff]  ;;  %v12670_v36 = vld [vmem:[#allocation95_spill] sm:$0xff]  ;;  %v12680_v19 = vld [vmem:[#allocation84_spill] sm:$0xff] }
 0x2b4   :  { %v2379_v62 = vadd.f32 %v2347_v12, %v9271_v37  ;;  %v2756_v35 = vadd.f32 %v2724_v10, %v2674_v61  ;;  %v4024_v29 = vadd.f32 %v3992_v49, %v12612_v16  ;;  %v4075_v55 = vmul.f32 %v12668_v22, %v12666_v30  ;;  %v12671_v49 = vld [vmem:[#allocation82_spill] sm:$0xff] }
 0x2b5   :  { %v9346_v51 = vmul.f32 0.5, %v2755_v3  ;;  %v4025_v24 = vadd.f32 %v3993_v13, %v12612_v16  ;;  %v4156_v5 = vmul.f32 %v12669_v31, %v12616_v26  ;;  %v4157_v10 = vmul.f32 %v12670_v36, %v12616_v26  ;;  %v12672_v3 = vld [vmem:[#allocation98_spill] sm:$0xff]  ;;  %v12673_v13 = vld [vmem:[#allocation99_spill] sm:$0xff] }
 0x2b6   :  { %v2420_v23 = vadd.f32 %v2379_v62, %v2378_v1  ;;  %v9353_v40 = vmul.f32 0.5, %v2756_v35  ;;  %v4106_v37 = vadd.f32 %v4074_v21, %v4024_v29  ;;  %v4238_v16 = vmul.f32 %v12672_v3, %v12671_v49  ;;  %v12674_v35 = vld [vmem:[#allocation89_spill] sm:$0xff]  ;;  %v12675_v29 = vld [vmem:[#allocation123_spill] sm:$0xff] }
 0x2b7   :  { %v5780_v12 = vpop.eup %5779  ;;  %5787 = vtanh.f32 %v9346_v51  ;;  %v4107_v61 = vadd.f32 %v4075_v55, %v4025_v24  ;;  %v4239_v30 = vmul.f32 %v12673_v13, %v12671_v49  ;;  %v3487_v26 = vmul.f32 %v12675_v29, %v12674_v35  ;;  %v12676_v55 = vld [vmem:[#allocation173_spill] sm:$0xff]  ;;  %v12677_v3 = vld [vmem:[#allocation135_spill] sm:$0xff]  ;;  %v12679_v13 = vld [vmem:[#allocation14_spill] sm:$0xff] }
 0x2b8   :  { %v5782_v22 = vpop.eup %5781  ;;  %2421 = vadd.xlane.f32.xlu0 %v2420_v23  ;;  %v1841_v1 = vmul.f32 %v5780_v12, %v9292_v34  ;;  %5789 = vtanh.f32 %v9353_v40  ;;  %v4188_v62 = vadd.f32 %v4156_v5, %v4106_v37  ;;  %v3488_v24 = vmul.f32 %v12676_v55, %v12674_v35  ;;  %v12678_v31 = vld [vmem:[#allocation83_spill] sm:$0xff] }
 0x2b9   :  { %v1842_v21 = vmul.f32 %v5782_v22, %v9297_v7  ;;  %v4189_v36 = vadd.f32 %v4157_v10, %v4107_v61  ;;  %v3569_v11 = vmul.f32 %v12678_v31, %v12677_v3  ;;  %v3519_v12 = vadd.f32 %v3487_v26, %v12679_v13  ;;  %v12681_v10 = vld [vmem:[#allocation91_spill] sm:$0xff]  ;;  %v12683_v31 = vld [vmem:[#allocation88_spill] sm:$0xff] }
 0x2ba   :  { %v1873_v49 = vadd.f32 %v1841_v1, %v9292_v34  ;;  %v4270_v23 = vadd.f32 %v4238_v16, %v4188_v62  ;;  %v3570_v5 = vmul.f32 %v12680_v19, %v12677_v3  ;;  %v3520_v22 = vadd.f32 %v3488_v24, %v12679_v13  ;;  %v12682_v61 = vld [vmem:[#allocation87_spill] sm:$0xff]  ;;  %v12686_v24 = vld [vmem:[#allocation86_spill] sm:$0xff] }
 0x2bb   :  { %v1874_v37 = vadd.f32 %v1842_v21, %v9297_v7  ;;  %v4271_v29 = vadd.f32 %v4239_v30, %v4189_v36  ;;  %v3651_v38 = vmul.f32 %v12682_v61, %v12681_v10  ;;  %v3601_v35 = vadd.f32 %v3569_v11, %v3519_v12  ;;  %v12684_v36 = vld [vmem:[#allocation92_spill] sm:$0xff]  ;;  %v12685_v30 = vld [vmem:[#allocation85_spill] sm:$0xff]  ;;  %v12688_v12 = vld [vmem:[#allocation18_spill] sm:$0xff] }
 0x2bc   :  { %v9379_v55 = vmul.f32 0.5, %v4270_v23  ;;  %v3652_v34 = vmul.f32 %v12683_v31, %v12681_v10  ;;  %v3602_v62 = vadd.f32 %v3570_v5, %v3520_v22  ;;  %v3733_v21 = vmul.f32 %v12685_v30, %v12684_v36  ;;  %v12691_v19 = vld [vmem:[#allocation34_spill] sm:$0xff]  ;;  %v9406_v10 = vpop.permute.xlu0 %400 }
 0x2bd   :  { %v1916_v16 = vadd.f32 %v1874_v37, %v1873_v49  ;;  %v9383_v1 = vmul.f32 0.5, %v4271_v29  ;;  %v3683_v7 = vadd.f32 %v3651_v38, %v3601_v35  ;;  %v3734_v61 = vmul.f32 %v12686_v24, %v12684_v36  ;;  %v12687_v29 = vld [vmem:[#allocation112_spill] sm:$0xff]  ;;  %v12689_v38 = vld [vmem:[#allocation19_spill] sm:$0xff]  ;;  %v9400_v36 = vpop.permute.xlu1 %336  ;;  %12694 = vst [vmem:[#allocation146_spill] sm:$0xff] %v9406_v10 }
 0x2be   :  { %5791 = vtanh.f32 %v9379_v55  ;;  %v3684_v49 = vadd.f32 %v3652_v34, %v3602_v62  ;;  %v964_v5 = vmul.f32 %v12688_v12, %v12687_v29  ;;  %v965_v35 = vmul.f32 %v12689_v38, %v12687_v29  ;;  %v12690_v24 = vld [vmem:[#allocation148_spill] sm:$0xff]  ;;  %12692 = vst [vmem:[#allocation145_spill] sm:$0xff] %v9400_v36  ;;  %v12693_v62 = vld [vmem:[#allocation45_spill] sm:$0xff] }
 0x2bf   :  { %v5784_v26 = vpop.eup %5783  ;;  %1917 = vadd.xlane.f32.xlu1 %v1916_v16  ;;  %5793 = vtanh.f32 %v9383_v1  ;;  %v3765_v22 = vadd.f32 %v3733_v21, %v3683_v7  ;;  %v1046_v16 = vmul.f32 %v12691_v19, %v12690_v24 }
 0x2c0   :  { %v5786_v23 = vpop.eup %5785  ;;  %v3356_v11 = vmul.f32 %v5784_v26, %v9325_v18  ;;  %v3766_v31 = vadd.f32 %v3734_v61, %v3684_v49  ;;  %v996_v12 = vadd.f32 %v964_v5, %v12693_v62  ;;  %v997_v21 = vadd.f32 %v965_v35, %v12693_v62 }
 0x2c1   :  { %v3357_v37 = vmul.f32 %v5786_v23, %v9327_v2  ;;  %v9403_v34 = vmul.f32 0.5, %v3765_v22  ;;  %v1129_v22 = vmul.f32 %v12158_v9, %v9400_v36 }
 0x2c2   :  { %v3388_v30 = vadd.f32 %v3356_v11, %v9325_v18  ;;  %v9408_v7 = vmul.f32 0.5, %v3766_v31  ;;  %v1047_v18 = vmul.f32 %v12303_v47, %v12690_v24  ;;  %v1078_v11 = vadd.f32 %v1046_v16, %v996_v12 }
 0x2c3   :  { %v3389_v26 = vadd.f32 %v3357_v37, %v9327_v2  ;;  %5795 = vtanh.f32 %v9403_v34  ;;  %v1128_v31 = vmul.f32 %v12157_v46, %v9400_v36  ;;  %v1211_v12 = vmul.f32 %v12497_v52, %v9406_v10 }
 0x2c4   :  { %v5788_v61 = vpop.eup %5787  ;;  %5797 = vtanh.f32 %v9408_v7  ;;  %v1079_v5 = vadd.f32 %v1047_v18, %v997_v21  ;;  %v458_v21 = vmul.f32 %v12629_v14, %v12687_v29 }
 0x2c5   :  { %v3428_v23 = vadd.f32 %v3389_v26, %v3388_v30  ;;  %v5790_v49 = vpop.eup %5789  ;;  %v2851_v2 = vmul.f32 %v5788_v61, %v9346_v51  ;;  %v1210_v30 = vmul.f32 %v12431_v63, %v9406_v10  ;;  %v1160_v16 = vadd.f32 %v1128_v31, %v1078_v11 }
 0x2c6   :  { %v2852_v37 = vmul.f32 %v5790_v49, %v9353_v40  ;;  %v457_v26 = vmul.f32 %v12563_v28, %v12687_v29  ;;  %v1161_v61 = vadd.f32 %v1129_v22, %v1079_v5  ;;  %v540_v49 = vmul.f32 %v12370_v8, %v12690_v24 }
 0x2c7   :  { %3429 = vadd.xlane.f32.xlu0 %v3428_v23  ;;  %v2883_v35 = vadd.f32 %v2851_v2, %v9346_v51  ;;  %v539_v23 = vmul.f32 %v12499_v27, %v12690_v24  ;;  %v1242_v63 = vadd.f32 %v1210_v30, %v1160_v16  ;;  %v490_v51 = vadd.f32 %v458_v21, %v12693_v62 }
 0x2c8   :  { %v2884_v18 = vadd.f32 %v2852_v37, %v9353_v40  ;;  %v489_v52 = vadd.f32 %v457_v26, %v12693_v62  ;;  %v621_v11 = vmul.f32 %v12434_v44, %v9400_v36  ;;  %v1243_v31 = vadd.f32 %v1211_v12, %v1161_v61 }
 0x2c9   :  { %v622_v40 = vmul.f32 %v12372_v50, %v9400_v36  ;;  %v9441_v37 = vmul.f32 0.5, %v1242_v63  ;;  %v572_v29 = vadd.f32 %v540_v49, %v490_v51  ;;  %v703_v26 = vmul.f32 %v12373_v58, %v9406_v10 }
 0x2ca   :  { %v2924_v2 = vadd.f32 %v2884_v18, %v2883_v35  ;;  %v571_v22 = vadd.f32 %v539_v23, %v489_v52  ;;  %v9444_v16 = vmul.f32 0.5, %v1243_v31  ;;  %v704_v12 = vmul.f32 %v12374_v32, %v9406_v10 }
 0x2cb   :  { %v5792_v5 = vpop.eup %5791  ;;  %5799 = vtanh.f32 %v9441_v37  ;;  %v654_v21 = vadd.f32 %v622_v40, %v572_v29  ;;  %v1974_v49 = vmul.f32 %v12313_v0, %v12630_v4  ;;  %v1975_v51 = vmul.f32 %v12314_v41, %v12630_v4 }
 0x2cc   :  { %v5794_v27 = vpop.eup %5793  ;;  %2925 = vadd.xlane.f32.xlu1 %v2924_v2  ;;  %v4366_v30 = vmul.f32 %v5792_v5, %v9379_v55  ;;  %v653_v63 = vadd.f32 %v621_v11, %v571_v22  ;;  %5801 = vtanh.f32 %v9444_v16  ;;  %v2057_v29 = vmul.f32 %v12435_v45, %v12561_v43 }
 0x2cd   :  { %v4367_v35 = vmul.f32 %v5794_v27, %v9383_v1  ;;  %v736_v23 = vadd.f32 %v704_v12, %v654_v21  ;;  %v2056_v27 = vmul.f32 %v12316_v54, %v12561_v43  ;;  %v2006_v40 = vadd.f32 %v1974_v49, %v12560_v42 }
 0x2ce   :  { %v4398_v52 = vadd.f32 %v4366_v30, %v9379_v55  ;;  %v735_v61 = vadd.f32 %v703_v26, %v653_v63  ;;  %v2138_v55 = vmul.f32 %v12320_v60, %v12632_v33  ;;  %v2007_v30 = vadd.f32 %v1975_v51, %v12560_v42 }
 0x2cf   :  { %v4399_v18 = vadd.f32 %v4367_v35, %v9383_v1  ;;  %v9467_v31 = vmul.f32 0.5, %v736_v23  ;;  %v2139_v26 = vmul.f32 %v12321_v48, %v12632_v33  ;;  %v2220_v12 = vmul.f32 %v12436_v39, %v12635_v25 }
 0x2d0   :  { %v5796_v11 = vpop.eup %5795  ;;  %v9465_v1 = vmul.f32 0.5, %v735_v61  ;;  %v2088_v63 = vadd.f32 %v2056_v27, %v2006_v40  ;;  %v2221_v21 = vmul.f32 %v12324_v57, %v12635_v25  ;;  %v1469_v61 = vmul.f32 %v12376_v15, %v12622_v6  ;;  %v12696_v40 = vld [vmem:[#allocation46_spill] sm:$0xff]  ;;  %v12698_v25 = vld [vmem:[#allocation143_spill] sm:$0xff] }
 0x2d1   :  { %v4436_v2 = vadd.f32 %v4399_v18, %v4398_v52  ;;  %v5798_v5 = vpop.eup %5797  ;;  %v3861_v22 = vmul.f32 %v5796_v11, %v9403_v34  ;;  %v2089_v18 = vadd.f32 %v2057_v29, %v2007_v30  ;;  %v1470_v51 = vmul.f32 %v12438_v59, %v12622_v6  ;;  %v12695_v11 = vld [vmem:[#allocation36_spill] sm:$0xff]  ;;  %v12699_v29 = vld [vmem:[#allocation55_spill] sm:$0xff] }
 0x2d2   :  { %v3862_v35 = vmul.f32 %v5798_v5, %v9408_v7  ;;  %5803 = vtanh.f32 %v9465_v1  ;;  %v2170_v49 = vadd.f32 %v2138_v55, %v2088_v63  ;;  %v1551_v27 = vmul.f32 %v12695_v11, %v12626_v56  ;;  %v12700_v55 = vld [vmem:[#allocation56_spill] sm:$0xff] }
 0x2d3   :  { %4437 = vadd.xlane.f32.xlu0 %v4436_v2  ;;  %v3893_v52 = vadd.f32 %v3861_v22, %v9403_v34  ;;  %5805 = vtanh.f32 %v9467_v31  ;;  %v2171_v2 = vadd.f32 %v2139_v26, %v2089_v18  ;;  %v1501_v5 = vadd.f32 %v1469_v61, %v12696_v40  ;;  %v12697_v34 = vld [vmem:[#allocation37_spill] sm:$0xff]  ;;  %v12701_v18 = vld [vmem:[#allocation144_spill] sm:$0xff] }
 0x2d4   :  { %v3894_v23 = vadd.f32 %v3862_v35, %v9408_v7  ;;  %v1552_v22 = vmul.f32 %v12697_v34, %v12626_v56  ;;  %v1633_v30 = vmul.f32 %v12699_v29, %v12698_v25  ;;  %v2252_v43 = vadd.f32 %v2220_v12, %v2170_v49  ;;  %v12702_v61 = vld [vmem:[#allocation61_spill] sm:$0xff]  ;;  %v12705_v49 = vld [vmem:[#allocation58_spill] sm:$0xff] }
 0x2d5   :  { %v1502_v7 = vadd.f32 %v1470_v51, %v12696_v40  ;;  %v1634_v35 = vmul.f32 %v12700_v55, %v12698_v25  ;;  %v2253_v63 = vadd.f32 %v2221_v21, %v2171_v2  ;;  %v1583_v42 = vadd.f32 %v1551_v27, %v1501_v5  ;;  %v12704_v12 = vld [vmem:[#allocation57_spill] sm:$0xff] }
 0x2d6   :  { %v3932_v33 = vadd.f32 %v3894_v23, %v3893_v52  ;;  %v9497_v4 = vmul.f32 0.5, %v2252_v43  ;;  %v1715_v10 = vmul.f32 %v12702_v61, %v12701_v18  ;;  %v12703_v52 = vld [vmem:[#allocation96_spill] sm:$0xff] }
 0x2d7   :  { %v1584_v26 = vadd.f32 %v1552_v22, %v1502_v7  ;;  %v9501_v34 = vmul.f32 0.5, %v2253_v63  ;;  %v1665_v29 = vadd.f32 %v1633_v30, %v1583_v42  ;;  %v2984_v23 = vmul.f32 %v12704_v12, %v12703_v52 }
 0x2d8   :  { %3933 = vadd.xlane.f32.xlu1 %v3932_v33  ;;  %v5800_v36 = vpop.eup %5799  ;;  %v2985_v51 = vmul.f32 %v12705_v49, %v12703_v52  ;;  %5807 = vtanh.f32 %v9497_v4  ;;  %v12706_v33 = vld [vmem:[#allocation62_spill] sm:$0xff]  ;;  %v12709_v49 = vld [vmem:[#allocation117_spill] sm:$0xff] }
 0x2d9   :  { %v5802_v55 = vpop.eup %5801  ;;  %v1338_v21 = vmul.f32 %v5800_v36, %v9441_v37  ;;  %v1666_v43 = vadd.f32 %v1634_v35, %v1584_v26  ;;  %v1716_v27 = vmul.f32 %v12706_v33, %v12701_v18  ;;  %5809 = vtanh.f32 %v9501_v34  ;;  %v12707_v36 = vld [vmem:[#allocation69_spill] sm:$0xff]  ;;  %v12708_v52 = vld [vmem:[#allocation70_spill] sm:$0xff] }
 0x2da   :  { %v1339_v2 = vmul.f32 %v5802_v55, %v9444_v16  ;;  %v1747_v42 = vadd.f32 %v1715_v10, %v1665_v29  ;;  %v3016_v5 = vadd.f32 %v2984_v23, %v12656_v17  ;;  %v3017_v7 = vadd.f32 %v2985_v51, %v12656_v17  ;;  %v12711_v51 = vld [vmem:[#allocation103_spill] sm:$0xff] }
 0x2db   :  { %v1370_v22 = vadd.f32 %v1338_v21, %v9441_v37  ;;  %v1748_v30 = vadd.f32 %v1716_v27, %v1666_v43  ;;  %v3066_v63 = vmul.f32 %v12707_v36, %v12654_v53  ;;  %v3067_v55 = vmul.f32 %v12708_v52, %v12654_v53  ;;  %v12710_v37 = vld [vmem:[#allocation118_spill] sm:$0xff]  ;;  %v12712_v43 = vld [vmem:[#allocation153_spill] sm:$0xff] }
 0x2dc   :  { %v1371_v35 = vadd.f32 %v1339_v2, %v9444_v16  ;;  %v9519_v26 = vmul.f32 0.5, %v1747_v42  ;;  %v3148_v10 = vmul.f32 %v12709_v49, %v12658_v20  ;;  %v3149_v21 = vmul.f32 %v12710_v37, %v12658_v20  ;;  %v12713_v2 = vld [vmem:[#allocation154_spill] sm:$0xff] }
 0x2dd   :  { %v9525_v29 = vmul.f32 0.5, %v1748_v30  ;;  %v3098_v23 = vadd.f32 %v3066_v63, %v3016_v5  ;;  %v3230_v27 = vmul.f32 %v12712_v43, %v12711_v51  ;;  %v3099_v16 = vadd.f32 %v3067_v55, %v3017_v7  ;;  %v12714_v30 = vld [vmem:[#allocation107_spill] sm:$0xff]  ;;  %v12717_v7 = vld [vmem:[#allocation104_spill] sm:$0xff] }
 0x2de   :  { %v1415_v36 = vadd.f32 %v1371_v35, %v1370_v22  ;;  %5811 = vtanh.f32 %v9519_v26  ;;  %v3231_v42 = vmul.f32 %v12713_v2, %v12711_v51  ;;  %v12715_v63 = vld [vmem:[#allocation43_spill] sm:$0xff]  ;;  %v12716_v22 = vld [vmem:[#allocation44_spill] sm:$0xff] }
 0x2df   :  { %v5804_v17 = vpop.eup %5803  ;;  %5813 = vtanh.f32 %v9525_v29  ;;  %v3180_v5 = vadd.f32 %v3148_v10, %v3098_v23  ;;  %v2479_v20 = vmul.f32 %v12715_v63, %v12714_v30  ;;  %v3181_v37 = vadd.f32 %v3149_v21, %v3099_v16  ;;  %v12718_v55 = vld [vmem:[#allocation63_spill] sm:$0xff]  ;;  %v12720_v10 = vld [vmem:[#allocation64_spill] sm:$0xff] }
 0x2e0   :  { %v5806_v53 = vpop.eup %5805  ;;  %v831_v49 = vmul.f32 %v5804_v17, %v9465_v1  ;;  %1416 = vadd.xlane.f32.xlu0 %v1415_v36  ;;  %v2480_v35 = vmul.f32 %v12716_v22, %v12714_v30  ;;  %v2561_v52 = vmul.f32 %v12718_v55, %v12717_v7  ;;  %v12719_v17 = vld [vmem:[#allocation33_spill] sm:$0xff]  ;;  %v2562_v23 = vmul.f32 %v12720_v10, %v12717_v7  ;;  %v12721_v21 = vld [vmem:[#allocation108_spill] sm:$0xff]  ;;  %v12722_v16 = vld [vmem:[#allocation71_spill] sm:$0xff]  ;;  %v9577_v10 = vpop.permute.xlu0 %408 }
 0x2e1   :  { %v832_v43 = vmul.f32 %v5806_v53, %v9467_v31  ;;  %v3262_v2 = vadd.f32 %v3230_v27, %v3180_v5  ;;  %v2511_v12 = vadd.f32 %v2479_v20, %v12719_v17  ;;  %v3263_v36 = vadd.f32 %v3231_v42, %v3181_v37  ;;  %v12723_v55 = vld [vmem:[#allocation72_spill] sm:$0xff]  ;;  %v12725_v37 = vld [vmem:[#allocation110_spill] sm:$0xff]  ;;  %v12726_v42 = vld [vmem:[#allocation111_spill] sm:$0xff]  ;;  %12732 = vst [vmem:[#allocation114_spill] sm:$0xff] %v9577_v10 }
 0x2e2   :  { %v863_v51 = vadd.f32 %v831_v49, %v9465_v1  ;;  %v2512_v53 = vadd.f32 %v2480_v35, %v12719_v17  ;;  %v2643_v33 = vmul.f32 %v12722_v16, %v12721_v21  ;;  %v2644_v1 = vmul.f32 %v12723_v55, %v12721_v21  ;;  %v12750_v21 = vld [vmem:[#allocation87_spill] sm:$0xff] }
 0x2e3   :  { %v864_v63 = vadd.f32 %v832_v43, %v9467_v31  ;;  %v9551_v22 = vmul.f32 0.5, %v3262_v2  ;;  %v2593_v30 = vadd.f32 %v2561_v52, %v2511_v12  ;;  %v9555_v27 = vmul.f32 0.5, %v3263_v36  ;;  %v12724_v31 = vld [vmem:[#allocation109_spill] sm:$0xff] }
 0x2e4   :  { %v2594_v20 = vadd.f32 %v2562_v23, %v2512_v53  ;;  %v2725_v43 = vmul.f32 %v12725_v37, %v12724_v31  ;;  %v2726_v35 = vmul.f32 %v12726_v42, %v12724_v31  ;;  %v12727_v12 = vld [vmem:[#allocation89_spill] sm:$0xff]  ;;  %v12730_v53 = vld [vmem:[#allocation136_spill] sm:$0xff] }
 0x2e5   :  { %v908_v49 = vadd.f32 %v864_v63, %v863_v51  ;;  %5815 = vtanh.f32 %v9551_v22  ;;  %v2675_v5 = vadd.f32 %v2643_v33, %v2593_v30  ;;  %v5808_v16 = vpop.eup %5807  ;;  %v12728_v2 = vld [vmem:[#allocation93_spill] sm:$0xff]  ;;  %v12729_v63 = vld [vmem:[#allocation94_spill] sm:$0xff]  ;;  %v4076_v37 = vmul.f32 %v12730_v53, %v12677_v3 }
 0x2e6   :  { %5817 = vtanh.f32 %v9555_v27  ;;  %v2676_v52 = vadd.f32 %v2644_v1, %v2594_v20  ;;  %v3994_v51 = vmul.f32 %v12728_v2, %v12727_v12  ;;  %v3995_v23 = vmul.f32 %v12729_v63, %v12727_v12  ;;  %v5810_v36 = vpop.eup %5809 }
 0x2e7   :  { %909 = vadd.xlane.f32.xlu1 %v908_v49  ;;  %v2348_v33 = vmul.f32 %v5808_v16, %v9497_v4  ;;  %v2757_v30 = vadd.f32 %v2725_v43, %v2675_v5  ;;  %v2349_v42 = vmul.f32 %v5810_v36, %v9501_v34  ;;  %v9571_v49 = vpop.permute.xlu1 %340  ;;  %v12733_v43 = vld [vmem:[#allocation137_spill] sm:$0xff] }
 0x2e8   :  { %v2758_v55 = vadd.f32 %v2726_v35, %v2676_v52  ;;  %12731 = vst [vmem:[#allocation149_spill] sm:$0xff] %v9571_v49  ;;  %v4026_v2 = vadd.f32 %v3994_v51, %v12679_v13  ;;  %v4027_v5 = vadd.f32 %v3995_v23, %v12679_v13  ;;  %v4077_v36 = vmul.f32 %v12733_v43, %v12677_v3  ;;  %v12736_v13 = vld [vmem:[#allocation95_spill] sm:$0xff]  ;;  %v12737_v23 = vld [vmem:[#allocation92_spill] sm:$0xff]  ;;  %v12738_v43 = vld [vmem:[#allocation98_spill] sm:$0xff] }
 0x2e9   :  { %v2380_v1 = vadd.f32 %v2348_v33, %v9497_v4  ;;  %v9574_v20 = vmul.f32 0.5, %v2757_v30  ;;  %v2381_v12 = vadd.f32 %v2349_v42, %v9501_v34  ;;  %v12734_v4 = vld [vmem:[#allocation91_spill] sm:$0xff]  ;;  %v12735_v33 = vld [vmem:[#allocation138_spill] sm:$0xff]  ;;  %v4240_v63 = vmul.f32 %v12738_v43, %v12737_v23 }
 0x2ea   :  { %v9580_v16 = vmul.f32 0.5, %v2758_v55  ;;  %v4108_v52 = vadd.f32 %v4076_v37, %v4026_v2  ;;  %v4158_v30 = vmul.f32 %v12735_v33, %v12734_v4  ;;  %v4109_v34 = vadd.f32 %v4077_v36, %v4027_v5  ;;  %v9595_v37 = vpop.xlane.xlu0 %873  ;;  %v12742_v33 = vld [vmem:[#allocation123_spill] sm:$0xff] }
 0x2eb   :  { %v5812_v35 = vpop.eup %5811  ;;  %5819 = vtanh.f32 %v9574_v20  ;;  %v2423_v51 = vadd.f32 %v2381_v12, %v2380_v1  ;;  %v4159_v42 = vmul.f32 %v12736_v13, %v12734_v4  ;;  %12739 = vst [vmem:[#allocation150_spill] sm:$0xff] %v9595_v37  ;;  %v12740_v1 = vld [vmem:[#allocation99_spill] sm:$0xff]  ;;  %v9604_v31 = vpop.permute.xlu1 %344  ;;  %v12747_v13 = vld [vmem:[#allocation25_spill] sm:$0xff] }
 0x2ec   :  { %v5814_v53 = vpop.eup %5813  ;;  %v1843_v10 = vmul.f32 %v5812_v35, %v9519_v26  ;;  %5821 = vtanh.f32 %v9580_v16  ;;  %v4190_v3 = vadd.f32 %v4158_v30, %v4108_v52  ;;  %v4241_v12 = vmul.f32 %v12740_v1, %v12737_v23  ;;  %v12741_v35 = vld [vmem:[#allocation97_spill] sm:$0xff]  ;;  %12744 = vst [vmem:[#allocation151_spill] sm:$0xff] %v9604_v31  ;;  %v12745_v43 = vld [vmem:[#allocation139_spill] sm:$0xff]  ;;  %v12748_v23 = vld [vmem:[#allocation84_spill] sm:$0xff] }
 0x2ed   :  { %v1844_v55 = vmul.f32 %v5814_v53, %v9525_v29  ;;  %2424 = vadd.xlane.f32.xlu0 %v2423_v51  ;;  %v3489_v5 = vmul.f32 %v12742_v33, %v12741_v35  ;;  %v12743_v53 = vld [vmem:[#allocation173_spill] sm:$0xff]  ;;  %v4191_v4 = vadd.f32 %v4159_v42, %v4109_v34  ;;  %v12746_v37 = vld [vmem:[#allocation83_spill] sm:$0xff]  ;;  %v3572_v1 = vmul.f32 %v12748_v23, %v12745_v43  ;;  %v12749_v33 = vld [vmem:[#allocation100_spill] sm:$0xff] }
 0x2ee   :  { %v1875_v2 = vadd.f32 %v1843_v10, %v9519_v26  ;;  %v3490_v36 = vmul.f32 %v12743_v53, %v12741_v35  ;;  %v4272_v30 = vadd.f32 %v4240_v63, %v4190_v3  ;;  %v3571_v51 = vmul.f32 %v12746_v37, %v12745_v43  ;;  %v12752_v23 = vld [vmem:[#allocation101_spill] sm:$0xff] }
 0x2ef   :  { %v1876_v52 = vadd.f32 %v1844_v55, %v9525_v29  ;;  %v3521_v26 = vadd.f32 %v3489_v5, %v12747_v13  ;;  %v3653_v7 = vmul.f32 %v12750_v21, %v12749_v33  ;;  %v4273_v35 = vadd.f32 %v4241_v12, %v4191_v4  ;;  %v12751_v29 = vld [vmem:[#allocation88_spill] sm:$0xff]  ;;  %v12753_v21 = vld [vmem:[#allocation85_spill] sm:$0xff]  ;;  %v9625_v12 = vpop.xlane.xlu0 %1377 }
 0x2f0   :  { %v3522_v10 = vadd.f32 %v3490_v36, %v12747_v13  ;;  %v9615_v31 = vmul.f32 0.5, %v4272_v30  ;;  %v3654_v63 = vmul.f32 %v12751_v29, %v12749_v33  ;;  %12754 = vst [vmem:[#allocation40_spill] sm:$0xff] %v9625_v12 }
 0x2f1   :  { %v1919_v53 = vadd.f32 %v1876_v52, %v1875_v2  ;;  %v3603_v55 = vadd.f32 %v3571_v51, %v3521_v26  ;;  %v9620_v36 = vmul.f32 0.5, %v4273_v35  ;;  %v3735_v2 = vmul.f32 %v12753_v21, %v12752_v23  ;;  %v12755_v51 = vld [vmem:[#allocation86_spill] sm:$0xff]  ;;  %v9630_v26 = vpop.permute.xlu1 %404  ;;  %v12757_v35 = vld [vmem:[#allocation116_spill] sm:$0xff] }
 0x2f2   :  { %v5816_v34 = vpop.eup %5815  ;;  %v3604_v42 = vadd.f32 %v3572_v1, %v3522_v10  ;;  %5823 = vtanh.f32 %v9615_v31  ;;  %v3736_v1 = vmul.f32 %v12755_v51, %v12752_v23  ;;  %12756 = vst [vmem:[#allocation152_spill] sm:$0xff] %v9630_v26  ;;  %v12758_v10 = vld [vmem:[#allocation18_spill] sm:$0xff] }
 0x2f3   :  { %v5818_v3 = vpop.eup %5817  ;;  %1920 = vadd.xlane.f32.xlu1 %v1919_v53  ;;  %v3358_v5 = vmul.f32 %v5816_v34, %v9551_v22  ;;  %v3685_v4 = vadd.f32 %v3653_v7, %v3603_v55  ;;  %5825 = vtanh.f32 %v9620_v36  ;;  %v966_v34 = vmul.f32 %v12758_v10, %v12757_v35 }
 0x2f4   :  { %v3359_v52 = vmul.f32 %v5818_v3, %v9555_v27  ;;  %v3686_v30 = vadd.f32 %v3654_v63, %v3604_v42  ;;  %v967_v7 = vmul.f32 %v12689_v38, %v12757_v35  ;;  %v12759_v63 = vld [vmem:[#allocation54_spill] sm:$0xff]  ;;  %v12760_v42 = vld [vmem:[#allocation155_spill] sm:$0xff] }
 0x2f5   :  { %v3390_v53 = vadd.f32 %v3358_v5, %v9551_v22  ;;  %v3767_v29 = vadd.f32 %v3735_v2, %v3685_v4  ;;  %v998_v55 = vadd.f32 %v966_v34, %v12759_v63  ;;  %v1048_v3 = vmul.f32 %v12691_v19, %v12760_v42 }
 0x2f6   :  { %v3391_v21 = vadd.f32 %v3359_v52, %v9555_v27  ;;  %v3768_v12 = vadd.f32 %v3736_v1, %v3686_v30  ;;  %v1049_v22 = vmul.f32 %v12303_v47, %v12760_v42  ;;  %v1130_v27 = vmul.f32 %v12157_v46, %v9571_v49  ;;  %v9650_v52 = vpop.xlane.xlu1 %870  ;;  %v9656_v47 = vpop.xlane.xlu0 %876 }
 0x2f7   :  { %v9644_v37 = vmul.f32 0.5, %v3767_v29  ;;  %12761 = vst [vmem:[#allocation157_spill] sm:$0xff] %v9650_v52  ;;  %v999_v30 = vadd.f32 %v967_v7, %v12759_v63  ;;  %v1080_v1 = vadd.f32 %v1048_v3, %v998_v55  ;;  %v1131_v34 = vmul.f32 %v12158_v9, %v9571_v49  ;;  %12762 = vst [vmem:[#allocation158_spill] sm:$0xff] %v9656_v47  ;;  %v12763_v29 = vld [vmem:[#allocation51_spill] sm:$0xff]  ;;  %v12765_v47 = vld [vmem:[#allocation30_spill] sm:$0xff] }
 0x2f8   :  { %v5820_v5 = vpop.eup %5819  ;;  %v3431_v51 = vadd.f32 %v3391_v21, %v3390_v53  ;;  %v9646_v10 = vmul.f32 0.5, %v3768_v12  ;;  %v1212_v12 = vmul.f32 %v12763_v29, %v9630_v26  ;;  %v12764_v53 = vld [vmem:[#allocation52_spill] sm:$0xff]  ;;  %v541_v29 = vmul.f32 %v12765_v47, %v12760_v42 }
 0x2f9   :  { %v5822_v2 = vpop.eup %5821  ;;  %v2853_v4 = vmul.f32 %v5820_v5, %v9574_v20  ;;  %5827 = vtanh.f32 %v9644_v37  ;;  %v1213_v52 = vmul.f32 %v12764_v53, %v9630_v26  ;;  %v1081_v7 = vadd.f32 %v1049_v22, %v999_v30 }
 0x2fa   :  { %3432 = vadd.xlane.f32.xlu0 %v3431_v51  ;;  %v2854_v21 = vmul.f32 %v5822_v2, %v9580_v16  ;;  %5829 = vtanh.f32 %v9646_v10  ;;  %v1162_v55 = vadd.f32 %v1130_v27, %v1080_v1  ;;  %v459_v51 = vmul.f32 %v12563_v28, %v12757_v35  ;;  %v9681_v1 = vpop.xlane.xlu1 %1380 }
 0x2fb   :  { %v2885_v5 = vadd.f32 %v2853_v4, %v9574_v20  ;;  %v460_v2 = vmul.f32 %v12629_v14, %v12757_v35  ;;  %v1163_v9 = vadd.f32 %v1131_v34, %v1081_v7  ;;  %v542_v20 = vmul.f32 %v12370_v8, %v12760_v42  ;;  %12766 = vst [vmem:[#allocation159_spill] sm:$0xff] %v9681_v1 }
 0x2fc   :  { %v2886_v3 = vadd.f32 %v2854_v21, %v9580_v16  ;;  %v1244_v46 = vadd.f32 %v1212_v12, %v1162_v55  ;;  %v623_v22 = vmul.f32 %v12434_v44, %v9571_v49  ;;  %v491_v16 = vadd.f32 %v459_v51, %v12759_v63  ;;  %v9685_v12 = vpop.xlane.xlu0 %1884 }
 0x2fd   :  { %v492_v4 = vadd.f32 %v460_v2, %v12759_v63  ;;  %v624_v30 = vmul.f32 %v12372_v50, %v9571_v49  ;;  %v1245_v21 = vadd.f32 %v1213_v52, %v1163_v9  ;;  %12767 = vst [vmem:[#allocation160_spill] sm:$0xff] %v9685_v12  ;;  %v2058_v1 = vmul.f32 %v12316_v54, %v12626_v56 }
 0x2fe   :  { %v2927_v27 = vadd.f32 %v2886_v3, %v2885_v5  ;;  %v9683_v35 = vmul.f32 0.5, %v1244_v46  ;;  %v573_v7 = vadd.f32 %v541_v29, %v491_v16  ;;  %v705_v5 = vmul.f32 %v12373_v58, %v9630_v26 }
 0x2ff   :  { %v5824_v34 = vpop.eup %5823  ;;  %v574_v55 = vadd.f32 %v542_v20, %v492_v4  ;;  %v706_v3 = vmul.f32 %v12374_v32, %v9630_v26  ;;  %v9692_v2 = vmul.f32 0.5, %v1245_v21  ;;  %v1976_v46 = vmul.f32 %v12313_v0, %v12622_v6 }
 0x300   :  { %2928 = vadd.xlane.f32.xlu1 %v2927_v27  ;;  %v4368_v51 = vmul.f32 %v5824_v34, %v9615_v31  ;;  %5831 = vtanh.f32 %v9683_v35  ;;  %v5826_v9 = vpop.eup %5825  ;;  %v655_v52 = vadd.f32 %v623_v22, %v573_v7  ;;  %v1977_v29 = vmul.f32 %v12314_v41, %v12622_v6  ;;  %v9706_v22 = vpop.xlane.xlu1 %1383  ;;  %v12781_v6 = vld [vmem:[#allocation58_spill] sm:$0xff] }
 0x301   :  { %v656_v27 = vadd.f32 %v624_v30, %v574_v55  ;;  %v4369_v20 = vmul.f32 %v5826_v9, %v9620_v36  ;;  %5833 = vtanh.f32 %v9692_v2  ;;  %v2008_v4 = vadd.f32 %v1976_v46, %v12696_v40  ;;  %12768 = vst [vmem:[#allocation161_spill] sm:$0xff] %v9706_v22 }
 0x302   :  { %v4400_v16 = vadd.f32 %v4368_v51, %v9615_v31  ;;  %v737_v21 = vadd.f32 %v705_v5, %v655_v52  ;;  %v2009_v12 = vadd.f32 %v1977_v29, %v12696_v40  ;;  %v2059_v7 = vmul.f32 %v12435_v45, %v12626_v56  ;;  %v9715_v5 = vpop.xlane.xlu0 %879  ;;  %v12773_v40 = vld [vmem:[#allocation145_spill] sm:$0xff] }
 0x303   :  { %v738_v34 = vadd.f32 %v706_v3, %v656_v27  ;;  %v4401_v30 = vadd.f32 %v4369_v20, %v9620_v36  ;;  %v2140_v31 = vmul.f32 %v12320_v60, %v12698_v25  ;;  %v2141_v55 = vmul.f32 %v12321_v48, %v12698_v25  ;;  %12769 = vst [vmem:[#allocation162_spill] sm:$0xff] %v9715_v5  ;;  %v12770_v20 = vld [vmem:[#allocation112_spill] sm:$0xff] }
 0x304   :  { %v9717_v3 = vmul.f32 0.5, %v737_v21  ;;  %v2090_v46 = vadd.f32 %v2058_v1, %v2008_v4  ;;  %v2222_v9 = vmul.f32 %v12436_v39, %v12701_v18  ;;  %v2091_v27 = vadd.f32 %v2059_v7, %v2009_v12 }
 0x305   :  { %v9719_v51 = vmul.f32 0.5, %v738_v34  ;;  %v4439_v52 = vadd.f32 %v4401_v30, %v4400_v16  ;;  %v2223_v29 = vmul.f32 %v12324_v57, %v12701_v18  ;;  %v1471_v22 = vmul.f32 %v12376_v15, %v12770_v20 }
 0x306   :  { %v5828_v36 = vpop.eup %5827  ;;  %5835 = vtanh.f32 %v9717_v3  ;;  %v2172_v21 = vadd.f32 %v2140_v31, %v2090_v46  ;;  %v1472_v1 = vmul.f32 %v12438_v59, %v12770_v20  ;;  %v2173_v12 = vadd.f32 %v2141_v55, %v2091_v27  ;;  %v9738_v31 = vpop.xlane.xlu1 %1887  ;;  %v12774_v55 = vld [vmem:[#allocation55_spill] sm:$0xff] }
 0x307   :  { %v5830_v25 = vpop.eup %5829  ;;  %v3863_v5 = vmul.f32 %v5828_v36, %v9644_v37  ;;  %4440 = vadd.xlane.f32.xlu0 %v4439_v52  ;;  %5837 = vtanh.f32 %v9719_v51  ;;  %v1503_v16 = vadd.f32 %v1471_v22, %v12693_v62  ;;  %v1553_v36 = vmul.f32 %v12695_v11, %v12690_v24  ;;  %12771 = vst [vmem:[#allocation163_spill] sm:$0xff] %v9738_v31  ;;  %v9745_v22 = vpop.xlane.xlu0 %1890 }
 0x308   :  { %v3864_v4 = vmul.f32 %v5830_v25, %v9646_v10  ;;  %v2254_v30 = vadd.f32 %v2222_v9, %v2172_v21  ;;  %v1504_v7 = vadd.f32 %v1472_v1, %v12693_v62  ;;  %v2255_v52 = vadd.f32 %v2223_v29, %v2173_v12  ;;  %v12772_v25 = vld [vmem:[#allocation37_spill] sm:$0xff]  ;;  %12775 = vst [vmem:[#allocation164_spill] sm:$0xff] %v9745_v22  ;;  %v12776_v9 = vld [vmem:[#allocation56_spill] sm:$0xff] }
 0x309   :  { %v3895_v34 = vadd.f32 %v3863_v5, %v9644_v37  ;;  %v1554_v18 = vmul.f32 %v12772_v25, %v12690_v24  ;;  %v1635_v27 = vmul.f32 %v12774_v55, %v12773_v40  ;;  %v1585_v5 = vadd.f32 %v1553_v36, %v1503_v16  ;;  %v12793_v55 = vld [vmem:[#allocation106_spill] sm:$0xff] }
 0x30a   :  { %v3896_v46 = vadd.f32 %v3864_v4, %v9646_v10  ;;  %v9747_v37 = vmul.f32 0.5, %v2254_v30  ;;  %v1636_v21 = vmul.f32 %v12776_v9, %v12773_v40  ;;  %v9751_v56 = vmul.f32 0.5, %v2255_v52  ;;  %v12777_v4 = vld [vmem:[#allocation146_spill] sm:$0xff]  ;;  %v12779_v52 = vld [vmem:[#allocation107_spill] sm:$0xff] }
 0x30b   :  { %v1586_v31 = vadd.f32 %v1554_v18, %v1504_v7  ;;  %v1667_v29 = vadd.f32 %v1635_v27, %v1585_v5  ;;  %v1717_v12 = vmul.f32 %v12702_v61, %v12777_v4  ;;  %v12778_v30 = vld [vmem:[#allocation62_spill] sm:$0xff]  ;;  %v12780_v18 = vld [vmem:[#allocation57_spill] sm:$0xff]  ;;  %v2987_v27 = vmul.f32 %v12781_v6, %v12779_v52  ;;  %v9764_v5 = vpop.xlane.xlu1 %1386  ;;  %v9768_v26 = vpop.xlane.xlu0 %2394 }
 0x30c   :  { %v3935_v1 = vadd.f32 %v3896_v46, %v3895_v34  ;;  %5839 = vtanh.f32 %v9747_v37  ;;  %v1718_v36 = vmul.f32 %v12778_v30, %v12777_v4  ;;  %v2986_v7 = vmul.f32 %v12780_v18, %v12779_v52  ;;  %12782 = vst [vmem:[#allocation167_spill] sm:$0xff] %v9764_v5  ;;  %12783 = vst [vmem:[#allocation168_spill] sm:$0xff] %v9768_v26  ;;  %v12784_v52 = vld [vmem:[#allocation104_spill] sm:$0xff]  ;;  %v12785_v6 = vld [vmem:[#allocation69_spill] sm:$0xff] }
 0x30d   :  { %v5832_v10 = vpop.eup %5831  ;;  %5841 = vtanh.f32 %v9751_v56  ;;  %v1668_v16 = vadd.f32 %v1636_v21, %v1586_v31  ;;  %v1749_v46 = vadd.f32 %v1717_v12, %v1667_v29  ;;  %v3019_v29 = vadd.f32 %v2987_v27, %v12719_v17 }
 0x30e   :  { %3936 = vadd.xlane.f32.xlu1 %v3935_v1  ;;  %v1340_v22 = vmul.f32 %v5832_v10, %v9683_v35  ;;  %v5834_v34 = vpop.eup %5833  ;;  %v3018_v21 = vadd.f32 %v2986_v7, %v12719_v17  ;;  %v3068_v5 = vmul.f32 %v12785_v6, %v12784_v52  ;;  %v12790_v17 = vld [vmem:[#allocation109_spill] sm:$0xff] }
 0x30f   :  { %v1341_v1 = vmul.f32 %v5834_v34, %v9692_v2  ;;  %v1750_v61 = vadd.f32 %v1718_v36, %v1668_v16  ;;  %v9770_v31 = vmul.f32 0.5, %v1749_v46  ;;  %v12786_v34 = vld [vmem:[#allocation70_spill] sm:$0xff]  ;;  %v12791_v6 = vld [vmem:[#allocation153_spill] sm:$0xff]  ;;  %v9794_v25 = vpop.xlane.xlu1 %2391 }
 0x310   :  { %v1372_v10 = vadd.f32 %v1340_v22, %v9683_v35  ;;  %v3069_v30 = vmul.f32 %v12786_v34, %v12784_v52  ;;  %v12787_v35 = vld [vmem:[#allocation108_spill] sm:$0xff]  ;;  %v12788_v22 = vld [vmem:[#allocation117_spill] sm:$0xff]  ;;  %v12789_v36 = vld [vmem:[#allocation118_spill] sm:$0xff]  ;;  %v3232_v52 = vmul.f32 %v12791_v6, %v12790_v17  ;;  %12795 = vst [vmem:[#allocation121_spill] sm:$0xff] %v9794_v25 }
 0x311   :  { %v1373_v12 = vadd.f32 %v1341_v1, %v9692_v2  ;;  %v9775_v18 = vmul.f32 0.5, %v1750_v61  ;;  %5843 = vtanh.f32 %v9770_v31  ;;  %v3150_v16 = vmul.f32 %v12788_v22, %v12787_v35  ;;  %v12792_v34 = vld [vmem:[#allocation154_spill] sm:$0xff]  ;;  %v12794_v22 = vld [vmem:[#allocation43_spill] sm:$0xff] }
 0x312   :  { %v3151_v46 = vmul.f32 %v12789_v36, %v12787_v35  ;;  %v3100_v61 = vadd.f32 %v3068_v5, %v3018_v21  ;;  %v3101_v2 = vadd.f32 %v3069_v30, %v3019_v29  ;;  %v3233_v9 = vmul.f32 %v12792_v34, %v12790_v17  ;;  %v12796_v30 = vld [vmem:[#allocation44_spill] sm:$0xff]  ;;  %v9799_v29 = vpop.xlane.xlu0 %1389  ;;  %v12799_v17 = vld [vmem:[#allocation105_spill] sm:$0xff]  ;;  %v12800_v34 = vld [vmem:[#allocation63_spill] sm:$0xff] }
 0x313   :  { %v5836_v7 = vpop.eup %5835  ;;  %v1418_v27 = vadd.f32 %v1373_v12, %v1372_v10  ;;  %5845 = vtanh.f32 %v9775_v18  ;;  %v2481_v49 = vmul.f32 %v12794_v22, %v12793_v55  ;;  %v2482_v21 = vmul.f32 %v12796_v30, %v12793_v55  ;;  %12797 = vst [vmem:[#allocation122_spill] sm:$0xff] %v9799_v29  ;;  %v12798_v35 = vld [vmem:[#allocation32_spill] sm:$0xff]  ;;  %v12803_v30 = vld [vmem:[#allocation71_spill] sm:$0xff] }
 0x314   :  { %v5838_v1 = vpop.eup %5837  ;;  %v833_v26 = vmul.f32 %v5836_v7, %v9717_v3  ;;  %v3182_v12 = vadd.f32 %v3150_v16, %v3100_v61  ;;  %v3183_v5 = vadd.f32 %v3151_v46, %v3101_v2  ;;  %v2563_v36 = vmul.f32 %v12800_v34, %v12799_v17  ;;  %v12801_v22 = vld [vmem:[#allocation64_spill] sm:$0xff]  ;;  %v12802_v2 = vld [vmem:[#allocation141_spill] sm:$0xff] }
 0x315   :  { %1419 = vadd.xlane.f32.xlu0 %v1418_v27  ;;  %v834_v10 = vmul.f32 %v5838_v1, %v9719_v51  ;;  %v2513_v6 = vadd.f32 %v2481_v49, %v12798_v35  ;;  %v2564_v25 = vmul.f32 %v12801_v22, %v12799_v17  ;;  %v2514_v46 = vadd.f32 %v2482_v21, %v12798_v35  ;;  %v12808_v21 = vld [vmem:[#allocation111_spill] sm:$0xff] }
 0x316   :  { %v865_v7 = vadd.f32 %v833_v26, %v9717_v3  ;;  %v3264_v1 = vadd.f32 %v3232_v52, %v3182_v12  ;;  %v3265_v16 = vadd.f32 %v3233_v9, %v3183_v5  ;;  %v2645_v29 = vmul.f32 %v12803_v30, %v12802_v2  ;;  %v12804_v26 = vld [vmem:[#allocation72_spill] sm:$0xff]  ;;  %v12805_v52 = vld [vmem:[#allocation142_spill] sm:$0xff] }
 0x317   :  { %v866_v27 = vadd.f32 %v834_v10, %v9719_v51  ;;  %v2595_v61 = vadd.f32 %v2563_v36, %v2513_v6  ;;  %v2646_v3 = vmul.f32 %v12804_v26, %v12802_v2  ;;  %v2596_v22 = vadd.f32 %v2564_v25, %v2514_v46  ;;  %v12806_v10 = vld [vmem:[#allocation110_spill] sm:$0xff]  ;;  %v9820_v36 = vpop.xlane.xlu1 %882  ;;  %v12810_v46 = vld [vmem:[#allocation97_spill] sm:$0xff] }
 0x318   :  { %v9813_v11 = vmul.f32 0.5, %v3264_v1  ;;  %v9815_v34 = vmul.f32 0.5, %v3265_v16  ;;  %v2727_v6 = vmul.f32 %v12806_v10, %v12805_v52  ;;  %12807 = vst [vmem:[#allocation165_spill] sm:$0xff] %v9820_v36 }
 0x319   :  { %v5840_v49 = vpop.eup %5839  ;;  %v911_v55 = vadd.f32 %v866_v27, %v865_v7  ;;  %v2677_v9 = vadd.f32 %v2645_v29, %v2595_v61  ;;  %v2678_v5 = vadd.f32 %v2646_v3, %v2596_v22  ;;  %v2728_v7 = vmul.f32 %v12808_v21, %v12805_v52  ;;  %v9826_v27 = vpop.xlane.xlu0 %2397  ;;  %v12812_v22 = vld [vmem:[#allocation94_spill] sm:$0xff] }
 0x31a   :  { %v5842_v17 = vpop.eup %5841  ;;  %v2350_v51 = vmul.f32 %v5840_v49, %v9747_v37  ;;  %5847 = vtanh.f32 %v9813_v11  ;;  %12809 = vst [vmem:[#allocation171_spill] sm:$0xff] %v9826_v27  ;;  %v3997_v3 = vmul.f32 %v12812_v22, %v12810_v46  ;;  %v12813_v49 = vld [vmem:[#allocation136_spill] sm:$0xff]  ;;  %v12814_v27 = vld [vmem:[#allocation137_spill] sm:$0xff] }
 0x31b   :  { %912 = vadd.xlane.f32.xlu1 %v911_v55  ;;  %v2351_v12 = vmul.f32 %v5842_v17, %v9751_v56  ;;  %5849 = vtanh.f32 %v9815_v34  ;;  %v2759_v29 = vadd.f32 %v2727_v6, %v2677_v9  ;;  %v2760_v16 = vadd.f32 %v2728_v7, %v2678_v5  ;;  %v12811_v55 = vld [vmem:[#allocation93_spill] sm:$0xff]  ;;  %v12815_v6 = vld [vmem:[#allocation138_spill] sm:$0xff] }
 0x31c   :  { %v2382_v25 = vadd.f32 %v2350_v51, %v9747_v37  ;;  %v3996_v61 = vmul.f32 %v12811_v55, %v12810_v46  ;;  %v4078_v36 = vmul.f32 %v12813_v49, %v12745_v43  ;;  %v4079_v37 = vmul.f32 %v12814_v27, %v12745_v43  ;;  %v12816_v46 = vld [vmem:[#allocation95_spill] sm:$0xff]  ;;  %v9851_v43 = vpop.xlane.xlu1 %1893  ;;  %v12823_v22 = vld [vmem:[#allocation173_spill] sm:$0xff] }
 0x31d   :  { %v2383_v1 = vadd.f32 %v2351_v12, %v9751_v56  ;;  %v9833_v17 = vmul.f32 0.5, %v2759_v29  ;;  %v9841_v9 = vmul.f32 0.5, %v2760_v16  ;;  %v4160_v12 = vmul.f32 %v12815_v6, %v12749_v33  ;;  %12817 = vst [vmem:[#allocation166_spill] sm:$0xff] %v9851_v43  ;;  %v12818_v16 = vld [vmem:[#allocation98_spill] sm:$0xff]  ;;  %v9857_v6 = vpop.xlane.xlu0 %2901  ;;  %v12825_v55 = vld [vmem:[#allocation83_spill] sm:$0xff] }
 0x31e   :  { %v5844_v51 = vpop.eup %5843  ;;  %v4028_v56 = vadd.f32 %v3996_v61, %v12747_v13  ;;  %v4029_v29 = vadd.f32 %v3997_v3, %v12747_v13  ;;  %v4161_v49 = vmul.f32 %v12816_v46, %v12749_v33  ;;  %v4242_v61 = vmul.f32 %v12818_v16, %v12752_v23  ;;  %12819 = vst [vmem:[#allocation172_spill] sm:$0xff] %v9857_v6  ;;  %v12820_v13 = vld [vmem:[#allocation99_spill] sm:$0xff]  ;;  %v12821_v33 = vld [vmem:[#allocation96_spill] sm:$0xff] }
 0x31f   :  { %v2426_v21 = vadd.f32 %v2383_v1, %v2382_v25  ;;  %v1845_v7 = vmul.f32 %v5844_v51, %v9770_v31  ;;  %5851 = vtanh.f32 %v9833_v17  ;;  %v4243_v3 = vmul.f32 %v12820_v13, %v12752_v23  ;;  %v12822_v46 = vld [vmem:[#allocation123_spill] sm:$0xff]  ;;  %v12826_v6 = vld [vmem:[#allocation24_spill] sm:$0xff] }
 0x320   :  { %v5846_v5 = vpop.eup %5845  ;;  %5853 = vtanh.f32 %v9841_v9  ;;  %v4110_v1 = vadd.f32 %v4078_v36, %v4028_v56  ;;  %v4111_v27 = vadd.f32 %v4079_v37, %v4029_v29  ;;  %v3491_v43 = vmul.f32 %v12822_v46, %v12821_v33  ;;  %v12824_v56 = vld [vmem:[#allocation140_spill] sm:$0xff]  ;;  %v12829_v23 = vld [vmem:[#allocation87_spill] sm:$0xff] }
 0x321   :  { %2427 = vadd.xlane.f32.xlu0 %v2426_v21  ;;  %v1846_v25 = vmul.f32 %v5846_v5, %v9775_v18  ;;  %v1877_v51 = vadd.f32 %v1845_v7, %v9770_v31  ;;  %v3492_v36 = vmul.f32 %v12823_v22, %v12821_v33  ;;  %v3573_v16 = vmul.f32 %v12825_v55, %v12824_v56  ;;  %v12827_v31 = vld [vmem:[#allocation84_spill] sm:$0xff]  ;;  %v12828_v7 = vld [vmem:[#allocation102_spill] sm:$0xff]  ;;  %v9877_v33 = vpop.xlane.xlu1 %2898 }
 0x322   :  { %v4192_v5 = vadd.f32 %v4160_v12, %v4110_v1  ;;  %v4193_v10 = vadd.f32 %v4161_v49, %v4111_v27  ;;  %v3523_v26 = vadd.f32 %v3491_v43, %v12826_v6  ;;  %v3574_v37 = vmul.f32 %v12827_v31, %v12824_v56  ;;  %v12830_v12 = vld [vmem:[#allocation88_spill] sm:$0xff]  ;;  %12831 = vst [vmem:[#allocation27_spill] sm:$0xff] %v9877_v33  ;;  %v12832_v43 = vld [vmem:[#allocation103_spill] sm:$0xff]  ;;  %v12833_v31 = vld [vmem:[#allocation85_spill] sm:$0xff] }
 0x323   :  { %v1878_v21 = vadd.f32 %v1846_v25, %v9775_v18  ;;  %v3655_v29 = vmul.f32 %v12829_v23, %v12828_v7  ;;  %v3524_v18 = vadd.f32 %v3492_v36, %v12826_v6  ;;  %v3656_v25 = vmul.f32 %v12830_v12, %v12828_v7  ;;  %v9883_v23 = vpop.xlane.xlu0 %1392  ;;  %v12840_v33 = vld [vmem:[#allocation35_spill] sm:$0xff] }
 0x324   :  { %v4274_v46 = vadd.f32 %v4242_v61, %v4192_v5  ;;  %v4275_v1 = vadd.f32 %v4243_v3, %v4193_v10  ;;  %v3605_v22 = vadd.f32 %v3573_v16, %v3523_v26  ;;  %v3737_v55 = vmul.f32 %v12833_v31, %v12832_v43  ;;  %12834 = vst [vmem:[#allocation38_spill] sm:$0xff] %v9883_v23  ;;  %v12836_v5 = vld [vmem:[#allocation18_spill] sm:$0xff] }
 0x325   :  { %v1922_v13 = vadd.f32 %v1878_v21, %v1877_v51  ;;  %v3606_v49 = vadd.f32 %v3574_v37, %v3524_v18  ;;  %v12835_v21 = vld [vmem:[#allocation115_spill] sm:$0xff]  ;;  %v9907_v31 = vpop.xlane.xlu1 %885 }
 0x326   :  { %v9879_v27 = vmul.f32 0.5, %v4274_v46  ;;  %v9885_v61 = vmul.f32 0.5, %v4275_v1  ;;  %v3687_v51 = vadd.f32 %v3655_v29, %v3605_v22  ;;  %v968_v36 = vmul.f32 %v12836_v5, %v12835_v21  ;;  %v12838_v1 = vld [vmem:[#allocation53_spill] sm:$0xff]  ;;  %12841 = vst [vmem:[#allocation59_spill] sm:$0xff] %v9907_v31 }
 0x327   :  { %1923 = vadd.xlane.f32.xlu1 %v1922_v13  ;;  %v5848_v56 = vpop.eup %5847  ;;  %v969_v26 = vmul.f32 %v12689_v38, %v12835_v21  ;;  %v3688_v16 = vadd.f32 %v3656_v25, %v3606_v49  ;;  %v12837_v13 = vld [vmem:[#allocation86_spill] sm:$0xff]  ;;  %v12839_v25 = vld [vmem:[#allocation156_spill] sm:$0xff] }
 0x328   :  { %v5850_v10 = vpop.eup %5849  ;;  %v3360_v46 = vmul.f32 %v5848_v56, %v9813_v11  ;;  %5855 = vtanh.f32 %v9879_v27  ;;  %v3738_v3 = vmul.f32 %v12837_v13, %v12832_v43  ;;  %v3769_v22 = vadd.f32 %v3737_v55, %v3687_v51  ;;  %v12843_v51 = vld [vmem:[#allocation47_spill] sm:$0xff] }
 0x329   :  { %v3361_v37 = vmul.f32 %v5850_v10, %v9815_v34  ;;  %5857 = vtanh.f32 %v9885_v61  ;;  %v1000_v5 = vadd.f32 %v968_v36, %v12838_v1  ;;  %v1001_v38 = vadd.f32 %v969_v26, %v12838_v1  ;;  %v12844_v26 = vld [vmem:[#allocation48_spill] sm:$0xff] }
 0x32a   :  { %v3392_v29 = vadd.f32 %v3360_v46, %v9813_v11  ;;  %v3770_v18 = vadd.f32 %v3738_v3, %v3688_v16  ;;  %v9901_v23 = vmul.f32 0.5, %v3769_v22  ;;  %v1050_v49 = vmul.f32 %v12691_v19, %v12839_v25  ;;  %v12842_v11 = vld [vmem:[#allocation151_spill] sm:$0xff]  ;;  %v9917_v22 = vpop.xlane.xlu0 %2400 }
 0x32b   :  { %v3393_v56 = vadd.f32 %v3361_v37, %v9815_v34  ;;  %v1051_v10 = vmul.f32 %v12840_v33, %v12839_v25  ;;  %v1132_v36 = vmul.f32 %v12843_v51, %v12842_v11  ;;  %v1133_v46 = vmul.f32 %v12844_v26, %v12842_v11  ;;  %v12845_v34 = vld [vmem:[#allocation114_spill] sm:$0xff]  ;;  %v12846_v16 = vld [vmem:[#allocation51_spill] sm:$0xff]  ;;  %12847 = vst [vmem:[#allocation60_spill] sm:$0xff] %v9917_v22 }
 0x32c   :  { %v5852_v13 = vpop.eup %5851  ;;  %v9909_v55 = vmul.f32 0.5, %v3770_v18  ;;  %v1214_v3 = vmul.f32 %v12846_v16, %v12845_v34  ;;  %5859 = vtanh.f32 %v9901_v23  ;;  %v1082_v31 = vadd.f32 %v1050_v49, %v1000_v5 }
 0x32d   :  { %v5854_v37 = vpop.eup %5853  ;;  %v3434_v19 = vadd.f32 %v3393_v56, %v3392_v29  ;;  %v2855_v33 = vmul.f32 %v5852_v13, %v9833_v17  ;;  %v1083_v51 = vadd.f32 %v1051_v10, %v1001_v38  ;;  %v1215_v26 = vmul.f32 %v12764_v53, %v12845_v34 }
 0x32e   :  { %v2856_v18 = vmul.f32 %v5854_v37, %v9841_v9  ;;  %5861 = vtanh.f32 %v9909_v55  ;;  %v1164_v12 = vadd.f32 %v1132_v36, %v1082_v31  ;;  %v461_v29 = vmul.f32 %v12563_v28, %v12835_v21  ;;  %v9939_v31 = vpop.xlane.xlu1 %1896 }
 0x32f   :  { %3435 = vadd.xlane.f32.xlu0 %v3434_v19  ;;  %v2887_v16 = vadd.f32 %v2855_v33, %v9833_v17  ;;  %v462_v13 = vmul.f32 %v12629_v14, %v12835_v21  ;;  %v1165_v56 = vadd.f32 %v1133_v46, %v1083_v51  ;;  %v543_v49 = vmul.f32 %v12765_v47, %v12839_v25  ;;  %v9943_v46 = vpop.xlane.xlu0 %3405 }
 0x330   :  { %v2888_v5 = vadd.f32 %v2856_v18, %v9841_v9  ;;  %v544_v38 = vmul.f32 %v12370_v8, %v12839_v25  ;;  %v1246_v53 = vadd.f32 %v1214_v3, %v1164_v12  ;;  %v493_v10 = vadd.f32 %v461_v29, %v12838_v1  ;;  %12848 = vst [vmem:[#allocation68_spill] sm:$0xff] %v9939_v31 }
 0x331   :  { %v494_v17 = vadd.f32 %v462_v13, %v12838_v1  ;;  %v625_v28 = vmul.f32 %v12434_v44, %v12842_v11  ;;  %v1247_v36 = vadd.f32 %v1215_v26, %v1165_v56  ;;  %v626_v9 = vmul.f32 %v12372_v50, %v12842_v11  ;;  %12849 = vst [vmem:[#allocation8_spill] sm:$0xff] %v9943_v46 }
 0x332   :  { %v2930_v14 = vadd.f32 %v2888_v5, %v2887_v16  ;;  %v9945_v47 = vmul.f32 0.5, %v1246_v53  ;;  %v575_v8 = vadd.f32 %v543_v49, %v493_v10  ;;  %v707_v37 = vmul.f32 %v12373_v58, %v12845_v34  ;;  %v9963_v56 = vpop.xlane.xlu1 %2904 }
 0x333   :  { %v576_v12 = vadd.f32 %v544_v38, %v494_v17  ;;  %v9947_v3 = vmul.f32 0.5, %v1247_v36  ;;  %v708_v44 = vmul.f32 %v12374_v32, %v12845_v34  ;;  %v1978_v19 = vmul.f32 %v12313_v0, %v12770_v20  ;;  %12850 = vst [vmem:[#allocation9_spill] sm:$0xff] %v9963_v56  ;;  %v9972_v17 = vpop.xlane.xlu0 %888 }
 0x334   :  { %2931 = vadd.xlane.f32.xlu1 %v2930_v14  ;;  %5863 = vtanh.f32 %v9945_v47  ;;  %v657_v50 = vadd.f32 %v625_v28, %v575_v8  ;;  %v1979_v51 = vmul.f32 %v12314_v41, %v12770_v20  ;;  %v2060_v38 = vmul.f32 %v12316_v54, %v12690_v24  ;;  %12851 = vst [vmem:[#allocation12_spill] sm:$0xff] %v9972_v17  ;;  %v12864_v17 = vld [vmem:[#allocation57_spill] sm:$0xff] }
 0x335   :  { %v5856_v33 = vpop.eup %5855  ;;  %v658_v18 = vadd.f32 %v626_v9, %v576_v12  ;;  %5865 = vtanh.f32 %v9947_v3  ;;  %v2010_v58 = vadd.f32 %v1978_v19, %v12693_v62  ;;  %v2061_v53 = vmul.f32 %v12435_v45, %v12690_v24 }
 0x336   :  { %v5858_v26 = vpop.eup %5857  ;;  %v4370_v16 = vmul.f32 %v5856_v33, %v9879_v27  ;;  %v739_v29 = vadd.f32 %v707_v37, %v657_v50  ;;  %v2011_v5 = vadd.f32 %v1979_v51, %v12693_v62  ;;  %v2142_v10 = vmul.f32 %v12320_v60, %v12773_v40  ;;  %v12852_v50 = vld [vmem:[#allocation116_spill] sm:$0xff] }
 0x337   :  { %v4371_v32 = vmul.f32 %v5858_v26, %v9885_v61  ;;  %v740_v13 = vadd.f32 %v708_v44, %v658_v18  ;;  %v2092_v8 = vadd.f32 %v2060_v38, %v2010_v58  ;;  %v2224_v37 = vmul.f32 %v12436_v39, %v12777_v4 }
 0x338   :  { %v4402_v49 = vadd.f32 %v4370_v16, %v9879_v27  ;;  %v9975_v14 = vmul.f32 0.5, %v739_v29  ;;  %v2143_v27 = vmul.f32 %v12321_v48, %v12773_v40  ;;  %v2093_v12 = vadd.f32 %v2061_v53, %v2011_v5 }
 0x339   :  { %v4403_v28 = vadd.f32 %v4371_v32, %v9885_v61  ;;  %v9977_v36 = vmul.f32 0.5, %v740_v13  ;;  %v5860_v9 = vpop.eup %5859  ;;  %v2225_v44 = vmul.f32 %v12324_v57, %v12777_v4  ;;  %v1473_v18 = vmul.f32 %v12376_v15, %v12852_v50  ;;  %v12853_v13 = vld [vmem:[#allocation36_spill] sm:$0xff] }
 0x33a   :  { %v3865_v61 = vmul.f32 %v5860_v9, %v9901_v23  ;;  %5867 = vtanh.f32 %v9975_v14  ;;  %v2174_v26 = vadd.f32 %v2142_v10, %v2092_v8  ;;  %v2175_v16 = vadd.f32 %v2143_v27, %v2093_v12  ;;  %v12855_v10 = vld [vmem:[#allocation37_spill] sm:$0xff]  ;;  %v10002_v9 = vpop.xlane.xlu0 %1899 }
 0x33b   :  { %v5862_v19 = vpop.eup %5861  ;;  %v4442_v33 = vadd.f32 %v4403_v28, %v4402_v49  ;;  %5869 = vtanh.f32 %v9977_v36  ;;  %v1474_v32 = vmul.f32 %v12438_v59, %v12852_v50  ;;  %v1505_v29 = vadd.f32 %v1473_v18, %v12759_v63  ;;  %v9997_v49 = vpop.xlane.xlu1 %3408  ;;  %12856 = vst [vmem:[#allocation65_spill] sm:$0xff] %v10002_v9  ;;  %v12857_v12 = vld [vmem:[#allocation149_spill] sm:$0xff]  ;;  %v12862_v9 = vld [vmem:[#allocation62_spill] sm:$0xff] }
 0x33c   :  { %v3866_v51 = vmul.f32 %v5862_v19, %v9909_v55  ;;  %v3897_v58 = vadd.f32 %v3865_v61, %v9901_v23  ;;  %v1555_v5 = vmul.f32 %v12853_v13, %v12760_v42  ;;  %12854 = vst [vmem:[#allocation13_spill] sm:$0xff] %v9997_v49  ;;  %v2256_v53 = vadd.f32 %v2224_v37, %v2174_v26  ;;  %v12858_v19 = vld [vmem:[#allocation55_spill] sm:$0xff]  ;;  %v12859_v61 = vld [vmem:[#allocation56_spill] sm:$0xff] }
 0x33d   :  { %4443 = vadd.xlane.f32.xlu0 %v4442_v33  ;;  %v2257_v28 = vadd.f32 %v2225_v44, %v2175_v16  ;;  %v1556_v27 = vmul.f32 %v12855_v10, %v12760_v42  ;;  %v1506_v23 = vadd.f32 %v1474_v32, %v12759_v63  ;;  %v1637_v33 = vmul.f32 %v12858_v19, %v12857_v12  ;;  %v12860_v37 = vld [vmem:[#allocation152_spill] sm:$0xff]  ;;  %v12861_v44 = vld [vmem:[#allocation61_spill] sm:$0xff] }
 0x33e   :  { %v3898_v38 = vadd.f32 %v3866_v51, %v9909_v55  ;;  %v1587_v8 = vadd.f32 %v1555_v5, %v1505_v29  ;;  %v1638_v18 = vmul.f32 %v12859_v61, %v12857_v12  ;;  %v10009_v49 = vmul.f32 0.5, %v2256_v53  ;;  %v12863_v5 = vld [vmem:[#allocation106_spill] sm:$0xff] }
 0x33f   :  { %v10011_v55 = vmul.f32 0.5, %v2257_v28  ;;  %v1719_v51 = vmul.f32 %v12861_v44, %v12860_v37  ;;  %v1588_v26 = vadd.f32 %v1556_v27, %v1506_v23  ;;  %v1720_v32 = vmul.f32 %v12862_v9, %v12860_v37  ;;  %v10022_v31 = vpop.xlane.xlu1 %1395  ;;  %v12866_v23 = vld [vmem:[#allocation58_spill] sm:$0xff] }
 0x340   :  { %v3938_v46 = vadd.f32 %v3898_v38, %v3897_v58  ;;  %v1669_v16 = vadd.f32 %v1637_v33, %v1587_v8  ;;  %5871 = vtanh.f32 %v10009_v49  ;;  %v2988_v56 = vmul.f32 %v12864_v17, %v12863_v5  ;;  %12865 = vst [vmem:[#allocation20_spill] sm:$0xff] %v10022_v31 }
 0x341   :  { %v5864_v29 = vpop.eup %5863  ;;  %5873 = vtanh.f32 %v10011_v55  ;;  %v1670_v53 = vadd.f32 %v1638_v18, %v1588_v26  ;;  %v2989_v8 = vmul.f32 %v12866_v23, %v12863_v5  ;;  %v12869_v26 = vld [vmem:[#allocation69_spill] sm:$0xff] }
 0x342   :  { %3939 = vadd.xlane.f32.xlu1 %v3938_v46  ;;  %v5866_v58 = vpop.eup %5865  ;;  %v1342_v38 = vmul.f32 %v5864_v29, %v9945_v47  ;;  %v1751_v28 = vadd.f32 %v1719_v51, %v1669_v16  ;;  %v10027_v46 = vpop.xlane.xlu0 %2907  ;;  %v3020_v40 = vadd.f32 %v2988_v56, %v12798_v35  ;;  %v12868_v51 = vld [vmem:[#allocation105_spill] sm:$0xff]  ;;  %v12872_v56 = vld [vmem:[#allocation118_spill] sm:$0xff] }
 0x343   :  { %v1343_v27 = vmul.f32 %v5866_v58, %v9947_v3  ;;  %12867 = vst [vmem:[#allocation7_spill] sm:$0xff] %v10027_v46  ;;  %v1752_v22 = vadd.f32 %v1720_v32, %v1670_v53  ;;  %v3021_v18 = vadd.f32 %v2989_v8, %v12798_v35  ;;  %v3070_v16 = vmul.f32 %v12869_v26, %v12868_v51  ;;  %v12870_v46 = vld [vmem:[#allocation70_spill] sm:$0xff]  ;;  %v12873_v35 = vld [vmem:[#allocation153_spill] sm:$0xff]  ;;  %v10050_v62 = vpop.xlane.xlu1 %2403 }
 0x344   :  { %v1374_v33 = vadd.f32 %v1342_v38, %v9945_v47  ;;  %v10030_v4 = vmul.f32 0.5, %v1751_v28  ;;  %v3071_v31 = vmul.f32 %v12870_v46, %v12868_v51  ;;  %v12871_v47 = vld [vmem:[#allocation117_spill] sm:$0xff]  ;;  %v3153_v28 = vmul.f32 %v12872_v56, %v12802_v2  ;;  %12874 = vst [vmem:[#allocation119_spill] sm:$0xff] %v10050_v62  ;;  %v12880_v56 = vld [vmem:[#allocation147_spill] sm:$0xff] }
 0x345   :  { %v1375_v29 = vadd.f32 %v1343_v27, %v9947_v3  ;;  %v10037_v58 = vmul.f32 0.5, %v1752_v22  ;;  %v3152_v32 = vmul.f32 %v12871_v47, %v12802_v2  ;;  %v3102_v3 = vadd.f32 %v3070_v16, %v3020_v40  ;;  %v12875_v40 = vld [vmem:[#allocation154_spill] sm:$0xff]  ;;  %v12877_v16 = vld [vmem:[#allocation43_spill] sm:$0xff] }
 0x346   :  { %5875 = vtanh.f32 %v10030_v4  ;;  %v3103_v22 = vadd.f32 %v3071_v31, %v3021_v18  ;;  %v3234_v5 = vmul.f32 %v12873_v35, %v12805_v52  ;;  %v10058_v20 = vpop.xlane.xlu0 %3912  ;;  %v12879_v18 = vld [vmem:[#allocation44_spill] sm:$0xff]  ;;  %v12881_v62 = vld [vmem:[#allocation63_spill] sm:$0xff] }
 0x347   :  { %v5868_v38 = vpop.eup %5867  ;;  %v1421_v53 = vadd.f32 %v1375_v29, %v1374_v33  ;;  %5877 = vtanh.f32 %v10037_v58  ;;  %v3184_v24 = vadd.f32 %v3152_v32, %v3102_v3  ;;  %v3235_v33 = vmul.f32 %v12875_v40, %v12805_v52  ;;  %v12876_v29 = vld [vmem:[#allocation113_spill] sm:$0xff]  ;;  %12878 = vst [vmem:[#allocation21_spill] sm:$0xff] %v10058_v20  ;;  %v12882_v3 = vld [vmem:[#allocation46_spill] sm:$0xff]  ;;  %v12883_v52 = vld [vmem:[#allocation64_spill] sm:$0xff] }
 0x348   :  { %v5870_v27 = vpop.eup %5869  ;;  %v835_v8 = vmul.f32 %v5868_v38, %v9975_v14  ;;  %v2483_v2 = vmul.f32 %v12877_v16, %v12876_v29  ;;  %v3185_v31 = vadd.f32 %v3153_v28, %v3103_v22  ;;  %v2484_v35 = vmul.f32 %v12879_v18, %v12876_v29  ;;  %v12885_v22 = vld [vmem:[#allocation72_spill] sm:$0xff] }
 0x349   :  { %1422 = vadd.xlane.f32.xlu0 %v1421_v53  ;;  %v836_v51 = vmul.f32 %v5870_v27, %v9977_v36  ;;  %v2565_v53 = vmul.f32 %v12881_v62, %v12880_v56  ;;  %v3266_v32 = vadd.f32 %v3234_v5, %v3184_v24  ;;  %v2566_v40 = vmul.f32 %v12883_v52, %v12880_v56 }
 0x34a   :  { %v867_v38 = vadd.f32 %v835_v8, %v9975_v14  ;;  %v2515_v47 = vadd.f32 %v2483_v2, %v12882_v3  ;;  %v3267_v16 = vadd.f32 %v3235_v33, %v3185_v31  ;;  %v2516_v14 = vadd.f32 %v2484_v35, %v12882_v3  ;;  %v12884_v8 = vld [vmem:[#allocation143_spill] sm:$0xff]  ;;  %v12887_v31 = vld [vmem:[#allocation144_spill] sm:$0xff] }
 0x34b   :  { %v868_v27 = vadd.f32 %v836_v51, %v9977_v36  ;;  %v2647_v28 = vmul.f32 %v12803_v30, %v12884_v8  ;;  %v2648_v20 = vmul.f32 %v12885_v22, %v12884_v8  ;;  %v10073_v46 = vmul.f32 0.5, %v3266_v32  ;;  %v10077_v51 = vpop.xlane.xlu1 %3411  ;;  %v12888_v30 = vld [vmem:[#allocation110_spill] sm:$0xff]  ;;  %v12891_v32 = vld [vmem:[#allocation96_spill] sm:$0xff] }
 0x34c   :  { %v2597_v62 = vadd.f32 %v2565_v53, %v2515_v47  ;;  %v10075_v24 = vmul.f32 0.5, %v3267_v16  ;;  %v2598_v2 = vadd.f32 %v2566_v40, %v2516_v14  ;;  %12886 = vst [vmem:[#allocation28_spill] sm:$0xff] %v10077_v51  ;;  %v2729_v22 = vmul.f32 %v12888_v30, %v12887_v31  ;;  %v12890_v40 = vld [vmem:[#allocation111_spill] sm:$0xff]  ;;  %v12892_v14 = vld [vmem:[#allocation93_spill] sm:$0xff]  ;;  %v12893_v51 = vld [vmem:[#allocation94_spill] sm:$0xff] }
 0x34d   :  { %v914_v18 = vadd.f32 %v868_v27, %v867_v38  ;;  %v5872_v36 = vpop.eup %5871  ;;  %5879 = vtanh.f32 %v10073_v46  ;;  %v10084_v27 = vpop.xlane.xlu0 %891  ;;  %v2730_v16 = vmul.f32 %v12890_v40, %v12887_v31  ;;  %v12894_v30 = vld [vmem:[#allocation140_spill] sm:$0xff] }
 0x34e   :  { %v5874_v5 = vpop.eup %5873  ;;  %v2352_v35 = vmul.f32 %v5872_v36, %v10009_v49  ;;  %v2679_v33 = vadd.f32 %v2647_v28, %v2597_v62  ;;  %12889 = vst [vmem:[#allocation29_spill] sm:$0xff] %v10084_v27  ;;  %5881 = vtanh.f32 %v10075_v24  ;;  %v2680_v47 = vadd.f32 %v2648_v20, %v2598_v2  ;;  %v12895_v27 = vld [vmem:[#allocation136_spill] sm:$0xff] }
 0x34f   :  { %915 = vadd.xlane.f32.xlu1 %v914_v18  ;;  %v2353_v38 = vmul.f32 %v5874_v5, %v10011_v55  ;;  %v3998_v36 = vmul.f32 %v12892_v14, %v12891_v32  ;;  %v3999_v5 = vmul.f32 %v12893_v51, %v12891_v32  ;;  %v4080_v52 = vmul.f32 %v12895_v27, %v12894_v30  ;;  %v10108_v32 = vpop.xlane.xlu1 %3915  ;;  %v12908_v51 = vld [vmem:[#allocation84_spill] sm:$0xff] }
 0x350   :  { %v2384_v18 = vadd.f32 %v2352_v35, %v10009_v49  ;;  %v2761_v53 = vadd.f32 %v2729_v22, %v2679_v33  ;;  %v2762_v28 = vadd.f32 %v2730_v16, %v2680_v47  ;;  %v12896_v49 = vld [vmem:[#allocation137_spill] sm:$0xff]  ;;  %v12897_v35 = vld [vmem:[#allocation138_spill] sm:$0xff]  ;;  %12898 = vst [vmem:[#allocation170_spill] sm:$0xff] %v10108_v32  ;;  %v12904_v32 = vld [vmem:[#allocation123_spill] sm:$0xff] }
 0x351   :  { %v2385_v62 = vadd.f32 %v2353_v38, %v10011_v55  ;;  %v4030_v2 = vadd.f32 %v3998_v36, %v12826_v6  ;;  %v4081_v22 = vmul.f32 %v12896_v49, %v12894_v30  ;;  %v4162_v33 = vmul.f32 %v12897_v35, %v12828_v7  ;;  %v12899_v36 = vld [vmem:[#allocation95_spill] sm:$0xff]  ;;  %v12900_v30 = vld [vmem:[#allocation98_spill] sm:$0xff]  ;;  %v12906_v35 = vld [vmem:[#allocation104_spill] sm:$0xff] }
 0x352   :  { %v10097_v20 = vmul.f32 0.5, %v2761_v53  ;;  %v10105_v38 = vmul.f32 0.5, %v2762_v28  ;;  %v4031_v47 = vadd.f32 %v3999_v5, %v12826_v6  ;;  %v4163_v27 = vmul.f32 %v12899_v36, %v12828_v7  ;;  %v10118_v6 = vpop.xlane.xlu0 %1902  ;;  %v12902_v5 = vld [vmem:[#allocation99_spill] sm:$0xff]  ;;  %v12905_v36 = vld [vmem:[#allocation173_spill] sm:$0xff] }
 0x353   :  { %v5876_v8 = vpop.eup %5875  ;;  %v2429_v14 = vadd.f32 %v2385_v62, %v2384_v18  ;;  %v4112_v53 = vadd.f32 %v4080_v52, %v4030_v2  ;;  %v4244_v49 = vmul.f32 %v12900_v30, %v12832_v43  ;;  %12901 = vst [vmem:[#allocation66_spill] sm:$0xff] %v10118_v6  ;;  %v4245_v52 = vmul.f32 %v12902_v5, %v12832_v43  ;;  %v12903_v2 = vld [vmem:[#allocation107_spill] sm:$0xff] }
 0x354   :  { %v1847_v55 = vmul.f32 %v5876_v8, %v10030_v4  ;;  %v5878_v16 = vpop.eup %5877  ;;  %5883 = vtanh.f32 %v10097_v20  ;;  %v4113_v62 = vadd.f32 %v4081_v22, %v4031_v47  ;;  %v3493_v7 = vmul.f32 %v12904_v32, %v12903_v2  ;;  %v12911_v5 = vld [vmem:[#allocation87_spill] sm:$0xff] }
 0x355   :  { %2430 = vadd.xlane.f32.xlu0 %v2429_v14  ;;  %v1848_v18 = vmul.f32 %v5878_v16, %v10037_v58  ;;  %5885 = vtanh.f32 %v10105_v38  ;;  %v4194_v28 = vadd.f32 %v4162_v33, %v4112_v53  ;;  %v3494_v30 = vmul.f32 %v12905_v36, %v12903_v2  ;;  %v12909_v33 = vld [vmem:[#allocation33_spill] sm:$0xff]  ;;  %v12910_v53 = vld [vmem:[#allocation108_spill] sm:$0xff] }
 0x356   :  { %v1879_v8 = vadd.f32 %v1847_v55, %v10030_v4  ;;  %v4195_v16 = vadd.f32 %v4163_v27, %v4113_v62  ;;  %v12907_v4 = vld [vmem:[#allocation83_spill] sm:$0xff]  ;;  %v3576_v6 = vmul.f32 %v12908_v51, %v12906_v35  ;;  %v3525_v47 = vadd.f32 %v3493_v7, %v12909_v33  ;;  %v12912_v36 = vld [vmem:[#allocation88_spill] sm:$0xff]  ;;  %v10137_v27 = vpop.xlane.xlu1 %1398 }
 0x357   :  { %v1880_v14 = vadd.f32 %v1848_v18, %v10037_v58  ;;  %v3575_v55 = vmul.f32 %v12907_v4, %v12906_v35  ;;  %v4276_v22 = vadd.f32 %v4244_v49, %v4194_v28  ;;  %v3526_v43 = vadd.f32 %v3494_v30, %v12909_v33  ;;  %12913 = vst [vmem:[#allocation120_spill] sm:$0xff] %v10137_v27  ;;  %v12914_v28 = vld [vmem:[#allocation109_spill] sm:$0xff] }
 0x358   :  { %v3657_v32 = vmul.f32 %v12911_v5, %v12910_v53  ;;  %v4277_v31 = vadd.f32 %v4245_v52, %v4195_v16  ;;  %v3658_v58 = vmul.f32 %v12912_v36, %v12910_v53  ;;  %v12915_v30 = vld [vmem:[#allocation85_spill] sm:$0xff]  ;;  %v12916_v5 = vld [vmem:[#allocation86_spill] sm:$0xff]  ;;  %v10147_v52 = vpop.xlane.xlu0 %2910 }
 0x359   :  { %v1925_v40 = vadd.f32 %v1880_v14, %v1879_v8  ;;  %v10139_v18 = vmul.f32 0.5, %v4276_v22  ;;  %v3607_v62 = vadd.f32 %v3575_v55, %v3525_v47  ;;  %v3608_v4 = vadd.f32 %v3576_v6, %v3526_v43  ;;  %12917 = vst [vmem:[#allocation4_spill] sm:$0xff] %v10147_v52 }
 0x35a   :  { %v5880_v51 = vpop.eup %5879  ;;  %v10141_v49 = vmul.f32 0.5, %v4277_v31  ;;  %v3739_v7 = vmul.f32 %v12915_v30, %v12914_v28  ;;  %v3740_v8 = vmul.f32 %v12916_v5, %v12914_v28  ;;  %v1980_v14 = vmul.f32 %v12313_v0, %v12852_v50 }
 0x35b   :  { %1926 = vadd.xlane.f32.xlu1 %v1925_v40  ;;  %v5882_v16 = vpop.eup %5881  ;;  %v3362_v22 = vmul.f32 %v5880_v51, %v10073_v46  ;;  %5887 = vtanh.f32 %v10139_v18  ;;  %v3689_v6 = vadd.f32 %v3657_v32, %v3607_v62  ;;  %v3690_v40 = vadd.f32 %v3658_v58, %v3608_v4 }
 0x35c   :  { %v3363_v31 = vmul.f32 %v5882_v16, %v10075_v24  ;;  %5889 = vtanh.f32 %v10141_v49  ;;  %v1981_v52 = vmul.f32 %v12314_v41, %v12852_v50  ;;  %v2012_v0 = vadd.f32 %v1980_v14, %v12759_v63 }
 0x35d   :  { %v3394_v55 = vadd.f32 %v3362_v22, %v10073_v46  ;;  %v3771_v47 = vadd.f32 %v3739_v7, %v3689_v6  ;;  %v3772_v43 = vadd.f32 %v3740_v8, %v3690_v40  ;;  %v2062_v51 = vmul.f32 %v12316_v54, %v12760_v42  ;;  %v10168_v46 = vpop.xlane.xlu1 %2406  ;;  %v10177_v6 = vpop.xlane.xlu0 %3918 }
 0x35e   :  { %v3395_v27 = vadd.f32 %v3363_v31, %v10075_v24  ;;  %v2063_v32 = vmul.f32 %v12435_v45, %v12760_v42  ;;  %12918 = vst [vmem:[#allocation129_spill] sm:$0xff] %v10168_v46  ;;  %v2013_v62 = vadd.f32 %v1981_v52, %v12759_v63  ;;  %v2144_v7 = vmul.f32 %v12320_v60, %v12857_v12 }
 0x35f   :  { %v10164_v4 = vmul.f32 0.5, %v3771_v47  ;;  %v10166_v58 = vmul.f32 0.5, %v3772_v43  ;;  %v2094_v14 = vadd.f32 %v2062_v51, %v2012_v0  ;;  %v2145_v16 = vmul.f32 %v12321_v48, %v12857_v12  ;;  %12919 = vst [vmem:[#allocation169_spill] sm:$0xff] %v10177_v6 }
 0x360   :  { %v3437_v8 = vadd.f32 %v3395_v27, %v3394_v55  ;;  %v2226_v22 = vmul.f32 %v12436_v39, %v12860_v37  ;;  %v2095_v52 = vadd.f32 %v2063_v32, %v2013_v62  ;;  %v2227_v47 = vmul.f32 %v12324_v57, %v12860_v37 }
 0x361   :  { %v5884_v24 = vpop.eup %5883  ;;  %5891 = vtanh.f32 %v10164_v4  ;;  %v2176_v27 = vadd.f32 %v2144_v7, %v2094_v14  ;;  %v1475_v55 = vmul.f32 %v12376_v15, %v12835_v21  ;;  %v1557_v32 = vmul.f32 %v12853_v13, %v12839_v25 }
 0x362   :  { %v5886_v40 = vpop.eup %5885  ;;  %v2857_v31 = vmul.f32 %v5884_v24, %v10097_v20  ;;  %3438 = vadd.xlane.f32.xlu0 %v3437_v8  ;;  %5893 = vtanh.f32 %v10166_v58  ;;  %v2177_v51 = vadd.f32 %v2145_v16, %v2095_v52  ;;  %v1476_v24 = vmul.f32 %v12438_v59, %v12835_v21  ;;  %v10201_v16 = vpop.xlane.xlu1 %3414 }
 0x363   :  { %v2858_v0 = vmul.f32 %v5886_v40, %v10105_v38  ;;  %v2258_v8 = vadd.f32 %v2226_v22, %v2176_v27  ;;  %v1507_v40 = vadd.f32 %v1475_v55, %v12838_v1  ;;  %v1558_v7 = vmul.f32 %v12855_v10, %v12839_v25  ;;  %12920 = vst [vmem:[#allocation130_spill] sm:$0xff] %v10201_v16  ;;  %v10205_v22 = vpop.xlane.xlu0 %4422 }
 0x364   :  { %v2889_v43 = vadd.f32 %v2857_v31, %v10097_v20  ;;  %v2259_v14 = vadd.f32 %v2227_v47, %v2177_v51  ;;  %v1508_v15 = vadd.f32 %v1476_v24, %v12838_v1  ;;  %v1639_v20 = vmul.f32 %v12858_v19, %v12842_v11  ;;  %12921 = vst [vmem:[#allocation31_spill] sm:$0xff] %v10205_v22 }
 0x365   :  { %v2890_v62 = vadd.f32 %v2858_v0, %v10105_v38  ;;  %v1640_v59 = vmul.f32 %v12859_v61, %v12842_v11  ;;  %v10203_v31 = vmul.f32 0.5, %v2258_v8  ;;  %v1589_v38 = vadd.f32 %v1557_v32, %v1507_v40 }
 0x366   :  { %v10207_v52 = vmul.f32 0.5, %v2259_v14  ;;  %v1590_v10 = vadd.f32 %v1558_v7, %v1508_v15  ;;  %v1721_v19 = vmul.f32 %v12861_v44, %v12845_v34  ;;  %v2990_v61 = vmul.f32 %v12864_v17, %v12876_v29  ;;  %v10225_v14 = vpop.xlane.xlu1 %4419 }
 0x367   :  { %v2933_v13 = vadd.f32 %v2890_v62, %v2889_v43  ;;  %5895 = vtanh.f32 %v10203_v31  ;;  %v1671_v0 = vadd.f32 %v1639_v20, %v1589_v38  ;;  %v1722_v51 = vmul.f32 %v12862_v9, %v12845_v34  ;;  %12922 = vst [vmem:[#allocation42_spill] sm:$0xff] %v10225_v14  ;;  %v10233_v38 = vpop.xlane.xlu0 %1401 }
 0x368   :  { %v5888_v47 = vpop.eup %5887  ;;  %5897 = vtanh.f32 %v10207_v52  ;;  %v1672_v43 = vadd.f32 %v1640_v59, %v1590_v10  ;;  %v2991_v62 = vmul.f32 %v12866_v23, %v12876_v29  ;;  %v3022_v40 = vadd.f32 %v2990_v61, %v12882_v3  ;;  %v12923_v59 = vld [vmem:[#allocation70_spill] sm:$0xff]  ;;  %12924 = vst [vmem:[#allocation49_spill] sm:$0xff] %v10233_v38 }
 0x369   :  { %2934 = vadd.xlane.f32.xlu1 %v2933_v13  ;;  %v5890_v27 = vpop.eup %5889  ;;  %v4372_v55 = vmul.f32 %v5888_v47, %v10139_v18  ;;  %v1753_v32 = vadd.f32 %v1721_v19, %v1671_v0  ;;  %v3072_v7 = vmul.f32 %v12869_v26, %v12880_v56  ;;  %v3073_v13 = vmul.f32 %v12923_v59, %v12880_v56  ;;  %v12925_v47 = vld [vmem:[#allocation143_spill] sm:$0xff]  ;;  %v12926_v0 = vld [vmem:[#allocation117_spill] sm:$0xff]  ;;  %v12927_v61 = vld [vmem:[#allocation118_spill] sm:$0xff] }
 0x36a   :  { %v4373_v24 = vmul.f32 %v5890_v27, %v10141_v49  ;;  %v1754_v8 = vadd.f32 %v1722_v51, %v1672_v43  ;;  %v3023_v9 = vadd.f32 %v2991_v62, %v12882_v3  ;;  %v3154_v19 = vmul.f32 %v12926_v0, %v12925_v47  ;;  %v12928_v51 = vld [vmem:[#allocation144_spill] sm:$0xff] }
 0x36b   :  { %v4404_v44 = vadd.f32 %v4372_v55, %v10139_v18  ;;  %v10228_v20 = vmul.f32 0.5, %v1753_v32  ;;  %v3104_v10 = vadd.f32 %v3072_v7, %v3022_v40  ;;  %v3155_v27 = vmul.f32 %v12927_v61, %v12925_v47  ;;  %v12930_v40 = vld [vmem:[#allocation154_spill] sm:$0xff]  ;;  %v10263_v59 = vpop.xlane.xlu0 %2409 }
 0x36c   :  { %v4405_v15 = vadd.f32 %v4373_v24, %v10141_v49  ;;  %v10235_v18 = vmul.f32 0.5, %v1754_v8  ;;  %v3105_v43 = vadd.f32 %v3073_v13, %v3023_v9  ;;  %v12929_v24 = vld [vmem:[#allocation153_spill] sm:$0xff]  ;;  %v3237_v7 = vmul.f32 %v12930_v40, %v12928_v51  ;;  %v12933_v9 = vld [vmem:[#allocation44_spill] sm:$0xff]  ;;  %v10258_v40 = vpop.xlane.xlu1 %894  ;;  %12939 = vst [vmem:[#allocation22_spill] sm:$0xff] %v10263_v59 }
 0x36d   :  { %5899 = vtanh.f32 %v10228_v20  ;;  %v3236_v32 = vmul.f32 %v12929_v24, %v12928_v51  ;;  %v3186_v8 = vadd.f32 %v3154_v19, %v3104_v10  ;;  %v12935_v24 = vld [vmem:[#allocation63_spill] sm:$0xff]  ;;  %v12936_v10 = vld [vmem:[#allocation64_spill] sm:$0xff]  ;;  %12937 = vst [vmem:[#allocation50_spill] sm:$0xff] %v10258_v40 }
 0x36e   :  { %v5892_v55 = vpop.eup %5891  ;;  %v4445_v49 = vadd.f32 %v4405_v15, %v4404_v44  ;;  %5901 = vtanh.f32 %v10235_v18  ;;  %v3187_v6 = vadd.f32 %v3155_v27, %v3105_v43  ;;  %v12931_v44 = vld [vmem:[#allocation112_spill] sm:$0xff]  ;;  %v12932_v15 = vld [vmem:[#allocation43_spill] sm:$0xff]  ;;  %v12938_v43 = vld [vmem:[#allocation45_spill] sm:$0xff] }
 0x36f   :  { %v5894_v62 = vpop.eup %5893  ;;  %v3867_v14 = vmul.f32 %v5892_v55, %v10164_v4  ;;  %v2485_v16 = vmul.f32 %v12932_v15, %v12931_v44  ;;  %v2486_v13 = vmul.f32 %v12933_v9, %v12931_v44  ;;  %v3268_v46 = vadd.f32 %v3236_v32, %v3186_v8  ;;  %v12934_v55 = vld [vmem:[#allocation148_spill] sm:$0xff]  ;;  %v10290_v47 = vpop.xlane.xlu0 %3417 }
 0x370   :  { %4446 = vadd.xlane.f32.xlu0 %v4445_v49  ;;  %v3868_v22 = vmul.f32 %v5894_v62, %v10166_v58  ;;  %v2567_v61 = vmul.f32 %v12935_v24, %v12934_v55  ;;  %v2568_v19 = vmul.f32 %v12936_v10, %v12934_v55  ;;  %v3269_v27 = vadd.f32 %v3237_v7, %v3187_v6  ;;  %v12942_v8 = vld [vmem:[#allocation72_spill] sm:$0xff] }
 0x371   :  { %v3899_v38 = vadd.f32 %v3867_v14, %v10164_v4  ;;  %v2517_v62 = vadd.f32 %v2485_v16, %v12938_v43  ;;  %v2518_v0 = vadd.f32 %v2486_v13, %v12938_v43  ;;  %v10265_v26 = vmul.f32 0.5, %v3268_v46  ;;  %v12940_v4 = vld [vmem:[#allocation145_spill] sm:$0xff]  ;;  %v12941_v14 = vld [vmem:[#allocation71_spill] sm:$0xff]  ;;  %v12943_v16 = vld [vmem:[#allocation146_spill] sm:$0xff]  ;;  %12950 = vst [vmem:[#allocation3_spill] sm:$0xff] %v10290_v47 }
 0x372   :  { %v3900_v49 = vadd.f32 %v3868_v22, %v10166_v58  ;;  %v2649_v32 = vmul.f32 %v12941_v14, %v12940_v4  ;;  %v2650_v23 = vmul.f32 %v12942_v8, %v12940_v4  ;;  %v10271_v17 = vmul.f32 0.5, %v3269_v27  ;;  %v12944_v22 = vld [vmem:[#allocation110_spill] sm:$0xff]  ;;  %v12945_v46 = vld [vmem:[#allocation111_spill] sm:$0xff]  ;;  %v10285_v4 = vpop.xlane.xlu1 %1905 }
 0x373   :  { %v2599_v40 = vadd.f32 %v2567_v61, %v2517_v62  ;;  %v2600_v58 = vadd.f32 %v2568_v19, %v2518_v0  ;;  %5903 = vtanh.f32 %v10265_v26  ;;  %v2731_v7 = vmul.f32 %v12944_v22, %v12943_v16  ;;  %v12946_v0 = vld [vmem:[#allocation93_spill] sm:$0xff]  ;;  %v12947_v27 = vld [vmem:[#allocation94_spill] sm:$0xff]  ;;  %12948 = vst [vmem:[#allocation74_spill] sm:$0xff] %v10285_v4 }
 0x374   :  { %v3941_v55 = vadd.f32 %v3900_v49, %v3899_v38  ;;  %v5896_v6 = vpop.eup %5895  ;;  %v2732_v13 = vmul.f32 %v12945_v46, %v12943_v16  ;;  %5905 = vtanh.f32 %v10271_v17  ;;  %v4000_v19 = vmul.f32 %v12946_v0, %v12903_v2  ;;  %v12956_v47 = vld [vmem:[#allocation106_spill] sm:$0xff] }
 0x375   :  { %v5898_v59 = vpop.eup %5897  ;;  %v2354_v43 = vmul.f32 %v5896_v6, %v10203_v31  ;;  %v2681_v38 = vadd.f32 %v2649_v32, %v2599_v40  ;;  %v2682_v49 = vadd.f32 %v2650_v23, %v2600_v58  ;;  %v4001_v62 = vmul.f32 %v12947_v27, %v12903_v2  ;;  %v12949_v6 = vld [vmem:[#allocation136_spill] sm:$0xff]  ;;  %v12951_v32 = vld [vmem:[#allocation137_spill] sm:$0xff] }
 0x376   :  { %3942 = vadd.xlane.f32.xlu1 %v3941_v55  ;;  %v2355_v61 = vmul.f32 %v5898_v59, %v10207_v52  ;;  %v4082_v51 = vmul.f32 %v12949_v6, %v12906_v35  ;;  %v4032_v59 = vadd.f32 %v4000_v19, %v12909_v33  ;;  %v4083_v2 = vmul.f32 %v12951_v32, %v12906_v35  ;;  %v12954_v19 = vld [vmem:[#allocation98_spill] sm:$0xff]  ;;  %v10323_v6 = vpop.xlane.xlu0 %4425 }
 0x377   :  { %v2386_v16 = vadd.f32 %v2354_v43, %v10203_v31  ;;  %v2763_v44 = vadd.f32 %v2731_v7, %v2681_v38  ;;  %v2764_v55 = vadd.f32 %v2732_v13, %v2682_v49  ;;  %v4033_v40 = vadd.f32 %v4001_v62, %v12909_v33  ;;  %v12952_v31 = vld [vmem:[#allocation138_spill] sm:$0xff]  ;;  %v12953_v7 = vld [vmem:[#allocation95_spill] sm:$0xff]  ;;  %12963 = vst [vmem:[#allocation124_spill] sm:$0xff] %v10323_v6 }
 0x378   :  { %v2387_v23 = vadd.f32 %v2355_v61, %v10207_v52  ;;  %v4164_v43 = vmul.f32 %v12952_v31, %v12910_v53  ;;  %v4165_v13 = vmul.f32 %v12953_v7, %v12910_v53  ;;  %v4114_v52 = vadd.f32 %v4082_v51, %v4032_v59  ;;  %v12957_v31 = vld [vmem:[#allocation123_spill] sm:$0xff] }
 0x379   :  { %v10297_v58 = vmul.f32 0.5, %v2763_v44  ;;  %v10299_v4 = vmul.f32 0.5, %v2764_v55  ;;  %v4115_v61 = vadd.f32 %v4083_v2, %v4033_v40  ;;  %v4246_v33 = vmul.f32 %v12954_v19, %v12914_v28  ;;  %v12955_v44 = vld [vmem:[#allocation99_spill] sm:$0xff]  ;;  %v12959_v40 = vld [vmem:[#allocation173_spill] sm:$0xff] }
 0x37a   :  { %v5900_v38 = vpop.eup %5899  ;;  %v2432_v49 = vadd.f32 %v2387_v23, %v2386_v16  ;;  %v4247_v55 = vmul.f32 %v12955_v44, %v12914_v28  ;;  %v3495_v32 = vmul.f32 %v12957_v31, %v12956_v47  ;;  %v4196_v51 = vadd.f32 %v4164_v43, %v4114_v52  ;;  %v10315_v23 = vpop.xlane.xlu1 %2913  ;;  %v12961_v28 = vld [vmem:[#allocation105_spill] sm:$0xff]  ;;  %v12962_v44 = vld [vmem:[#allocation83_spill] sm:$0xff]  ;;  %v12964_v43 = vld [vmem:[#allocation84_spill] sm:$0xff] }
 0x37b   :  { %v5902_v62 = vpop.eup %5901  ;;  %v1849_v35 = vmul.f32 %v5900_v38, %v10228_v20  ;;  %5907 = vtanh.f32 %v10297_v58  ;;  %v4197_v16 = vadd.f32 %v4165_v13, %v4115_v61  ;;  %12958 = vst [vmem:[#allocation126_spill] sm:$0xff] %v10315_v23  ;;  %v3496_v2 = vmul.f32 %v12959_v40, %v12956_v47  ;;  %v12960_v38 = vld [vmem:[#allocation32_spill] sm:$0xff]  ;;  %v12965_v61 = vld [vmem:[#allocation141_spill] sm:$0xff] }
 0x37c   :  { %2433 = vadd.xlane.f32.xlu0 %v2432_v49  ;;  %v1850_v53 = vmul.f32 %v5902_v62, %v10235_v18  ;;  %5909 = vtanh.f32 %v10299_v4  ;;  %v3527_v19 = vadd.f32 %v3495_v32, %v12960_v38  ;;  %v3577_v7 = vmul.f32 %v12962_v44, %v12961_v28 }
 0x37d   :  { %v1881_v59 = vadd.f32 %v1849_v35, %v10228_v20  ;;  %v4278_v62 = vadd.f32 %v4246_v33, %v4196_v51  ;;  %v4279_v27 = vadd.f32 %v4247_v55, %v4197_v16  ;;  %v3578_v13 = vmul.f32 %v12964_v43, %v12961_v28  ;;  %v12966_v35 = vld [vmem:[#allocation87_spill] sm:$0xff] }
 0x37e   :  { %v1882_v49 = vadd.f32 %v1850_v53, %v10235_v18  ;;  %v3528_v52 = vadd.f32 %v3496_v2, %v12960_v38  ;;  %v3609_v20 = vadd.f32 %v3577_v7, %v3527_v19  ;;  %v3659_v23 = vmul.f32 %v12966_v35, %v12965_v61  ;;  %v12967_v53 = vld [vmem:[#allocation142_spill] sm:$0xff] }
 0x37f   :  { %v3660_v32 = vmul.f32 %v12912_v36, %v12965_v61  ;;  %v10333_v47 = vmul.f32 0.5, %v4278_v62  ;;  %v10335_v6 = vmul.f32 0.5, %v4279_v27  ;;  %v3741_v51 = vmul.f32 %v12915_v30, %v12967_v53  ;;  %v10345_v27 = vpop.xlane.xlu1 %3921  ;;  %v10349_v62 = vpop.xlane.xlu0 %1404 }
 0x380   :  { %v1928_v0 = vadd.f32 %v1882_v49, %v1881_v59  ;;  %v5904_v18 = vpop.eup %5903  ;;  %v3610_v33 = vadd.f32 %v3578_v13, %v3528_v52  ;;  %v3691_v55 = vadd.f32 %v3659_v23, %v3609_v20  ;;  %v3742_v19 = vmul.f32 %v12916_v5, %v12967_v53  ;;  %12968 = vst [vmem:[#allocation131_spill] sm:$0xff] %v10345_v27 }
 0x381   :  { %v5906_v16 = vpop.eup %5905  ;;  %v3364_v7 = vmul.f32 %v5904_v18, %v10265_v26  ;;  %5911 = vtanh.f32 %v10333_v47  ;;  %v2487_v59 = vmul.f32 %v12932_v15, %v12852_v50  ;;  %12969 = vst [vmem:[#allocation73_spill] sm:$0xff] %v10349_v62  ;;  %v2488_v13 = vmul.f32 %v12933_v9, %v12852_v50 }
 0x382   :  { %1929 = vadd.xlane.f32.xlu1 %v1928_v0  ;;  %v3365_v2 = vmul.f32 %v5906_v16, %v10271_v17  ;;  %5913 = vtanh.f32 %v10335_v6  ;;  %v3692_v23 = vadd.f32 %v3660_v32, %v3610_v33  ;;  %v3773_v49 = vadd.f32 %v3741_v51, %v3691_v55 }
 0x383   :  { %v3396_v0 = vadd.f32 %v3364_v7, %v10265_v26  ;;  %v2569_v27 = vmul.f32 %v12935_v24, %v12760_v42  ;;  %v2519_v16 = vadd.f32 %v2487_v59, %v12759_v63  ;;  %v2520_v32 = vadd.f32 %v2488_v13, %v12759_v63  ;;  %v10376_v13 = vpop.xlane.xlu0 %2412 }
 0x384   :  { %v3397_v52 = vadd.f32 %v3365_v2, %v10271_v17  ;;  %v3774_v20 = vadd.f32 %v3742_v19, %v3692_v23  ;;  %v10355_v18 = vmul.f32 0.5, %v3773_v49  ;;  %v2570_v33 = vmul.f32 %v12936_v10, %v12760_v42  ;;  %v10368_v2 = vpop.xlane.xlu1 %897  ;;  %12971 = vst [vmem:[#allocation77_spill] sm:$0xff] %v10376_v13 }
 0x385   :  { %v2601_v17 = vadd.f32 %v2569_v27, %v2519_v16  ;;  %v2651_v19 = vmul.f32 %v12941_v14, %v12857_v12  ;;  %12970 = vst [vmem:[#allocation6_spill] sm:$0xff] %v10368_v2  ;;  %v2652_v49 = vmul.f32 %v12942_v8, %v12857_v12  ;;  %v12972_v16 = vld [vmem:[#allocation26_spill] sm:$0xff]  ;;  %v2064_v2 = vmul.f32 %v12316_v54, %v12839_v25  ;;  %v12992_v12 = vld [vmem:[#allocation153_spill] sm:$0xff] }
 0x386   :  { %v3440_v55 = vadd.f32 %v3397_v52, %v3396_v0  ;;  %v10363_v26 = vmul.f32 0.5, %v3774_v20  ;;  %5915 = vtanh.f32 %v10355_v18  ;;  %v2602_v7 = vadd.f32 %v2570_v33, %v2520_v32 }
 0x387   :  { %v2733_v0 = vmul.f32 %v12944_v22, %v12860_v37  ;;  %v2683_v52 = vadd.f32 %v2651_v19, %v2601_v17  ;;  %v2734_v20 = vmul.f32 %v12945_v46, %v12860_v37  ;;  %v1982_v32 = vmul.f32 %v12972_v16, %v12835_v21 }
 0x388   :  { %v5908_v51 = vpop.eup %5907  ;;  %3441 = vadd.xlane.f32.xlu0 %v3440_v55  ;;  %5917 = vtanh.f32 %v10363_v26  ;;  %v2684_v55 = vadd.f32 %v2652_v49, %v2602_v7  ;;  %v2065_v19 = vmul.f32 %v12435_v45, %v12839_v25  ;;  %v10403_v45 = vpop.xlane.xlu0 %3420 }
 0x389   :  { %v5910_v23 = vpop.eup %5909  ;;  %v2859_v59 = vmul.f32 %v5908_v51, %v10297_v58  ;;  %v1983_v51 = vmul.f32 %v12314_v41, %v12835_v21  ;;  %v2765_v62 = vadd.f32 %v2733_v0, %v2683_v52  ;;  %v2014_v17 = vadd.f32 %v1982_v32, %v12838_v1  ;;  %12974 = vst [vmem:[#allocation39_spill] sm:$0xff] %v10403_v45  ;;  %v12982_v45 = vld [vmem:[#allocation148_spill] sm:$0xff] }
 0x38a   :  { %v2860_v27 = vmul.f32 %v5910_v23, %v10299_v4  ;;  %v2766_v23 = vadd.f32 %v2734_v20, %v2684_v55  ;;  %v2147_v41 = vmul.f32 %v12321_v48, %v12842_v11  ;;  %v2228_v48 = vmul.f32 %v12436_v39, %v12845_v34 }
 0x38b   :  { %v2891_v33 = vadd.f32 %v2859_v59, %v10297_v58  ;;  %v2015_v16 = vadd.f32 %v1983_v51, %v12838_v1  ;;  %v2146_v58 = vmul.f32 %v12320_v60, %v12842_v11  ;;  %v10397_v59 = vmul.f32 0.5, %v2765_v62 }
 0x38c   :  { %v2892_v13 = vadd.f32 %v2860_v27, %v10299_v4  ;;  %v2096_v54 = vadd.f32 %v2064_v2, %v2014_v17  ;;  %v10399_v4 = vpop.xlane.xlu1 %1908  ;;  %v10401_v0 = vmul.f32 0.5, %v2766_v23  ;;  %v3497_v55 = vmul.f32 %v12957_v31, %v12876_v29 }
 0x38d   :  { %12973 = vst [vmem:[#allocation41_spill] sm:$0xff] %v10399_v4  ;;  %v2097_v27 = vadd.f32 %v2065_v19, %v2015_v16  ;;  %5919 = vtanh.f32 %v10397_v59  ;;  %v3498_v39 = vmul.f32 %v12959_v40, %v12876_v29  ;;  %v3579_v19 = vmul.f32 %v12962_v44, %v12880_v56  ;;  %v12986_v4 = vld [vmem:[#allocation145_spill] sm:$0xff] }
 0x38e   :  { %v2936_v7 = vadd.f32 %v2892_v13, %v2891_v33  ;;  %v5912_v49 = vpop.eup %5911  ;;  %v2178_v60 = vadd.f32 %v2146_v58, %v2096_v54  ;;  %5921 = vtanh.f32 %v10401_v0  ;;  %v2229_v13 = vmul.f32 %v12324_v57, %v12845_v34  ;;  %v12975_v58 = vld [vmem:[#allocation143_spill] sm:$0xff] }
 0x38f   :  { %v5914_v52 = vpop.eup %5913  ;;  %v4374_v20 = vmul.f32 %v5912_v49, %v10333_v47  ;;  %v2179_v2 = vadd.f32 %v2147_v41, %v2097_v27  ;;  %v3529_v57 = vadd.f32 %v3497_v55, %v12882_v3  ;;  %v3661_v41 = vmul.f32 %v12966_v35, %v12975_v58 }
 0x390   :  { %2937 = vadd.xlane.f32.xlu1 %v2936_v7  ;;  %v4375_v62 = vmul.f32 %v5914_v52, %v10335_v6  ;;  %v2260_v33 = vadd.f32 %v2228_v48, %v2178_v60  ;;  %v10428_v7 = vpop.xlane.xlu1 %2916  ;;  %v3530_v27 = vadd.f32 %v3498_v39, %v12882_v3  ;;  %v10434_v52 = vpop.xlane.xlu0 %4428  ;;  %v3662_v48 = vmul.f32 %v12912_v36, %v12975_v58  ;;  %v12980_v39 = vld [vmem:[#allocation57_spill] sm:$0xff] }
 0x391   :  { %v4406_v32 = vadd.f32 %v4374_v20, %v10333_v47  ;;  %v2261_v17 = vadd.f32 %v2229_v13, %v2179_v2  ;;  %v3580_v47 = vmul.f32 %v12964_v43, %v12880_v56  ;;  %12976 = vst [vmem:[#allocation67_spill] sm:$0xff] %v10428_v7  ;;  %12977 = vst [vmem:[#allocation23_spill] sm:$0xff] %v10434_v52 }
 0x392   :  { %v4407_v51 = vadd.f32 %v4375_v62, %v10335_v6  ;;  %v10421_v16 = vmul.f32 0.5, %v2260_v33  ;;  %v3611_v60 = vadd.f32 %v3579_v19, %v3529_v57  ;;  %v12978_v62 = vld [vmem:[#allocation144_spill] sm:$0xff] }
 0x393   :  { %v5916_v23 = vpop.eup %5915  ;;  %v10431_v49 = vmul.f32 0.5, %v2261_v17  ;;  %v3743_v2 = vmul.f32 %v12915_v30, %v12978_v62  ;;  %v3612_v33 = vadd.f32 %v3580_v47, %v3530_v27  ;;  %v12979_v17 = vld [vmem:[#allocation112_spill] sm:$0xff] }
 0x394   :  { %v4448_v6 = vadd.f32 %v4407_v51, %v4406_v32  ;;  %v3869_v54 = vmul.f32 %v5916_v23, %v10355_v18  ;;  %5923 = vtanh.f32 %v10421_v16  ;;  %v3693_v55 = vadd.f32 %v3661_v41, %v3611_v60  ;;  %v12981_v23 = vld [vmem:[#allocation58_spill] sm:$0xff]  ;;  %v12985_v41 = vld [vmem:[#allocation45_spill] sm:$0xff]  ;;  %v10459_v3 = vpop.xlane.xlu1 %3924 }
 0x395   :  { %v5918_v20 = vpop.eup %5917  ;;  %5925 = vtanh.f32 %v10431_v49  ;;  %v3744_v51 = vmul.f32 %v12916_v5, %v12978_v62  ;;  %v2992_v19 = vmul.f32 %v12980_v39, %v12979_v17  ;;  %v2993_v57 = vmul.f32 %v12981_v23, %v12979_v17  ;;  %v12987_v62 = vld [vmem:[#allocation117_spill] sm:$0xff]  ;;  %12988 = vst [vmem:[#allocation127_spill] sm:$0xff] %v10459_v3  ;;  %v12993_v3 = vld [vmem:[#allocation154_spill] sm:$0xff] }
 0x396   :  { %4449 = vadd.xlane.f32.xlu0 %v4448_v6  ;;  %v3870_v13 = vmul.f32 %v5918_v20, %v10363_v26  ;;  %v3901_v32 = vadd.f32 %v3869_v54, %v10355_v18  ;;  %v3694_v6 = vadd.f32 %v3662_v48, %v3612_v33  ;;  %v12983_v20 = vld [vmem:[#allocation69_spill] sm:$0xff]  ;;  %v12984_v18 = vld [vmem:[#allocation70_spill] sm:$0xff]  ;;  %v3775_v47 = vadd.f32 %v3743_v2, %v3693_v55 }
 0x397   :  { %v3074_v7 = vmul.f32 %v12983_v20, %v12982_v45  ;;  %v3075_v54 = vmul.f32 %v12984_v18, %v12982_v45  ;;  %v3024_v27 = vadd.f32 %v2992_v19, %v12985_v41  ;;  %v3025_v60 = vadd.f32 %v2993_v57, %v12985_v41  ;;  %v12991_v57 = vld [vmem:[#allocation146_spill] sm:$0xff] }
 0x398   :  { %v3902_v52 = vadd.f32 %v3870_v13, %v10363_v26  ;;  %v3156_v58 = vmul.f32 %v12987_v62, %v12986_v4  ;;  %v3776_v29 = vadd.f32 %v3744_v51, %v3694_v6  ;;  %v12989_v26 = vld [vmem:[#allocation118_spill] sm:$0xff]  ;;  %v10463_v13 = vpop.xlane.xlu0 %1407  ;;  %v10465_v33 = vmul.f32 0.5, %v3775_v47 }
 0x399   :  { %v3157_v48 = vmul.f32 %v12989_v26, %v12986_v4  ;;  %12990 = vst [vmem:[#allocation128_spill] sm:$0xff] %v10463_v13  ;;  %v3106_v37 = vadd.f32 %v3074_v7, %v3024_v27  ;;  %v3107_v2 = vadd.f32 %v3075_v54, %v3025_v60  ;;  %v3238_v62 = vmul.f32 %v12992_v12, %v12991_v57  ;;  %v10482_v13 = vpop.xlane.xlu1 %900 }
 0x39a   :  { %v3944_v56 = vadd.f32 %v3902_v52, %v3901_v32  ;;  %v5920_v55 = vpop.eup %5919  ;;  %v10467_v19 = vmul.f32 0.5, %v3776_v29  ;;  %v3239_v52 = vmul.f32 %v12993_v3, %v12991_v57  ;;  %v2489_v32 = vmul.f32 %v12932_v15, %v12835_v21  ;;  %12994 = vst [vmem:[#allocation80_spill] sm:$0xff] %v10482_v13 }
 0x39b   :  { %v5922_v51 = vpop.eup %5921  ;;  %v2861_v6 = vmul.f32 %v5920_v55, %v10397_v59  ;;  %5927 = vtanh.f32 %v10465_v33  ;;  %v3188_v7 = vadd.f32 %v3156_v58, %v3106_v37  ;;  %v3189_v54 = vadd.f32 %v3157_v48, %v3107_v2 }
 0x39c   :  { %3945 = vadd.xlane.f32.xlu1 %v3944_v56  ;;  %v2862_v56 = vmul.f32 %v5922_v51, %v10401_v0  ;;  %5929 = vtanh.f32 %v10467_v19  ;;  %v2490_v60 = vmul.f32 %v12933_v9, %v12835_v21  ;;  %v2521_v55 = vadd.f32 %v2489_v32, %v12838_v1  ;;  %v10490_v48 = vpop.xlane.xlu0 %2415 }
 0x39d   :  { %v2893_v29 = vadd.f32 %v2861_v6, %v10397_v59  ;;  %v3270_v47 = vadd.f32 %v3238_v62, %v3188_v7  ;;  %v3271_v27 = vadd.f32 %v3239_v52, %v3189_v54  ;;  %v2571_v37 = vmul.f32 %v12935_v24, %v12839_v25  ;;  %12995 = vst [vmem:[#allocation11_spill] sm:$0xff] %v10490_v48 }
 0x39e   :  { %v2894_v15 = vadd.f32 %v2862_v56, %v10401_v0  ;;  %v2572_v58 = vmul.f32 %v12936_v10, %v12839_v25  ;;  %v2522_v9 = vadd.f32 %v2490_v60, %v12838_v1  ;;  %v2653_v2 = vmul.f32 %v12941_v14, %v12842_v11  ;;  %v12998_v60 = vld [vmem:[#allocation94_spill] sm:$0xff] }
 0x39f   :  { %v10492_v59 = vmul.f32 0.5, %v3270_v47  ;;  %v10494_v62 = vmul.f32 0.5, %v3271_v27  ;;  %v2603_v32 = vadd.f32 %v2571_v37, %v2521_v55  ;;  %v2654_v24 = vmul.f32 %v12942_v8, %v12842_v11  ;;  %v12997_v8 = vld [vmem:[#allocation93_spill] sm:$0xff]  ;;  %v12999_v55 = vld [vmem:[#allocation136_spill] sm:$0xff] }
 0x3a0   :  { %v2939_v52 = vadd.f32 %v2894_v15, %v2893_v29  ;;  %v2735_v10 = vmul.f32 %v12944_v22, %v12845_v34  ;;  %v2604_v7 = vadd.f32 %v2572_v58, %v2522_v9  ;;  %v2736_v54 = vmul.f32 %v12945_v46, %v12845_v34  ;;  %v12996_v29 = vld [vmem:[#allocation106_spill] sm:$0xff]  ;;  %v10516_v58 = vpop.xlane.xlu1 %1911 }
 0x3a1   :  { %v5924_v0 = vpop.eup %5923  ;;  %5931 = vtanh.f32 %v10492_v59  ;;  %v2685_v56 = vadd.f32 %v2653_v2, %v2603_v32  ;;  %v4002_v47 = vmul.f32 %v12997_v8, %v12996_v29  ;;  %v4003_v15 = vmul.f32 %v12998_v60, %v12996_v29  ;;  %13000 = vst [vmem:[#allocation132_spill] sm:$0xff] %v10516_v58  ;;  %v13001_v2 = vld [vmem:[#allocation137_spill] sm:$0xff]  ;;  %v10522_v32 = vpop.xlane.xlu0 %3423 }
 0x3a2   :  { %v5926_v51 = vpop.eup %5925  ;;  %v2356_v6 = vmul.f32 %v5924_v0, %v10421_v16  ;;  %2940 = vadd.xlane.f32.xlu0 %v2939_v52  ;;  %5933 = vtanh.f32 %v10494_v62  ;;  %v2686_v27 = vadd.f32 %v2654_v24, %v2604_v7  ;;  %v4084_v37 = vmul.f32 %v12999_v55, %v12961_v28  ;;  %13002 = vst [vmem:[#allocation125_spill] sm:$0xff] %v10522_v32  ;;  %v13004_v7 = vld [vmem:[#allocation95_spill] sm:$0xff]  ;;  %v13012_v32 = vld [vmem:[#allocation117_spill] sm:$0xff] }
 0x3a3   :  { %v2357_v14 = vmul.f32 %v5926_v51, %v10431_v49  ;;  %v2767_v9 = vadd.f32 %v2735_v10, %v2685_v56  ;;  %v4034_v0 = vadd.f32 %v4002_v47, %v12960_v38  ;;  %v4085_v52 = vmul.f32 %v13001_v2, %v12961_v28  ;;  %v13003_v51 = vld [vmem:[#allocation138_spill] sm:$0xff] }
 0x3a4   :  { %v2388_v22 = vadd.f32 %v2356_v6, %v10421_v16  ;;  %v2768_v16 = vadd.f32 %v2736_v54, %v2686_v27  ;;  %v4035_v24 = vadd.f32 %v4003_v15, %v12960_v38  ;;  %v4166_v6 = vmul.f32 %v13003_v51, %v12965_v61  ;;  %v13005_v38 = vld [vmem:[#allocation98_spill] sm:$0xff]  ;;  %v13006_v15 = vld [vmem:[#allocation99_spill] sm:$0xff] }
 0x3a5   :  { %v2389_v46 = vadd.f32 %v2357_v14, %v10431_v49  ;;  %v4167_v29 = vmul.f32 %v13004_v7, %v12965_v61  ;;  %v10529_v58 = vmul.f32 0.5, %v2767_v9  ;;  %v4116_v49 = vadd.f32 %v4084_v37, %v4034_v0 }
 0x3a6   :  { %v10531_v10 = vmul.f32 0.5, %v2768_v16  ;;  %v4117_v14 = vadd.f32 %v4085_v52, %v4035_v24  ;;  %v4248_v54 = vmul.f32 %v13005_v38, %v12967_v53  ;;  %v3499_v47 = vmul.f32 %v12957_v31, %v12979_v17  ;;  %v10547_v52 = vpop.xlane.xlu0 %4431 }
 0x3a7   :  { %v2435_v13 = vadd.f32 %v2389_v46, %v2388_v22  ;;  %5935 = vtanh.f32 %v10529_v58  ;;  %v4198_v28 = vadd.f32 %v4166_v6, %v4116_v49  ;;  %v4249_v37 = vmul.f32 %v13006_v15, %v12967_v53  ;;  %v10542_v46 = vpop.xlane.xlu1 %2919  ;;  %13008 = vst [vmem:[#allocation16_spill] sm:$0xff] %v10547_v52 }
 0x3a8   :  { %v5928_v56 = vpop.eup %5927  ;;  %5937 = vtanh.f32 %v10531_v10  ;;  %v4199_v22 = vadd.f32 %v4167_v29, %v4117_v14  ;;  %13007 = vst [vmem:[#allocation78_spill] sm:$0xff] %v10542_v46  ;;  %v3500_v0 = vmul.f32 %v12959_v40, %v12979_v17  ;;  %v3531_v6 = vadd.f32 %v3499_v47, %v12985_v41 }
 0x3a9   :  { %2436 = vadd.xlane.f32.xlu1 %v2435_v13  ;;  %v5930_v27 = vpop.eup %5929  ;;  %v3871_v61 = vmul.f32 %v5928_v56, %v10465_v33  ;;  %v4280_v9 = vadd.f32 %v4248_v54, %v4198_v28  ;;  %v3581_v29 = vmul.f32 %v12962_v44, %v12982_v45  ;;  %v3582_v56 = vmul.f32 %v12964_v43, %v12982_v45 }
 0x3aa   :  { %v3872_v13 = vmul.f32 %v5930_v27, %v10467_v19  ;;  %v4281_v24 = vadd.f32 %v4249_v37, %v4199_v22  ;;  %v3532_v14 = vadd.f32 %v3500_v0, %v12985_v41  ;;  %v3664_v47 = vmul.f32 %v12912_v36, %v12986_v4 }
 0x3ab   :  { %v3903_v16 = vadd.f32 %v3871_v61, %v10465_v33  ;;  %v10554_v49 = vmul.f32 0.5, %v4280_v9  ;;  %v3613_v54 = vadd.f32 %v3581_v29, %v3531_v6  ;;  %v3663_v33 = vmul.f32 %v12966_v35, %v12986_v4 }
 0x3ac   :  { %v3904_v53 = vadd.f32 %v3872_v13, %v10467_v19  ;;  %v10559_v28 = vmul.f32 0.5, %v4281_v24  ;;  %v3614_v19 = vadd.f32 %v3582_v56, %v3532_v14  ;;  %v3745_v22 = vmul.f32 %v12915_v30, %v12991_v57  ;;  %v10572_v24 = vpop.xlane.xlu1 %3927  ;;  %v10579_v14 = vpop.xlane.xlu0 %1410 }
 0x3ad   :  { %5939 = vtanh.f32 %v10554_v49  ;;  %v3695_v9 = vadd.f32 %v3663_v33, %v3613_v54  ;;  %v3746_v0 = vmul.f32 %v12916_v5, %v12991_v57  ;;  %13009 = vst [vmem:[#allocation79_spill] sm:$0xff] %v10572_v24  ;;  %v2994_v29 = vmul.f32 %v12980_v39, %v12852_v50  ;;  %13010 = vst [vmem:[#allocation133_spill] sm:$0xff] %v10579_v14  ;;  %v13011_v24 = vld [vmem:[#allocation149_spill] sm:$0xff] }
 0x3ae   :  { %v5932_v27 = vpop.eup %5931  ;;  %v3947_v61 = vadd.f32 %v3904_v53, %v3903_v16  ;;  %5941 = vtanh.f32 %v10559_v28  ;;  %v3696_v6 = vadd.f32 %v3664_v47, %v3614_v19  ;;  %v2995_v53 = vmul.f32 %v12981_v23, %v12852_v50 }
 0x3af   :  { %v5934_v37 = vpop.eup %5933  ;;  %v3366_v13 = vmul.f32 %v5932_v27, %v10492_v59  ;;  %v3777_v54 = vadd.f32 %v3745_v22, %v3695_v9  ;;  %v3076_v33 = vmul.f32 %v12983_v20, %v12760_v42  ;;  %v3077_v27 = vmul.f32 %v12984_v18, %v12760_v42  ;;  %v13013_v22 = vld [vmem:[#allocation152_spill] sm:$0xff] }
 0x3b0   :  { %3948 = vadd.xlane.f32.xlu0 %v3947_v61  ;;  %v3367_v16 = vmul.f32 %v5934_v37, %v10494_v62  ;;  %v3778_v47 = vadd.f32 %v3746_v0, %v3696_v6  ;;  %v3026_v19 = vadd.f32 %v2994_v29, %v12759_v63  ;;  %v3027_v37 = vadd.f32 %v2995_v53, %v12759_v63  ;;  %v10602_v29 = vpop.xlane.xlu1 %903 }
 0x3b1   :  { %v3398_v56 = vadd.f32 %v3366_v13, %v10492_v59  ;;  %v10589_v52 = vmul.f32 0.5, %v3777_v54  ;;  %v3158_v14 = vmul.f32 %v13012_v32, %v13011_v24  ;;  %v3159_v59 = vmul.f32 %v12989_v26, %v13011_v24 }
 0x3b2   :  { %v3399_v61 = vadd.f32 %v3367_v16, %v10494_v62  ;;  %v3240_v13 = vmul.f32 %v12992_v12, %v13013_v22  ;;  %v10597_v46 = vmul.f32 0.5, %v3778_v47  ;;  %v3108_v62 = vadd.f32 %v3076_v33, %v3026_v19 }
 0x3b3   :  { %v3109_v0 = vadd.f32 %v3077_v27, %v3027_v37  ;;  %5943 = vtanh.f32 %v10589_v52  ;;  %v3241_v6 = vmul.f32 %v12993_v3, %v13013_v22  ;;  %v2996_v27 = vmul.f32 %v12980_v39, %v12835_v21 }
 0x3b4   :  { %v3443_v9 = vadd.f32 %v3399_v61, %v3398_v56  ;;  %v5936_v16 = vpop.eup %5935  ;;  %5945 = vtanh.f32 %v10597_v46  ;;  %v3190_v48 = vadd.f32 %v3158_v14, %v3108_v62  ;;  %v10606_v61 = vpop.xlane.xlu0 %2418  ;;  %v2997_v47 = vmul.f32 %v12981_v23, %v12835_v21 }
 0x3b5   :  { %v5938_v53 = vpop.eup %5937  ;;  %v2863_v54 = vmul.f32 %v5936_v16, %v10529_v58  ;;  %v3191_v56 = vadd.f32 %v3159_v59, %v3109_v0  ;;  %v3078_v16 = vmul.f32 %v12983_v20, %v12839_v25  ;;  %v3028_v59 = vadd.f32 %v2996_v27, %v12838_v1 }
 0x3b6   :  { %3444 = vadd.xlane.f32.xlu1 %v3443_v9  ;;  %v2864_v33 = vmul.f32 %v5938_v53, %v10531_v10  ;;  %v3272_v37 = vadd.f32 %v3240_v13, %v3190_v48  ;;  %v3029_v39 = vadd.f32 %v2997_v47, %v12838_v1  ;;  %v3079_v23 = vmul.f32 %v12984_v18, %v12839_v25  ;;  %v10625_v13 = vpop.xlane.xlu1 %1914 }
 0x3b7   :  { %v2895_v19 = vadd.f32 %v2863_v54, %v10529_v58  ;;  %v3273_v9 = vadd.f32 %v3241_v6, %v3191_v56  ;;  %v3110_v48 = vadd.f32 %v3078_v16, %v3028_v59  ;;  %v3160_v54 = vmul.f32 %v13012_v32, %v12842_v11  ;;  %v13015_v32 = vld [vmem:[#allocation113_spill] sm:$0xff] }
 0x3b8   :  { %v2896_v14 = vadd.f32 %v2864_v33, %v10531_v10  ;;  %v10618_v62 = vmul.f32 0.5, %v3272_v37  ;;  %v3111_v10 = vadd.f32 %v3079_v23, %v3029_v39  ;;  %v10631_v56 = vpop.xlane.xlu0 %3426  ;;  %v3161_v18 = vmul.f32 %v12989_v26, %v12842_v11  ;;  %v13016_v39 = vld [vmem:[#allocation147_spill] sm:$0xff] }
 0x3b9   :  { %v10620_v0 = vmul.f32 0.5, %v3273_v9  ;;  %13014 = vst [vmem:[#allocation10_spill] sm:$0xff] %v10631_v56  ;;  %v3242_v27 = vmul.f32 %v12992_v12, %v12845_v34  ;;  %v3243_v37 = vmul.f32 %v12993_v3, %v12845_v34  ;;  %v4004_v9 = vmul.f32 %v12997_v8, %v13015_v32  ;;  %v13017_v12 = vld [vmem:[#allocation46_spill] sm:$0xff] }
 0x3ba   :  { %v5940_v53 = vpop.eup %5939  ;;  %v2942_v58 = vadd.f32 %v2896_v14, %v2895_v19  ;;  %5947 = vtanh.f32 %v10618_v62  ;;  %v3192_v19 = vadd.f32 %v3160_v54, %v3110_v48  ;;  %v3193_v14 = vadd.f32 %v3161_v18, %v3111_v10  ;;  %v10657_v10 = vpop.xlane.xlu1 %2922 }
 0x3bb   :  { %v5942_v6 = vpop.eup %5941  ;;  %v4376_v20 = vmul.f32 %v5940_v53, %v10554_v49  ;;  %5949 = vtanh.f32 %v10620_v0  ;;  %v4005_v59 = vmul.f32 %v12998_v60, %v13015_v32  ;;  %v4086_v26 = vmul.f32 %v12999_v55, %v13016_v39 }
 0x3bc   :  { %2943 = vadd.xlane.f32.xlu0 %v2942_v58  ;;  %v4377_v33 = vmul.f32 %v5942_v6, %v10559_v28  ;;  %v3274_v23 = vadd.f32 %v3242_v27, %v3192_v19  ;;  %v4036_v53 = vadd.f32 %v4004_v9, %v13017_v12  ;;  %v13018_v58 = vld [vmem:[#allocation143_spill] sm:$0xff]  ;;  %v3275_v6 = vadd.f32 %v3243_v37, %v3193_v14  ;;  %v10661_v27 = vpop.xlane.xlu0 %4434  ;;  %v13020_v14 = vld [vmem:[#allocation144_spill] sm:$0xff] }
 0x3bd   :  { %v4408_v47 = vadd.f32 %v4376_v20, %v10554_v49  ;;  %v4087_v49 = vmul.f32 %v13001_v2, %v13016_v39  ;;  %v4168_v3 = vmul.f32 %v13003_v51, %v13018_v58  ;;  %v4169_v20 = vmul.f32 %v13004_v7, %v13018_v58  ;;  %13019 = vst [vmem:[#allocation75_spill] sm:$0xff] %v10661_v27 }
 0x3be   :  { %v4409_v16 = vadd.f32 %v4377_v33, %v10559_v28  ;;  %v4037_v28 = vadd.f32 %v4005_v59, %v13017_v12  ;;  %v10659_v33 = vmul.f32 0.5, %v3274_v23  ;;  %v4118_v18 = vadd.f32 %v4086_v26, %v4036_v53 }
 0x3bf   :  { %v10664_v9 = vmul.f32 0.5, %v3275_v6  ;;  %v4250_v59 = vmul.f32 %v13005_v38, %v13020_v14  ;;  %v4251_v23 = vmul.f32 %v13006_v15, %v13020_v14  ;;  %v10683_v6 = vpop.xlane.xlu1 %3930 }
 0x3c0   :  { %v4451_v48 = vadd.f32 %v4409_v16, %v4408_v47  ;;  %v5944_v54 = vpop.eup %5943  ;;  %v4119_v47 = vadd.f32 %v4087_v49, %v4037_v28  ;;  %5951 = vtanh.f32 %v10659_v33  ;;  %v4200_v16 = vadd.f32 %v4168_v3, %v4118_v18  ;;  %13021 = vst [vmem:[#allocation76_spill] sm:$0xff] %v10683_v6  ;;  %v10690_v18 = vpop.xlane.xlu0 %1413  ;;  %v13062_v6 = vld [vmem:[#allocation65_spill] sm:$0xff] }
 0x3c1   :  { %v5946_v19 = vpop.eup %5945  ;;  %v3873_v32 = vmul.f32 %v5944_v54, %v10589_v52  ;;  %5953 = vtanh.f32 %v10664_v9  ;;  %v4006_v49 = vmul.f32 %v12997_v8, %v12979_v17  ;;  %v4007_v3 = vmul.f32 %v12998_v60, %v12979_v17 }
 0x3c2   :  { %4452 = vadd.xlane.f32.xlu1 %v4451_v48  ;;  %v3874_v37 = vmul.f32 %v5946_v19, %v10597_v46  ;;  %v4201_v26 = vadd.f32 %v4169_v20, %v4119_v47  ;;  %v4282_v53 = vadd.f32 %v4250_v59, %v4200_v16  ;;  %v4088_v48 = vmul.f32 %v12999_v55, %v12982_v45 }
 0x3c3   :  { %v3905_v39 = vadd.f32 %v3873_v32, %v10589_v52  ;;  %v4089_v52 = vmul.f32 %v13001_v2, %v12982_v45  ;;  %v4170_v54 = vmul.f32 %v13003_v51, %v12986_v4  ;;  %v4039_v32 = vadd.f32 %v4007_v3, %v12985_v41 }
 0x3c4   :  { %v3906_v12 = vadd.f32 %v3874_v37, %v10597_v46  ;;  %v4283_v58 = vadd.f32 %v4251_v23, %v4201_v26  ;;  %v10685_v20 = vmul.f32 0.5, %v4282_v53  ;;  %v4038_v46 = vadd.f32 %v4006_v49, %v12985_v41 }
 0x3c5   :  { %v4171_v45 = vmul.f32 %v13004_v7, %v12986_v4  ;;  %v4252_v47 = vmul.f32 %v13005_v38, %v12991_v57  ;;  %v4253_v59 = vmul.f32 %v13006_v15, %v12991_v57  ;;  %v4121_v41 = vadd.f32 %v4089_v52, %v4039_v32 }
 0x3c6   :  { %v3950_v28 = vadd.f32 %v3906_v12, %v3905_v39  ;;  %v10692_v17 = vmul.f32 0.5, %v4283_v58  ;;  %5955 = vtanh.f32 %v10685_v20  ;;  %v4120_v14 = vadd.f32 %v4088_v48, %v4038_v46  ;;  %v10716_v48 = vpop.xlane.xlu1 %906 }
 0x3c7   :  { %v5948_v19 = vpop.eup %5947  ;;  %v3501_v4 = vmul.f32 %v12957_v31, %v12852_v50  ;;  %v3502_v12 = vmul.f32 %v12959_v40, %v12852_v50  ;;  %v3583_v53 = vmul.f32 %v12962_v44, %v12760_v42  ;;  %v4203_v57 = vadd.f32 %v4171_v45, %v4121_v41 }
 0x3c8   :  { %v5950_v37 = vpop.eup %5949  ;;  %3951 = vadd.xlane.f32.xlu0 %v3950_v28  ;;  %v3368_v16 = vmul.f32 %v5948_v19, %v10618_v62  ;;  %5957 = vtanh.f32 %v10692_v17  ;;  %v4202_v23 = vadd.f32 %v4170_v54, %v4120_v14  ;;  %v3584_v3 = vmul.f32 %v12964_v43, %v12760_v42  ;;  %v10723_v54 = vpop.xlane.xlu0 %2421 }
 0x3c9   :  { %v3369_v39 = vmul.f32 %v5950_v37, %v10620_v0  ;;  %v3533_v58 = vadd.f32 %v3501_v4, %v12759_v63  ;;  %v3665_v28 = vmul.f32 %v12966_v35, %v13011_v24  ;;  %v3666_v46 = vmul.f32 %v12912_v36, %v13011_v24 }
 0x3ca   :  { %v3400_v26 = vadd.f32 %v3368_v16, %v10618_v62  ;;  %v4284_v52 = vadd.f32 %v4252_v47, %v4202_v23  ;;  %v3534_v62 = vadd.f32 %v3502_v12, %v12759_v63  ;;  %v4285_v19 = vadd.f32 %v4253_v59, %v4203_v57 }
 0x3cb   :  { %v3401_v49 = vadd.f32 %v3369_v39, %v10620_v0  ;;  %v3615_v32 = vadd.f32 %v3583_v53, %v3533_v58  ;;  %v3747_v45 = vmul.f32 %v12915_v30, %v13013_v22  ;;  %v3748_v47 = vmul.f32 %v12916_v5, %v13013_v22 }
 0x3cc   :  { %v10727_v37 = vmul.f32 0.5, %v4284_v52  ;;  %v3616_v16 = vadd.f32 %v3584_v3, %v3534_v62  ;;  %v10731_v39 = vmul.f32 0.5, %v4285_v19  ;;  %v4008_v4 = vmul.f32 %v12997_v8, %v12852_v50  ;;  %v10745_v62 = vpop.xlane.xlu0 %3429 }
 0x3cd   :  { %v3446_v0 = vadd.f32 %v3401_v49, %v3400_v26  ;;  %v5952_v14 = vpop.eup %5951  ;;  %v3697_v41 = vadd.f32 %v3665_v28, %v3615_v32  ;;  %v10739_v49 = vpop.xlane.xlu1 %1917  ;;  %v4009_v3 = vmul.f32 %v12998_v60, %v12852_v50  ;;  %13022 = vst [vmem:[#allocation90_spill] sm:$0xff] %v10745_v62  ;;  %v4091_v19 = vmul.f32 %v13001_v2, %v12760_v42  ;;  %v13077_v62 = vld [vmem:[#allocation126_spill] sm:$0xff] }
 0x3ce   :  { %v5954_v26 = vpop.eup %5953  ;;  %v3370_v59 = vmul.f32 %v5952_v14, %v10659_v33  ;;  %5959 = vtanh.f32 %v10727_v37  ;;  %v3698_v23 = vadd.f32 %v3666_v46, %v3616_v16  ;;  %v4040_v52 = vadd.f32 %v4008_v4, %v12759_v63 }
 0x3cf   :  { %3447 = vadd.xlane.f32.xlu1 %v3446_v0  ;;  %v3371_v12 = vmul.f32 %v5954_v26, %v10664_v9  ;;  %5961 = vtanh.f32 %v10731_v39  ;;  %v3779_v53 = vadd.f32 %v3747_v45, %v3697_v41  ;;  %v4090_v0 = vmul.f32 %v12999_v55, %v12760_v42 }
 0x3d0   :  { %v3402_v57 = vadd.f32 %v3370_v59, %v10659_v33  ;;  %v3780_v58 = vadd.f32 %v3748_v47, %v3698_v23  ;;  %v4041_v33 = vadd.f32 %v4009_v3, %v12759_v63  ;;  %v4172_v50 = vmul.f32 %v13003_v51, %v13011_v24  ;;  %v10780_v3 = vpop.xlane.xlu0 %4437 }
 0x3d1   :  { %v3403_v28 = vadd.f32 %v3371_v12, %v10664_v9  ;;  %v10748_v46 = vmul.f32 0.5, %v3779_v53  ;;  %v4173_v45 = vmul.f32 %v13004_v7, %v13011_v24  ;;  %v4122_v47 = vadd.f32 %v4090_v0, %v4040_v52  ;;  %v10773_v12 = vpop.xlane.xlu1 %2925  ;;  %13023 = vst [vmem:[#allocation15_spill] sm:$0xff] %v10780_v3 }
 0x3d2   :  { %v10754_v32 = vmul.f32 0.5, %v3780_v58  ;;  %v4254_v14 = vmul.f32 %v13005_v38, %v13013_v22  ;;  %v4123_v63 = vadd.f32 %v4091_v19, %v4041_v33  ;;  %v4255_v4 = vmul.f32 %v13006_v15, %v13013_v22 }
 0x3d3   :  { %v5956_v16 = vpop.eup %5955  ;;  %v3449_v9 = vadd.f32 %v3403_v28, %v3402_v57  ;;  %5963 = vtanh.f32 %v10748_v46  ;;  %v4204_v26 = vadd.f32 %v4172_v50, %v4122_v47  ;;  %v3503_v59 = vmul.f32 %v12957_v31, %v12835_v21 }
 0x3d4   :  { %v4378_v42 = vmul.f32 %v5956_v16, %v10685_v20  ;;  %5965 = vtanh.f32 %v10754_v32  ;;  %v3504_v23 = vmul.f32 %v12959_v40, %v12835_v21  ;;  %v4205_v57 = vadd.f32 %v4173_v45, %v4123_v63  ;;  %v10801_v63 = vpop.xlane.xlu0 %1416 }
 0x3d5   :  { %v5958_v41 = vpop.eup %5957  ;;  %3450 = vadd.xlane.f32.xlu0 %v3449_v9  ;;  %v3585_v58 = vmul.f32 %v12962_v44, %v12839_v25  ;;  %v3586_v22 = vmul.f32 %v12964_v43, %v12839_v25  ;;  %v4286_v28 = vadd.f32 %v4254_v14, %v4204_v26  ;;  %v3535_v31 = vadd.f32 %v3503_v59, %v12838_v1  ;;  %v10798_v14 = vpop.xlane.xlu1 %3933 }
 0x3d6   :  { %v4379_v24 = vmul.f32 %v5958_v41, %v10692_v17  ;;  %v4410_v53 = vadd.f32 %v4378_v42, %v10685_v20  ;;  %v3536_v40 = vadd.f32 %v3504_v23, %v12838_v1  ;;  %v4287_v0 = vadd.f32 %v4255_v4, %v4205_v57  ;;  %13024 = vst [vmem:[#allocation81_spill] sm:$0xff] %v10798_v14 }
 0x3d7   :  { %v3667_v20 = vmul.f32 %v12966_v35, %v12842_v11  ;;  %v3668_v19 = vmul.f32 %v12912_v36, %v12842_v11  ;;  %v10789_v33 = vmul.f32 0.5, %v4286_v28  ;;  %v3617_v43 = vadd.f32 %v3585_v58, %v3535_v31 }
 0x3d8   :  { %v4411_v52 = vadd.f32 %v4379_v24, %v10692_v17  ;;  %v3618_v50 = vadd.f32 %v3586_v22, %v3536_v40  ;;  %v4319_v45 = vmul.f32 0.5, %v4287_v0  ;;  %v3749_v17 = vmul.f32 %v12915_v30, %v12845_v34  ;;  %v10824_v0 = vpop.xlane.xlu0 %2424 }
 0x3d9   :  { %v3750_v16 = vmul.f32 %v12916_v5, %v12845_v34  ;;  %5967 = vtanh.f32 %v10789_v33  ;;  %v3699_v35 = vadd.f32 %v3667_v20, %v3617_v43  ;;  %v4010_v36 = vmul.f32 %v12997_v8, %v12835_v21 }
 0x3da   :  { %v4454_v44 = vadd.f32 %v4411_v52, %v4410_v53  ;;  %v3700_v47 = vadd.f32 %v3668_v19, %v3618_v50  ;;  %5969 = vtanh.f32 %v4319_v45  ;;  %v4011_v24 = vmul.f32 %v12998_v60, %v12835_v21 }
 0x3db   :  { %v5960_v9 = vpop.eup %5959  ;;  %v3781_v5 = vadd.f32 %v3749_v17, %v3699_v35  ;;  %v4042_v59 = vadd.f32 %v4010_v36, %v12838_v1  ;;  %v4092_v8 = vmul.f32 %v12999_v55, %v12839_v25  ;;  %v4093_v23 = vmul.f32 %v13001_v2, %v12839_v25  ;;  %v10819_v2 = vpop.xlane.xlu1 %909 }
 0x3dc   :  { %4455 = vadd.xlane.f32.xlu1 %v4454_v44  ;;  %v5962_v41 = vpop.eup %5961  ;;  %v4380_v42 = vmul.f32 %v5960_v9, %v10727_v37  ;;  %v3782_v4 = vadd.f32 %v3750_v16, %v3700_v47  ;;  %v4043_v22 = vadd.f32 %v4011_v24, %v12838_v1  ;;  %v4174_v21 = vmul.f32 %v13003_v51, %v12842_v11 }
 0x3dd   :  { %v4381_v30 = vmul.f32 %v5962_v41, %v10731_v39  ;;  %v3813_v57 = vmul.f32 0.5, %v3781_v5  ;;  %v4124_v28 = vadd.f32 %v4092_v8, %v4042_v59  ;;  %v4175_v60 = vmul.f32 %v13004_v7, %v12842_v11 }
 0x3de   :  { %v4412_v26 = vadd.f32 %v4380_v42, %v10727_v37  ;;  %v3814_v58 = vmul.f32 0.5, %v3782_v4  ;;  %v4125_v25 = vadd.f32 %v4093_v23, %v4043_v22  ;;  %v4256_v40 = vmul.f32 %v13005_v38, %v12845_v34  ;;  %v10832_v38 = vpop.xlane.xlu0 %3432 }
 0x3df   :  { %v4413_v53 = vadd.f32 %v4381_v30, %v10731_v39  ;;  %5971 = vtanh.f32 %v3813_v57  ;;  %v4206_v1 = vadd.f32 %v4174_v21, %v4124_v28  ;;  %v4257_v7 = vmul.f32 %v13006_v15, %v12845_v34  ;;  %v10830_v16 = vpop.xlane.xlu1 %1920  ;;  %13025 = vst [vmem:[#allocation17_spill] sm:$0xff] %v10832_v38 }
 0x3e0   :  { %v5964_v52 = vpop.eup %5963  ;;  %5973 = vtanh.f32 %v3814_v58  ;;  %v4207_v51 = vadd.f32 %v4175_v60, %v4125_v25 }
 0x3e1   :  { %v5966_v37 = vpop.eup %5965  ;;  %v4457_v31 = vadd.f32 %v4413_v53, %v4412_v26  ;;  %v3875_v55 = vmul.f32 %v5964_v52, %v10748_v46  ;;  %v4288_v19 = vadd.f32 %v4256_v40, %v4206_v1  ;;  %v5304_v1 = vld [vmem:[%s11401_s3 + $0x78] sm:$0xff]  ;;  %v11897_v40 = vmov 0.0  }
 0x3e2   :  { %v3876_v39 = vmul.f32 %v5966_v37, %v10754_v32  ;;  %v4289_v44 = vadd.f32 %v4257_v7, %v4207_v51  ;;  %v10838_v42 = vpop.xlane.xlu0 %4440  ;;  %5416 = vmatprep.subr.mxu0 %v11897_v40  ;;  %v5302_v7 = vld [vmem:[%s11401_s3 + $0x68] sm:$0xff]  ;;  %5448 = vmatprep.mubr.msk.f32.mxu0 %vm5985_vm0, %v11897_v40  ;;  %vm5267_vm0 = vcmask 1040384  }
 0x3e3   :  { %4458 = vadd.xlane.f32.xlu0 %v4457_v31  ;;  %v3907_v11 = vadd.f32 %v3875_v55, %v10748_v46  ;;  %v4320_v50 = vmul.f32 0.5, %v4288_v19  ;;  %13026 = vst [vmem:[#allocation134_spill] sm:$0xff] %v10838_v42  ;;  %v13029_v55 = vlaneseq  ;;  %5417 = vmatpush3.msra.mxu0 %v5304_v1 }
 0x3e4   :  { %v3908_v20 = vadd.f32 %v3876_v39, %v10754_v32  ;;  %v4321_v17 = vmul.f32 0.5, %v4289_v44  ;;  %v10836_v32 = vpop.xlane.xlu1 %2928  ;;  %5418 = vmatprep.subr.mxu0 %v11897_v40 }
 0x3e5   :  { %5975 = vtanh.f32 %v4320_v50  ;;  %v10855_v25 = vand.u32 127, %v13029_v55  ;;  %v13040_v55 = vld [vmem:[#allocation160_spill] sm:$0xff] }
 0x3e6   :  { %v3953_v43 = vadd.f32 %v3908_v20, %v3907_v11  ;;  %v5968_v9 = vpop.eup %5967  ;;  %5977 = vtanh.f32 %v4321_v17  ;;  %v10842_v23 = vpop.xlane.xlu0 %1419  ;;  %v5303_v11 = vld [vmem:[%s11401_s3 + $0x70] sm:$0xff] }
 0x3e7   :  { %v5970_v35 = vpop.eup %5969  ;;  %v4382_v46 = vmul.f32 %v5968_v9, %v10789_v33  ;;  %v4489_v51 = vadd.s32 4294967288, %v10855_v25  ;;  %5419 = vmatpush3.msra.mxu0 %v5303_v11  ;;  %v4496_v19 = vadd.s32 4294967280, %v10855_v25  ;;  %v13041_v11 = vld [vmem:[#allocation163_spill] sm:$0xff] }
 0x3e8   :  { %3954 = vadd.xlane.f32.xlu1 %v3953_v43  ;;  %v4383_v47 = vmul.f32 %v5970_v35, %v4319_v45  ;;  %v10840_v59 = vpop.xlane.xlu1 %3936  ;;  %5420 = vmatprep.subr.mxu0 %v11897_v40  ;;  %v5301_v43 = vld [vmem:[%s11401_s3 + $0x60] sm:$0xff] }
 0x3e9   :  { %v4414_v34 = vadd.f32 %v4382_v46, %v10789_v33  ;;  %13027 = vst [vmem:[#allocation82_spill] sm:$0xff] %v10840_v59  ;;  %5421 = vmatpush3.msra.mxu0 %v5302_v7  ;;  %v5300_v46 = vld [vmem:[%s11401_s3 + $0x58] sm:$0xff]  ;;  %v4517_v7 = vadd.s32 4294967256, %v10855_v25  ;;  %v13061_v59 = vld [vmem:[#allocation12_spill] sm:$0xff] }
 0x3ea   :  { %v4415_v15 = vadd.f32 %v4383_v47, %v4319_v45  ;;  %v10846_v60 = vpop.xlane.xlu0 %2427  ;;  %5422 = vmatprep.subr.mxu0 %v11897_v40  ;;  %v4510_v47 = vadd.s32 4294967264, %v10855_v25 }
 0x3eb   :  { %5423 = vmatpush3.msra.mxu0 %v5301_v43  ;;  %v13042_v43 = vld [vmem:[#allocation161_spill] sm:$0xff] }
 0x3ec   :  { %v5972_v36 = vpop.eup %5971  ;;  %v4460_v41 = vadd.f32 %v4415_v15, %v4414_v34  ;;  %v10844_v21 = vpop.xlane.xlu1 %912  ;;  %5424 = vmatprep.subr.mxu0 %v11897_v40  ;;  %v5299_v15 = vld [vmem:[%s11401_s3 + $0x50] sm:$0xff] }
 0x3ed   :  { %v5974_v30 = vpop.eup %5973  ;;  %v3877_v5 = vmul.f32 %v5972_v36, %v3813_v57  ;;  %5425 = vmatpush3.msra.mxu0 %v5300_v46  ;;  %v13043_v46 = vld [vmem:[#allocation162_spill] sm:$0xff] }
 0x3ee   :  { %4461 = vadd.xlane.f32.xlu0 %v4460_v41  ;;  %v3878_v4 = vmul.f32 %v5974_v30, %v3814_v58  ;;  %v13034_v30 = vld [vmem:[#allocation150_spill] sm:$0xff]  ;;  %5426 = vmatprep.subr.mxu0 %v11897_v40 }
 0x3ef   :  { %v3909_v24 = vadd.f32 %v3877_v5, %v3813_v57  ;;  %5427 = vmatpush3.msra.mxu0 %v5299_v15  ;;  %v13044_v15 = vld [vmem:[#allocation164_spill] sm:$0xff] }
 0x3f0   :  { %v3910_v26 = vadd.f32 %v3878_v4, %v3814_v58  ;;  %v10848_v57 = vpop.xlane.xlu1 %1923  ;;  %v10850_v58 = vpop.xlane.xlu0 %3435  ;;  %v13035_v4 = vld [vmem:[#allocation40_spill] sm:$0xff]  ;;  %5428 = vmatprep.subr.mxu0 %v11897_v40  ;;  %v4524_v40 = vadd.s32 4294967248, %v10855_v25 }
 0x3f1   :  { %13028 = vst [vmem:[#allocation135_spill] sm:$0xff] %v10850_v58 }
 0x3f2   :  { %v3956_v8 = vadd.f32 %v3910_v26, %v3909_v24  ;;  %v5976_v53 = vpop.eup %5975 }
 0x3f3   :  { %v5978_v33 = vpop.eup %5977  ;;  %v4384_v45 = vmul.f32 %v5976_v53, %v4320_v50  ;;  %v13036_v53 = vld [vmem:[#allocation157_spill] sm:$0xff] }
 0x3f4   :  { %3957 = vadd.xlane.f32.xlu1 %v3956_v8  ;;  %v4385_v22 = vmul.f32 %v5978_v33, %v4321_v17  ;;  %v10852_v31 = vpop.xlane.xlu1 %2931  ;;  %v10857_v39 = vpop.xlane.xlu0 %4443  ;;  %v5298_v8 = vld [vmem:[%s11401_s3 + $0x48] sm:$0xff] }
 0x3f5   :  { %v4416_v52 = vadd.f32 %v4384_v45, %v4320_v50  ;;  %13030 = vst [vmem:[#allocation14_spill] sm:$0xff] %v10857_v39  ;;  %v4503_v50 = vadd.s32 4294967272, %v10855_v25  ;;  %v13037_v45 = vld [vmem:[#allocation159_spill] sm:$0xff]  ;;  %5429 = vmatpush3.msra.mxu0 %v5298_v8 }
 0x3f6   :  { %v4417_v28 = vadd.f32 %v4385_v22, %v4321_v17  ;;  %v13032_v17 = vld [vmem:[#allocation5_spill] sm:$0xff] }
 0x3f7   :  { %v10883_v9 = vsub.s32 %v4489_v51, %v13032_v17  ;;  %v10887_v35 = vsub.s32 %v10855_v25, %v13032_v17  ;;  %v10895_v34 = vsub.s32 %v4496_v19, %v13032_v17  ;;  %v10902_v36 = vsub.s32 %v4503_v50, %v13032_v17  ;;  %v5297_v19 = vld [vmem:[%s11401_s3 + $0x40] sm:$0xff] }
 0x3f8   :  { %v4463_v37 = vadd.f32 %v4417_v28, %v4416_v52  ;;  %v10872_v20 = vpop.xlane.xlu1 %3939  ;;  %v10875_v44 = vpop.xlane.xlu0 %1422  ;;  %v10921_v52 = vsub.s32 %v4510_v47, %v13032_v17  ;;  %v13039_v28 = vld [vmem:[#allocation158_spill] sm:$0xff]  ;;  %v10960_v3 = vsub.s32 %v4517_v7, %v13032_v17 }
 0x3f9   :  { %13031 = vst [vmem:[#allocation19_spill] sm:$0xff] %v10872_v20  ;;  %13033 = vst [vmem:[#allocation34_spill] sm:$0xff] %v10902_v36  ;;  %v4493_v5 = vrot.slane %v13034_v30, %v10883_v9  ;;  %v4614_v24 = vrot.slane %v13035_v4, %v10887_v35  ;;  %v4488_v33 = vrot.slane %v13036_v53, %v10887_v35  ;;  %v13045_v4 = vld [vmem:[#allocation167_spill] sm:$0xff] }
 0x3fa   :  { %4464 = vadd.xlane.f32.xlu1 %v4463_v37  ;;  %v4618_v22 = vrot.slane %v13037_v45, %v10883_v9  ;;  %13038 = vst [vmem:[#allocation89_spill] sm:$0xff] %v10921_v52  ;;  %v4500_v37 = vrot.slane %v13039_v28, %v10895_v34  ;;  %v4710_v1 = vrot.slane %v13040_v55, %v10887_v35  ;;  %v13046_v45 = vld [vmem:[#allocation168_spill] sm:$0xff]  ;;  %v13047_v55 = vld [vmem:[#allocation121_spill] sm:$0xff] }
 0x3fb   :  { %v4714_v51 = vrot.slane %v13041_v11, %v10883_v9  ;;  %v4623_v50 = vrot.slane %v13042_v43, %v10895_v34  ;;  %v4507_v47 = vrot.slane %v13043_v46, %v10902_v36  ;;  %v4719_v30 = vrot.slane %v13044_v15, %v10895_v34  ;;  %v5296_v46 = vld [vmem:[%s11401_s3 + $0x38] sm:$0xff] }
 0x3fc   :  { %v10904_v41 = vpop.xlane.xlu1 %915  ;;  %v10910_v26 = vpop.xlane.xlu0 %2430  ;;  %v4628_v53 = vrot.slane %v13045_v4, %v10902_v36  ;;  %v4810_v28 = vrot.slane %v13046_v45, %v10883_v9  ;;  %v4806_v11 = vrot.slane %v13047_v55, %v10887_v35  ;;  %v13048_v43 = vmov 0.0   ;;  %v13049_v4 = vld [vmem:[#allocation122_spill] sm:$0xff] }
 0x3fd   :  { %5430 = vmatprep.subr.mxu0 %v13048_v43  ;;  %v4495_v15 = vsel %vm4494_vm1, %v4493_v5, %v4488_v33  ;;  %v4619_v8 = vsel %vm4494_vm1, %v4618_v22, %v4614_v24  ;;  %v4633_v39 = vrot.slane %v13049_v4, %v10921_v52  ;;  %v4715_v55 = vsel %vm4494_vm1, %v4714_v51, %v4710_v1  ;;  %v5295_v5 = vld [vmem:[%s11401_s3 + $0x30] sm:$0xff] }
 0x3fe   :  { %5431 = vmatpush3.msra.mxu0 %v5297_v19  ;;  %v4502_v45 = vsel %vm4501_vm2, %v4500_v37, %v4495_v15  ;;  %v4624_v24 = vsel %vm4501_vm2, %v4623_v50, %v4619_v8  ;;  %v4720_v22 = vsel %vm4501_vm2, %v4719_v30, %v4715_v55  ;;  %v4811_v1 = vsel %vm4494_vm1, %v4810_v28, %v4806_v11  ;;  %v13051_v51 = vld [vmem:[#allocation165_spill] sm:$0xff]  ;;  %v5294_v50 = vld [vmem:[%s11401_s3 + $0x28] sm:$0xff]  ;;  %v13052_v30 = vld [vmem:[#allocation171_spill] sm:$0xff] }
 0x3ff   :  { %5432 = vmatprep.subr.mxu0 %v13048_v43  ;;  %v4509_v33 = vsel %vm4508_vm3, %v4507_v47, %v4502_v45  ;;  %v4629_v37 = vsel %vm4508_vm3, %v4628_v53, %v4624_v24  ;;  %v4514_v7 = vrot.slane %v13051_v51, %v10921_v52  ;;  %v10976_v19 = vsub.s32 %v4524_v40, %v13032_v17  ;;  %v13053_v53 = vld [vmem:[#allocation166_spill] sm:$0xff]  ;;  %v13054_v40 = vld [vmem:[#allocation172_spill] sm:$0xff]  ;;  %v13055_v8 = vld [vmem:[#allocation27_spill] sm:$0xff] }
 0x400   :  { %v10955_v42 = vpop.xlane.xlu1 %1926  ;;  %v10962_v27 = vpop.xlane.xlu0 %3438  ;;  %5433 = vmatpush3.msra.mxu0 %v5296_v46  ;;  %v4634_v47 = vsel %vm4515_vm4, %v4633_v39, %v4629_v37  ;;  %v4815_v46 = vrot.slane %v13052_v30, %v10895_v34  ;;  %v4724_v28 = vrot.slane %v13053_v53, %v10902_v36  ;;  %v4531_v11 = vadd.s32 4294967240, %v10855_v25  ;;  %v13056_v45 = vld [vmem:[#allocation38_spill] sm:$0xff]  ;;  %v5293_v39 = vld [vmem:[%s11401_s3 + $0x20] sm:$0xff]  ;;  %v13059_v30 = vld [vmem:[#allocation68_spill] sm:$0xff] }
 0x401   :  { %13050 = vst [vmem:[#allocation91_spill] sm:$0xff] %v10962_v27  ;;  %5434 = vmatprep.subr.mxu0 %v13048_v43  ;;  %v4906_v15 = vrot.slane %v13054_v40, %v10883_v9  ;;  %v4902_v4 = vrot.slane %v13055_v8, %v10887_v35  ;;  %v4638_v55 = vrot.slane %v13056_v45, %v10960_v3  ;;  %v13057_v24 = vld [vmem:[#allocation59_spill] sm:$0xff]  ;;  %v4538_v40 = vadd.s32 4294967232, %v10855_v25  ;;  %v13060_v45 = vld [vmem:[#allocation9_spill] sm:$0xff]  ;;  %v13063_v27 = vld [vmem:[#allocation20_spill] sm:$0xff] }
 0x402   :  { %5435 = vmatpush3.msra.mxu0 %v5295_v5  ;;  %v4521_v37 = vrot.slane %v13057_v24, %v10960_v3  ;;  %v13058_v5 = vld [vmem:[#allocation60_spill] sm:$0xff]  ;;  %v4729_v53 = vrot.slane %v13059_v30, %v10921_v52  ;;  %v4911_v20 = vrot.slane %v13060_v45, %v10895_v34  ;;  %v4528_v14 = vrot.slane %v13061_v59, %v10976_v19 }
 0x403   :  { %5436 = vmatprep.subr.mxu0 %v13048_v43  ;;  %v4820_v51 = vrot.slane %v13058_v5, %v10902_v36  ;;  %v4734_v24 = vrot.slane %v13062_v6, %v10960_v3  ;;  %v4643_v5 = vrot.slane %v13063_v27, %v10976_v19  ;;  %v4516_v30 = vsel %vm4515_vm4, %v4514_v7, %v4509_v33  ;;  %v5291_v33 = vld [vmem:[%s11401_s3 + $0x10] sm:$0xff] }
 0x404   :  { %v11005_v8 = vpop.xlane.xlu1 %2934  ;;  %5437 = vmatpush3.msra.mxu0 %v5294_v50  ;;  %v11015_v58 = vpop.xlane.xlu0 %4446  ;;  %v5292_v50 = vld [vmem:[%s11401_s3 + $0x18] sm:$0xff]  ;;  %v11023_v45 = vsub.s32 %v4531_v11, %v13032_v17  ;;  %v4545_v59 = vadd.s32 4294967224, %v10855_v25  ;;  %v4816_v6 = vsel %vm4501_vm2, %v4815_v46, %v4811_v1  ;;  %v4725_v27 = vsel %vm4508_vm3, %v4724_v28, %v4720_v22 }
 0x405   :  { %13064 = vst [vmem:[#allocation92_spill] sm:$0xff] %v11015_v58  ;;  %5438 = vmatprep.subr.mxu0 %v13048_v43  ;;  %v4907_v58 = vsel %vm4494_vm1, %v4906_v15, %v4902_v4  ;;  %v4639_v38 = vsel %vm4522_vm5, %v4638_v55, %v4634_v47  ;;  %v4523_v7 = vsel %vm4522_vm5, %v4521_v37, %v4516_v30  ;;  %v5290_v15 = vld [vmem:[%s11401_s3 + $0x8] sm:$0xff]  ;;  %v13065_v4 = vld [vmem:[#allocation7_spill] sm:$0xff] }
 0x406   :  { %5439 = vmatpush3.msra.mxu0 %v5293_v39  ;;  %v4821_v11 = vsel %vm4508_vm3, %v4820_v51, %v4816_v6  ;;  %v4730_v39 = vsel %vm4515_vm4, %v4729_v53, %v4725_v27  ;;  %v11038_v1 = vsub.s32 %v4538_v40, %v13032_v17  ;;  %v4912_v22 = vsel %vm4501_vm2, %v4911_v20, %v4907_v58  ;;  %v13066_v37 = vld [vmem:[#allocation119_spill] sm:$0xff]  ;;  %v13067_v58 = vld [vmem:[#allocation29_spill] sm:$0xff] }
 0x407   :  { %5440 = vmatprep.subr.mxu0 %v13048_v43  ;;  %v4530_v47 = vsel %vm4529_vm6, %v4528_v14, %v4523_v7  ;;  %v4735_v46 = vsel %vm4522_vm5, %v4734_v24, %v4730_v39  ;;  %v4644_v28 = vsel %vm4529_vm6, %v4643_v5, %v4639_v38  ;;  %v4916_v55 = vrot.slane %v13065_v4, %v10902_v36  ;;  %v13069_v38 = vld [vmem:[#allocation66_spill] sm:$0xff]  ;;  %v13070_v24 = vld [vmem:[#allocation120_spill] sm:$0xff]  ;;  %v13072_v27 = vld [vmem:[#allocation129_spill] sm:$0xff] }
 0x408   :  { %5441 = vmatpush3.msra.mxu0 %v5292_v50  ;;  %v4825_v51 = vrot.slane %v13066_v37, %v10921_v52  ;;  %v4535_v20 = vrot.slane %v13067_v58, %v11023_v45  ;;  %v11055_v14 = vsub.s32 %v4545_v59, %v13032_v17  ;;  %v11057_v53 = vpop.xlane.xlu1 %3942  ;;  %v4739_v40 = vrot.slane %v13069_v38, %v10976_v19  ;;  %v13071_v50 = vld [vmem:[#allocation4_spill] sm:$0xff]  ;;  %v11065_v6 = vpop.xlane.xlu0 %2433  ;;  %v5289_v59 = vld [vmem:[%s11401_s3] sm:$0xff]  ;;  %v13073_v7 = vld [vmem:[#allocation49_spill] sm:$0xff] }
 0x409   :  { %5442 = vmatprep.subr.mxu0 %v13048_v43  ;;  %13068 = vst [vmem:[#allocation139_spill] sm:$0xff] %v11057_v53  ;;  %v4648_v5 = vrot.slane %v13070_v24, %v11023_v45  ;;  %v4921_v30 = vrot.slane %v13071_v50, %v10921_v52  ;;  %v4653_v39 = vrot.slane %v13073_v7, %v11038_v1  ;;  %v13074_v4 = vld [vmem:[#allocation50_spill] sm:$0xff]  ;;  %v4552_v58 = vadd.s32 4294967216, %v10855_v25 }
 0x40a   :  { %5443 = vmatpush3.msra.mxu0 %v5291_v33  ;;  %v4830_v33 = vrot.slane %v13072_v27, %v10960_v3  ;;  %v4542_v37 = vrot.slane %v13074_v4, %v11038_v1  ;;  %v13075_v38 = vld [vmem:[#allocation22_spill] sm:$0xff]  ;;  %v4926_v56 = vrot.slane %v13077_v62, %v10960_v3  ;;  %v4917_v27 = vsel %vm4508_vm3, %v4916_v55, %v4912_v22 }
 0x40b   :  { %5444 = vmatprep.subr.mxu0 %v13048_v43  ;;  %v4835_v24 = vrot.slane %v13075_v38, %v10976_v19  ;;  %v13076_v50 = vld [vmem:[#allocation74_spill] sm:$0xff]  ;;  %v4826_v7 = vsel %vm4515_vm4, %v4825_v51, %v4821_v11  ;;  %v4537_v4 = vsel %vm4536_vm7, %v4535_v20, %v4530_v47  ;;  %v4740_v38 = vsel %vm4529_vm6, %v4739_v40, %v4735_v46 }
 0x40c   :  { %5445 = vmatpush3.msra.mxu0 %v5290_v15  ;;  %v4744_v53 = vrot.slane %v13076_v50, %v11023_v45  ;;  %v13078_v15 = vld [vmem:[#allocation73_spill] sm:$0xff]  ;;  %v4649_v36 = vsel %vm4536_vm7, %v4648_v5, %v4644_v28  ;;  %v4922_v50 = vsel %vm4515_vm4, %v4921_v30, %v4917_v27  ;;  %v4831_v62 = vsel %vm4522_vm5, %v4830_v33, %v4826_v7  ;;  %v11099_v47 = vpop.xlane.xlu1 %1929  ;;  %v13086_v7 = vld [vmem:[#allocation128_spill] sm:$0xff] }
 0x40d   :  { %5446 = vmatprep.subr.mxu0 %v13048_v43  ;;  %v4658_v52 = vrot.slane %v13078_v15, %v11055_v14  ;;  %v4654_v43 = vsel %vm11905_vm8, %v4653_v39, %v4649_v36  ;;  %v4544_v22 = vsel %vm11905_vm8, %v4542_v37, %v4537_v4  ;;  %v11097_v11 = vsub.s32 %v4552_v58, %v13032_v17  ;;  %v13080_v36 = vld [vmem:[#allocation6_spill] sm:$0xff]  ;;  %v13081_v30 = vld [vmem:[#allocation77_spill] sm:$0xff]  ;;  %v13083_v37 = vld [vmem:[#allocation67_spill] sm:$0xff] }
 0x40e   :  { %5447 = vmatpush3.msra.mxu0 %v5289_v59  ;;  %v4836_v55 = vsel %vm4529_vm6, %v4835_v24, %v4831_v62  ;;  %v4745_v46 = vsel %vm4536_vm7, %v4744_v53, %v4740_v38  ;;  %v4927_v28 = vsel %vm4522_vm5, %v4926_v56, %v4922_v50  ;;  %v4559_v51 = vadd.s32 4294967208, %v10855_v25  ;;  %v13082_v33 = vld [vmem:[#allocation41_spill] sm:$0xff]  ;;  %v13084_v56 = vld [vmem:[#allocation11_spill] sm:$0xff]  ;;  %v13085_v24 = vld [vmem:[#allocation132_spill] sm:$0xff] }
 0x40f   :  { %v4659_v40 = vsel %vm11904_vm9, %v4658_v52, %v4654_v43  ;;  %v4549_v5 = vrot.slane %v13080_v36, %v11055_v14  ;;  %v4840_v59 = vrot.slane %v13081_v30, %v11023_v45  ;;  %v4749_v39 = vrot.slane %v13082_v33, %v11038_v1  ;;  %v13087_v15 = vld [vmem:[#allocation80_spill] sm:$0xff]  ;;  %v13088_v50 = vld [vmem:[#allocation78_spill] sm:$0xff] }
 0x410   :  { %v4931_v53 = vrot.slane %v13083_v37, %v10976_v19  ;;  %v4845_v58 = vrot.slane %v13084_v56, %v11038_v1  ;;  %v4754_v27 = vrot.slane %v13085_v24, %v11055_v14  ;;  %v4566_v52 = vadd.s32 4294967200, %v10855_v25 }
 0x411   :  { %v11105_v20 = vpop.xlane.xlu0 %3441  ;;  %v4663_v4 = vrot.slane %v13086_v7, %v11097_v11  ;;  %v4556_v38 = vrot.slane %v13087_v15, %v11097_v11  ;;  %v4936_v62 = vrot.slane %v13088_v50, %v11023_v45  ;;  %v11128_v43 = vsub.s32 %v4559_v51, %v13032_v17 }
 0x412   :  { %13079 = vst [vmem:[#allocation25_spill] sm:$0xff] %v11105_v20  ;;  %v4850_v36 = vrot.slane %v10606_v61, %v11055_v14  ;;  %v4759_v30 = vrot.slane %v10625_v13, %v11097_v11  ;;  %v4573_v33 = vadd.s32 4294967192, %v10855_v25  ;;  %v4551_v37 = vsel %vm11904_vm9, %v4549_v5, %v4544_v22 }
 0x413   :  { %v4841_v56 = vsel %vm4536_vm7, %v4840_v59, %v4836_v55  ;;  %v4750_v24 = vsel %vm11905_vm8, %v4749_v39, %v4745_v46  ;;  %v4941_v7 = vrot.slane %v10657_v10, %v11038_v1  ;;  %v4932_v51 = vsel %vm4529_vm6, %v4931_v53, %v4927_v28  ;;  %v13089_v10 = vld [vmem:[#allocation133_spill] sm:$0xff] }
 0x414   :  { %v4846_v61 = vsel %vm11905_vm8, %v4845_v58, %v4841_v56  ;;  %v4755_v50 = vsel %vm11904_vm9, %v4754_v27, %v4750_v24  ;;  %v11146_v13 = vsub.s32 %v4566_v52, %v13032_v17  ;;  %v4664_v22 = vsel %vm11903_vm10, %v4663_v4, %v4659_v40 }
 0x415   :  { %v4558_v55 = vsel %vm11903_vm10, %v4556_v38, %v4551_v37  ;;  %v4937_v46 = vsel %vm4536_vm7, %v4936_v62, %v4932_v51  ;;  %v4668_v5 = vrot.slane %v13089_v10, %v11128_v43  ;;  %v4851_v28 = vsel %vm11904_vm9, %v4850_v36, %v4846_v61 }
 0x416   :  { %v4760_v59 = vsel %vm11903_vm10, %v4759_v30, %v4755_v50  ;;  %v11158_v39 = vsub.s32 %v4573_v33, %v13032_v17  ;;  %v4563_v53 = vrot.slane %v10602_v29, %v11128_v43  ;;  %v4942_v40 = vsel %vm11905_vm8, %v4941_v7, %v4937_v46 }
 0x417   :  { %v4855_v58 = vrot.slane %v10723_v54, %v11097_v11  ;;  %v4580_v27 = vadd.s32 4294967184, %v10855_v25  ;;  %v4673_v52 = vrot.slane %v10690_v18, %v11146_v13  ;;  %v4764_v4 = vrot.slane %v10739_v49, %v11128_v43 }
 0x418   :  { %v4946_v38 = vrot.slane %v10773_v12, %v11055_v14  ;;  %v4587_v62 = vadd.s32 4294967176, %v10855_v25  ;;  %v4570_v29 = vrot.slane %v10716_v48, %v11146_v13  ;;  %v4860_v54 = vrot.slane %v10824_v0, %v11128_v43 }
 0x419   :  { %v11140_v15 = vpop.xlane.xlu1 %2937  ;;  %v4769_v36 = vrot.slane %v10830_v16, %v11146_v13  ;;  %v4669_v18 = vsel %vm4564_vm11, %v4668_v5, %v4664_v22  ;;  %v4678_v49 = vrot.slane %v10801_v63, %v11158_v39  ;;  %v4577_v12 = vrot.slane %v10819_v2, %v11158_v39 }
 0x41a   :  { %v4951_v25 = vrot.slane %v10836_v32, %v11097_v11  ;;  %v4565_v33 = vsel %vm4564_vm11, %v4563_v53, %v4558_v55  ;;  %v4856_v0 = vsel %vm11903_vm10, %v4855_v58, %v4851_v28  ;;  %v11191_v16 = vsub.s32 %v4580_v27, %v13032_v17 }
 0x41b   :  { %v4674_v37 = vsel %vm4571_vm12, %v4673_v52, %v4669_v18  ;;  %v4765_v56 = vsel %vm4564_vm11, %v4764_v4, %v4760_v59  ;;  %v4947_v63 = vsel %vm11904_vm9, %v4946_v38, %v4942_v40  ;;  %v11197_v2 = vsub.s32 %v4587_v62, %v13032_v17 }
 0x41c   :  { %v4572_v32 = vsel %vm4571_vm12, %v4570_v29, %v4565_v33  ;;  %v4861_v24 = vsel %vm4564_vm11, %v4860_v54, %v4856_v0  ;;  %v4770_v7 = vsel %vm4571_vm12, %v4769_v36, %v4765_v56  ;;  %v4865_v51 = vrot.slane %v10846_v60, %v11146_v13  ;;  %v13090_v56 = vld [vmem:[#allocation13_spill] sm:$0xff] }
 0x41d   :  { %v4679_v61 = vsel %vm4578_vm13, %v4678_v49, %v4674_v37  ;;  %v4579_v50 = vsel %vm4578_vm13, %v4577_v12, %v4572_v32  ;;  %v4952_v22 = vsel %vm11903_vm10, %v4951_v25, %v4947_v63  ;;  %v4774_v55 = vrot.slane %v10848_v57, %v11158_v39  ;;  %v13091_v32 = vld [vmem:[#allocation28_spill] sm:$0xff] }
 0x41e   :  { %v4683_v17 = vrot.slane %v10842_v23, %v11191_v16  ;;  %v4584_v46 = vrot.slane %v10844_v21, %v11191_v16  ;;  %v4870_v10 = vrot.slane %v10910_v26, %v11158_v39  ;;  %v4956_v5 = vrot.slane %v10852_v31, %v11128_v43 }
 0x41f   :  { %v11148_v20 = vpop.xlane.xlu0 %4449  ;;  %v4688_v28 = vrot.slane %v10875_v44, %v11197_v2  ;;  %v4591_v57 = vrot.slane %v10904_v41, %v11197_v2  ;;  %v4779_v59 = vrot.slane %v10955_v42, %v11191_v16  ;;  %v4866_v21 = vsel %vm4571_vm12, %v4865_v51, %v4861_v24 }
 0x420   :  { %v4875_v26 = vrot.slane %v11065_v6, %v11191_v16  ;;  %v4784_v31 = vrot.slane %v11099_v47, %v11197_v2  ;;  %v4775_v53 = vsel %vm4578_vm13, %v4774_v55, %v4770_v7  ;;  %v4961_v44 = vrot.slane %v11005_v8, %v11146_v13  ;;  %v13092_v7 = vld [vmem:[#allocation8_spill] sm:$0xff]  ;;  %v13095_v55 = vld [vmem:[#allocation89_spill] sm:$0xff] }
 0x421   :  { %v4684_v42 = vsel %vm4585_vm14, %v4683_v17, %v4679_v61  ;;  %v4586_v40 = vsel %vm4585_vm14, %v4584_v46, %v4579_v50  ;;  %v4871_v58 = vsel %vm4578_vm13, %v4870_v10, %v4866_v21  ;;  %v4966_v6 = vrot.slane %v11140_v15, %v11158_v39  ;;  %v13093_v61 = vld [vmem:[#allocation34_spill] sm:$0xff]  ;;  %v13096_v17 = vld [vmem:[#allocation3_spill] sm:$0xff] }
 0x422   :  { %v4689_v27 = vsel %vm4592_vm15, %v4688_v28, %v4684_v42  ;;  %v4593_v47 = vsel %vm4592_vm15, %v4591_v57, %v4586_v40  ;;  %v4780_v52 = vsel %vm4585_vm14, %v4779_v59, %v4775_v53  ;;  %v4957_v8 = vsel %vm4564_vm11, %v4956_v5, %v4952_v22  ;;  %v13094_v50 = vld [vmem:[#allocation130_spill] sm:$0xff]  ;;  %v13098_v59 = vld [vmem:[#allocation125_spill] sm:$0xff] }
 0x423   :  { %v4876_v38 = vsel %vm4585_vm14, %v4875_v26, %v4871_v58  ;;  %vm5269_vm10 = vcmask 1041408   ;;  %v4785_v62 = vsel %vm4592_vm15, %v4784_v31, %v4780_v52  ;;  %v4962_v29 = vsel %vm4571_vm12, %v4961_v44, %v4957_v8  ;;  %v13099_v31 = vld [vmem:[#allocation10_spill] sm:$0xff]  ;;  %v13101_v58 = vld [vmem:[#allocation17_spill] sm:$0xff] }
 0x424   :  { %vm5271_vm9 = vcmask 1042432   ;;  %v5268_v36 = vsel %vm5267_vm0, %v4593_v47, %v4689_v27  ;;  %v4967_v18 = vsel %vm4578_vm13, %v4966_v6, %v4962_v29  ;;  %vm5273_vm8 = vcmask 1043456   ;;  %v13102_v47 = vld [vmem:[#allocation135_spill] sm:$0xff] }
 0x425   :  { %v11179_v30 = vpop.xlane.xlu1 %3945  ;;  %v5270_v12 = vsel %vm5269_vm10, %v5268_v36, %v4785_v62  ;;  %v5002_v63 = vrot.slane %v13090_v56, %v10883_v9  ;;  %v5007_v24 = vrot.slane %v13091_v32, %v10895_v34  ;;  %v4998_v51 = vrot.slane %v13092_v7, %v10887_v35 }
 0x426   :  { %v5012_v22 = vrot.slane %v13094_v50, %v13093_v61  ;;  %v5017_v46 = vrot.slane %v13096_v17, %v13095_v55  ;;  %v5027_v21 = vrot.slane %v13098_v59, %v10976_v19  ;;  %v5032_v53 = vrot.slane %v13099_v31, %v11023_v45 }
 0x427   :  { %v5003_v10 = vsel %vm4494_vm1, %v5002_v63, %v4998_v51  ;;  %v5042_v6 = vrot.slane %v13101_v58, %v11055_v14  ;;  %v5047_v52 = vrot.slane %v13102_v47, %v11097_v11  ;;  %vm13107_vm10 = vcmask 720512   ;;  %v13116_v58 = vld [vmem:[#allocation42_spill] sm:$0xff]  ;;  %v13117_v47 = vld [vmem:[#allocation81_spill] sm:$0xff] }
 0x428   :  { %v5008_v57 = vsel %vm4501_vm2, %v5007_v24, %v5003_v10  ;;  %vm5275_vm0 = vcmask 1044480  }
 0x429   :  { %v5013_v26 = vsel %vm4508_vm3, %v5012_v22, %v5008_v57  ;;  %v13109_v22 = vld [vmem:[#allocation169_spill] sm:$0xff]  ;;  %v13112_v57 = vld [vmem:[#allocation127_spill] sm:$0xff] }
 0x42a   :  { %v5018_v44 = vsel %vm4515_vm4, %v5017_v46, %v5013_v26  ;;  %v5103_v17 = vrot.slane %v13109_v22, %v10895_v34  ;;  %v13110_v46 = vld [vmem:[#allocation21_spill] sm:$0xff]  ;;  %v5113_v59 = vrot.slane %v13112_v57, %v13095_v55 }
 0x42b   :  { %v2941_v48 = vpop.xlane.xlu0 %2940  ;;  %v5094_v10 = vrot.slane %v13110_v46, %v10887_v35 }
 0x42c   :  { %v4971_v4 = vrot.slane %v2941_v48, %v11191_v16 }
 0x42e   :  { %v4972_v25 = vsel %vm4585_vm14, %v4971_v4, %v4967_v18 }
 0x432   :  { %v2437_v60 = vpop.xlane.xlu1 %2436 }
 0x433   :  { %v4880_v41 = vrot.slane %v2437_v60, %v11197_v2  ;;  %v13097_v60 = vld [vmem:[#allocation39_spill] sm:$0xff] }
 0x434   :  { %v5022_v5 = vrot.slane %v13097_v60, %v10960_v3  ;;  %v13111_v60 = vld [vmem:[#allocation131_spill] sm:$0xff] }
 0x435   :  { %v4881_v15 = vsel %vm4592_vm15, %v4880_v41, %v4876_v38  ;;  %v13100_v41 = vld [vmem:[#allocation90_spill] sm:$0xff]  ;;  %v13103_v38 = vld [vmem:[#allocation91_spill] sm:$0xff] }
 0x436   :  { %v5272_v48 = vsel %vm5271_vm9, %v5270_v12, %v4881_v15  ;;  %v5037_v42 = vrot.slane %v13100_v41, %v11038_v1  ;;  %v5023_v40 = vsel %vm4522_vm5, %v5022_v5, %v5018_v44  ;;  %v5052_v62 = vrot.slane %v13103_v38, %v11128_v43  ;;  %v13114_v44 = vld [vmem:[#allocation76_spill] sm:$0xff] }
 0x437   :  { %v5028_v27 = vsel %vm4529_vm6, %v5027_v21, %v5023_v40  ;;  %vm13106_vm9 = vcmask 654912   ;;  %v5108_v5 = vrot.slane %v13111_v60, %v13093_v61  ;;  %v5123_v41 = vrot.slane %v13114_v44, %v10976_v19  ;;  %v13127_v60 = vld [vmem:[#allocation134_spill] sm:$0xff] }
 0x438   :  { %v5033_v8 = vsel %vm4536_vm7, %v5032_v53, %v5028_v27 }
 0x439   :  { %v11223_v23 = vpop.xlane.xlu0 %3948 }
 0x43a   :  { %v5153_v22 = vrot.slane %v11223_v23, %v11146_v13  ;;  %v13129_v23 = vld [vmem:[#allocation14_spill] sm:$0xff] }
 0x43f   :  { %v3445_v37 = vpop.xlane.xlu1 %3444 }
 0x445   :  { %v2944_v54 = vpop.xlane.xlu0 %2943 }
 0x446   :  { %v4976_v49 = vrot.slane %v2944_v54, %v11197_v2  ;;  %v13105_v54 = vld [vmem:[#allocation25_spill] sm:$0xff] }
 0x447   :  { %v5057_v36 = vrot.slane %v13105_v54, %v11146_v13  ;;  %v13120_v54 = vld [vmem:[#allocation23_spill] sm:$0xff] }
 0x448   :  { %v4977_v33 = vsel %vm4592_vm15, %v4976_v49, %v4972_v25  ;;  %v5062_v49 = vrot.slane %v3445_v37, %v11158_v39  ;;  %v13108_v37 = vld [vmem:[#allocation170_spill] sm:$0xff] }
 0x449   :  { %v5274_v0 = vsel %vm5273_vm8, %v5272_v48, %v4977_v33  ;;  %vm13104_vm8 = vcmask 589312   ;;  %v5098_v50 = vrot.slane %v13108_v37, %v10883_v9 }
 0x44a   :  { %v5038_v15 = vsel %vm13104_vm8, %v5037_v42, %v5033_v8  ;;  %v13115_v42 = vld [vmem:[#allocation31_spill] sm:$0xff]  ;;  %v13118_v8 = vld [vmem:[#allocation124_spill] sm:$0xff] }
 0x44b   :  { %v11266_v28 = vpop.xlane.xlu1 %4452  ;;  %v5043_v18 = vsel %vm13106_vm9, %v5042_v6, %v5038_v15  ;;  %v5099_v26 = vsel %vm4494_vm1, %v5098_v50, %v5094_v10  ;;  %v5194_v40 = vrot.slane %v13115_v42, %v10883_v9  ;;  %v5190_v6 = vrot.slane %v13116_v58, %v10887_v35  ;;  %v13121_v35 = vld [vmem:[#allocation19_spill] sm:$0xff] }
 0x44c   :  { %v5048_v12 = vsel %vm13107_vm10, %v5047_v52, %v5043_v18  ;;  %v5104_v53 = vsel %vm4501_vm2, %v5103_v17, %v5099_v26  ;;  %v5128_v52 = vrot.slane %v13117_v47, %v11023_v45  ;;  %v5199_v38 = vrot.slane %v13118_v8, %v10895_v34  ;;  %v13123_v34 = vld [vmem:[#allocation139_spill] sm:$0xff] }
 0x44d   :  { %v5053_v48 = vsel %vm4564_vm11, %v5052_v62, %v5048_v12  ;;  %v5109_v27 = vsel %vm4508_vm3, %v5108_v5, %v5104_v53  ;;  %v5138_v18 = vrot.slane %v13121_v35, %v11055_v14  ;;  %v5224_v5 = vrot.slane %v13127_v60, %v11023_v45 }
 0x44e   :  { %v5058_v33 = vsel %vm4571_vm12, %v5057_v36, %v5053_v48  ;;  %v5114_v62 = vsel %vm4515_vm4, %v5113_v59, %v5109_v27  ;;  %v5204_v36 = vrot.slane %v13120_v54, %v13093_v61  ;;  %v5143_v48 = vrot.slane %v13123_v34, %v11097_v11 }
 0x44f   :  { %v5063_v63 = vsel %vm4578_vm13, %v5062_v49, %v5058_v33  ;;  %v13122_v49 = vld [vmem:[#allocation16_spill] sm:$0xff]  ;;  %v5229_v26 = vrot.slane %v13129_v23, %v11038_v1  ;;  %v5239_v45 = vrot.slane %v11148_v20, %v11097_v11  ;;  %v5244_v58 = vrot.slane %v11266_v28, %v11128_v43 }
 0x450   :  { %v5209_v12 = vrot.slane %v13122_v49, %v13095_v55  ;;  %v13125_v55 = vld [vmem:[#allocation15_spill] sm:$0xff] }
 0x451   :  { %v11283_v4 = vpop.xlane.xlu0 %3951  ;;  %v5219_v37 = vrot.slane %v13125_v55, %v10976_v19 }
 0x452   :  { %v5158_v10 = vrot.slane %v11283_v4, %v11158_v39  ;;  %v13130_v4 = vld [vmem:[#allocation92_spill] sm:$0xff] }
 0x453   :  { %v5234_v53 = vrot.slane %v13130_v4, %v11055_v14 }
 0x458   :  { %v3448_v29 = vpop.xlane.xlu1 %3447 }
 0x459   :  { %v5067_v25 = vrot.slane %v3448_v29, %v11191_v16  ;;  %v13119_v29 = vld [vmem:[#allocation82_spill] sm:$0xff] }
 0x45a   :  { %v5133_v15 = vrot.slane %v13119_v29, %v11038_v1 }
 0x45b   :  { %v5068_v24 = vsel %vm4585_vm14, %v5067_v25, %v5063_v63  ;;  %v13124_v63 = vld [vmem:[#allocation75_spill] sm:$0xff] }
 0x45e   :  { %v3451_v56 = vpop.xlane.xlu0 %3450 }
 0x45f   :  { %v5072_v32 = vrot.slane %v3451_v56, %v11197_v2  ;;  %v5195_v56 = vsel %vm4494_vm1, %v5194_v40, %v5190_v6  ;;  %vm13126_vm1 = vmmov %vm13106_vm9 }
 0x461   :  { %v5073_v7 = vsel %vm4592_vm15, %v5072_v32, %v5068_v24  ;;  %v5214_v32 = vrot.slane %v13124_v63, %v10960_v3  ;;  %v5148_v24 = vrot.slane %v11179_v30, %v11128_v43 }
 0x462   :  { %v5276_v51 = vsel %vm5275_vm0, %v5274_v0, %v5073_v7  ;;  %v13113_v0 = vld [vmem:[#allocation79_spill] sm:$0xff]  ;;  %v5200_v7 = vsel %vm4501_vm2, %v5199_v38, %v5195_v56  ;;  %vm13128_vm2 = vmmov %vm13107_vm10 }
 0x463   :  { %v5118_v31 = vrot.slane %v13113_v0, %v10960_v3  ;;  %v5205_v46 = vsel %vm4508_vm3, %v5204_v36, %v5200_v7  ;;  %vm5277_vm3 = vcmask 1045504  }
 0x464   :  { %v5210_v30 = vsel %vm4515_vm4, %v5209_v12, %v5205_v46  ;;  %vm13131_vm4 = vmmov %vm13104_vm8 }
 0x465   :  { %v4456_v21 = vpop.xlane.xlu1 %4455  ;;  %v5119_v9 = vsel %vm4522_vm5, %v5118_v31, %v5114_v62  ;;  %v5215_v59 = vsel %vm4522_vm5, %v5214_v32, %v5210_v30  ;;  %vm13132_vm5 = vmmov %vm13126_vm1 }
 0x466   :  { %v5124_v25 = vsel %vm4529_vm6, %v5123_v41, %v5119_v9  ;;  %v5220_v31 = vsel %vm4529_vm6, %v5219_v37, %v5215_v59  ;;  %v5249_v47 = vrot.slane %v4456_v21, %v11146_v13  ;;  %vm13133_vm6 = vmmov %vm13128_vm2 }
 0x467   :  { %v5129_v61 = vsel %vm4536_vm7, %v5128_v52, %v5124_v25  ;;  %v5225_v1 = vsel %vm4536_vm7, %v5224_v5, %v5220_v31  ;;  %vm5279_vm7 = vcmask 1046528  }
 0x468   :  { %v5134_v50 = vsel %vm13104_vm8, %v5133_v15, %v5129_v61  ;;  %v5230_v14 = vsel %vm13131_vm4, %v5229_v26, %v5225_v1 }
 0x469   :  { %v5139_v3 = vsel %vm13126_vm1, %v5138_v18, %v5134_v50  ;;  %v5235_v11 = vsel %vm13132_vm5, %v5234_v53, %v5230_v14 }
 0x46a   :  { %v5144_v19 = vsel %vm13128_vm2, %v5143_v48, %v5139_v3  ;;  %v5240_v38 = vsel %vm13133_vm6, %v5239_v45, %v5235_v11 }
 0x46b   :  { %v5149_v0 = vsel %vm4564_vm11, %v5148_v24, %v5144_v19  ;;  %v5245_v43 = vsel %vm4564_vm11, %v5244_v58, %v5240_v38 }
 0x46c   :  { %v4459_v17 = vpop.xlane.xlu0 %4458  ;;  %v5154_v44 = vsel %vm4571_vm12, %v5153_v22, %v5149_v0  ;;  %v5250_v28 = vsel %vm4571_vm12, %v5249_v47, %v5245_v43 }
 0x46d   :  { %v5159_v42 = vsel %vm4578_vm13, %v5158_v10, %v5154_v44  ;;  %v5254_v20 = vrot.slane %v4459_v17, %v11158_v39 }
 0x46f   :  { %v5255_v15 = vsel %vm4578_vm13, %v5254_v20, %v5250_v28 }
 0x471   :  { %v3955_v33 = vpop.xlane.xlu1 %3954 }
 0x472   :  { %v5163_v57 = vrot.slane %v3955_v33, %v11191_v16 }
 0x474   :  { %v5164_v6 = vsel %vm4585_vm14, %v5163_v57, %v5159_v42 }
 0x477   :  { %v4462_v27 = vpop.xlane.xlu0 %4461 }
 0x478   :  { %v5259_v62 = vrot.slane %v4462_v27, %v11191_v16  ;;  %v5398_v16 = vld [vmem:[%s11403_s4] ss:$0 sm:$0xff] }
 0x47a   :  { %v5260_v21 = vsel %vm4585_vm14, %v5259_v62, %v5255_v15 }
 0x47d   :  { %v3958_v41 = vpop.xlane.xlu1 %3957 }
 0x47e   :  { %v5168_v40 = vrot.slane %v3958_v41, %v11197_v2 }
 0x480   :  { %v5169_v52 = vsel %vm4592_vm15, %v5168_v40, %v5164_v6 }
 0x481   :  { %v5278_v8 = vsel %vm5277_vm3, %v5276_v51, %v5169_v52 }
 0x483   :  { %v4465_v29 = vpop.xlane.xlu1 %4464 }
 0x484   :  { %v5264_v13 = vrot.slane %v4465_v29, %v11197_v2 }
 0x486   :  { %v5265_v54 = vsel %vm4592_vm15, %v5264_v13, %v5260_v21 }
 0x487   :  { %v5280_v39 = vsel %vm5279_vm7, %v5278_v8, %v5265_v54 }
 0x488   :  { %v5287_v51 = vmul.f32 0.00390625, %v5280_v39 }
 0x48a   :  { %5288 = vst [vmem:[%s11402_s6] sm:$0xff] %v5287_v51  ;;  %5449 = vmatmul.mubr.f32.vlgmr.msra.gmra.mxu0 %v5287_v51 }
 0x54a   :  { %v5378_v36 = vpop.f32.mrf.mxu0 }
 0x54b   :  { %v5379_v9 = vadd.f32 %v5398_v16, %v5378_v36 }
 0x54c   :  { %v5450_v35 = vpop.f32.mrf.mxu0 }
 0x54d   :  { %5382 = vst [vmem:[%s11404_s5] sm:$0xff] %v5379_v9 }

</bundles_post_ra>
